<compile_context>
chip_gen: v7x
topology: tpu7x:2x2x1
jax: 0.10.0
libtpu: 0.0.40
codegen_flags: <defaults>
</compile_context>

<pallas_src>
import functools

import jax
import jax.numpy as jnp
from jax.experimental import pallas as pl
from jax.experimental.pallas import tpu as pltpu


# ----------------------------- Pallas kernel -------------------------------

def make_kernel(nlayers: int, depth: int, hidden_size: int, x_size: int):
    """Single-invocation kernel: whole sequence resident in VMEM."""
    H = hidden_size

    def kernel(*refs):
        (x_ref, wi0_ref, bi0_ref, wh0_ref, bhn0_ref) = refs[:5]
        idx = 5
        wfull_refs, bfull_refs = [], []
        for _ in range(nlayers):
            wfull_refs.append(refs[idx]); idx += 1
            bfull_refs.append(refs[idx]); idx += 1
        w0_r, b0_r, w1_r, b1_r, w2_r, b2_r = refs[idx:idx + 6]
        preds_ref = refs[idx + 6]                   # (T, B, depth*x_size)
        h_ref = refs[idx + 7]                       # (nlayers, B, H)

        T = x_ref.shape[0]
        B = x_ref.shape[1]

        def cell_fused(i, z_in, h):
            """One GRU cell = one matmul: [z, h] @ Wfull, gates [r|z|n_in|n_h].

            Weights are loaded from VMEM here (inside the unrolled body) to
            keep vreg pressure low; load slots have slack.
            """
            zh = jnp.concatenate([z_in, h], axis=-1)
            g = (jnp.dot(zh, wfull_refs[i][...],
                         preferred_element_type=jnp.float32)
                 + bfull_refs[i][...])
            s = jax.nn.sigmoid(g[:, :2 * H])        # r,z on one contiguous slab
            r = s[:, :H]
            zg = s[:, H:2 * H]
            n = jnp.tanh(g[:, 2 * H:3 * H] + r * g[:, 3 * H:])
            return (1.0 - zg) * n + zg * h

        def cell_layer0_primary(t, h):
            """Layer-0 primary step: x-side gates computed from x[t] (this
            matmul has no dependence on the h-chain, so it hides under MXU
            slack of the previous timestep)."""
            gi = (jnp.dot(x_ref[t], wi0_ref[...],
                          preferred_element_type=jnp.float32)
                  + bi0_ref[...])
            gh = jnp.dot(h, wh0_ref[...], preferred_element_type=jnp.float32)
            s = jax.nn.sigmoid(gi[:, :2 * H] + gh[:, :2 * H])
            r = s[:, :H]
            zg = s[:, H:2 * H]
            n = jnp.tanh(gi[:, 2 * H:] + r * (gh[:, 2 * H:] + bhn0_ref[...]))
            return (1.0 - zg) * n + zg * h

        def rnncell(inp, hs):
            new_h, z = [], inp
            for i in range(nlayers):
                hi = cell_fused(i, z, hs[i])
                new_h.append(hi)
                z = hi                               # dropout == identity (eval)
            return new_h

        def readout(h_last):
            a = jnp.maximum(
                jnp.dot(h_last, w0_r[...], preferred_element_type=jnp.float32)
                + b0_r[...], 0.0)
            a = jnp.maximum(
                jnp.dot(a, w1_r[...], preferred_element_type=jnp.float32)
                + b1_r[...], 0.0)
            return (jnp.dot(a, w2_r[...], preferred_element_type=jnp.float32)
                    + b2_r[...])

        def step(t, hs):
            hs = list(hs)
            # Primary chain (persists into the carried hidden state).
            h_new = [cell_layer0_primary(t, hs[0])]
            z = h_new[0]
            for i in range(1, nlayers):
                hi = cell_fused(i, z, hs[i])
                h_new.append(hi)
                z = hi
            xo = readout(h_new[-1])

            # Depth rollout (does NOT persist into h); off the t-critical path.
            outs = [xo]
            hh, xoo = list(h_new), xo
            for _ in range(1, depth):
                hh = rnncell(xoo, hh)
                xoo = readout(hh[-1])
                outs.append(xoo)

            # One lane-dense slab store per timestep.
            preds_ref[t] = jnp.concatenate(outs, axis=-1)
            return tuple(h_new)

        h_init = tuple(jnp.zeros((B, H), jnp.float32) for _ in range(nlayers))
        h_final = jax.lax.fori_loop(0, T, step, h_init, unroll=True)

        # Single stacked store of the hidden-state carry.
        h_ref[...] = jnp.stack(list(h_final), axis=0)

    return kernel


# --------------------- one-time parameter packing ---------------------------

def pack_params(params):
    """Packs GRU/readout params once (keep this OUT of the per-call forward).

    Fused per-layer weight Wfull: (in_dim+H, 4H), columns [r | z | n_in | n_h]
    with zero blocks so the r-gated n-gate stays numerically exact; bias
    bfull: [b_ir+b_hr | b_iz+b_hz | b_in | b_hn].
    """
    gru = params["gru"]
    packed = []
    for li, layer in enumerate(gru):
        (w_ir, w_iz, w_in, w_hr, w_hz, w_hn,
         b_ir, b_iz, b_in, b_hr, b_hz, b_hn) = layer
        in_dim = w_ir.shape[0]
        H = w_hr.shape[0]
        zpad_i = jnp.zeros((in_dim, H), w_ir.dtype)
        zpad_h = jnp.zeros((H, H), w_hr.dtype)
        wfull = jnp.concatenate([
            jnp.concatenate([w_ir, w_iz, w_in, zpad_i], axis=1),
            jnp.concatenate([w_hr, w_hz, zpad_h, w_hn], axis=1)], axis=0)
        bfull = jnp.concatenate([b_ir + b_hr, b_iz + b_hz, b_in, b_hn], axis=1)
        entry = {"wfull": wfull, "bfull": bfull}
        if li == 0:
            # Layer-0 primary step keeps the split 3H layout: x-side gates are
            # computed per-t inside the kernel; only h @ Wh0 sits on the chain.
            entry["wi"] = jnp.concatenate([w_ir, w_iz, w_in], axis=1)
            entry["bi"] = jnp.concatenate([b_ir + b_hr, b_iz + b_hz, b_in],
                                          axis=1)
            entry["wh"] = jnp.concatenate([w_hr, w_hz, w_hn], axis=1)
            entry["bhn"] = b_hn
        packed.append(entry)
    return {"gru": packed, "readout": tuple(params["readout"])}


# ------------------------------- wrapper ------------------------------------

@functools.partial(jax.jit, static_argnums=(2,))
def p_rnn_forward(x, packed, depth):
    """x: (T, B, 2*input_size) f32. Returns (preds (T,B,depth,2*input_size), h)."""
    T, B, x_size = x.shape
    gru = packed["gru"]
    ro = packed["readout"]
    nlayers = len(gru)
    H = gru[0]["wh"].shape[0]

    flat_args = [x]
    in_specs = [pl.BlockSpec(x.shape, lambda i: (0, 0, 0))]

    def add_const(arr):
        flat_args.append(arr)
        nd = arr.ndim
        in_specs.append(pl.BlockSpec(arr.shape, lambda i, _nd=nd: (0,) * _nd))

    add_const(gru[0]["wi"])
    add_const(gru[0]["bi"])
    add_const(gru[0]["wh"])
    add_const(gru[0]["bhn"])
    for entry in gru:
        add_const(entry["wfull"])
        add_const(entry["bfull"])
    for a in ro:
        add_const(a)

    kernel = make_kernel(nlayers, depth, H, x_size)

    preds_flat, h = pl.pallas_call(
        kernel,
        grid=(1,),
        in_specs=in_specs,
        out_specs=[
            pl.BlockSpec((T, B, depth * x_size), lambda i: (0, 0, 0)),
            pl.BlockSpec((nlayers, B, H), lambda i: (0, 0, 0)),
        ],
        out_shape=[
            jax.ShapeDtypeStruct((T, B, depth * x_size), jnp.float32),
            jax.ShapeDtypeStruct((nlayers, B, H), jnp.float32),
        ],
        compiler_params=pltpu.CompilerParams(
            dimension_semantics=("arbitrary",),
        ),
    )(*flat_args)

    # (T, B, depth*x_size) -> (T, B, depth, x_size): pure reshape, no transpose.
    preds = preds_flat.reshape(T, B, depth, x_size)
    return preds, h


# ------------------------ deterministic parameter init ----------------------

def init_params(key, input_size, hidden_size, nlayers):
    x_size = 2 * input_size
    H = hidden_size
    keys = jax.random.split(key, 12 * nlayers + 6)
    ki = iter(range(len(keys)))

    def unif(shape, fan):
        bound = 1.0 / float(fan) ** 0.5
        return jax.random.uniform(keys[next(ki)], shape, jnp.float32, -bound, bound)

    gru = []
    in_dim = x_size
    for _ in range(nlayers):
        layer = []
        for _ in range(3):                      # w_ir, w_iz, w_in  (in_dim, H)
            layer.append(unif((in_dim, H), H))
        for _ in range(3):                      # w_hr, w_hz, w_hn  (H, H)
            layer.append(unif((H, H), H))
        for _ in range(6):                      # b_ir..b_hn        (1, H)
            layer.append(unif((1, H), H))
        gru.append(tuple(layer))
        in_dim = H

    ro = (
        unif((H, H), H), unif((1, H), H),            # Linear(H, H)
        unif((H, H), H), unif((1, H), H),            # Linear(H, H)
        unif((H, x_size), H), unif((1, x_size), H),  # Linear(H, 2*input_size)
    )
    return {"gru": gru, "readout": ro}


# ----------------------------- pure-JAX reference ---------------------------

def ref_forward(x, params, depth):
    T, B, x_size = x.shape
    gru = params["gru"]
    ro = params["readout"]
    nlayers = len(gru)
    H = gru[0][3].shape[0]

    def gru_cell(layer, z, h):
        (w_ir, w_iz, w_in, w_hr, w_hz, w_hn,
         b_ir, b_iz, b_in, b_hr, b_hz, b_hn) = layer
        r = jax.nn.sigmoid(z @ w_ir + b_ir + h @ w_hr + b_hr)
        zg = jax.nn.sigmoid(z @ w_iz + b_iz + h @ w_hz + b_hz)
        n = jnp.tanh(z @ w_in + b_in + r * (h @ w_hn + b_hn))
        return (1.0 - zg) * n + zg * h

    def rnncell(inp, h_list):
        new_h, z = [], inp
        for i in range(nlayers):
            hi = gru_cell(gru[i], z, h_list[i])
            new_h.append(hi)
            z = hi
        return new_h

    def readout(h_last):
        w0, b0, w1, b1, w2, b2 = ro
        a = jax.nn.relu(h_last @ w0 + b0)
        a = jax.nn.relu(a @ w1 + b1)
        return a @ w2 + b2

    h_list = [jnp.zeros((B, H), jnp.float32) for _ in range(nlayers)]
    preds = []
    for t in range(T):
        h_list = rnncell(x[t], h_list)
        xo = readout(h_list[-1])
        xos, hh, xoo = [xo], list(h_list), xo
        for _ in range(depth - 1):
            hh = rnncell(xoo, hh)
            xoo = readout(hh[-1])
            xos.append(xoo)
        preds.append(jnp.stack(xos, axis=1))    # (B, depth, x_size)
    return jnp.stack(preds, 0), jnp.stack(h_list, 0)


# --------------------------------- main --------------------------------------

if __name__ == "__main__":
    input_size = 4
    hidden_size = 32
    nlayers = 2
    depth = 3
    T, B = 6, 8
    x_size = 2 * input_size

    key = jax.random.PRNGKey(0)
    kp, kx = jax.random.split(key)
    params = init_params(kp, input_size, hidden_size, nlayers)
    packed = pack_params(params)                 # one-time packing, out of the hot path
    x = jax.random.normal(kx, (T, B, x_size), jnp.float32)

    preds, h = p_rnn_forward(x, packed, depth)
    jax.block_until_ready((preds, h))

    ref_preds, ref_h = ref_forward(x, params, depth)
    assert preds.shape == (T, B, depth, x_size)
    assert h.shape == (nlayers, B, hidden_size)
    assert jnp.allclose(preds, ref_preds, atol=1e-5, rtol=1e-5)
    assert jnp.allclose(h, ref_h, atol=1e-5, rtol=1e-5)

    print("KERNEL_OK")
</pallas_src>

<mosaic_0001>
module attributes {stable_mosaic.version = 11 : i64} {
  func.func @kernel(%arg0: i32, %arg1: memref<6x8x8xf32, #tpu.memory_space<vmem>>, %arg2: memref<8x96xf32, #tpu.memory_space<vmem>>, %arg3: memref<1x96xf32, #tpu.memory_space<vmem>>, %arg4: memref<32x96xf32, #tpu.memory_space<vmem>>, %arg5: memref<1x32xf32, #tpu.memory_space<vmem>>, %arg6: memref<40x128xf32, #tpu.memory_space<vmem>>, %arg7: memref<1x128xf32, #tpu.memory_space<vmem>>, %arg8: memref<64x128xf32, #tpu.memory_space<vmem>>, %arg9: memref<1x128xf32, #tpu.memory_space<vmem>>, %arg10: memref<32x32xf32, #tpu.memory_space<vmem>>, %arg11: memref<1x32xf32, #tpu.memory_space<vmem>>, %arg12: memref<32x32xf32, #tpu.memory_space<vmem>>, %arg13: memref<1x32xf32, #tpu.memory_space<vmem>>, %arg14: memref<32x8xf32, #tpu.memory_space<vmem>>, %arg15: memref<1x8xf32, #tpu.memory_space<vmem>>, %arg16: memref<6x8x24xf32, #tpu.memory_space<vmem>>, %arg17: memref<2x8x32xf32, #tpu.memory_space<vmem>>) attributes {dimension_semantics = [#tpu.dimension_semantics<arbitrary>], iteration_bounds = array<i64: 1>, scalar_prefetch = 0 : i64, scratch_operands = 0 : i64, tpu.core_type = #tpu.core_type<tc>, window_params = [{pipeline_mode = #tpu.pipeline_mode<synchronous>, transform_indices = @transform_0, window_bounds = array<i64: 6, 8, 8>}, {pipeline_mode = #tpu.pipeline_mode<synchronous>, transform_indices = @transform_1, window_bounds = array<i64: 8, 96>}, {pipeline_mode = #tpu.pipeline_mode<synchronous>, transform_indices = @transform_2, window_bounds = array<i64: 1, 96>}, {pipeline_mode = #tpu.pipeline_mode<synchronous>, transform_indices = @transform_3, window_bounds = array<i64: 32, 96>}, {pipeline_mode = #tpu.pipeline_mode<synchronous>, transform_indices = @transform_4, window_bounds = array<i64: 1, 32>}, {pipeline_mode = #tpu.pipeline_mode<synchronous>, transform_indices = @transform_5, window_bounds = array<i64: 40, 128>}, {pipeline_mode = #tpu.pipeline_mode<synchronous>, transform_indices = @transform_6, window_bounds = array<i64: 1, 128>}, {pipeline_mode = #tpu.pipeline_mode<synchronous>, transform_indices = @transform_7, window_bounds = array<i64: 64, 128>}, {pipeline_mode = #tpu.pipeline_mode<synchronous>, transform_indices = @transform_8, window_bounds = array<i64: 1, 128>}, {pipeline_mode = #tpu.pipeline_mode<synchronous>, transform_indices = @transform_9, window_bounds = array<i64: 32, 32>}, {pipeline_mode = #tpu.pipeline_mode<synchronous>, transform_indices = @transform_10, window_bounds = array<i64: 1, 32>}, {pipeline_mode = #tpu.pipeline_mode<synchronous>, transform_indices = @transform_11, window_bounds = array<i64: 32, 32>}, {pipeline_mode = #tpu.pipeline_mode<synchronous>, transform_indices = @transform_12, window_bounds = array<i64: 1, 32>}, {pipeline_mode = #tpu.pipeline_mode<synchronous>, transform_indices = @transform_13, window_bounds = array<i64: 32, 8>}, {pipeline_mode = #tpu.pipeline_mode<synchronous>, transform_indices = @transform_14, window_bounds = array<i64: 1, 8>}, {pipeline_mode = #tpu.pipeline_mode<synchronous>, transform_indices = @transform_15, window_bounds = array<i64: 6, 8, 24>}, {pipeline_mode = #tpu.pipeline_mode<synchronous>, transform_indices = @transform_16, window_bounds = array<i64: 2, 8, 32>}]} {
    %cst = arith.constant 0.000000e+00 : f32
    %0 = vector.broadcast %cst : f32 to vector<8x32xf32>
    %cst_0 = arith.constant 0.000000e+00 : f32
    %1 = vector.broadcast %cst_0 : f32 to vector<8x32xf32>
    %c0_i32 = arith.constant 0 : i32
    %2 = arith.index_cast %c0_i32 : i32 to index
    %c0 = arith.constant 0 : index
    %c0_1 = arith.constant 0 : index
    %3 = vector.load %arg1[%2, %c0, %c0_1] : memref<6x8x8xf32, #tpu.memory_space<vmem>>, vector<1x8x8xf32>
    %4 = vector.shape_cast %3 : vector<1x8x8xf32> to vector<8x8xf32>
    %c0_2 = arith.constant 0 : index
    %c0_3 = arith.constant 0 : index
    %5 = vector.load %arg2[%c0_2, %c0_3] : memref<8x96xf32, #tpu.memory_space<vmem>>, vector<8x96xf32>
    %cst_4 = arith.constant dense<0.000000e+00> : vector<8x96xf32>
    %6 = tpu.matmul %4, %5, %cst_4 {dimension_numbers = #tpu.dot_dimension_numbers<[1], [0], [0], [1], [0, 0, 1, 1], [], []>} : vector<8x8xf32>, vector<8x96xf32>, vector<8x96xf32> -> vector<8x96xf32>
    %c0_5 = arith.constant 0 : index
    %c0_6 = arith.constant 0 : index
    %7 = vector.load %arg3[%c0_5, %c0_6] : memref<1x96xf32, #tpu.memory_space<vmem>>, vector<1x96xf32>
    %8 = vector.broadcast %7 : vector<1x96xf32> to vector<8x96xf32>
    %9 = arith.addf %6, %8 : vector<8x96xf32>
    %c0_7 = arith.constant 0 : index
    %c0_8 = arith.constant 0 : index
    %10 = vector.load %arg4[%c0_7, %c0_8] : memref<32x96xf32, #tpu.memory_space<vmem>>, vector<32x96xf32>
    %cst_9 = arith.constant dense<0.000000e+00> : vector<8x96xf32>
    %11 = tpu.matmul %0, %10, %cst_9 {dimension_numbers = #tpu.dot_dimension_numbers<[1], [0], [0], [1], [0, 0, 1, 1], [], []>} : vector<8x32xf32>, vector<32x96xf32>, vector<8x96xf32> -> vector<8x96xf32>
    %12 = vector.extract_strided_slice %9 {offsets = [0, 0], sizes = [8, 64], strides = [1, 1]} : vector<8x96xf32> to vector<8x64xf32>
    %13 = vector.extract_strided_slice %11 {offsets = [0, 0], sizes = [8, 64], strides = [1, 1]} : vector<8x96xf32> to vector<8x64xf32>
    %14 = arith.addf %12, %13 : vector<8x64xf32>
    %15 = arith.negf %14 : vector<8x64xf32>
    %16 = math.exp %15 : vector<8x64xf32>
    %cst_10 = arith.constant 1.000000e+00 : f32
    %17 = vector.broadcast %cst_10 : f32 to vector<8x64xf32>
    %18 = arith.addf %17, %16 : vector<8x64xf32>
    %19 = arith.divf %17, %18 : vector<8x64xf32>
    %20 = vector.extract_strided_slice %19 {offsets = [0, 0], sizes = [8, 32], strides = [1, 1]} : vector<8x64xf32> to vector<8x32xf32>
    %21 = vector.extract_strided_slice %19 {offsets = [0, 32], sizes = [8, 32], strides = [1, 1]} : vector<8x64xf32> to vector<8x32xf32>
    %22 = vector.extract_strided_slice %9 {offsets = [0, 64], sizes = [8, 32], strides = [1, 1]} : vector<8x96xf32> to vector<8x32xf32>
    %23 = vector.extract_strided_slice %11 {offsets = [0, 64], sizes = [8, 32], strides = [1, 1]} : vector<8x96xf32> to vector<8x32xf32>
    %c0_11 = arith.constant 0 : index
    %c0_12 = arith.constant 0 : index
    %24 = vector.load %arg5[%c0_11, %c0_12] : memref<1x32xf32, #tpu.memory_space<vmem>>, vector<1x32xf32>
    %25 = vector.broadcast %24 : vector<1x32xf32> to vector<8x32xf32>
    %26 = arith.addf %23, %25 : vector<8x32xf32>
    %27 = arith.mulf %20, %26 : vector<8x32xf32>
    %28 = arith.addf %22, %27 : vector<8x32xf32>
    %29 = math.tanh %28 : vector<8x32xf32>
    %cst_13 = arith.constant 1.000000e+00 : f32
    %30 = vector.broadcast %cst_13 : f32 to vector<8x32xf32>
    %31 = arith.subf %30, %21 : vector<8x32xf32>
    %32 = arith.mulf %31, %29 : vector<8x32xf32>
    %33 = arith.mulf %21, %0 : vector<8x32xf32>
    %34 = arith.addf %32, %33 : vector<8x32xf32>
    %35 = tpu.concatenate %34, %1 in 1 : vector<8x32xf32>, vector<8x32xf32> -> vector<8x64xf32>
    %c0_14 = arith.constant 0 : index
    %c0_15 = arith.constant 0 : index
    %36 = vector.load %arg8[%c0_14, %c0_15] : memref<64x128xf32, #tpu.memory_space<vmem>>, vector<64x128xf32>
    %cst_16 = arith.constant dense<0.000000e+00> : vector<8x128xf32>
    %37 = tpu.matmul %35, %36, %cst_16 {dimension_numbers = #tpu.dot_dimension_numbers<[1], [0], [0], [1], [0, 0, 1, 1], [], []>} : vector<8x64xf32>, vector<64x128xf32>, vector<8x128xf32> -> vector<8x128xf32>
    %c0_17 = arith.constant 0 : index
    %c0_18 = arith.constant 0 : index
    %38 = vector.load %arg9[%c0_17, %c0_18] : memref<1x128xf32, #tpu.memory_space<vmem>>, vector<1x128xf32>
    %39 = vector.broadcast %38 : vector<1x128xf32> to vector<8x128xf32>
    %40 = arith.addf %37, %39 : vector<8x128xf32>
    %41 = vector.extract_strided_slice %40 {offsets = [0, 0], sizes = [8, 64], strides = [1, 1]} : vector<8x128xf32> to vector<8x64xf32>
    %42 = arith.negf %41 : vector<8x64xf32>
    %43 = math.exp %42 : vector<8x64xf32>
    %cst_19 = arith.constant 1.000000e+00 : f32
    %44 = vector.broadcast %cst_19 : f32 to vector<8x64xf32>
    %45 = arith.addf %44, %43 : vector<8x64xf32>
    %46 = arith.divf %44, %45 : vector<8x64xf32>
    %47 = vector.extract_strided_slice %46 {offsets = [0, 0], sizes = [8, 32], strides = [1, 1]} : vector<8x64xf32> to vector<8x32xf32>
    %48 = vector.extract_strided_slice %46 {offsets = [0, 32], sizes = [8, 32], strides = [1, 1]} : vector<8x64xf32> to vector<8x32xf32>
    %49 = vector.extract_strided_slice %40 {offsets = [0, 64], sizes = [8, 32], strides = [1, 1]} : vector<8x128xf32> to vector<8x32xf32>
    %50 = vector.extract_strided_slice %40 {offsets = [0, 96], sizes = [8, 32], strides = [1, 1]} : vector<8x128xf32> to vector<8x32xf32>
    %51 = arith.mulf %47, %50 : vector<8x32xf32>
    %52 = arith.addf %49, %51 : vector<8x32xf32>
    %53 = math.tanh %52 : vector<8x32xf32>
    %cst_20 = arith.constant 1.000000e+00 : f32
    %54 = vector.broadcast %cst_20 : f32 to vector<8x32xf32>
    %55 = arith.subf %54, %48 : vector<8x32xf32>
    %56 = arith.mulf %55, %53 : vector<8x32xf32>
    %57 = arith.mulf %48, %1 : vector<8x32xf32>
    %58 = arith.addf %56, %57 : vector<8x32xf32>
    %c0_21 = arith.constant 0 : index
    %c0_22 = arith.constant 0 : index
    %59 = vector.load %arg10[%c0_21, %c0_22] : memref<32x32xf32, #tpu.memory_space<vmem>>, vector<32x32xf32>
    %cst_23 = arith.constant dense<0.000000e+00> : vector<8x32xf32>
    %60 = tpu.matmul %58, %59, %cst_23 {dimension_numbers = #tpu.dot_dimension_numbers<[1], [0], [0], [1], [0, 0, 1, 1], [], []>} : vector<8x32xf32>, vector<32x32xf32>, vector<8x32xf32> -> vector<8x32xf32>
    %c0_24 = arith.constant 0 : index
    %c0_25 = arith.constant 0 : index
    %61 = vector.load %arg11[%c0_24, %c0_25] : memref<1x32xf32, #tpu.memory_space<vmem>>, vector<1x32xf32>
    %62 = vector.broadcast %61 : vector<1x32xf32> to vector<8x32xf32>
    %63 = arith.addf %60, %62 : vector<8x32xf32>
    %cst_26 = arith.constant 0.000000e+00 : f32
    %64 = vector.broadcast %cst_26 : f32 to vector<8x32xf32>
    %65 = arith.maximumf %63, %64 : vector<8x32xf32>
    %c0_27 = arith.constant 0 : index
    %c0_28 = arith.constant 0 : index
    %66 = vector.load %arg12[%c0_27, %c0_28] : memref<32x32xf32, #tpu.memory_space<vmem>>, vector<32x32xf32>
    %cst_29 = arith.constant dense<0.000000e+00> : vector<8x32xf32>
    %67 = tpu.matmul %65, %66, %cst_29 {dimension_numbers = #tpu.dot_dimension_numbers<[1], [0], [0], [1], [0, 0, 1, 1], [], []>} : vector<8x32xf32>, vector<32x32xf32>, vector<8x32xf32> -> vector<8x32xf32>
    %c0_30 = arith.constant 0 : index
    %c0_31 = arith.constant 0 : index
    %68 = vector.load %arg13[%c0_30, %c0_31] : memref<1x32xf32, #tpu.memory_space<vmem>>, vector<1x32xf32>
    %69 = vector.broadcast %68 : vector<1x32xf32> to vector<8x32xf32>
    %70 = arith.addf %67, %69 : vector<8x32xf32>
    %cst_32 = arith.constant 0.000000e+00 : f32
    %71 = vector.broadcast %cst_32 : f32 to vector<8x32xf32>
    %72 = arith.maximumf %70, %71 : vector<8x32xf32>
    %c0_33 = arith.constant 0 : index
    %c0_34 = arith.constant 0 : index
    %73 = vector.load %arg14[%c0_33, %c0_34] : memref<32x8xf32, #tpu.memory_space<vmem>>, vector<32x8xf32>
    %cst_35 = arith.constant dense<0.000000e+00> : vector<8x8xf32>
    %74 = tpu.matmul %72, %73, %cst_35 {dimension_numbers = #tpu.dot_dimension_numbers<[1], [0], [0], [1], [0, 0, 1, 1], [], []>} : vector<8x32xf32>, vector<32x8xf32>, vector<8x8xf32> -> vector<8x8xf32>
    %c0_36 = arith.constant 0 : index
    %c0_37 = arith.constant 0 : index
    %75 = vector.load %arg15[%c0_36, %c0_37] : memref<1x8xf32, #tpu.memory_space<vmem>>, vector<1x8xf32>
    %76 = vector.broadcast %75 : vector<1x8xf32> to vector<8x8xf32>
    %77 = arith.addf %74, %76 : vector<8x8xf32>
    %78 = tpu.concatenate %77, %34 in 1 : vector<8x8xf32>, vector<8x32xf32> -> vector<8x40xf32>
    %c0_38 = arith.constant 0 : index
    %c0_39 = arith.constant 0 : index
    %79 = vector.load %arg6[%c0_38, %c0_39] : memref<40x128xf32, #tpu.memory_space<vmem>>, vector<40x128xf32>
    %cst_40 = arith.constant dense<0.000000e+00> : vector<8x128xf32>
    %80 = tpu.matmul %78, %79, %cst_40 {dimension_numbers = #tpu.dot_dimension_numbers<[1], [0], [0], [1], [0, 0, 1, 1], [], []>} : vector<8x40xf32>, vector<40x128xf32>, vector<8x128xf32> -> vector<8x128xf32>
    %c0_41 = arith.constant 0 : index
    %c0_42 = arith.constant 0 : index
    %81 = vector.load %arg7[%c0_41, %c0_42] : memref<1x128xf32, #tpu.memory_space<vmem>>, vector<1x128xf32>
    %82 = vector.broadcast %81 : vector<1x128xf32> to vector<8x128xf32>
    %83 = arith.addf %80, %82 : vector<8x128xf32>
    %84 = vector.extract_strided_slice %83 {offsets = [0, 0], sizes = [8, 64], strides = [1, 1]} : vector<8x128xf32> to vector<8x64xf32>
    %85 = arith.negf %84 : vector<8x64xf32>
    %86 = math.exp %85 : vector<8x64xf32>
    %cst_43 = arith.constant 1.000000e+00 : f32
    %87 = vector.broadcast %cst_43 : f32 to vector<8x64xf32>
    %88 = arith.addf %87, %86 : vector<8x64xf32>
    %89 = arith.divf %87, %88 : vector<8x64xf32>
    %90 = vector.extract_strided_slice %89 {offsets = [0, 0], sizes = [8, 32], strides = [1, 1]} : vector<8x64xf32> to vector<8x32xf32>
    %91 = vector.extract_strided_slice %89 {offsets = [0, 32], sizes = [8, 32], strides = [1, 1]} : vector<8x64xf32> to vector<8x32xf32>
    %92 = vector.extract_strided_slice %83 {offsets = [0, 64], sizes = [8, 32], strides = [1, 1]} : vector<8x128xf32> to vector<8x32xf32>
    %93 = vector.extract_strided_slice %83 {offsets = [0, 96], sizes = [8, 32], strides = [1, 1]} : vector<8x128xf32> to vector<8x32xf32>
    %94 = arith.mulf %90, %93 : vector<8x32xf32>
    %95 = arith.addf %92, %94 : vector<8x32xf32>
    %96 = math.tanh %95 : vector<8x32xf32>
    %cst_44 = arith.constant 1.000000e+00 : f32
    %97 = vector.broadcast %cst_44 : f32 to vector<8x32xf32>
    %98 = arith.subf %97, %91 : vector<8x32xf32>
    %99 = arith.mulf %98, %96 : vector<8x32xf32>
    %100 = arith.mulf %91, %34 : vector<8x32xf32>
    %101 = arith.addf %99, %100 : vector<8x32xf32>
    %102 = tpu.concatenate %101, %58 in 1 : vector<8x32xf32>, vector<8x32xf32> -> vector<8x64xf32>
    %c0_45 = arith.constant 0 : index
    %c0_46 = arith.constant 0 : index
    %103 = vector.load %arg8[%c0_45, %c0_46] : memref<64x128xf32, #tpu.memory_space<vmem>>, vector<64x128xf32>
    %cst_47 = arith.constant dense<0.000000e+00> : vector<8x128xf32>
    %104 = tpu.matmul %102, %103, %cst_47 {dimension_numbers = #tpu.dot_dimension_numbers<[1], [0], [0], [1], [0, 0, 1, 1], [], []>} : vector<8x64xf32>, vector<64x128xf32>, vector<8x128xf32> -> vector<8x128xf32>
    %c0_48 = arith.constant 0 : index
    %c0_49 = arith.constant 0 : index
    %105 = vector.load %arg9[%c0_48, %c0_49] : memref<1x128xf32, #tpu.memory_space<vmem>>, vector<1x128xf32>
    %106 = vector.broadcast %105 : vector<1x128xf32> to vector<8x128xf32>
    %107 = arith.addf %104, %106 : vector<8x128xf32>
    %108 = vector.extract_strided_slice %107 {offsets = [0, 0], sizes = [8, 64], strides = [1, 1]} : vector<8x128xf32> to vector<8x64xf32>
    %109 = arith.negf %108 : vector<8x64xf32>
    %110 = math.exp %109 : vector<8x64xf32>
    %cst_50 = arith.constant 1.000000e+00 : f32
    %111 = vector.broadcast %cst_50 : f32 to vector<8x64xf32>
    %112 = arith.addf %111, %110 : vector<8x64xf32>
    %113 = arith.divf %111, %112 : vector<8x64xf32>
    %114 = vector.extract_strided_slice %113 {offsets = [0, 0], sizes = [8, 32], strides = [1, 1]} : vector<8x64xf32> to vector<8x32xf32>
    %115 = vector.extract_strided_slice %113 {offsets = [0, 32], sizes = [8, 32], strides = [1, 1]} : vector<8x64xf32> to vector<8x32xf32>
    %116 = vector.extract_strided_slice %107 {offsets = [0, 64], sizes = [8, 32], strides = [1, 1]} : vector<8x128xf32> to vector<8x32xf32>
    %117 = vector.extract_strided_slice %107 {offsets = [0, 96], sizes = [8, 32], strides = [1, 1]} : vector<8x128xf32> to vector<8x32xf32>
    %118 = arith.mulf %114, %117 : vector<8x32xf32>
    %119 = arith.addf %116, %118 : vector<8x32xf32>
    %120 = math.tanh %119 : vector<8x32xf32>
    %cst_51 = arith.constant 1.000000e+00 : f32
    %121 = vector.broadcast %cst_51 : f32 to vector<8x32xf32>
    %122 = arith.subf %121, %115 : vector<8x32xf32>
    %123 = arith.mulf %122, %120 : vector<8x32xf32>
    %124 = arith.mulf %115, %58 : vector<8x32xf32>
    %125 = arith.addf %123, %124 : vector<8x32xf32>
    %c0_52 = arith.constant 0 : index
    %c0_53 = arith.constant 0 : index
    %126 = vector.load %arg10[%c0_52, %c0_53] : memref<32x32xf32, #tpu.memory_space<vmem>>, vector<32x32xf32>
    %cst_54 = arith.constant dense<0.000000e+00> : vector<8x32xf32>
    %127 = tpu.matmul %125, %126, %cst_54 {dimension_numbers = #tpu.dot_dimension_numbers<[1], [0], [0], [1], [0, 0, 1, 1], [], []>} : vector<8x32xf32>, vector<32x32xf32>, vector<8x32xf32> -> vector<8x32xf32>
    %c0_55 = arith.constant 0 : index
    %c0_56 = arith.constant 0 : index
    %128 = vector.load %arg11[%c0_55, %c0_56] : memref<1x32xf32, #tpu.memory_space<vmem>>, vector<1x32xf32>
    %129 = vector.broadcast %128 : vector<1x32xf32> to vector<8x32xf32>
    %130 = arith.addf %127, %129 : vector<8x32xf32>
    %cst_57 = arith.constant 0.000000e+00 : f32
    %131 = vector.broadcast %cst_57 : f32 to vector<8x32xf32>
    %132 = arith.maximumf %130, %131 : vector<8x32xf32>
    %c0_58 = arith.constant 0 : index
    %c0_59 = arith.constant 0 : index
    %133 = vector.load %arg12[%c0_58, %c0_59] : memref<32x32xf32, #tpu.memory_space<vmem>>, vector<32x32xf32>
    %cst_60 = arith.constant dense<0.000000e+00> : vector<8x32xf32>
    %134 = tpu.matmul %132, %133, %cst_60 {dimension_numbers = #tpu.dot_dimension_numbers<[1], [0], [0], [1], [0, 0, 1, 1], [], []>} : vector<8x32xf32>, vector<32x32xf32>, vector<8x32xf32> -> vector<8x32xf32>
    %c0_61 = arith.constant 0 : index
    %c0_62 = arith.constant 0 : index
    %135 = vector.load %arg13[%c0_61, %c0_62] : memref<1x32xf32, #tpu.memory_space<vmem>>, vector<1x32xf32>
    %136 = vector.broadcast %135 : vector<1x32xf32> to vector<8x32xf32>
    %137 = arith.addf %134, %136 : vector<8x32xf32>
    %cst_63 = arith.constant 0.000000e+00 : f32
    %138 = vector.broadcast %cst_63 : f32 to vector<8x32xf32>
    %139 = arith.maximumf %137, %138 : vector<8x32xf32>
    %c0_64 = arith.constant 0 : index
    %c0_65 = arith.constant 0 : index
    %140 = vector.load %arg14[%c0_64, %c0_65] : memref<32x8xf32, #tpu.memory_space<vmem>>, vector<32x8xf32>
    %cst_66 = arith.constant dense<0.000000e+00> : vector<8x8xf32>
    %141 = tpu.matmul %139, %140, %cst_66 {dimension_numbers = #tpu.dot_dimension_numbers<[1], [0], [0], [1], [0, 0, 1, 1], [], []>} : vector<8x32xf32>, vector<32x8xf32>, vector<8x8xf32> -> vector<8x8xf32>
    %c0_67 = arith.constant 0 : index
    %c0_68 = arith.constant 0 : index
    %142 = vector.load %arg15[%c0_67, %c0_68] : memref<1x8xf32, #tpu.memory_space<vmem>>, vector<1x8xf32>
    %143 = vector.broadcast %142 : vector<1x8xf32> to vector<8x8xf32>
    %144 = arith.addf %141, %143 : vector<8x8xf32>
    %145 = tpu.concatenate %144, %101 in 1 : vector<8x8xf32>, vector<8x32xf32> -> vector<8x40xf32>
    %c0_69 = arith.constant 0 : index
    %c0_70 = arith.constant 0 : index
    %146 = vector.load %arg6[%c0_69, %c0_70] : memref<40x128xf32, #tpu.memory_space<vmem>>, vector<40x128xf32>
    %cst_71 = arith.constant dense<0.000000e+00> : vector<8x128xf32>
    %147 = tpu.matmul %145, %146, %cst_71 {dimension_numbers = #tpu.dot_dimension_numbers<[1], [0], [0], [1], [0, 0, 1, 1], [], []>} : vector<8x40xf32>, vector<40x128xf32>, vector<8x128xf32> -> vector<8x128xf32>
    %c0_72 = arith.constant 0 : index
    %c0_73 = arith.constant 0 : index
    %148 = vector.load %arg7[%c0_72, %c0_73] : memref<1x128xf32, #tpu.memory_space<vmem>>, vector<1x128xf32>
    %149 = vector.broadcast %148 : vector<1x128xf32> to vector<8x128xf32>
    %150 = arith.addf %147, %149 : vector<8x128xf32>
    %151 = vector.extract_strided_slice %150 {offsets = [0, 0], sizes = [8, 64], strides = [1, 1]} : vector<8x128xf32> to vector<8x64xf32>
    %152 = arith.negf %151 : vector<8x64xf32>
    %153 = math.exp %152 : vector<8x64xf32>
    %cst_74 = arith.constant 1.000000e+00 : f32
    %154 = vector.broadcast %cst_74 : f32 to vector<8x64xf32>
    %155 = arith.addf %154, %153 : vector<8x64xf32>
    %156 = arith.divf %154, %155 : vector<8x64xf32>
    %157 = vector.extract_strided_slice %156 {offsets = [0, 0], sizes = [8, 32], strides = [1, 1]} : vector<8x64xf32> to vector<8x32xf32>
    %158 = vector.extract_strided_slice %156 {offsets = [0, 32], sizes = [8, 32], strides = [1, 1]} : vector<8x64xf32> to vector<8x32xf32>
    %159 = vector.extract_strided_slice %150 {offsets = [0, 64], sizes = [8, 32], strides = [1, 1]} : vector<8x128xf32> to vector<8x32xf32>
    %160 = vector.extract_strided_slice %150 {offsets = [0, 96], sizes = [8, 32], strides = [1, 1]} : vector<8x128xf32> to vector<8x32xf32>
    %161 = arith.mulf %157, %160 : vector<8x32xf32>
    %162 = arith.addf %159, %161 : vector<8x32xf32>
    %163 = math.tanh %162 : vector<8x32xf32>
    %cst_75 = arith.constant 1.000000e+00 : f32
    %164 = vector.broadcast %cst_75 : f32 to vector<8x32xf32>
    %165 = arith.subf %164, %158 : vector<8x32xf32>
    %166 = arith.mulf %165, %163 : vector<8x32xf32>
    %167 = arith.mulf %158, %101 : vector<8x32xf32>
    %168 = arith.addf %166, %167 : vector<8x32xf32>
    %169 = tpu.concatenate %168, %125 in 1 : vector<8x32xf32>, vector<8x32xf32> -> vector<8x64xf32>
    %c0_76 = arith.constant 0 : index
    %c0_77 = arith.constant 0 : index
    %170 = vector.load %arg8[%c0_76, %c0_77] : memref<64x128xf32, #tpu.memory_space<vmem>>, vector<64x128xf32>
    %cst_78 = arith.constant dense<0.000000e+00> : vector<8x128xf32>
    %171 = tpu.matmul %169, %170, %cst_78 {dimension_numbers = #tpu.dot_dimension_numbers<[1], [0], [0], [1], [0, 0, 1, 1], [], []>} : vector<8x64xf32>, vector<64x128xf32>, vector<8x128xf32> -> vector<8x128xf32>
    %c0_79 = arith.constant 0 : index
    %c0_80 = arith.constant 0 : index
    %172 = vector.load %arg9[%c0_79, %c0_80] : memref<1x128xf32, #tpu.memory_space<vmem>>, vector<1x128xf32>
    %173 = vector.broadcast %172 : vector<1x128xf32> to vector<8x128xf32>
    %174 = arith.addf %171, %173 : vector<8x128xf32>
    %175 = vector.extract_strided_slice %174 {offsets = [0, 0], sizes = [8, 64], strides = [1, 1]} : vector<8x128xf32> to vector<8x64xf32>
    %176 = arith.negf %175 : vector<8x64xf32>
    %177 = math.exp %176 : vector<8x64xf32>
    %cst_81 = arith.constant 1.000000e+00 : f32
    %178 = vector.broadcast %cst_81 : f32 to vector<8x64xf32>
    %179 = arith.addf %178, %177 : vector<8x64xf32>
    %180 = arith.divf %178, %179 : vector<8x64xf32>
    %181 = vector.extract_strided_slice %180 {offsets = [0, 0], sizes = [8, 32], strides = [1, 1]} : vector<8x64xf32> to vector<8x32xf32>
    %182 = vector.extract_strided_slice %180 {offsets = [0, 32], sizes = [8, 32], strides = [1, 1]} : vector<8x64xf32> to vector<8x32xf32>
    %183 = vector.extract_strided_slice %174 {offsets = [0, 64], sizes = [8, 32], strides = [1, 1]} : vector<8x128xf32> to vector<8x32xf32>
    %184 = vector.extract_strided_slice %174 {offsets = [0, 96], sizes = [8, 32], strides = [1, 1]} : vector<8x128xf32> to vector<8x32xf32>
    %185 = arith.mulf %181, %184 : vector<8x32xf32>
    %186 = arith.addf %183, %185 : vector<8x32xf32>
    %187 = math.tanh %186 : vector<8x32xf32>
    %cst_82 = arith.constant 1.000000e+00 : f32
    %188 = vector.broadcast %cst_82 : f32 to vector<8x32xf32>
    %189 = arith.subf %188, %182 : vector<8x32xf32>
    %190 = arith.mulf %189, %187 : vector<8x32xf32>
    %191 = arith.mulf %182, %125 : vector<8x32xf32>
    %192 = arith.addf %190, %191 : vector<8x32xf32>
    %c0_83 = arith.constant 0 : index
    %c0_84 = arith.constant 0 : index
    %193 = vector.load %arg10[%c0_83, %c0_84] : memref<32x32xf32, #tpu.memory_space<vmem>>, vector<32x32xf32>
    %cst_85 = arith.constant dense<0.000000e+00> : vector<8x32xf32>
    %194 = tpu.matmul %192, %193, %cst_85 {dimension_numbers = #tpu.dot_dimension_numbers<[1], [0], [0], [1], [0, 0, 1, 1], [], []>} : vector<8x32xf32>, vector<32x32xf32>, vector<8x32xf32> -> vector<8x32xf32>
    %c0_86 = arith.constant 0 : index
    %c0_87 = arith.constant 0 : index
    %195 = vector.load %arg11[%c0_86, %c0_87] : memref<1x32xf32, #tpu.memory_space<vmem>>, vector<1x32xf32>
    %196 = vector.broadcast %195 : vector<1x32xf32> to vector<8x32xf32>
    %197 = arith.addf %194, %196 : vector<8x32xf32>
    %cst_88 = arith.constant 0.000000e+00 : f32
    %198 = vector.broadcast %cst_88 : f32 to vector<8x32xf32>
    %199 = arith.maximumf %197, %198 : vector<8x32xf32>
    %c0_89 = arith.constant 0 : index
    %c0_90 = arith.constant 0 : index
    %200 = vector.load %arg12[%c0_89, %c0_90] : memref<32x32xf32, #tpu.memory_space<vmem>>, vector<32x32xf32>
    %cst_91 = arith.constant dense<0.000000e+00> : vector<8x32xf32>
    %201 = tpu.matmul %199, %200, %cst_91 {dimension_numbers = #tpu.dot_dimension_numbers<[1], [0], [0], [1], [0, 0, 1, 1], [], []>} : vector<8x32xf32>, vector<32x32xf32>, vector<8x32xf32> -> vector<8x32xf32>
    %c0_92 = arith.constant 0 : index
    %c0_93 = arith.constant 0 : index
    %202 = vector.load %arg13[%c0_92, %c0_93] : memref<1x32xf32, #tpu.memory_space<vmem>>, vector<1x32xf32>
    %203 = vector.broadcast %202 : vector<1x32xf32> to vector<8x32xf32>
    %204 = arith.addf %201, %203 : vector<8x32xf32>
    %cst_94 = arith.constant 0.000000e+00 : f32
    %205 = vector.broadcast %cst_94 : f32 to vector<8x32xf32>
    %206 = arith.maximumf %204, %205 : vector<8x32xf32>
    %c0_95 = arith.constant 0 : index
    %c0_96 = arith.constant 0 : index
    %207 = vector.load %arg14[%c0_95, %c0_96] : memref<32x8xf32, #tpu.memory_space<vmem>>, vector<32x8xf32>
    %cst_97 = arith.constant dense<0.000000e+00> : vector<8x8xf32>
    %208 = tpu.matmul %206, %207, %cst_97 {dimension_numbers = #tpu.dot_dimension_numbers<[1], [0], [0], [1], [0, 0, 1, 1], [], []>} : vector<8x32xf32>, vector<32x8xf32>, vector<8x8xf32> -> vector<8x8xf32>
    %c0_98 = arith.constant 0 : index
    %c0_99 = arith.constant 0 : index
    %209 = vector.load %arg15[%c0_98, %c0_99] : memref<1x8xf32, #tpu.memory_space<vmem>>, vector<1x8xf32>
    %210 = vector.broadcast %209 : vector<1x8xf32> to vector<8x8xf32>
    %211 = arith.addf %208, %210 : vector<8x8xf32>
    %212 = tpu.concatenate %77, %144, %211 in 1 : vector<8x8xf32>, vector<8x8xf32>, vector<8x8xf32> -> vector<8x24xf32>
    %213 = arith.index_cast %c0_i32 : i32 to index
    %c0_100 = arith.constant 0 : index
    %c0_101 = arith.constant 0 : index
    %214 = vector.load %arg16[%213, %c0_100, %c0_101] : memref<6x8x24xf32, #tpu.memory_space<vmem>>, vector<1x8x24xf32>
    %215 = vector.shape_cast %214 : vector<1x8x24xf32> to vector<8x24xf32>
    %216 = vector.shape_cast %212 : vector<8x24xf32> to vector<1x8x24xf32>
    tpu.vector_store %arg16[%213, %c0_100, %c0_101], %216 {strides = array<i32>} : memref<6x8x24xf32, #tpu.memory_space<vmem>>, vector<1x8x24xf32>,
    %c1_i32 = arith.constant 1 : i32
    %217 = arith.index_cast %c1_i32 : i32 to index
    %c0_102 = arith.constant 0 : index
    %c0_103 = arith.constant 0 : index
    %218 = vector.load %arg1[%217, %c0_102, %c0_103] : memref<6x8x8xf32, #tpu.memory_space<vmem>>, vector<1x8x8xf32>
    %219 = vector.shape_cast %218 : vector<1x8x8xf32> to vector<8x8xf32>
    %c0_104 = arith.constant 0 : index
    %c0_105 = arith.constant 0 : index
    %220 = vector.load %arg2[%c0_104, %c0_105] : memref<8x96xf32, #tpu.memory_space<vmem>>, vector<8x96xf32>
    %cst_106 = arith.constant dense<0.000000e+00> : vector<8x96xf32>
    %221 = tpu.matmul %219, %220, %cst_106 {dimension_numbers = #tpu.dot_dimension_numbers<[1], [0], [0], [1], [0, 0, 1, 1], [], []>} : vector<8x8xf32>, vector<8x96xf32>, vector<8x96xf32> -> vector<8x96xf32>
    %c0_107 = arith.constant 0 : index
    %c0_108 = arith.constant 0 : index
    %222 = vector.load %arg3[%c0_107, %c0_108] : memref<1x96xf32, #tpu.memory_space<vmem>>, vector<1x96xf32>
    %223 = vector.broadcast %222 : vector<1x96xf32> to vector<8x96xf32>
    %224 = arith.addf %221, %223 : vector<8x96xf32>
    %c0_109 = arith.constant 0 : index
    %c0_110 = arith.constant 0 : index
    %225 = vector.load %arg4[%c0_109, %c0_110] : memref<32x96xf32, #tpu.memory_space<vmem>>, vector<32x96xf32>
    %cst_111 = arith.constant dense<0.000000e+00> : vector<8x96xf32>
    %226 = tpu.matmul %34, %225, %cst_111 {dimension_numbers = #tpu.dot_dimension_numbers<[1], [0], [0], [1], [0, 0, 1, 1], [], []>} : vector<8x32xf32>, vector<32x96xf32>, vector<8x96xf32> -> vector<8x96xf32>
    %227 = vector.extract_strided_slice %224 {offsets = [0, 0], sizes = [8, 64], strides = [1, 1]} : vector<8x96xf32> to vector<8x64xf32>
    %228 = vector.extract_strided_slice %226 {offsets = [0, 0], sizes = [8, 64], strides = [1, 1]} : vector<8x96xf32> to vector<8x64xf32>
    %229 = arith.addf %227, %228 : vector<8x64xf32>
    %230 = arith.negf %229 : vector<8x64xf32>
    %231 = math.exp %230 : vector<8x64xf32>
    %cst_112 = arith.constant 1.000000e+00 : f32
    %232 = vector.broadcast %cst_112 : f32 to vector<8x64xf32>
    %233 = arith.addf %232, %231 : vector<8x64xf32>
    %234 = arith.divf %232, %233 : vector<8x64xf32>
    %235 = vector.extract_strided_slice %234 {offsets = [0, 0], sizes = [8, 32], strides = [1, 1]} : vector<8x64xf32> to vector<8x32xf32>
    %236 = vector.extract_strided_slice %234 {offsets = [0, 32], sizes = [8, 32], strides = [1, 1]} : vector<8x64xf32> to vector<8x32xf32>
    %237 = vector.extract_strided_slice %224 {offsets = [0, 64], sizes = [8, 32], strides = [1, 1]} : vector<8x96xf32> to vector<8x32xf32>
    %238 = vector.extract_strided_slice %226 {offsets = [0, 64], sizes = [8, 32], strides = [1, 1]} : vector<8x96xf32> to vector<8x32xf32>
    %c0_113 = arith.constant 0 : index
    %c0_114 = arith.constant 0 : index
    %239 = vector.load %arg5[%c0_113, %c0_114] : memref<1x32xf32, #tpu.memory_space<vmem>>, vector<1x32xf32>
    %240 = vector.broadcast %239 : vector<1x32xf32> to vector<8x32xf32>
    %241 = arith.addf %238, %240 : vector<8x32xf32>
    %242 = arith.mulf %235, %241 : vector<8x32xf32>
    %243 = arith.addf %237, %242 : vector<8x32xf32>
    %244 = math.tanh %243 : vector<8x32xf32>
    %cst_115 = arith.constant 1.000000e+00 : f32
    %245 = vector.broadcast %cst_115 : f32 to vector<8x32xf32>
    %246 = arith.subf %245, %236 : vector<8x32xf32>
    %247 = arith.mulf %246, %244 : vector<8x32xf32>
    %248 = arith.mulf %236, %34 : vector<8x32xf32>
    %249 = arith.addf %247, %248 : vector<8x32xf32>
    %250 = tpu.concatenate %249, %58 in 1 : vector<8x32xf32>, vector<8x32xf32> -> vector<8x64xf32>
    %c0_116 = arith.constant 0 : index
    %c0_117 = arith.constant 0 : index
    %251 = vector.load %arg8[%c0_116, %c0_117] : memref<64x128xf32, #tpu.memory_space<vmem>>, vector<64x128xf32>
    %cst_118 = arith.constant dense<0.000000e+00> : vector<8x128xf32>
    %252 = tpu.matmul %250, %251, %cst_118 {dimension_numbers = #tpu.dot_dimension_numbers<[1], [0], [0], [1], [0, 0, 1, 1], [], []>} : vector<8x64xf32>, vector<64x128xf32>, vector<8x128xf32> -> vector<8x128xf32>
    %c0_119 = arith.constant 0 : index
    %c0_120 = arith.constant 0 : index
    %253 = vector.load %arg9[%c0_119, %c0_120] : memref<1x128xf32, #tpu.memory_space<vmem>>, vector<1x128xf32>
    %254 = vector.broadcast %253 : vector<1x128xf32> to vector<8x128xf32>
    %255 = arith.addf %252, %254 : vector<8x128xf32>
    %256 = vector.extract_strided_slice %255 {offsets = [0, 0], sizes = [8, 64], strides = [1, 1]} : vector<8x128xf32> to vector<8x64xf32>
    %257 = arith.negf %256 : vector<8x64xf32>
    %258 = math.exp %257 : vector<8x64xf32>
    %cst_121 = arith.constant 1.000000e+00 : f32
    %259 = vector.broadcast %cst_121 : f32 to vector<8x64xf32>
    %260 = arith.addf %259, %258 : vector<8x64xf32>
    %261 = arith.divf %259, %260 : vector<8x64xf32>
    %262 = vector.extract_strided_slice %261 {offsets = [0, 0], sizes = [8, 32], strides = [1, 1]} : vector<8x64xf32> to vector<8x32xf32>
    %263 = vector.extract_strided_slice %261 {offsets = [0, 32], sizes = [8, 32], strides = [1, 1]} : vector<8x64xf32> to vector<8x32xf32>
    %264 = vector.extract_strided_slice %255 {offsets = [0, 64], sizes = [8, 32], strides = [1, 1]} : vector<8x128xf32> to vector<8x32xf32>
    %265 = vector.extract_strided_slice %255 {offsets = [0, 96], sizes = [8, 32], strides = [1, 1]} : vector<8x128xf32> to vector<8x32xf32>
    %266 = arith.mulf %262, %265 : vector<8x32xf32>
    %267 = arith.addf %264, %266 : vector<8x32xf32>
    %268 = math.tanh %267 : vector<8x32xf32>
    %cst_122 = arith.constant 1.000000e+00 : f32
    %269 = vector.broadcast %cst_122 : f32 to vector<8x32xf32>
    %270 = arith.subf %269, %263 : vector<8x32xf32>
    %271 = arith.mulf %270, %268 : vector<8x32xf32>
    %272 = arith.mulf %263, %58 : vector<8x32xf32>
    %273 = arith.addf %271, %272 : vector<8x32xf32>
    %c0_123 = arith.constant 0 : index
    %c0_124 = arith.constant 0 : index
    %274 = vector.load %arg10[%c0_123, %c0_124] : memref<32x32xf32, #tpu.memory_space<vmem>>, vector<32x32xf32>
    %cst_125 = arith.constant dense<0.000000e+00> : vector<8x32xf32>
    %275 = tpu.matmul %273, %274, %cst_125 {dimension_numbers = #tpu.dot_dimension_numbers<[1], [0], [0], [1], [0, 0, 1, 1], [], []>} : vector<8x32xf32>, vector<32x32xf32>, vector<8x32xf32> -> vector<8x32xf32>
    %c0_126 = arith.constant 0 : index
    %c0_127 = arith.constant 0 : index
    %276 = vector.load %arg11[%c0_126, %c0_127] : memref<1x32xf32, #tpu.memory_space<vmem>>, vector<1x32xf32>
    %277 = vector.broadcast %276 : vector<1x32xf32> to vector<8x32xf32>
    %278 = arith.addf %275, %277 : vector<8x32xf32>
    %cst_128 = arith.constant 0.000000e+00 : f32
    %279 = vector.broadcast %cst_128 : f32 to vector<8x32xf32>
    %280 = arith.maximumf %278, %279 : vector<8x32xf32>
    %c0_129 = arith.constant 0 : index
    %c0_130 = arith.constant 0 : index
    %281 = vector.load %arg12[%c0_129, %c0_130] : memref<32x32xf32, #tpu.memory_space<vmem>>, vector<32x32xf32>
    %cst_131 = arith.constant dense<0.000000e+00> : vector<8x32xf32>
    %282 = tpu.matmul %280, %281, %cst_131 {dimension_numbers = #tpu.dot_dimension_numbers<[1], [0], [0], [1], [0, 0, 1, 1], [], []>} : vector<8x32xf32>, vector<32x32xf32>, vector<8x32xf32> -> vector<8x32xf32>
    %c0_132 = arith.constant 0 : index
    %c0_133 = arith.constant 0 : index
    %283 = vector.load %arg13[%c0_132, %c0_133] : memref<1x32xf32, #tpu.memory_space<vmem>>, vector<1x32xf32>
    %284 = vector.broadcast %283 : vector<1x32xf32> to vector<8x32xf32>
    %285 = arith.addf %282, %284 : vector<8x32xf32>
    %cst_134 = arith.constant 0.000000e+00 : f32
    %286 = vector.broadcast %cst_134 : f32 to vector<8x32xf32>
    %287 = arith.maximumf %285, %286 : vector<8x32xf32>
    %c0_135 = arith.constant 0 : index
    %c0_136 = arith.constant 0 : index
    %288 = vector.load %arg14[%c0_135, %c0_136] : memref<32x8xf32, #tpu.memory_space<vmem>>, vector<32x8xf32>
    %cst_137 = arith.constant dense<0.000000e+00> : vector<8x8xf32>
    %289 = tpu.matmul %287, %288, %cst_137 {dimension_numbers = #tpu.dot_dimension_numbers<[1], [0], [0], [1], [0, 0, 1, 1], [], []>} : vector<8x32xf32>, vector<32x8xf32>, vector<8x8xf32> -> vector<8x8xf32>
    %c0_138 = arith.constant 0 : index
    %c0_139 = arith.constant 0 : index
    %290 = vector.load %arg15[%c0_138, %c0_139] : memref<1x8xf32, #tpu.memory_space<vmem>>, vector<1x8xf32>
    %291 = vector.broadcast %290 : vector<1x8xf32> to vector<8x8xf32>
    %292 = arith.addf %289, %291 : vector<8x8xf32>
    %293 = tpu.concatenate %292, %249 in 1 : vector<8x8xf32>, vector<8x32xf32> -> vector<8x40xf32>
    %c0_140 = arith.constant 0 : index
    %c0_141 = arith.constant 0 : index
    %294 = vector.load %arg6[%c0_140, %c0_141] : memref<40x128xf32, #tpu.memory_space<vmem>>, vector<40x128xf32>
    %cst_142 = arith.constant dense<0.000000e+00> : vector<8x128xf32>
    %295 = tpu.matmul %293, %294, %cst_142 {dimension_numbers = #tpu.dot_dimension_numbers<[1], [0], [0], [1], [0, 0, 1, 1], [], []>} : vector<8x40xf32>, vector<40x128xf32>, vector<8x128xf32> -> vector<8x128xf32>
    %c0_143 = arith.constant 0 : index
    %c0_144 = arith.constant 0 : index
    %296 = vector.load %arg7[%c0_143, %c0_144] : memref<1x128xf32, #tpu.memory_space<vmem>>, vector<1x128xf32>
    %297 = vector.broadcast %296 : vector<1x128xf32> to vector<8x128xf32>
    %298 = arith.addf %295, %297 : vector<8x128xf32>
    %299 = vector.extract_strided_slice %298 {offsets = [0, 0], sizes = [8, 64], strides = [1, 1]} : vector<8x128xf32> to vector<8x64xf32>
    %300 = arith.negf %299 : vector<8x64xf32>
    %301 = math.exp %300 : vector<8x64xf32>
    %cst_145 = arith.constant 1.000000e+00 : f32
    %302 = vector.broadcast %cst_145 : f32 to vector<8x64xf32>
    %303 = arith.addf %302, %301 : vector<8x64xf32>
    %304 = arith.divf %302, %303 : vector<8x64xf32>
    %305 = vector.extract_strided_slice %304 {offsets = [0, 0], sizes = [8, 32], strides = [1, 1]} : vector<8x64xf32> to vector<8x32xf32>
    %306 = vector.extract_strided_slice %304 {offsets = [0, 32], sizes = [8, 32], strides = [1, 1]} : vector<8x64xf32> to vector<8x32xf32>
    %307 = vector.extract_strided_slice %298 {offsets = [0, 64], sizes = [8, 32], strides = [1, 1]} : vector<8x128xf32> to vector<8x32xf32>
    %308 = vector.extract_strided_slice %298 {offsets = [0, 96], sizes = [8, 32], strides = [1, 1]} : vector<8x128xf32> to vector<8x32xf32>
    %309 = arith.mulf %305, %308 : vector<8x32xf32>
    %310 = arith.addf %307, %309 : vector<8x32xf32>
    %311 = math.tanh %310 : vector<8x32xf32>
    %cst_146 = arith.constant 1.000000e+00 : f32
    %312 = vector.broadcast %cst_146 : f32 to vector<8x32xf32>
    %313 = arith.subf %312, %306 : vector<8x32xf32>
    %314 = arith.mulf %313, %311 : vector<8x32xf32>
    %315 = arith.mulf %306, %249 : vector<8x32xf32>
    %316 = arith.addf %314, %315 : vector<8x32xf32>
    %317 = tpu.concatenate %316, %273 in 1 : vector<8x32xf32>, vector<8x32xf32> -> vector<8x64xf32>
    %c0_147 = arith.constant 0 : index
    %c0_148 = arith.constant 0 : index
    %318 = vector.load %arg8[%c0_147, %c0_148] : memref<64x128xf32, #tpu.memory_space<vmem>>, vector<64x128xf32>
    %cst_149 = arith.constant dense<0.000000e+00> : vector<8x128xf32>
    %319 = tpu.matmul %317, %318, %cst_149 {dimension_numbers = #tpu.dot_dimension_numbers<[1], [0], [0], [1], [0, 0, 1, 1], [], []>} : vector<8x64xf32>, vector<64x128xf32>, vector<8x128xf32> -> vector<8x128xf32>
    %c0_150 = arith.constant 0 : index
    %c0_151 = arith.constant 0 : index
    %320 = vector.load %arg9[%c0_150, %c0_151] : memref<1x128xf32, #tpu.memory_space<vmem>>, vector<1x128xf32>
    %321 = vector.broadcast %320 : vector<1x128xf32> to vector<8x128xf32>
    %322 = arith.addf %319, %321 : vector<8x128xf32>
    %323 = vector.extract_strided_slice %322 {offsets = [0, 0], sizes = [8, 64], strides = [1, 1]} : vector<8x128xf32> to vector<8x64xf32>
    %324 = arith.negf %323 : vector<8x64xf32>
    %325 = math.exp %324 : vector<8x64xf32>
    %cst_152 = arith.constant 1.000000e+00 : f32
    %326 = vector.broadcast %cst_152 : f32 to vector<8x64xf32>
    %327 = arith.addf %326, %325 : vector<8x64xf32>
    %328 = arith.divf %326, %327 : vector<8x64xf32>
    %329 = vector.extract_strided_slice %328 {offsets = [0, 0], sizes = [8, 32], strides = [1, 1]} : vector<8x64xf32> to vector<8x32xf32>
    %330 = vector.extract_strided_slice %328 {offsets = [0, 32], sizes = [8, 32], strides = [1, 1]} : vector<8x64xf32> to vector<8x32xf32>
    %331 = vector.extract_strided_slice %322 {offsets = [0, 64], sizes = [8, 32], strides = [1, 1]} : vector<8x128xf32> to vector<8x32xf32>
    %332 = vector.extract_strided_slice %322 {offsets = [0, 96], sizes = [8, 32], strides = [1, 1]} : vector<8x128xf32> to vector<8x32xf32>
    %333 = arith.mulf %329, %332 : vector<8x32xf32>
    %334 = arith.addf %331, %333 : vector<8x32xf32>
    %335 = math.tanh %334 : vector<8x32xf32>
    %cst_153 = arith.constant 1.000000e+00 : f32
    %336 = vector.broadcast %cst_153 : f32 to vector<8x32xf32>
    %337 = arith.subf %336, %330 : vector<8x32xf32>
    %338 = arith.mulf %337, %335 : vector<8x32xf32>
    %339 = arith.mulf %330, %273 : vector<8x32xf32>
    %340 = arith.addf %338, %339 : vector<8x32xf32>
    %c0_154 = arith.constant 0 : index
    %c0_155 = arith.constant 0 : index
    %341 = vector.load %arg10[%c0_154, %c0_155] : memref<32x32xf32, #tpu.memory_space<vmem>>, vector<32x32xf32>
    %cst_156 = arith.constant dense<0.000000e+00> : vector<8x32xf32>
    %342 = tpu.matmul %340, %341, %cst_156 {dimension_numbers = #tpu.dot_dimension_numbers<[1], [0], [0], [1], [0, 0, 1, 1], [], []>} : vector<8x32xf32>, vector<32x32xf32>, vector<8x32xf32> -> vector<8x32xf32>
    %c0_157 = arith.constant 0 : index
    %c0_158 = arith.constant 0 : index
    %343 = vector.load %arg11[%c0_157, %c0_158] : memref<1x32xf32, #tpu.memory_space<vmem>>, vector<1x32xf32>
    %344 = vector.broadcast %343 : vector<1x32xf32> to vector<8x32xf32>
    %345 = arith.addf %342, %344 : vector<8x32xf32>
    %cst_159 = arith.constant 0.000000e+00 : f32
    %346 = vector.broadcast %cst_159 : f32 to vector<8x32xf32>
    %347 = arith.maximumf %345, %346 : vector<8x32xf32>
    %c0_160 = arith.constant 0 : index
    %c0_161 = arith.constant 0 : index
    %348 = vector.load %arg12[%c0_160, %c0_161] : memref<32x32xf32, #tpu.memory_space<vmem>>, vector<32x32xf32>
    %cst_162 = arith.constant dense<0.000000e+00> : vector<8x32xf32>
    %349 = tpu.matmul %347, %348, %cst_162 {dimension_numbers = #tpu.dot_dimension_numbers<[1], [0], [0], [1], [0, 0, 1, 1], [], []>} : vector<8x32xf32>, vector<32x32xf32>, vector<8x32xf32> -> vector<8x32xf32>
    %c0_163 = arith.constant 0 : index
    %c0_164 = arith.constant 0 : index
    %350 = vector.load %arg13[%c0_163, %c0_164] : memref<1x32xf32, #tpu.memory_space<vmem>>, vector<1x32xf32>
    %351 = vector.broadcast %350 : vector<1x32xf32> to vector<8x32xf32>
    %352 = arith.addf %349, %351 : vector<8x32xf32>
    %cst_165 = arith.constant 0.000000e+00 : f32
    %353 = vector.broadcast %cst_165 : f32 to vector<8x32xf32>
    %354 = arith.maximumf %352, %353 : vector<8x32xf32>
    %c0_166 = arith.constant 0 : index
    %c0_167 = arith.constant 0 : index
    %355 = vector.load %arg14[%c0_166, %c0_167] : memref<32x8xf32, #tpu.memory_space<vmem>>, vector<32x8xf32>
    %cst_168 = arith.constant dense<0.000000e+00> : vector<8x8xf32>
    %356 = tpu.matmul %354, %355, %cst_168 {dimension_numbers = #tpu.dot_dimension_numbers<[1], [0], [0], [1], [0, 0, 1, 1], [], []>} : vector<8x32xf32>, vector<32x8xf32>, vector<8x8xf32> -> vector<8x8xf32>
    %c0_169 = arith.constant 0 : index
    %c0_170 = arith.constant 0 : index
    %357 = vector.load %arg15[%c0_169, %c0_170] : memref<1x8xf32, #tpu.memory_space<vmem>>, vector<1x8xf32>
    %358 = vector.broadcast %357 : vector<1x8xf32> to vector<8x8xf32>
    %359 = arith.addf %356, %358 : vector<8x8xf32>
    %360 = tpu.concatenate %359, %316 in 1 : vector<8x8xf32>, vector<8x32xf32> -> vector<8x40xf32>
    %c0_171 = arith.constant 0 : index
    %c0_172 = arith.constant 0 : index
    %361 = vector.load %arg6[%c0_171, %c0_172] : memref<40x128xf32, #tpu.memory_space<vmem>>, vector<40x128xf32>
    %cst_173 = arith.constant dense<0.000000e+00> : vector<8x128xf32>
    %362 = tpu.matmul %360, %361, %cst_173 {dimension_numbers = #tpu.dot_dimension_numbers<[1], [0], [0], [1], [0, 0, 1, 1], [], []>} : vector<8x40xf32>, vector<40x128xf32>, vector<8x128xf32> -> vector<8x128xf32>
    %c0_174 = arith.constant 0 : index
    %c0_175 = arith.constant 0 : index
    %363 = vector.load %arg7[%c0_174, %c0_175] : memref<1x128xf32, #tpu.memory_space<vmem>>, vector<1x128xf32>
    %364 = vector.broadcast %363 : vector<1x128xf32> to vector<8x128xf32>
    %365 = arith.addf %362, %364 : vector<8x128xf32>
    %366 = vector.extract_strided_slice %365 {offsets = [0, 0], sizes = [8, 64], strides = [1, 1]} : vector<8x128xf32> to vector<8x64xf32>
    %367 = arith.negf %366 : vector<8x64xf32>
    %368 = math.exp %367 : vector<8x64xf32>
    %cst_176 = arith.constant 1.000000e+00 : f32
    %369 = vector.broadcast %cst_176 : f32 to vector<8x64xf32>
    %370 = arith.addf %369, %368 : vector<8x64xf32>
    %371 = arith.divf %369, %370 : vector<8x64xf32>
    %372 = vector.extract_strided_slice %371 {offsets = [0, 0], sizes = [8, 32], strides = [1, 1]} : vector<8x64xf32> to vector<8x32xf32>
    %373 = vector.extract_strided_slice %371 {offsets = [0, 32], sizes = [8, 32], strides = [1, 1]} : vector<8x64xf32> to vector<8x32xf32>
    %374 = vector.extract_strided_slice %365 {offsets = [0, 64], sizes = [8, 32], strides = [1, 1]} : vector<8x128xf32> to vector<8x32xf32>
    %375 = vector.extract_strided_slice %365 {offsets = [0, 96], sizes = [8, 32], strides = [1, 1]} : vector<8x128xf32> to vector<8x32xf32>
    %376 = arith.mulf %372, %375 : vector<8x32xf32>
    %377 = arith.addf %374, %376 : vector<8x32xf32>
    %378 = math.tanh %377 : vector<8x32xf32>
    %cst_177 = arith.constant 1.000000e+00 : f32
    %379 = vector.broadcast %cst_177 : f32 to vector<8x32xf32>
    %380 = arith.subf %379, %373 : vector<8x32xf32>
    %381 = arith.mulf %380, %378 : vector<8x32xf32>
    %382 = arith.mulf %373, %316 : vector<8x32xf32>
    %383 = arith.addf %381, %382 : vector<8x32xf32>
    %384 = tpu.concatenate %383, %340 in 1 : vector<8x32xf32>, vector<8x32xf32> -> vector<8x64xf32>
    %c0_178 = arith.constant 0 : index
    %c0_179 = arith.constant 0 : index
    %385 = vector.load %arg8[%c0_178, %c0_179] : memref<64x128xf32, #tpu.memory_space<vmem>>, vector<64x128xf32>
    %cst_180 = arith.constant dense<0.000000e+00> : vector<8x128xf32>
    %386 = tpu.matmul %384, %385, %cst_180 {dimension_numbers = #tpu.dot_dimension_numbers<[1], [0], [0], [1], [0, 0, 1, 1], [], []>} : vector<8x64xf32>, vector<64x128xf32>, vector<8x128xf32> -> vector<8x128xf32>
    %c0_181 = arith.constant 0 : index
    %c0_182 = arith.constant 0 : index
    %387 = vector.load %arg9[%c0_181, %c0_182] : memref<1x128xf32, #tpu.memory_space<vmem>>, vector<1x128xf32>
    %388 = vector.broadcast %387 : vector<1x128xf32> to vector<8x128xf32>
    %389 = arith.addf %386, %388 : vector<8x128xf32>
    %390 = vector.extract_strided_slice %389 {offsets = [0, 0], sizes = [8, 64], strides = [1, 1]} : vector<8x128xf32> to vector<8x64xf32>
    %391 = arith.negf %390 : vector<8x64xf32>
    %392 = math.exp %391 : vector<8x64xf32>
    %cst_183 = arith.constant 1.000000e+00 : f32
    %393 = vector.broadcast %cst_183 : f32 to vector<8x64xf32>
    %394 = arith.addf %393, %392 : vector<8x64xf32>
    %395 = arith.divf %393, %394 : vector<8x64xf32>
    %396 = vector.extract_strided_slice %395 {offsets = [0, 0], sizes = [8, 32], strides = [1, 1]} : vector<8x64xf32> to vector<8x32xf32>
    %397 = vector.extract_strided_slice %395 {offsets = [0, 32], sizes = [8, 32], strides = [1, 1]} : vector<8x64xf32> to vector<8x32xf32>
    %398 = vector.extract_strided_slice %389 {offsets = [0, 64], sizes = [8, 32], strides = [1, 1]} : vector<8x128xf32> to vector<8x32xf32>
    %399 = vector.extract_strided_slice %389 {offsets = [0, 96], sizes = [8, 32], strides = [1, 1]} : vector<8x128xf32> to vector<8x32xf32>
    %400 = arith.mulf %396, %399 : vector<8x32xf32>
    %401 = arith.addf %398, %400 : vector<8x32xf32>
    %402 = math.tanh %401 : vector<8x32xf32>
    %cst_184 = arith.constant 1.000000e+00 : f32
    %403 = vector.broadcast %cst_184 : f32 to vector<8x32xf32>
    %404 = arith.subf %403, %397 : vector<8x32xf32>
    %405 = arith.mulf %404, %402 : vector<8x32xf32>
    %406 = arith.mulf %397, %340 : vector<8x32xf32>
    %407 = arith.addf %405, %406 : vector<8x32xf32>
    %c0_185 = arith.constant 0 : index
    %c0_186 = arith.constant 0 : index
    %408 = vector.load %arg10[%c0_185, %c0_186] : memref<32x32xf32, #tpu.memory_space<vmem>>, vector<32x32xf32>
    %cst_187 = arith.constant dense<0.000000e+00> : vector<8x32xf32>
    %409 = tpu.matmul %407, %408, %cst_187 {dimension_numbers = #tpu.dot_dimension_numbers<[1], [0], [0], [1], [0, 0, 1, 1], [], []>} : vector<8x32xf32>, vector<32x32xf32>, vector<8x32xf32> -> vector<8x32xf32>
    %c0_188 = arith.constant 0 : index
    %c0_189 = arith.constant 0 : index
    %410 = vector.load %arg11[%c0_188, %c0_189] : memref<1x32xf32, #tpu.memory_space<vmem>>, vector<1x32xf32>
    %411 = vector.broadcast %410 : vector<1x32xf32> to vector<8x32xf32>
    %412 = arith.addf %409, %411 : vector<8x32xf32>
    %cst_190 = arith.constant 0.000000e+00 : f32
    %413 = vector.broadcast %cst_190 : f32 to vector<8x32xf32>
    %414 = arith.maximumf %412, %413 : vector<8x32xf32>
    %c0_191 = arith.constant 0 : index
    %c0_192 = arith.constant 0 : index
    %415 = vector.load %arg12[%c0_191, %c0_192] : memref<32x32xf32, #tpu.memory_space<vmem>>, vector<32x32xf32>
    %cst_193 = arith.constant dense<0.000000e+00> : vector<8x32xf32>
    %416 = tpu.matmul %414, %415, %cst_193 {dimension_numbers = #tpu.dot_dimension_numbers<[1], [0], [0], [1], [0, 0, 1, 1], [], []>} : vector<8x32xf32>, vector<32x32xf32>, vector<8x32xf32> -> vector<8x32xf32>
    %c0_194 = arith.constant 0 : index
    %c0_195 = arith.constant 0 : index
    %417 = vector.load %arg13[%c0_194, %c0_195] : memref<1x32xf32, #tpu.memory_space<vmem>>, vector<1x32xf32>
    %418 = vector.broadcast %417 : vector<1x32xf32> to vector<8x32xf32>
    %419 = arith.addf %416, %418 : vector<8x32xf32>
    %cst_196 = arith.constant 0.000000e+00 : f32
    %420 = vector.broadcast %cst_196 : f32 to vector<8x32xf32>
    %421 = arith.maximumf %419, %420 : vector<8x32xf32>
    %c0_197 = arith.constant 0 : index
    %c0_198 = arith.constant 0 : index
    %422 = vector.load %arg14[%c0_197, %c0_198] : memref<32x8xf32, #tpu.memory_space<vmem>>, vector<32x8xf32>
    %cst_199 = arith.constant dense<0.000000e+00> : vector<8x8xf32>
    %423 = tpu.matmul %421, %422, %cst_199 {dimension_numbers = #tpu.dot_dimension_numbers<[1], [0], [0], [1], [0, 0, 1, 1], [], []>} : vector<8x32xf32>, vector<32x8xf32>, vector<8x8xf32> -> vector<8x8xf32>
    %c0_200 = arith.constant 0 : index
    %c0_201 = arith.constant 0 : index
    %424 = vector.load %arg15[%c0_200, %c0_201] : memref<1x8xf32, #tpu.memory_space<vmem>>, vector<1x8xf32>
    %425 = vector.broadcast %424 : vector<1x8xf32> to vector<8x8xf32>
    %426 = arith.addf %423, %425 : vector<8x8xf32>
    %427 = tpu.concatenate %292, %359, %426 in 1 : vector<8x8xf32>, vector<8x8xf32>, vector<8x8xf32> -> vector<8x24xf32>
    %428 = arith.index_cast %c1_i32 : i32 to index
    %c0_202 = arith.constant 0 : index
    %c0_203 = arith.constant 0 : index
    %429 = vector.load %arg16[%428, %c0_202, %c0_203] : memref<6x8x24xf32, #tpu.memory_space<vmem>>, vector<1x8x24xf32>
    %430 = vector.shape_cast %429 : vector<1x8x24xf32> to vector<8x24xf32>
    %431 = vector.shape_cast %427 : vector<8x24xf32> to vector<1x8x24xf32>
    tpu.vector_store %arg16[%428, %c0_202, %c0_203], %431 {strides = array<i32>} : memref<6x8x24xf32, #tpu.memory_space<vmem>>, vector<1x8x24xf32>,
    %c2_i32 = arith.constant 2 : i32
    %432 = arith.index_cast %c2_i32 : i32 to index
    %c0_204 = arith.constant 0 : index
    %c0_205 = arith.constant 0 : index
    %433 = vector.load %arg1[%432, %c0_204, %c0_205] : memref<6x8x8xf32, #tpu.memory_space<vmem>>, vector<1x8x8xf32>
    %434 = vector.shape_cast %433 : vector<1x8x8xf32> to vector<8x8xf32>
    %c0_206 = arith.constant 0 : index
    %c0_207 = arith.constant 0 : index
    %435 = vector.load %arg2[%c0_206, %c0_207] : memref<8x96xf32, #tpu.memory_space<vmem>>, vector<8x96xf32>
    %cst_208 = arith.constant dense<0.000000e+00> : vector<8x96xf32>
    %436 = tpu.matmul %434, %435, %cst_208 {dimension_numbers = #tpu.dot_dimension_numbers<[1], [0], [0], [1], [0, 0, 1, 1], [], []>} : vector<8x8xf32>, vector<8x96xf32>, vector<8x96xf32> -> vector<8x96xf32>
    %c0_209 = arith.constant 0 : index
    %c0_210 = arith.constant 0 : index
    %437 = vector.load %arg3[%c0_209, %c0_210] : memref<1x96xf32, #tpu.memory_space<vmem>>, vector<1x96xf32>
    %438 = vector.broadcast %437 : vector<1x96xf32> to vector<8x96xf32>
    %439 = arith.addf %436, %438 : vector<8x96xf32>
    %c0_211 = arith.constant 0 : index
    %c0_212 = arith.constant 0 : index
    %440 = vector.load %arg4[%c0_211, %c0_212] : memref<32x96xf32, #tpu.memory_space<vmem>>, vector<32x96xf32>
    %cst_213 = arith.constant dense<0.000000e+00> : vector<8x96xf32>
    %441 = tpu.matmul %249, %440, %cst_213 {dimension_numbers = #tpu.dot_dimension_numbers<[1], [0], [0], [1], [0, 0, 1, 1], [], []>} : vector<8x32xf32>, vector<32x96xf32>, vector<8x96xf32> -> vector<8x96xf32>
    %442 = vector.extract_strided_slice %439 {offsets = [0, 0], sizes = [8, 64], strides = [1, 1]} : vector<8x96xf32> to vector<8x64xf32>
    %443 = vector.extract_strided_slice %441 {offsets = [0, 0], sizes = [8, 64], strides = [1, 1]} : vector<8x96xf32> to vector<8x64xf32>
    %444 = arith.addf %442, %443 : vector<8x64xf32>
    %445 = arith.negf %444 : vector<8x64xf32>
    %446 = math.exp %445 : vector<8x64xf32>
    %cst_214 = arith.constant 1.000000e+00 : f32
    %447 = vector.broadcast %cst_214 : f32 to vector<8x64xf32>
    %448 = arith.addf %447, %446 : vector<8x64xf32>
    %449 = arith.divf %447, %448 : vector<8x64xf32>
    %450 = vector.extract_strided_slice %449 {offsets = [0, 0], sizes = [8, 32], strides = [1, 1]} : vector<8x64xf32> to vector<8x32xf32>
    %451 = vector.extract_strided_slice %449 {offsets = [0, 32], sizes = [8, 32], strides = [1, 1]} : vector<8x64xf32> to vector<8x32xf32>
    %452 = vector.extract_strided_slice %439 {offsets = [0, 64], sizes = [8, 32], strides = [1, 1]} : vector<8x96xf32> to vector<8x32xf32>
    %453 = vector.extract_strided_slice %441 {offsets = [0, 64], sizes = [8, 32], strides = [1, 1]} : vector<8x96xf32> to vector<8x32xf32>
    %c0_215 = arith.constant 0 : index
    %c0_216 = arith.constant 0 : index
    %454 = vector.load %arg5[%c0_215, %c0_216] : memref<1x32xf32, #tpu.memory_space<vmem>>, vector<1x32xf32>
    %455 = vector.broadcast %454 : vector<1x32xf32> to vector<8x32xf32>
    %456 = arith.addf %453, %455 : vector<8x32xf32>
    %457 = arith.mulf %450, %456 : vector<8x32xf32>
    %458 = arith.addf %452, %457 : vector<8x32xf32>
    %459 = math.tanh %458 : vector<8x32xf32>
    %cst_217 = arith.constant 1.000000e+00 : f32
    %460 = vector.broadcast %cst_217 : f32 to vector<8x32xf32>
    %461 = arith.subf %460, %451 : vector<8x32xf32>
    %462 = arith.mulf %461, %459 : vector<8x32xf32>
    %463 = arith.mulf %451, %249 : vector<8x32xf32>
    %464 = arith.addf %462, %463 : vector<8x32xf32>
    %465 = tpu.concatenate %464, %273 in 1 : vector<8x32xf32>, vector<8x32xf32> -> vector<8x64xf32>
    %c0_218 = arith.constant 0 : index
    %c0_219 = arith.constant 0 : index
    %466 = vector.load %arg8[%c0_218, %c0_219] : memref<64x128xf32, #tpu.memory_space<vmem>>, vector<64x128xf32>
    %cst_220 = arith.constant dense<0.000000e+00> : vector<8x128xf32>
    %467 = tpu.matmul %465, %466, %cst_220 {dimension_numbers = #tpu.dot_dimension_numbers<[1], [0], [0], [1], [0, 0, 1, 1], [], []>} : vector<8x64xf32>, vector<64x128xf32>, vector<8x128xf32> -> vector<8x128xf32>
    %c0_221 = arith.constant 0 : index
    %c0_222 = arith.constant 0 : index
    %468 = vector.load %arg9[%c0_221, %c0_222] : memref<1x128xf32, #tpu.memory_space<vmem>>, vector<1x128xf32>
    %469 = vector.broadcast %468 : vector<1x128xf32> to vector<8x128xf32>
    %470 = arith.addf %467, %469 : vector<8x128xf32>
    %471 = vector.extract_strided_slice %470 {offsets = [0, 0], sizes = [8, 64], strides = [1, 1]} : vector<8x128xf32> to vector<8x64xf32>
    %472 = arith.negf %471 : vector<8x64xf32>
    %473 = math.exp %472 : vector<8x64xf32>
    %cst_223 = arith.constant 1.000000e+00 : f32
    %474 = vector.broadcast %cst_223 : f32 to vector<8x64xf32>
    %475 = arith.addf %474, %473 : vector<8x64xf32>
    %476 = arith.divf %474, %475 : vector<8x64xf32>
    %477 = vector.extract_strided_slice %476 {offsets = [0, 0], sizes = [8, 32], strides = [1, 1]} : vector<8x64xf32> to vector<8x32xf32>
    %478 = vector.extract_strided_slice %476 {offsets = [0, 32], sizes = [8, 32], strides = [1, 1]} : vector<8x64xf32> to vector<8x32xf32>
    %479 = vector.extract_strided_slice %470 {offsets = [0, 64], sizes = [8, 32], strides = [1, 1]} : vector<8x128xf32> to vector<8x32xf32>
    %480 = vector.extract_strided_slice %470 {offsets = [0, 96], sizes = [8, 32], strides = [1, 1]} : vector<8x128xf32> to vector<8x32xf32>
    %481 = arith.mulf %477, %480 : vector<8x32xf32>
    %482 = arith.addf %479, %481 : vector<8x32xf32>
    %483 = math.tanh %482 : vector<8x32xf32>
    %cst_224 = arith.constant 1.000000e+00 : f32
    %484 = vector.broadcast %cst_224 : f32 to vector<8x32xf32>
    %485 = arith.subf %484, %478 : vector<8x32xf32>
    %486 = arith.mulf %485, %483 : vector<8x32xf32>
    %487 = arith.mulf %478, %273 : vector<8x32xf32>
    %488 = arith.addf %486, %487 : vector<8x32xf32>
    %c0_225 = arith.constant 0 : index
    %c0_226 = arith.constant 0 : index
    %489 = vector.load %arg10[%c0_225, %c0_226] : memref<32x32xf32, #tpu.memory_space<vmem>>, vector<32x32xf32>
    %cst_227 = arith.constant dense<0.000000e+00> : vector<8x32xf32>
    %490 = tpu.matmul %488, %489, %cst_227 {dimension_numbers = #tpu.dot_dimension_numbers<[1], [0], [0], [1], [0, 0, 1, 1], [], []>} : vector<8x32xf32>, vector<32x32xf32>, vector<8x32xf32> -> vector<8x32xf32>
    %c0_228 = arith.constant 0 : index
    %c0_229 = arith.constant 0 : index
    %491 = vector.load %arg11[%c0_228, %c0_229] : memref<1x32xf32, #tpu.memory_space<vmem>>, vector<1x32xf32>
    %492 = vector.broadcast %491 : vector<1x32xf32> to vector<8x32xf32>
    %493 = arith.addf %490, %492 : vector<8x32xf32>
    %cst_230 = arith.constant 0.000000e+00 : f32
    %494 = vector.broadcast %cst_230 : f32 to vector<8x32xf32>
    %495 = arith.maximumf %493, %494 : vector<8x32xf32>
    %c0_231 = arith.constant 0 : index
    %c0_232 = arith.constant 0 : index
    %496 = vector.load %arg12[%c0_231, %c0_232] : memref<32x32xf32, #tpu.memory_space<vmem>>, vector<32x32xf32>
    %cst_233 = arith.constant dense<0.000000e+00> : vector<8x32xf32>
    %497 = tpu.matmul %495, %496, %cst_233 {dimension_numbers = #tpu.dot_dimension_numbers<[1], [0], [0], [1], [0, 0, 1, 1], [], []>} : vector<8x32xf32>, vector<32x32xf32>, vector<8x32xf32> -> vector<8x32xf32>
    %c0_234 = arith.constant 0 : index
    %c0_235 = arith.constant 0 : index
    %498 = vector.load %arg13[%c0_234, %c0_235] : memref<1x32xf32, #tpu.memory_space<vmem>>, vector<1x32xf32>
    %499 = vector.broadcast %498 : vector<1x32xf32> to vector<8x32xf32>
    %500 = arith.addf %497, %499 : vector<8x32xf32>
    %cst_236 = arith.constant 0.000000e+00 : f32
    %501 = vector.broadcast %cst_236 : f32 to vector<8x32xf32>
    %502 = arith.maximumf %500, %501 : vector<8x32xf32>
    %c0_237 = arith.constant 0 : index
    %c0_238 = arith.constant 0 : index
    %503 = vector.load %arg14[%c0_237, %c0_238] : memref<32x8xf32, #tpu.memory_space<vmem>>, vector<32x8xf32>
    %cst_239 = arith.constant dense<0.000000e+00> : vector<8x8xf32>
    %504 = tpu.matmul %502, %503, %cst_239 {dimension_numbers = #tpu.dot_dimension_numbers<[1], [0], [0], [1], [0, 0, 1, 1], [], []>} : vector<8x32xf32>, vector<32x8xf32>, vector<8x8xf32> -> vector<8x8xf32>
    %c0_240 = arith.constant 0 : index
    %c0_241 = arith.constant 0 : index
    %505 = vector.load %arg15[%c0_240, %c0_241] : memref<1x8xf32, #tpu.memory_space<vmem>>, vector<1x8xf32>
    %506 = vector.broadcast %505 : vector<1x8xf32> to vector<8x8xf32>
    %507 = arith.addf %504, %506 : vector<8x8xf32>
    %508 = tpu.concatenate %507, %464 in 1 : vector<8x8xf32>, vector<8x32xf32> -> vector<8x40xf32>
    %c0_242 = arith.constant 0 : index
    %c0_243 = arith.constant 0 : index
    %509 = vector.load %arg6[%c0_242, %c0_243] : memref<40x128xf32, #tpu.memory_space<vmem>>, vector<40x128xf32>
    %cst_244 = arith.constant dense<0.000000e+00> : vector<8x128xf32>
    %510 = tpu.matmul %508, %509, %cst_244 {dimension_numbers = #tpu.dot_dimension_numbers<[1], [0], [0], [1], [0, 0, 1, 1], [], []>} : vector<8x40xf32>, vector<40x128xf32>, vector<8x128xf32> -> vector<8x128xf32>
    %c0_245 = arith.constant 0 : index
    %c0_246 = arith.constant 0 : index
    %511 = vector.load %arg7[%c0_245, %c0_246] : memref<1x128xf32, #tpu.memory_space<vmem>>, vector<1x128xf32>
    %512 = vector.broadcast %511 : vector<1x128xf32> to vector<8x128xf32>
    %513 = arith.addf %510, %512 : vector<8x128xf32>
    %514 = vector.extract_strided_slice %513 {offsets = [0, 0], sizes = [8, 64], strides = [1, 1]} : vector<8x128xf32> to vector<8x64xf32>
    %515 = arith.negf %514 : vector<8x64xf32>
    %516 = math.exp %515 : vector<8x64xf32>
    %cst_247 = arith.constant 1.000000e+00 : f32
    %517 = vector.broadcast %cst_247 : f32 to vector<8x64xf32>
    %518 = arith.addf %517, %516 : vector<8x64xf32>
    %519 = arith.divf %517, %518 : vector<8x64xf32>
    %520 = vector.extract_strided_slice %519 {offsets = [0, 0], sizes = [8, 32], strides = [1, 1]} : vector<8x64xf32> to vector<8x32xf32>
    %521 = vector.extract_strided_slice %519 {offsets = [0, 32], sizes = [8, 32], strides = [1, 1]} : vector<8x64xf32> to vector<8x32xf32>
    %522 = vector.extract_strided_slice %513 {offsets = [0, 64], sizes = [8, 32], strides = [1, 1]} : vector<8x128xf32> to vector<8x32xf32>
    %523 = vector.extract_strided_slice %513 {offsets = [0, 96], sizes = [8, 32], strides = [1, 1]} : vector<8x128xf32> to vector<8x32xf32>
    %524 = arith.mulf %520, %523 : vector<8x32xf32>
    %525 = arith.addf %522, %524 : vector<8x32xf32>
    %526 = math.tanh %525 : vector<8x32xf32>
    %cst_248 = arith.constant 1.000000e+00 : f32
    %527 = vector.broadcast %cst_248 : f32 to vector<8x32xf32>
    %528 = arith.subf %527, %521 : vector<8x32xf32>
    %529 = arith.mulf %528, %526 : vector<8x32xf32>
    %530 = arith.mulf %521, %464 : vector<8x32xf32>
    %531 = arith.addf %529, %530 : vector<8x32xf32>
    %532 = tpu.concatenate %531, %488 in 1 : vector<8x32xf32>, vector<8x32xf32> -> vector<8x64xf32>
    %c0_249 = arith.constant 0 : index
    %c0_250 = arith.constant 0 : index
    %533 = vector.load %arg8[%c0_249, %c0_250] : memref<64x128xf32, #tpu.memory_space<vmem>>, vector<64x128xf32>
    %cst_251 = arith.constant dense<0.000000e+00> : vector<8x128xf32>
    %534 = tpu.matmul %532, %533, %cst_251 {dimension_numbers = #tpu.dot_dimension_numbers<[1], [0], [0], [1], [0, 0, 1, 1], [], []>} : vector<8x64xf32>, vector<64x128xf32>, vector<8x128xf32> -> vector<8x128xf32>
    %c0_252 = arith.constant 0 : index
    %c0_253 = arith.constant 0 : index
    %535 = vector.load %arg9[%c0_252, %c0_253] : memref<1x128xf32, #tpu.memory_space<vmem>>, vector<1x128xf32>
    %536 = vector.broadcast %535 : vector<1x128xf32> to vector<8x128xf32>
    %537 = arith.addf %534, %536 : vector<8x128xf32>
    %538 = vector.extract_strided_slice %537 {offsets = [0, 0], sizes = [8, 64], strides = [1, 1]} : vector<8x128xf32> to vector<8x64xf32>
    %539 = arith.negf %538 : vector<8x64xf32>
    %540 = math.exp %539 : vector<8x64xf32>
    %cst_254 = arith.constant 1.000000e+00 : f32
    %541 = vector.broadcast %cst_254 : f32 to vector<8x64xf32>
    %542 = arith.addf %541, %540 : vector<8x64xf32>
    %543 = arith.divf %541, %542 : vector<8x64xf32>
    %544 = vector.extract_strided_slice %543 {offsets = [0, 0], sizes = [8, 32], strides = [1, 1]} : vector<8x64xf32> to vector<8x32xf32>
    %545 = vector.extract_strided_slice %543 {offsets = [0, 32], sizes = [8, 32], strides = [1, 1]} : vector<8x64xf32> to vector<8x32xf32>
    %546 = vector.extract_strided_slice %537 {offsets = [0, 64], sizes = [8, 32], strides = [1, 1]} : vector<8x128xf32> to vector<8x32xf32>
    %547 = vector.extract_strided_slice %537 {offsets = [0, 96], sizes = [8, 32], strides = [1, 1]} : vector<8x128xf32> to vector<8x32xf32>
    %548 = arith.mulf %544, %547 : vector<8x32xf32>
    %549 = arith.addf %546, %548 : vector<8x32xf32>
    %550 = math.tanh %549 : vector<8x32xf32>
    %cst_255 = arith.constant 1.000000e+00 : f32
    %551 = vector.broadcast %cst_255 : f32 to vector<8x32xf32>
    %552 = arith.subf %551, %545 : vector<8x32xf32>
    %553 = arith.mulf %552, %550 : vector<8x32xf32>
    %554 = arith.mulf %545, %488 : vector<8x32xf32>
    %555 = arith.addf %553, %554 : vector<8x32xf32>
    %c0_256 = arith.constant 0 : index
    %c0_257 = arith.constant 0 : index
    %556 = vector.load %arg10[%c0_256, %c0_257] : memref<32x32xf32, #tpu.memory_space<vmem>>, vector<32x32xf32>
    %cst_258 = arith.constant dense<0.000000e+00> : vector<8x32xf32>
    %557 = tpu.matmul %555, %556, %cst_258 {dimension_numbers = #tpu.dot_dimension_numbers<[1], [0], [0], [1], [0, 0, 1, 1], [], []>} : vector<8x32xf32>, vector<32x32xf32>, vector<8x32xf32> -> vector<8x32xf32>
    %c0_259 = arith.constant 0 : index
    %c0_260 = arith.constant 0 : index
    %558 = vector.load %arg11[%c0_259, %c0_260] : memref<1x32xf32, #tpu.memory_space<vmem>>, vector<1x32xf32>
    %559 = vector.broadcast %558 : vector<1x32xf32> to vector<8x32xf32>
    %560 = arith.addf %557, %559 : vector<8x32xf32>
    %cst_261 = arith.constant 0.000000e+00 : f32
    %561 = vector.broadcast %cst_261 : f32 to vector<8x32xf32>
    %562 = arith.maximumf %560, %561 : vector<8x32xf32>
    %c0_262 = arith.constant 0 : index
    %c0_263 = arith.constant 0 : index
    %563 = vector.load %arg12[%c0_262, %c0_263] : memref<32x32xf32, #tpu.memory_space<vmem>>, vector<32x32xf32>
    %cst_264 = arith.constant dense<0.000000e+00> : vector<8x32xf32>
    %564 = tpu.matmul %562, %563, %cst_264 {dimension_numbers = #tpu.dot_dimension_numbers<[1], [0], [0], [1], [0, 0, 1, 1], [], []>} : vector<8x32xf32>, vector<32x32xf32>, vector<8x32xf32> -> vector<8x32xf32>
    %c0_265 = arith.constant 0 : index
    %c0_266 = arith.constant 0 : index
    %565 = vector.load %arg13[%c0_265, %c0_266] : memref<1x32xf32, #tpu.memory_space<vmem>>, vector<1x32xf32>
    %566 = vector.broadcast %565 : vector<1x32xf32> to vector<8x32xf32>
    %567 = arith.addf %564, %566 : vector<8x32xf32>
    %cst_267 = arith.constant 0.000000e+00 : f32
    %568 = vector.broadcast %cst_267 : f32 to vector<8x32xf32>
    %569 = arith.maximumf %567, %568 : vector<8x32xf32>
    %c0_268 = arith.constant 0 : index
    %c0_269 = arith.constant 0 : index
    %570 = vector.load %arg14[%c0_268, %c0_269] : memref<32x8xf32, #tpu.memory_space<vmem>>, vector<32x8xf32>
    %cst_270 = arith.constant dense<0.000000e+00> : vector<8x8xf32>
    %571 = tpu.matmul %569, %570, %cst_270 {dimension_numbers = #tpu.dot_dimension_numbers<[1], [0], [0], [1], [0, 0, 1, 1], [], []>} : vector<8x32xf32>, vector<32x8xf32>, vector<8x8xf32> -> vector<8x8xf32>
    %c0_271 = arith.constant 0 : index
    %c0_272 = arith.constant 0 : index
    %572 = vector.load %arg15[%c0_271, %c0_272] : memref<1x8xf32, #tpu.memory_space<vmem>>, vector<1x8xf32>
    %573 = vector.broadcast %572 : vector<1x8xf32> to vector<8x8xf32>
    %574 = arith.addf %571, %573 : vector<8x8xf32>
    %575 = tpu.concatenate %574, %531 in 1 : vector<8x8xf32>, vector<8x32xf32> -> vector<8x40xf32>
    %c0_273 = arith.constant 0 : index
    %c0_274 = arith.constant 0 : index
    %576 = vector.load %arg6[%c0_273, %c0_274] : memref<40x128xf32, #tpu.memory_space<vmem>>, vector<40x128xf32>
    %cst_275 = arith.constant dense<0.000000e+00> : vector<8x128xf32>
    %577 = tpu.matmul %575, %576, %cst_275 {dimension_numbers = #tpu.dot_dimension_numbers<[1], [0], [0], [1], [0, 0, 1, 1], [], []>} : vector<8x40xf32>, vector<40x128xf32>, vector<8x128xf32> -> vector<8x128xf32>
    %c0_276 = arith.constant 0 : index
    %c0_277 = arith.constant 0 : index
    %578 = vector.load %arg7[%c0_276, %c0_277] : memref<1x128xf32, #tpu.memory_space<vmem>>, vector<1x128xf32>
    %579 = vector.broadcast %578 : vector<1x128xf32> to vector<8x128xf32>
    %580 = arith.addf %577, %579 : vector<8x128xf32>
    %581 = vector.extract_strided_slice %580 {offsets = [0, 0], sizes = [8, 64], strides = [1, 1]} : vector<8x128xf32> to vector<8x64xf32>
    %582 = arith.negf %581 : vector<8x64xf32>
    %583 = math.exp %582 : vector<8x64xf32>
    %cst_278 = arith.constant 1.000000e+00 : f32
    %584 = vector.broadcast %cst_278 : f32 to vector<8x64xf32>
    %585 = arith.addf %584, %583 : vector<8x64xf32>
    %586 = arith.divf %584, %585 : vector<8x64xf32>
    %587 = vector.extract_strided_slice %586 {offsets = [0, 0], sizes = [8, 32], strides = [1, 1]} : vector<8x64xf32> to vector<8x32xf32>
    %588 = vector.extract_strided_slice %586 {offsets = [0, 32], sizes = [8, 32], strides = [1, 1]} : vector<8x64xf32> to vector<8x32xf32>
    %589 = vector.extract_strided_slice %580 {offsets = [0, 64], sizes = [8, 32], strides = [1, 1]} : vector<8x128xf32> to vector<8x32xf32>
    %590 = vector.extract_strided_slice %580 {offsets = [0, 96], sizes = [8, 32], strides = [1, 1]} : vector<8x128xf32> to vector<8x32xf32>
    %591 = arith.mulf %587, %590 : vector<8x32xf32>
    %592 = arith.addf %589, %591 : vector<8x32xf32>
    %593 = math.tanh %592 : vector<8x32xf32>
    %cst_279 = arith.constant 1.000000e+00 : f32
    %594 = vector.broadcast %cst_279 : f32 to vector<8x32xf32>
    %595 = arith.subf %594, %588 : vector<8x32xf32>
    %596 = arith.mulf %595, %593 : vector<8x32xf32>
    %597 = arith.mulf %588, %531 : vector<8x32xf32>
    %598 = arith.addf %596, %597 : vector<8x32xf32>
    %599 = tpu.concatenate %598, %555 in 1 : vector<8x32xf32>, vector<8x32xf32> -> vector<8x64xf32>
    %c0_280 = arith.constant 0 : index
    %c0_281 = arith.constant 0 : index
    %600 = vector.load %arg8[%c0_280, %c0_281] : memref<64x128xf32, #tpu.memory_space<vmem>>, vector<64x128xf32>
    %cst_282 = arith.constant dense<0.000000e+00> : vector<8x128xf32>
    %601 = tpu.matmul %599, %600, %cst_282 {dimension_numbers = #tpu.dot_dimension_numbers<[1], [0], [0], [1], [0, 0, 1, 1], [], []>} : vector<8x64xf32>, vector<64x128xf32>, vector<8x128xf32> -> vector<8x128xf32>
    %c0_283 = arith.constant 0 : index
    %c0_284 = arith.constant 0 : index
    %602 = vector.load %arg9[%c0_283, %c0_284] : memref<1x128xf32, #tpu.memory_space<vmem>>, vector<1x128xf32>
    %603 = vector.broadcast %602 : vector<1x128xf32> to vector<8x128xf32>
    %604 = arith.addf %601, %603 : vector<8x128xf32>
    %605 = vector.extract_strided_slice %604 {offsets = [0, 0], sizes = [8, 64], strides = [1, 1]} : vector<8x128xf32> to vector<8x64xf32>
    %606 = arith.negf %605 : vector<8x64xf32>
    %607 = math.exp %606 : vector<8x64xf32>
    %cst_285 = arith.constant 1.000000e+00 : f32
    %608 = vector.broadcast %cst_285 : f32 to vector<8x64xf32>
    %609 = arith.addf %608, %607 : vector<8x64xf32>
    %610 = arith.divf %608, %609 : vector<8x64xf32>
    %611 = vector.extract_strided_slice %610 {offsets = [0, 0], sizes = [8, 32], strides = [1, 1]} : vector<8x64xf32> to vector<8x32xf32>
    %612 = vector.extract_strided_slice %610 {offsets = [0, 32], sizes = [8, 32], strides = [1, 1]} : vector<8x64xf32> to vector<8x32xf32>
    %613 = vector.extract_strided_slice %604 {offsets = [0, 64], sizes = [8, 32], strides = [1, 1]} : vector<8x128xf32> to vector<8x32xf32>
    %614 = vector.extract_strided_slice %604 {offsets = [0, 96], sizes = [8, 32], strides = [1, 1]} : vector<8x128xf32> to vector<8x32xf32>
    %615 = arith.mulf %611, %614 : vector<8x32xf32>
    %616 = arith.addf %613, %615 : vector<8x32xf32>
    %617 = math.tanh %616 : vector<8x32xf32>
    %cst_286 = arith.constant 1.000000e+00 : f32
    %618 = vector.broadcast %cst_286 : f32 to vector<8x32xf32>
    %619 = arith.subf %618, %612 : vector<8x32xf32>
    %620 = arith.mulf %619, %617 : vector<8x32xf32>
    %621 = arith.mulf %612, %555 : vector<8x32xf32>
    %622 = arith.addf %620, %621 : vector<8x32xf32>
    %c0_287 = arith.constant 0 : index
    %c0_288 = arith.constant 0 : index
    %623 = vector.load %arg10[%c0_287, %c0_288] : memref<32x32xf32, #tpu.memory_space<vmem>>, vector<32x32xf32>
    %cst_289 = arith.constant dense<0.000000e+00> : vector<8x32xf32>
    %624 = tpu.matmul %622, %623, %cst_289 {dimension_numbers = #tpu.dot_dimension_numbers<[1], [0], [0], [1], [0, 0, 1, 1], [], []>} : vector<8x32xf32>, vector<32x32xf32>, vector<8x32xf32> -> vector<8x32xf32>
    %c0_290 = arith.constant 0 : index
    %c0_291 = arith.constant 0 : index
    %625 = vector.load %arg11[%c0_290, %c0_291] : memref<1x32xf32, #tpu.memory_space<vmem>>, vector<1x32xf32>
    %626 = vector.broadcast %625 : vector<1x32xf32> to vector<8x32xf32>
    %627 = arith.addf %624, %626 : vector<8x32xf32>
    %cst_292 = arith.constant 0.000000e+00 : f32
    %628 = vector.broadcast %cst_292 : f32 to vector<8x32xf32>
    %629 = arith.maximumf %627, %628 : vector<8x32xf32>
    %c0_293 = arith.constant 0 : index
    %c0_294 = arith.constant 0 : index
    %630 = vector.load %arg12[%c0_293, %c0_294] : memref<32x32xf32, #tpu.memory_space<vmem>>, vector<32x32xf32>
    %cst_295 = arith.constant dense<0.000000e+00> : vector<8x32xf32>
    %631 = tpu.matmul %629, %630, %cst_295 {dimension_numbers = #tpu.dot_dimension_numbers<[1], [0], [0], [1], [0, 0, 1, 1], [], []>} : vector<8x32xf32>, vector<32x32xf32>, vector<8x32xf32> -> vector<8x32xf32>
    %c0_296 = arith.constant 0 : index
    %c0_297 = arith.constant 0 : index
    %632 = vector.load %arg13[%c0_296, %c0_297] : memref<1x32xf32, #tpu.memory_space<vmem>>, vector<1x32xf32>
    %633 = vector.broadcast %632 : vector<1x32xf32> to vector<8x32xf32>
    %634 = arith.addf %631, %633 : vector<8x32xf32>
    %cst_298 = arith.constant 0.000000e+00 : f32
    %635 = vector.broadcast %cst_298 : f32 to vector<8x32xf32>
    %636 = arith.maximumf %634, %635 : vector<8x32xf32>
    %c0_299 = arith.constant 0 : index
    %c0_300 = arith.constant 0 : index
    %637 = vector.load %arg14[%c0_299, %c0_300] : memref<32x8xf32, #tpu.memory_space<vmem>>, vector<32x8xf32>
    %cst_301 = arith.constant dense<0.000000e+00> : vector<8x8xf32>
    %638 = tpu.matmul %636, %637, %cst_301 {dimension_numbers = #tpu.dot_dimension_numbers<[1], [0], [0], [1], [0, 0, 1, 1], [], []>} : vector<8x32xf32>, vector<32x8xf32>, vector<8x8xf32> -> vector<8x8xf32>
    %c0_302 = arith.constant 0 : index
    %c0_303 = arith.constant 0 : index
    %639 = vector.load %arg15[%c0_302, %c0_303] : memref<1x8xf32, #tpu.memory_space<vmem>>, vector<1x8xf32>
    %640 = vector.broadcast %639 : vector<1x8xf32> to vector<8x8xf32>
    %641 = arith.addf %638, %640 : vector<8x8xf32>
    %642 = tpu.concatenate %507, %574, %641 in 1 : vector<8x8xf32>, vector<8x8xf32>, vector<8x8xf32> -> vector<8x24xf32>
    %643 = arith.index_cast %c2_i32 : i32 to index
    %c0_304 = arith.constant 0 : index
    %c0_305 = arith.constant 0 : index
    %644 = vector.load %arg16[%643, %c0_304, %c0_305] : memref<6x8x24xf32, #tpu.memory_space<vmem>>, vector<1x8x24xf32>
    %645 = vector.shape_cast %644 : vector<1x8x24xf32> to vector<8x24xf32>
    %646 = vector.shape_cast %642 : vector<8x24xf32> to vector<1x8x24xf32>
    tpu.vector_store %arg16[%643, %c0_304, %c0_305], %646 {strides = array<i32>} : memref<6x8x24xf32, #tpu.memory_space<vmem>>, vector<1x8x24xf32>,
    %c3_i32 = arith.constant 3 : i32
    %647 = arith.index_cast %c3_i32 : i32 to index
    %c0_306 = arith.constant 0 : index
    %c0_307 = arith.constant 0 : index
    %648 = vector.load %arg1[%647, %c0_306, %c0_307] : memref<6x8x8xf32, #tpu.memory_space<vmem>>, vector<1x8x8xf32>
    %649 = vector.shape_cast %648 : vector<1x8x8xf32> to vector<8x8xf32>
    %c0_308 = arith.constant 0 : index
    %c0_309 = arith.constant 0 : index
    %650 = vector.load %arg2[%c0_308, %c0_309] : memref<8x96xf32, #tpu.memory_space<vmem>>, vector<8x96xf32>
    %cst_310 = arith.constant dense<0.000000e+00> : vector<8x96xf32>
    %651 = tpu.matmul %649, %650, %cst_310 {dimension_numbers = #tpu.dot_dimension_numbers<[1], [0], [0], [1], [0, 0, 1, 1], [], []>} : vector<8x8xf32>, vector<8x96xf32>, vector<8x96xf32> -> vector<8x96xf32>
    %c0_311 = arith.constant 0 : index
    %c0_312 = arith.constant 0 : index
    %652 = vector.load %arg3[%c0_311, %c0_312] : memref<1x96xf32, #tpu.memory_space<vmem>>, vector<1x96xf32>
    %653 = vector.broadcast %652 : vector<1x96xf32> to vector<8x96xf32>
    %654 = arith.addf %651, %653 : vector<8x96xf32>
    %c0_313 = arith.constant 0 : index
    %c0_314 = arith.constant 0 : index
    %655 = vector.load %arg4[%c0_313, %c0_314] : memref<32x96xf32, #tpu.memory_space<vmem>>, vector<32x96xf32>
    %cst_315 = arith.constant dense<0.000000e+00> : vector<8x96xf32>
    %656 = tpu.matmul %464, %655, %cst_315 {dimension_numbers = #tpu.dot_dimension_numbers<[1], [0], [0], [1], [0, 0, 1, 1], [], []>} : vector<8x32xf32>, vector<32x96xf32>, vector<8x96xf32> -> vector<8x96xf32>
    %657 = vector.extract_strided_slice %654 {offsets = [0, 0], sizes = [8, 64], strides = [1, 1]} : vector<8x96xf32> to vector<8x64xf32>
    %658 = vector.extract_strided_slice %656 {offsets = [0, 0], sizes = [8, 64], strides = [1, 1]} : vector<8x96xf32> to vector<8x64xf32>
    %659 = arith.addf %657, %658 : vector<8x64xf32>
    %660 = arith.negf %659 : vector<8x64xf32>
    %661 = math.exp %660 : vector<8x64xf32>
    %cst_316 = arith.constant 1.000000e+00 : f32
    %662 = vector.broadcast %cst_316 : f32 to vector<8x64xf32>
    %663 = arith.addf %662, %661 : vector<8x64xf32>
    %664 = arith.divf %662, %663 : vector<8x64xf32>
    %665 = vector.extract_strided_slice %664 {offsets = [0, 0], sizes = [8, 32], strides = [1, 1]} : vector<8x64xf32> to vector<8x32xf32>
    %666 = vector.extract_strided_slice %664 {offsets = [0, 32], sizes = [8, 32], strides = [1, 1]} : vector<8x64xf32> to vector<8x32xf32>
    %667 = vector.extract_strided_slice %654 {offsets = [0, 64], sizes = [8, 32], strides = [1, 1]} : vector<8x96xf32> to vector<8x32xf32>
    %668 = vector.extract_strided_slice %656 {offsets = [0, 64], sizes = [8, 32], strides = [1, 1]} : vector<8x96xf32> to vector<8x32xf32>
    %c0_317 = arith.constant 0 : index
    %c0_318 = arith.constant 0 : index
    %669 = vector.load %arg5[%c0_317, %c0_318] : memref<1x32xf32, #tpu.memory_space<vmem>>, vector<1x32xf32>
    %670 = vector.broadcast %669 : vector<1x32xf32> to vector<8x32xf32>
    %671 = arith.addf %668, %670 : vector<8x32xf32>
    %672 = arith.mulf %665, %671 : vector<8x32xf32>
    %673 = arith.addf %667, %672 : vector<8x32xf32>
    %674 = math.tanh %673 : vector<8x32xf32>
    %cst_319 = arith.constant 1.000000e+00 : f32
    %675 = vector.broadcast %cst_319 : f32 to vector<8x32xf32>
    %676 = arith.subf %675, %666 : vector<8x32xf32>
    %677 = arith.mulf %676, %674 : vector<8x32xf32>
    %678 = arith.mulf %666, %464 : vector<8x32xf32>
    %679 = arith.addf %677, %678 : vector<8x32xf32>
    %680 = tpu.concatenate %679, %488 in 1 : vector<8x32xf32>, vector<8x32xf32> -> vector<8x64xf32>
    %c0_320 = arith.constant 0 : index
    %c0_321 = arith.constant 0 : index
    %681 = vector.load %arg8[%c0_320, %c0_321] : memref<64x128xf32, #tpu.memory_space<vmem>>, vector<64x128xf32>
    %cst_322 = arith.constant dense<0.000000e+00> : vector<8x128xf32>
    %682 = tpu.matmul %680, %681, %cst_322 {dimension_numbers = #tpu.dot_dimension_numbers<[1], [0], [0], [1], [0, 0, 1, 1], [], []>} : vector<8x64xf32>, vector<64x128xf32>, vector<8x128xf32> -> vector<8x128xf32>
    %c0_323 = arith.constant 0 : index
    %c0_324 = arith.constant 0 : index
    %683 = vector.load %arg9[%c0_323, %c0_324] : memref<1x128xf32, #tpu.memory_space<vmem>>, vector<1x128xf32>
    %684 = vector.broadcast %683 : vector<1x128xf32> to vector<8x128xf32>
    %685 = arith.addf %682, %684 : vector<8x128xf32>
    %686 = vector.extract_strided_slice %685 {offsets = [0, 0], sizes = [8, 64], strides = [1, 1]} : vector<8x128xf32> to vector<8x64xf32>
    %687 = arith.negf %686 : vector<8x64xf32>
    %688 = math.exp %687 : vector<8x64xf32>
    %cst_325 = arith.constant 1.000000e+00 : f32
    %689 = vector.broadcast %cst_325 : f32 to vector<8x64xf32>
    %690 = arith.addf %689, %688 : vector<8x64xf32>
    %691 = arith.divf %689, %690 : vector<8x64xf32>
    %692 = vector.extract_strided_slice %691 {offsets = [0, 0], sizes = [8, 32], strides = [1, 1]} : vector<8x64xf32> to vector<8x32xf32>
    %693 = vector.extract_strided_slice %691 {offsets = [0, 32], sizes = [8, 32], strides = [1, 1]} : vector<8x64xf32> to vector<8x32xf32>
    %694 = vector.extract_strided_slice %685 {offsets = [0, 64], sizes = [8, 32], strides = [1, 1]} : vector<8x128xf32> to vector<8x32xf32>
    %695 = vector.extract_strided_slice %685 {offsets = [0, 96], sizes = [8, 32], strides = [1, 1]} : vector<8x128xf32> to vector<8x32xf32>
    %696 = arith.mulf %692, %695 : vector<8x32xf32>
    %697 = arith.addf %694, %696 : vector<8x32xf32>
    %698 = math.tanh %697 : vector<8x32xf32>
    %cst_326 = arith.constant 1.000000e+00 : f32
    %699 = vector.broadcast %cst_326 : f32 to vector<8x32xf32>
    %700 = arith.subf %699, %693 : vector<8x32xf32>
    %701 = arith.mulf %700, %698 : vector<8x32xf32>
    %702 = arith.mulf %693, %488 : vector<8x32xf32>
    %703 = arith.addf %701, %702 : vector<8x32xf32>
    %c0_327 = arith.constant 0 : index
    %c0_328 = arith.constant 0 : index
    %704 = vector.load %arg10[%c0_327, %c0_328] : memref<32x32xf32, #tpu.memory_space<vmem>>, vector<32x32xf32>
    %cst_329 = arith.constant dense<0.000000e+00> : vector<8x32xf32>
    %705 = tpu.matmul %703, %704, %cst_329 {dimension_numbers = #tpu.dot_dimension_numbers<[1], [0], [0], [1], [0, 0, 1, 1], [], []>} : vector<8x32xf32>, vector<32x32xf32>, vector<8x32xf32> -> vector<8x32xf32>
    %c0_330 = arith.constant 0 : index
    %c0_331 = arith.constant 0 : index
    %706 = vector.load %arg11[%c0_330, %c0_331] : memref<1x32xf32, #tpu.memory_space<vmem>>, vector<1x32xf32>
    %707 = vector.broadcast %706 : vector<1x32xf32> to vector<8x32xf32>
    %708 = arith.addf %705, %707 : vector<8x32xf32>
    %cst_332 = arith.constant 0.000000e+00 : f32
    %709 = vector.broadcast %cst_332 : f32 to vector<8x32xf32>
    %710 = arith.maximumf %708, %709 : vector<8x32xf32>
    %c0_333 = arith.constant 0 : index
    %c0_334 = arith.constant 0 : index
    %711 = vector.load %arg12[%c0_333, %c0_334] : memref<32x32xf32, #tpu.memory_space<vmem>>, vector<32x32xf32>
    %cst_335 = arith.constant dense<0.000000e+00> : vector<8x32xf32>
    %712 = tpu.matmul %710, %711, %cst_335 {dimension_numbers = #tpu.dot_dimension_numbers<[1], [0], [0], [1], [0, 0, 1, 1], [], []>} : vector<8x32xf32>, vector<32x32xf32>, vector<8x32xf32> -> vector<8x32xf32>
    %c0_336 = arith.constant 0 : index
    %c0_337 = arith.constant 0 : index
    %713 = vector.load %arg13[%c0_336, %c0_337] : memref<1x32xf32, #tpu.memory_space<vmem>>, vector<1x32xf32>
    %714 = vector.broadcast %713 : vector<1x32xf32> to vector<8x32xf32>
    %715 = arith.addf %712, %714 : vector<8x32xf32>
    %cst_338 = arith.constant 0.000000e+00 : f32
    %716 = vector.broadcast %cst_338 : f32 to vector<8x32xf32>
    %717 = arith.maximumf %715, %716 : vector<8x32xf32>
    %c0_339 = arith.constant 0 : index
    %c0_340 = arith.constant 0 : index
    %718 = vector.load %arg14[%c0_339, %c0_340] : memref<32x8xf32, #tpu.memory_space<vmem>>, vector<32x8xf32>
    %cst_341 = arith.constant dense<0.000000e+00> : vector<8x8xf32>
    %719 = tpu.matmul %717, %718, %cst_341 {dimension_numbers = #tpu.dot_dimension_numbers<[1], [0], [0], [1], [0, 0, 1, 1], [], []>} : vector<8x32xf32>, vector<32x8xf32>, vector<8x8xf32> -> vector<8x8xf32>
    %c0_342 = arith.constant 0 : index
    %c0_343 = arith.constant 0 : index
    %720 = vector.load %arg15[%c0_342, %c0_343] : memref<1x8xf32, #tpu.memory_space<vmem>>, vector<1x8xf32>
    %721 = vector.broadcast %720 : vector<1x8xf32> to vector<8x8xf32>
    %722 = arith.addf %719, %721 : vector<8x8xf32>
    %723 = tpu.concatenate %722, %679 in 1 : vector<8x8xf32>, vector<8x32xf32> -> vector<8x40xf32>
    %c0_344 = arith.constant 0 : index
    %c0_345 = arith.constant 0 : index
    %724 = vector.load %arg6[%c0_344, %c0_345] : memref<40x128xf32, #tpu.memory_space<vmem>>, vector<40x128xf32>
    %cst_346 = arith.constant dense<0.000000e+00> : vector<8x128xf32>
    %725 = tpu.matmul %723, %724, %cst_346 {dimension_numbers = #tpu.dot_dimension_numbers<[1], [0], [0], [1], [0, 0, 1, 1], [], []>} : vector<8x40xf32>, vector<40x128xf32>, vector<8x128xf32> -> vector<8x128xf32>
    %c0_347 = arith.constant 0 : index
    %c0_348 = arith.constant 0 : index
    %726 = vector.load %arg7[%c0_347, %c0_348] : memref<1x128xf32, #tpu.memory_space<vmem>>, vector<1x128xf32>
    %727 = vector.broadcast %726 : vector<1x128xf32> to vector<8x128xf32>
    %728 = arith.addf %725, %727 : vector<8x128xf32>
    %729 = vector.extract_strided_slice %728 {offsets = [0, 0], sizes = [8, 64], strides = [1, 1]} : vector<8x128xf32> to vector<8x64xf32>
    %730 = arith.negf %729 : vector<8x64xf32>
    %731 = math.exp %730 : vector<8x64xf32>
    %cst_349 = arith.constant 1.000000e+00 : f32
    %732 = vector.broadcast %cst_349 : f32 to vector<8x64xf32>
    %733 = arith.addf %732, %731 : vector<8x64xf32>
    %734 = arith.divf %732, %733 : vector<8x64xf32>
    %735 = vector.extract_strided_slice %734 {offsets = [0, 0], sizes = [8, 32], strides = [1, 1]} : vector<8x64xf32> to vector<8x32xf32>
    %736 = vector.extract_strided_slice %734 {offsets = [0, 32], sizes = [8, 32], strides = [1, 1]} : vector<8x64xf32> to vector<8x32xf32>
    %737 = vector.extract_strided_slice %728 {offsets = [0, 64], sizes = [8, 32], strides = [1, 1]} : vector<8x128xf32> to vector<8x32xf32>
    %738 = vector.extract_strided_slice %728 {offsets = [0, 96], sizes = [8, 32], strides = [1, 1]} : vector<8x128xf32> to vector<8x32xf32>
    %739 = arith.mulf %735, %738 : vector<8x32xf32>
    %740 = arith.addf %737, %739 : vector<8x32xf32>
    %741 = math.tanh %740 : vector<8x32xf32>
    %cst_350 = arith.constant 1.000000e+00 : f32
    %742 = vector.broadcast %cst_350 : f32 to vector<8x32xf32>
    %743 = arith.subf %742, %736 : vector<8x32xf32>
    %744 = arith.mulf %743, %741 : vector<8x32xf32>
    %745 = arith.mulf %736, %679 : vector<8x32xf32>
    %746 = arith.addf %744, %745 : vector<8x32xf32>
    %747 = tpu.concatenate %746, %703 in 1 : vector<8x32xf32>, vector<8x32xf32> -> vector<8x64xf32>
    %c0_351 = arith.constant 0 : index
    %c0_352 = arith.constant 0 : index
    %748 = vector.load %arg8[%c0_351, %c0_352] : memref<64x128xf32, #tpu.memory_space<vmem>>, vector<64x128xf32>
    %cst_353 = arith.constant dense<0.000000e+00> : vector<8x128xf32>
    %749 = tpu.matmul %747, %748, %cst_353 {dimension_numbers = #tpu.dot_dimension_numbers<[1], [0], [0], [1], [0, 0, 1, 1], [], []>} : vector<8x64xf32>, vector<64x128xf32>, vector<8x128xf32> -> vector<8x128xf32>
    %c0_354 = arith.constant 0 : index
    %c0_355 = arith.constant 0 : index
    %750 = vector.load %arg9[%c0_354, %c0_355] : memref<1x128xf32, #tpu.memory_space<vmem>>, vector<1x128xf32>
    %751 = vector.broadcast %750 : vector<1x128xf32> to vector<8x128xf32>
    %752 = arith.addf %749, %751 : vector<8x128xf32>
    %753 = vector.extract_strided_slice %752 {offsets = [0, 0], sizes = [8, 64], strides = [1, 1]} : vector<8x128xf32> to vector<8x64xf32>
    %754 = arith.negf %753 : vector<8x64xf32>
    %755 = math.exp %754 : vector<8x64xf32>
    %cst_356 = arith.constant 1.000000e+00 : f32
    %756 = vector.broadcast %cst_356 : f32 to vector<8x64xf32>
    %757 = arith.addf %756, %755 : vector<8x64xf32>
    %758 = arith.divf %756, %757 : vector<8x64xf32>
    %759 = vector.extract_strided_slice %758 {offsets = [0, 0], sizes = [8, 32], strides = [1, 1]} : vector<8x64xf32> to vector<8x32xf32>
    %760 = vector.extract_strided_slice %758 {offsets = [0, 32], sizes = [8, 32], strides = [1, 1]} : vector<8x64xf32> to vector<8x32xf32>
    %761 = vector.extract_strided_slice %752 {offsets = [0, 64], sizes = [8, 32], strides = [1, 1]} : vector<8x128xf32> to vector<8x32xf32>
    %762 = vector.extract_strided_slice %752 {offsets = [0, 96], sizes = [8, 32], strides = [1, 1]} : vector<8x128xf32> to vector<8x32xf32>
    %763 = arith.mulf %759, %762 : vector<8x32xf32>
    %764 = arith.addf %761, %763 : vector<8x32xf32>
    %765 = math.tanh %764 : vector<8x32xf32>
    %cst_357 = arith.constant 1.000000e+00 : f32
    %766 = vector.broadcast %cst_357 : f32 to vector<8x32xf32>
    %767 = arith.subf %766, %760 : vector<8x32xf32>
    %768 = arith.mulf %767, %765 : vector<8x32xf32>
    %769 = arith.mulf %760, %703 : vector<8x32xf32>
    %770 = arith.addf %768, %769 : vector<8x32xf32>
    %c0_358 = arith.constant 0 : index
    %c0_359 = arith.constant 0 : index
    %771 = vector.load %arg10[%c0_358, %c0_359] : memref<32x32xf32, #tpu.memory_space<vmem>>, vector<32x32xf32>
    %cst_360 = arith.constant dense<0.000000e+00> : vector<8x32xf32>
    %772 = tpu.matmul %770, %771, %cst_360 {dimension_numbers = #tpu.dot_dimension_numbers<[1], [0], [0], [1], [0, 0, 1, 1], [], []>} : vector<8x32xf32>, vector<32x32xf32>, vector<8x32xf32> -> vector<8x32xf32>
    %c0_361 = arith.constant 0 : index
    %c0_362 = arith.constant 0 : index
    %773 = vector.load %arg11[%c0_361, %c0_362] : memref<1x32xf32, #tpu.memory_space<vmem>>, vector<1x32xf32>
    %774 = vector.broadcast %773 : vector<1x32xf32> to vector<8x32xf32>
    %775 = arith.addf %772, %774 : vector<8x32xf32>
    %cst_363 = arith.constant 0.000000e+00 : f32
    %776 = vector.broadcast %cst_363 : f32 to vector<8x32xf32>
    %777 = arith.maximumf %775, %776 : vector<8x32xf32>
    %c0_364 = arith.constant 0 : index
    %c0_365 = arith.constant 0 : index
    %778 = vector.load %arg12[%c0_364, %c0_365] : memref<32x32xf32, #tpu.memory_space<vmem>>, vector<32x32xf32>
    %cst_366 = arith.constant dense<0.000000e+00> : vector<8x32xf32>
    %779 = tpu.matmul %777, %778, %cst_366 {dimension_numbers = #tpu.dot_dimension_numbers<[1], [0], [0], [1], [0, 0, 1, 1], [], []>} : vector<8x32xf32>, vector<32x32xf32>, vector<8x32xf32> -> vector<8x32xf32>
    %c0_367 = arith.constant 0 : index
    %c0_368 = arith.constant 0 : index
    %780 = vector.load %arg13[%c0_367, %c0_368] : memref<1x32xf32, #tpu.memory_space<vmem>>, vector<1x32xf32>
    %781 = vector.broadcast %780 : vector<1x32xf32> to vector<8x32xf32>
    %782 = arith.addf %779, %781 : vector<8x32xf32>
    %cst_369 = arith.constant 0.000000e+00 : f32
    %783 = vector.broadcast %cst_369 : f32 to vector<8x32xf32>
    %784 = arith.maximumf %782, %783 : vector<8x32xf32>
    %c0_370 = arith.constant 0 : index
    %c0_371 = arith.constant 0 : index
    %785 = vector.load %arg14[%c0_370, %c0_371] : memref<32x8xf32, #tpu.memory_space<vmem>>, vector<32x8xf32>
    %cst_372 = arith.constant dense<0.000000e+00> : vector<8x8xf32>
    %786 = tpu.matmul %784, %785, %cst_372 {dimension_numbers = #tpu.dot_dimension_numbers<[1], [0], [0], [1], [0, 0, 1, 1], [], []>} : vector<8x32xf32>, vector<32x8xf32>, vector<8x8xf32> -> vector<8x8xf32>
    %c0_373 = arith.constant 0 : index
    %c0_374 = arith.constant 0 : index
    %787 = vector.load %arg15[%c0_373, %c0_374] : memref<1x8xf32, #tpu.memory_space<vmem>>, vector<1x8xf32>
    %788 = vector.broadcast %787 : vector<1x8xf32> to vector<8x8xf32>
    %789 = arith.addf %786, %788 : vector<8x8xf32>
    %790 = tpu.concatenate %789, %746 in 1 : vector<8x8xf32>, vector<8x32xf32> -> vector<8x40xf32>
    %c0_375 = arith.constant 0 : index
    %c0_376 = arith.constant 0 : index
    %791 = vector.load %arg6[%c0_375, %c0_376] : memref<40x128xf32, #tpu.memory_space<vmem>>, vector<40x128xf32>
    %cst_377 = arith.constant dense<0.000000e+00> : vector<8x128xf32>
    %792 = tpu.matmul %790, %791, %cst_377 {dimension_numbers = #tpu.dot_dimension_numbers<[1], [0], [0], [1], [0, 0, 1, 1], [], []>} : vector<8x40xf32>, vector<40x128xf32>, vector<8x128xf32> -> vector<8x128xf32>
    %c0_378 = arith.constant 0 : index
    %c0_379 = arith.constant 0 : index
    %793 = vector.load %arg7[%c0_378, %c0_379] : memref<1x128xf32, #tpu.memory_space<vmem>>, vector<1x128xf32>
    %794 = vector.broadcast %793 : vector<1x128xf32> to vector<8x128xf32>
    %795 = arith.addf %792, %794 : vector<8x128xf32>
    %796 = vector.extract_strided_slice %795 {offsets = [0, 0], sizes = [8, 64], strides = [1, 1]} : vector<8x128xf32> to vector<8x64xf32>
    %797 = arith.negf %796 : vector<8x64xf32>
    %798 = math.exp %797 : vector<8x64xf32>
    %cst_380 = arith.constant 1.000000e+00 : f32
    %799 = vector.broadcast %cst_380 : f32 to vector<8x64xf32>
    %800 = arith.addf %799, %798 : vector<8x64xf32>
    %801 = arith.divf %799, %800 : vector<8x64xf32>
    %802 = vector.extract_strided_slice %801 {offsets = [0, 0], sizes = [8, 32], strides = [1, 1]} : vector<8x64xf32> to vector<8x32xf32>
    %803 = vector.extract_strided_slice %801 {offsets = [0, 32], sizes = [8, 32], strides = [1, 1]} : vector<8x64xf32> to vector<8x32xf32>
    %804 = vector.extract_strided_slice %795 {offsets = [0, 64], sizes = [8, 32], strides = [1, 1]} : vector<8x128xf32> to vector<8x32xf32>
    %805 = vector.extract_strided_slice %795 {offsets = [0, 96], sizes = [8, 32], strides = [1, 1]} : vector<8x128xf32> to vector<8x32xf32>
    %806 = arith.mulf %802, %805 : vector<8x32xf32>
    %807 = arith.addf %804, %806 : vector<8x32xf32>
    %808 = math.tanh %807 : vector<8x32xf32>
    %cst_381 = arith.constant 1.000000e+00 : f32
    %809 = vector.broadcast %cst_381 : f32 to vector<8x32xf32>
    %810 = arith.subf %809, %803 : vector<8x32xf32>
    %811 = arith.mulf %810, %808 : vector<8x32xf32>
    %812 = arith.mulf %803, %746 : vector<8x32xf32>
    %813 = arith.addf %811, %812 : vector<8x32xf32>
    %814 = tpu.concatenate %813, %770 in 1 : vector<8x32xf32>, vector<8x32xf32> -> vector<8x64xf32>
    %c0_382 = arith.constant 0 : index
    %c0_383 = arith.constant 0 : index
    %815 = vector.load %arg8[%c0_382, %c0_383] : memref<64x128xf32, #tpu.memory_space<vmem>>, vector<64x128xf32>
    %cst_384 = arith.constant dense<0.000000e+00> : vector<8x128xf32>
    %816 = tpu.matmul %814, %815, %cst_384 {dimension_numbers = #tpu.dot_dimension_numbers<[1], [0], [0], [1], [0, 0, 1, 1], [], []>} : vector<8x64xf32>, vector<64x128xf32>, vector<8x128xf32> -> vector<8x128xf32>
    %c0_385 = arith.constant 0 : index
    %c0_386 = arith.constant 0 : index
    %817 = vector.load %arg9[%c0_385, %c0_386] : memref<1x128xf32, #tpu.memory_space<vmem>>, vector<1x128xf32>
    %818 = vector.broadcast %817 : vector<1x128xf32> to vector<8x128xf32>
    %819 = arith.addf %816, %818 : vector<8x128xf32>
    %820 = vector.extract_strided_slice %819 {offsets = [0, 0], sizes = [8, 64], strides = [1, 1]} : vector<8x128xf32> to vector<8x64xf32>
    %821 = arith.negf %820 : vector<8x64xf32>
    %822 = math.exp %821 : vector<8x64xf32>
    %cst_387 = arith.constant 1.000000e+00 : f32
    %823 = vector.broadcast %cst_387 : f32 to vector<8x64xf32>
    %824 = arith.addf %823, %822 : vector<8x64xf32>
    %825 = arith.divf %823, %824 : vector<8x64xf32>
    %826 = vector.extract_strided_slice %825 {offsets = [0, 0], sizes = [8, 32], strides = [1, 1]} : vector<8x64xf32> to vector<8x32xf32>
    %827 = vector.extract_strided_slice %825 {offsets = [0, 32], sizes = [8, 32], strides = [1, 1]} : vector<8x64xf32> to vector<8x32xf32>
    %828 = vector.extract_strided_slice %819 {offsets = [0, 64], sizes = [8, 32], strides = [1, 1]} : vector<8x128xf32> to vector<8x32xf32>
    %829 = vector.extract_strided_slice %819 {offsets = [0, 96], sizes = [8, 32], strides = [1, 1]} : vector<8x128xf32> to vector<8x32xf32>
    %830 = arith.mulf %826, %829 : vector<8x32xf32>
    %831 = arith.addf %828, %830 : vector<8x32xf32>
    %832 = math.tanh %831 : vector<8x32xf32>
    %cst_388 = arith.constant 1.000000e+00 : f32
    %833 = vector.broadcast %cst_388 : f32 to vector<8x32xf32>
    %834 = arith.subf %833, %827 : vector<8x32xf32>
    %835 = arith.mulf %834, %832 : vector<8x32xf32>
    %836 = arith.mulf %827, %770 : vector<8x32xf32>
    %837 = arith.addf %835, %836 : vector<8x32xf32>
    %c0_389 = arith.constant 0 : index
    %c0_390 = arith.constant 0 : index
    %838 = vector.load %arg10[%c0_389, %c0_390] : memref<32x32xf32, #tpu.memory_space<vmem>>, vector<32x32xf32>
    %cst_391 = arith.constant dense<0.000000e+00> : vector<8x32xf32>
    %839 = tpu.matmul %837, %838, %cst_391 {dimension_numbers = #tpu.dot_dimension_numbers<[1], [0], [0], [1], [0, 0, 1, 1], [], []>} : vector<8x32xf32>, vector<32x32xf32>, vector<8x32xf32> -> vector<8x32xf32>
    %c0_392 = arith.constant 0 : index
    %c0_393 = arith.constant 0 : index
    %840 = vector.load %arg11[%c0_392, %c0_393] : memref<1x32xf32, #tpu.memory_space<vmem>>, vector<1x32xf32>
    %841 = vector.broadcast %840 : vector<1x32xf32> to vector<8x32xf32>
    %842 = arith.addf %839, %841 : vector<8x32xf32>
    %cst_394 = arith.constant 0.000000e+00 : f32
    %843 = vector.broadcast %cst_394 : f32 to vector<8x32xf32>
    %844 = arith.maximumf %842, %843 : vector<8x32xf32>
    %c0_395 = arith.constant 0 : index
    %c0_396 = arith.constant 0 : index
    %845 = vector.load %arg12[%c0_395, %c0_396] : memref<32x32xf32, #tpu.memory_space<vmem>>, vector<32x32xf32>
    %cst_397 = arith.constant dense<0.000000e+00> : vector<8x32xf32>
    %846 = tpu.matmul %844, %845, %cst_397 {dimension_numbers = #tpu.dot_dimension_numbers<[1], [0], [0], [1], [0, 0, 1, 1], [], []>} : vector<8x32xf32>, vector<32x32xf32>, vector<8x32xf32> -> vector<8x32xf32>
    %c0_398 = arith.constant 0 : index
    %c0_399 = arith.constant 0 : index
    %847 = vector.load %arg13[%c0_398, %c0_399] : memref<1x32xf32, #tpu.memory_space<vmem>>, vector<1x32xf32>
    %848 = vector.broadcast %847 : vector<1x32xf32> to vector<8x32xf32>
    %849 = arith.addf %846, %848 : vector<8x32xf32>
    %cst_400 = arith.constant 0.000000e+00 : f32
    %850 = vector.broadcast %cst_400 : f32 to vector<8x32xf32>
    %851 = arith.maximumf %849, %850 : vector<8x32xf32>
    %c0_401 = arith.constant 0 : index
    %c0_402 = arith.constant 0 : index
    %852 = vector.load %arg14[%c0_401, %c0_402] : memref<32x8xf32, #tpu.memory_space<vmem>>, vector<32x8xf32>
    %cst_403 = arith.constant dense<0.000000e+00> : vector<8x8xf32>
    %853 = tpu.matmul %851, %852, %cst_403 {dimension_numbers = #tpu.dot_dimension_numbers<[1], [0], [0], [1], [0, 0, 1, 1], [], []>} : vector<8x32xf32>, vector<32x8xf32>, vector<8x8xf32> -> vector<8x8xf32>
    %c0_404 = arith.constant 0 : index
    %c0_405 = arith.constant 0 : index
    %854 = vector.load %arg15[%c0_404, %c0_405] : memref<1x8xf32, #tpu.memory_space<vmem>>, vector<1x8xf32>
    %855 = vector.broadcast %854 : vector<1x8xf32> to vector<8x8xf32>
    %856 = arith.addf %853, %855 : vector<8x8xf32>
    %857 = tpu.concatenate %722, %789, %856 in 1 : vector<8x8xf32>, vector<8x8xf32>, vector<8x8xf32> -> vector<8x24xf32>
    %858 = arith.index_cast %c3_i32 : i32 to index
    %c0_406 = arith.constant 0 : index
    %c0_407 = arith.constant 0 : index
    %859 = vector.load %arg16[%858, %c0_406, %c0_407] : memref<6x8x24xf32, #tpu.memory_space<vmem>>, vector<1x8x24xf32>
    %860 = vector.shape_cast %859 : vector<1x8x24xf32> to vector<8x24xf32>
    %861 = vector.shape_cast %857 : vector<8x24xf32> to vector<1x8x24xf32>
    tpu.vector_store %arg16[%858, %c0_406, %c0_407], %861 {strides = array<i32>} : memref<6x8x24xf32, #tpu.memory_space<vmem>>, vector<1x8x24xf32>,
    %c4_i32 = arith.constant 4 : i32
    %862 = arith.index_cast %c4_i32 : i32 to index
    %c0_408 = arith.constant 0 : index
    %c0_409 = arith.constant 0 : index
    %863 = vector.load %arg1[%862, %c0_408, %c0_409] : memref<6x8x8xf32, #tpu.memory_space<vmem>>, vector<1x8x8xf32>
    %864 = vector.shape_cast %863 : vector<1x8x8xf32> to vector<8x8xf32>
    %c0_410 = arith.constant 0 : index
    %c0_411 = arith.constant 0 : index
    %865 = vector.load %arg2[%c0_410, %c0_411] : memref<8x96xf32, #tpu.memory_space<vmem>>, vector<8x96xf32>
    %cst_412 = arith.constant dense<0.000000e+00> : vector<8x96xf32>
    %866 = tpu.matmul %864, %865, %cst_412 {dimension_numbers = #tpu.dot_dimension_numbers<[1], [0], [0], [1], [0, 0, 1, 1], [], []>} : vector<8x8xf32>, vector<8x96xf32>, vector<8x96xf32> -> vector<8x96xf32>
    %c0_413 = arith.constant 0 : index
    %c0_414 = arith.constant 0 : index
    %867 = vector.load %arg3[%c0_413, %c0_414] : memref<1x96xf32, #tpu.memory_space<vmem>>, vector<1x96xf32>
    %868 = vector.broadcast %867 : vector<1x96xf32> to vector<8x96xf32>
    %869 = arith.addf %866, %868 : vector<8x96xf32>
    %c0_415 = arith.constant 0 : index
    %c0_416 = arith.constant 0 : index
    %870 = vector.load %arg4[%c0_415, %c0_416] : memref<32x96xf32, #tpu.memory_space<vmem>>, vector<32x96xf32>
    %cst_417 = arith.constant dense<0.000000e+00> : vector<8x96xf32>
    %871 = tpu.matmul %679, %870, %cst_417 {dimension_numbers = #tpu.dot_dimension_numbers<[1], [0], [0], [1], [0, 0, 1, 1], [], []>} : vector<8x32xf32>, vector<32x96xf32>, vector<8x96xf32> -> vector<8x96xf32>
    %872 = vector.extract_strided_slice %869 {offsets = [0, 0], sizes = [8, 64], strides = [1, 1]} : vector<8x96xf32> to vector<8x64xf32>
    %873 = vector.extract_strided_slice %871 {offsets = [0, 0], sizes = [8, 64], strides = [1, 1]} : vector<8x96xf32> to vector<8x64xf32>
    %874 = arith.addf %872, %873 : vector<8x64xf32>
    %875 = arith.negf %874 : vector<8x64xf32>
    %876 = math.exp %875 : vector<8x64xf32>
    %cst_418 = arith.constant 1.000000e+00 : f32
    %877 = vector.broadcast %cst_418 : f32 to vector<8x64xf32>
    %878 = arith.addf %877, %876 : vector<8x64xf32>
    %879 = arith.divf %877, %878 : vector<8x64xf32>
    %880 = vector.extract_strided_slice %879 {offsets = [0, 0], sizes = [8, 32], strides = [1, 1]} : vector<8x64xf32> to vector<8x32xf32>
    %881 = vector.extract_strided_slice %879 {offsets = [0, 32], sizes = [8, 32], strides = [1, 1]} : vector<8x64xf32> to vector<8x32xf32>
    %882 = vector.extract_strided_slice %869 {offsets = [0, 64], sizes = [8, 32], strides = [1, 1]} : vector<8x96xf32> to vector<8x32xf32>
    %883 = vector.extract_strided_slice %871 {offsets = [0, 64], sizes = [8, 32], strides = [1, 1]} : vector<8x96xf32> to vector<8x32xf32>
    %c0_419 = arith.constant 0 : index
    %c0_420 = arith.constant 0 : index
    %884 = vector.load %arg5[%c0_419, %c0_420] : memref<1x32xf32, #tpu.memory_space<vmem>>, vector<1x32xf32>
    %885 = vector.broadcast %884 : vector<1x32xf32> to vector<8x32xf32>
    %886 = arith.addf %883, %885 : vector<8x32xf32>
    %887 = arith.mulf %880, %886 : vector<8x32xf32>
    %888 = arith.addf %882, %887 : vector<8x32xf32>
    %889 = math.tanh %888 : vector<8x32xf32>
    %cst_421 = arith.constant 1.000000e+00 : f32
    %890 = vector.broadcast %cst_421 : f32 to vector<8x32xf32>
    %891 = arith.subf %890, %881 : vector<8x32xf32>
    %892 = arith.mulf %891, %889 : vector<8x32xf32>
    %893 = arith.mulf %881, %679 : vector<8x32xf32>
    %894 = arith.addf %892, %893 : vector<8x32xf32>
    %895 = tpu.concatenate %894, %703 in 1 : vector<8x32xf32>, vector<8x32xf32> -> vector<8x64xf32>
    %c0_422 = arith.constant 0 : index
    %c0_423 = arith.constant 0 : index
    %896 = vector.load %arg8[%c0_422, %c0_423] : memref<64x128xf32, #tpu.memory_space<vmem>>, vector<64x128xf32>
    %cst_424 = arith.constant dense<0.000000e+00> : vector<8x128xf32>
    %897 = tpu.matmul %895, %896, %cst_424 {dimension_numbers = #tpu.dot_dimension_numbers<[1], [0], [0], [1], [0, 0, 1, 1], [], []>} : vector<8x64xf32>, vector<64x128xf32>, vector<8x128xf32> -> vector<8x128xf32>
    %c0_425 = arith.constant 0 : index
    %c0_426 = arith.constant 0 : index
    %898 = vector.load %arg9[%c0_425, %c0_426] : memref<1x128xf32, #tpu.memory_space<vmem>>, vector<1x128xf32>
    %899 = vector.broadcast %898 : vector<1x128xf32> to vector<8x128xf32>
    %900 = arith.addf %897, %899 : vector<8x128xf32>
    %901 = vector.extract_strided_slice %900 {offsets = [0, 0], sizes = [8, 64], strides = [1, 1]} : vector<8x128xf32> to vector<8x64xf32>
    %902 = arith.negf %901 : vector<8x64xf32>
    %903 = math.exp %902 : vector<8x64xf32>
    %cst_427 = arith.constant 1.000000e+00 : f32
    %904 = vector.broadcast %cst_427 : f32 to vector<8x64xf32>
    %905 = arith.addf %904, %903 : vector<8x64xf32>
    %906 = arith.divf %904, %905 : vector<8x64xf32>
    %907 = vector.extract_strided_slice %906 {offsets = [0, 0], sizes = [8, 32], strides = [1, 1]} : vector<8x64xf32> to vector<8x32xf32>
    %908 = vector.extract_strided_slice %906 {offsets = [0, 32], sizes = [8, 32], strides = [1, 1]} : vector<8x64xf32> to vector<8x32xf32>
    %909 = vector.extract_strided_slice %900 {offsets = [0, 64], sizes = [8, 32], strides = [1, 1]} : vector<8x128xf32> to vector<8x32xf32>
    %910 = vector.extract_strided_slice %900 {offsets = [0, 96], sizes = [8, 32], strides = [1, 1]} : vector<8x128xf32> to vector<8x32xf32>
    %911 = arith.mulf %907, %910 : vector<8x32xf32>
    %912 = arith.addf %909, %911 : vector<8x32xf32>
    %913 = math.tanh %912 : vector<8x32xf32>
    %cst_428 = arith.constant 1.000000e+00 : f32
    %914 = vector.broadcast %cst_428 : f32 to vector<8x32xf32>
    %915 = arith.subf %914, %908 : vector<8x32xf32>
    %916 = arith.mulf %915, %913 : vector<8x32xf32>
    %917 = arith.mulf %908, %703 : vector<8x32xf32>
    %918 = arith.addf %916, %917 : vector<8x32xf32>
    %c0_429 = arith.constant 0 : index
    %c0_430 = arith.constant 0 : index
    %919 = vector.load %arg10[%c0_429, %c0_430] : memref<32x32xf32, #tpu.memory_space<vmem>>, vector<32x32xf32>
    %cst_431 = arith.constant dense<0.000000e+00> : vector<8x32xf32>
    %920 = tpu.matmul %918, %919, %cst_431 {dimension_numbers = #tpu.dot_dimension_numbers<[1], [0], [0], [1], [0, 0, 1, 1], [], []>} : vector<8x32xf32>, vector<32x32xf32>, vector<8x32xf32> -> vector<8x32xf32>
    %c0_432 = arith.constant 0 : index
    %c0_433 = arith.constant 0 : index
    %921 = vector.load %arg11[%c0_432, %c0_433] : memref<1x32xf32, #tpu.memory_space<vmem>>, vector<1x32xf32>
    %922 = vector.broadcast %921 : vector<1x32xf32> to vector<8x32xf32>
    %923 = arith.addf %920, %922 : vector<8x32xf32>
    %cst_434 = arith.constant 0.000000e+00 : f32
    %924 = vector.broadcast %cst_434 : f32 to vector<8x32xf32>
    %925 = arith.maximumf %923, %924 : vector<8x32xf32>
    %c0_435 = arith.constant 0 : index
    %c0_436 = arith.constant 0 : index
    %926 = vector.load %arg12[%c0_435, %c0_436] : memref<32x32xf32, #tpu.memory_space<vmem>>, vector<32x32xf32>
    %cst_437 = arith.constant dense<0.000000e+00> : vector<8x32xf32>
    %927 = tpu.matmul %925, %926, %cst_437 {dimension_numbers = #tpu.dot_dimension_numbers<[1], [0], [0], [1], [0, 0, 1, 1], [], []>} : vector<8x32xf32>, vector<32x32xf32>, vector<8x32xf32> -> vector<8x32xf32>
    %c0_438 = arith.constant 0 : index
    %c0_439 = arith.constant 0 : index
    %928 = vector.load %arg13[%c0_438, %c0_439] : memref<1x32xf32, #tpu.memory_space<vmem>>, vector<1x32xf32>
    %929 = vector.broadcast %928 : vector<1x32xf32> to vector<8x32xf32>
    %930 = arith.addf %927, %929 : vector<8x32xf32>
    %cst_440 = arith.constant 0.000000e+00 : f32
    %931 = vector.broadcast %cst_440 : f32 to vector<8x32xf32>
    %932 = arith.maximumf %930, %931 : vector<8x32xf32>
    %c0_441 = arith.constant 0 : index
    %c0_442 = arith.constant 0 : index
    %933 = vector.load %arg14[%c0_441, %c0_442] : memref<32x8xf32, #tpu.memory_space<vmem>>, vector<32x8xf32>
    %cst_443 = arith.constant dense<0.000000e+00> : vector<8x8xf32>
    %934 = tpu.matmul %932, %933, %cst_443 {dimension_numbers = #tpu.dot_dimension_numbers<[1], [0], [0], [1], [0, 0, 1, 1], [], []>} : vector<8x32xf32>, vector<32x8xf32>, vector<8x8xf32> -> vector<8x8xf32>
    %c0_444 = arith.constant 0 : index
    %c0_445 = arith.constant 0 : index
    %935 = vector.load %arg15[%c0_444, %c0_445] : memref<1x8xf32, #tpu.memory_space<vmem>>, vector<1x8xf32>
    %936 = vector.broadcast %935 : vector<1x8xf32> to vector<8x8xf32>
    %937 = arith.addf %934, %936 : vector<8x8xf32>
    %938 = tpu.concatenate %937, %894 in 1 : vector<8x8xf32>, vector<8x32xf32> -> vector<8x40xf32>
    %c0_446 = arith.constant 0 : index
    %c0_447 = arith.constant 0 : index
    %939 = vector.load %arg6[%c0_446, %c0_447] : memref<40x128xf32, #tpu.memory_space<vmem>>, vector<40x128xf32>
    %cst_448 = arith.constant dense<0.000000e+00> : vector<8x128xf32>
    %940 = tpu.matmul %938, %939, %cst_448 {dimension_numbers = #tpu.dot_dimension_numbers<[1], [0], [0], [1], [0, 0, 1, 1], [], []>} : vector<8x40xf32>, vector<40x128xf32>, vector<8x128xf32> -> vector<8x128xf32>
    %c0_449 = arith.constant 0 : index
    %c0_450 = arith.constant 0 : index
    %941 = vector.load %arg7[%c0_449, %c0_450] : memref<1x128xf32, #tpu.memory_space<vmem>>, vector<1x128xf32>
    %942 = vector.broadcast %941 : vector<1x128xf32> to vector<8x128xf32>
    %943 = arith.addf %940, %942 : vector<8x128xf32>
    %944 = vector.extract_strided_slice %943 {offsets = [0, 0], sizes = [8, 64], strides = [1, 1]} : vector<8x128xf32> to vector<8x64xf32>
    %945 = arith.negf %944 : vector<8x64xf32>
    %946 = math.exp %945 : vector<8x64xf32>
    %cst_451 = arith.constant 1.000000e+00 : f32
    %947 = vector.broadcast %cst_451 : f32 to vector<8x64xf32>
    %948 = arith.addf %947, %946 : vector<8x64xf32>
    %949 = arith.divf %947, %948 : vector<8x64xf32>
    %950 = vector.extract_strided_slice %949 {offsets = [0, 0], sizes = [8, 32], strides = [1, 1]} : vector<8x64xf32> to vector<8x32xf32>
    %951 = vector.extract_strided_slice %949 {offsets = [0, 32], sizes = [8, 32], strides = [1, 1]} : vector<8x64xf32> to vector<8x32xf32>
    %952 = vector.extract_strided_slice %943 {offsets = [0, 64], sizes = [8, 32], strides = [1, 1]} : vector<8x128xf32> to vector<8x32xf32>
    %953 = vector.extract_strided_slice %943 {offsets = [0, 96], sizes = [8, 32], strides = [1, 1]} : vector<8x128xf32> to vector<8x32xf32>
    %954 = arith.mulf %950, %953 : vector<8x32xf32>
    %955 = arith.addf %952, %954 : vector<8x32xf32>
    %956 = math.tanh %955 : vector<8x32xf32>
    %cst_452 = arith.constant 1.000000e+00 : f32
    %957 = vector.broadcast %cst_452 : f32 to vector<8x32xf32>
    %958 = arith.subf %957, %951 : vector<8x32xf32>
    %959 = arith.mulf %958, %956 : vector<8x32xf32>
    %960 = arith.mulf %951, %894 : vector<8x32xf32>
    %961 = arith.addf %959, %960 : vector<8x32xf32>
    %962 = tpu.concatenate %961, %918 in 1 : vector<8x32xf32>, vector<8x32xf32> -> vector<8x64xf32>
    %c0_453 = arith.constant 0 : index
    %c0_454 = arith.constant 0 : index
    %963 = vector.load %arg8[%c0_453, %c0_454] : memref<64x128xf32, #tpu.memory_space<vmem>>, vector<64x128xf32>
    %cst_455 = arith.constant dense<0.000000e+00> : vector<8x128xf32>
    %964 = tpu.matmul %962, %963, %cst_455 {dimension_numbers = #tpu.dot_dimension_numbers<[1], [0], [0], [1], [0, 0, 1, 1], [], []>} : vector<8x64xf32>, vector<64x128xf32>, vector<8x128xf32> -> vector<8x128xf32>
    %c0_456 = arith.constant 0 : index
    %c0_457 = arith.constant 0 : index
    %965 = vector.load %arg9[%c0_456, %c0_457] : memref<1x128xf32, #tpu.memory_space<vmem>>, vector<1x128xf32>
    %966 = vector.broadcast %965 : vector<1x128xf32> to vector<8x128xf32>
    %967 = arith.addf %964, %966 : vector<8x128xf32>
    %968 = vector.extract_strided_slice %967 {offsets = [0, 0], sizes = [8, 64], strides = [1, 1]} : vector<8x128xf32> to vector<8x64xf32>
    %969 = arith.negf %968 : vector<8x64xf32>
    %970 = math.exp %969 : vector<8x64xf32>
    %cst_458 = arith.constant 1.000000e+00 : f32
    %971 = vector.broadcast %cst_458 : f32 to vector<8x64xf32>
    %972 = arith.addf %971, %970 : vector<8x64xf32>
    %973 = arith.divf %971, %972 : vector<8x64xf32>
    %974 = vector.extract_strided_slice %973 {offsets = [0, 0], sizes = [8, 32], strides = [1, 1]} : vector<8x64xf32> to vector<8x32xf32>
    %975 = vector.extract_strided_slice %973 {offsets = [0, 32], sizes = [8, 32], strides = [1, 1]} : vector<8x64xf32> to vector<8x32xf32>
    %976 = vector.extract_strided_slice %967 {offsets = [0, 64], sizes = [8, 32], strides = [1, 1]} : vector<8x128xf32> to vector<8x32xf32>
    %977 = vector.extract_strided_slice %967 {offsets = [0, 96], sizes = [8, 32], strides = [1, 1]} : vector<8x128xf32> to vector<8x32xf32>
    %978 = arith.mulf %974, %977 : vector<8x32xf32>
    %979 = arith.addf %976, %978 : vector<8x32xf32>
    %980 = math.tanh %979 : vector<8x32xf32>
    %cst_459 = arith.constant 1.000000e+00 : f32
    %981 = vector.broadcast %cst_459 : f32 to vector<8x32xf32>
    %982 = arith.subf %981, %975 : vector<8x32xf32>
    %983 = arith.mulf %982, %980 : vector<8x32xf32>
    %984 = arith.mulf %975, %918 : vector<8x32xf32>
    %985 = arith.addf %983, %984 : vector<8x32xf32>
    %c0_460 = arith.constant 0 : index
    %c0_461 = arith.constant 0 : index
    %986 = vector.load %arg10[%c0_460, %c0_461] : memref<32x32xf32, #tpu.memory_space<vmem>>, vector<32x32xf32>
    %cst_462 = arith.constant dense<0.000000e+00> : vector<8x32xf32>
    %987 = tpu.matmul %985, %986, %cst_462 {dimension_numbers = #tpu.dot_dimension_numbers<[1], [0], [0], [1], [0, 0, 1, 1], [], []>} : vector<8x32xf32>, vector<32x32xf32>, vector<8x32xf32> -> vector<8x32xf32>
    %c0_463 = arith.constant 0 : index
    %c0_464 = arith.constant 0 : index
    %988 = vector.load %arg11[%c0_463, %c0_464] : memref<1x32xf32, #tpu.memory_space<vmem>>, vector<1x32xf32>
    %989 = vector.broadcast %988 : vector<1x32xf32> to vector<8x32xf32>
    %990 = arith.addf %987, %989 : vector<8x32xf32>
    %cst_465 = arith.constant 0.000000e+00 : f32
    %991 = vector.broadcast %cst_465 : f32 to vector<8x32xf32>
    %992 = arith.maximumf %990, %991 : vector<8x32xf32>
    %c0_466 = arith.constant 0 : index
    %c0_467 = arith.constant 0 : index
    %993 = vector.load %arg12[%c0_466, %c0_467] : memref<32x32xf32, #tpu.memory_space<vmem>>, vector<32x32xf32>
    %cst_468 = arith.constant dense<0.000000e+00> : vector<8x32xf32>
    %994 = tpu.matmul %992, %993, %cst_468 {dimension_numbers = #tpu.dot_dimension_numbers<[1], [0], [0], [1], [0, 0, 1, 1], [], []>} : vector<8x32xf32>, vector<32x32xf32>, vector<8x32xf32> -> vector<8x32xf32>
    %c0_469 = arith.constant 0 : index
    %c0_470 = arith.constant 0 : index
    %995 = vector.load %arg13[%c0_469, %c0_470] : memref<1x32xf32, #tpu.memory_space<vmem>>, vector<1x32xf32>
    %996 = vector.broadcast %995 : vector<1x32xf32> to vector<8x32xf32>
    %997 = arith.addf %994, %996 : vector<8x32xf32>
    %cst_471 = arith.constant 0.000000e+00 : f32
    %998 = vector.broadcast %cst_471 : f32 to vector<8x32xf32>
    %999 = arith.maximumf %997, %998 : vector<8x32xf32>
    %c0_472 = arith.constant 0 : index
    %c0_473 = arith.constant 0 : index
    %1000 = vector.load %arg14[%c0_472, %c0_473] : memref<32x8xf32, #tpu.memory_space<vmem>>, vector<32x8xf32>
    %cst_474 = arith.constant dense<0.000000e+00> : vector<8x8xf32>
    %1001 = tpu.matmul %999, %1000, %cst_474 {dimension_numbers = #tpu.dot_dimension_numbers<[1], [0], [0], [1], [0, 0, 1, 1], [], []>} : vector<8x32xf32>, vector<32x8xf32>, vector<8x8xf32> -> vector<8x8xf32>
    %c0_475 = arith.constant 0 : index
    %c0_476 = arith.constant 0 : index
    %1002 = vector.load %arg15[%c0_475, %c0_476] : memref<1x8xf32, #tpu.memory_space<vmem>>, vector<1x8xf32>
    %1003 = vector.broadcast %1002 : vector<1x8xf32> to vector<8x8xf32>
    %1004 = arith.addf %1001, %1003 : vector<8x8xf32>
    %1005 = tpu.concatenate %1004, %961 in 1 : vector<8x8xf32>, vector<8x32xf32> -> vector<8x40xf32>
    %c0_477 = arith.constant 0 : index
    %c0_478 = arith.constant 0 : index
    %1006 = vector.load %arg6[%c0_477, %c0_478] : memref<40x128xf32, #tpu.memory_space<vmem>>, vector<40x128xf32>
    %cst_479 = arith.constant dense<0.000000e+00> : vector<8x128xf32>
    %1007 = tpu.matmul %1005, %1006, %cst_479 {dimension_numbers = #tpu.dot_dimension_numbers<[1], [0], [0], [1], [0, 0, 1, 1], [], []>} : vector<8x40xf32>, vector<40x128xf32>, vector<8x128xf32> -> vector<8x128xf32>
    %c0_480 = arith.constant 0 : index
    %c0_481 = arith.constant 0 : index
    %1008 = vector.load %arg7[%c0_480, %c0_481] : memref<1x128xf32, #tpu.memory_space<vmem>>, vector<1x128xf32>
    %1009 = vector.broadcast %1008 : vector<1x128xf32> to vector<8x128xf32>
    %1010 = arith.addf %1007, %1009 : vector<8x128xf32>
    %1011 = vector.extract_strided_slice %1010 {offsets = [0, 0], sizes = [8, 64], strides = [1, 1]} : vector<8x128xf32> to vector<8x64xf32>
    %1012 = arith.negf %1011 : vector<8x64xf32>
    %1013 = math.exp %1012 : vector<8x64xf32>
    %cst_482 = arith.constant 1.000000e+00 : f32
    %1014 = vector.broadcast %cst_482 : f32 to vector<8x64xf32>
    %1015 = arith.addf %1014, %1013 : vector<8x64xf32>
    %1016 = arith.divf %1014, %1015 : vector<8x64xf32>
    %1017 = vector.extract_strided_slice %1016 {offsets = [0, 0], sizes = [8, 32], strides = [1, 1]} : vector<8x64xf32> to vector<8x32xf32>
    %1018 = vector.extract_strided_slice %1016 {offsets = [0, 32], sizes = [8, 32], strides = [1, 1]} : vector<8x64xf32> to vector<8x32xf32>
    %1019 = vector.extract_strided_slice %1010 {offsets = [0, 64], sizes = [8, 32], strides = [1, 1]} : vector<8x128xf32> to vector<8x32xf32>
    %1020 = vector.extract_strided_slice %1010 {offsets = [0, 96], sizes = [8, 32], strides = [1, 1]} : vector<8x128xf32> to vector<8x32xf32>
    %1021 = arith.mulf %1017, %1020 : vector<8x32xf32>
    %1022 = arith.addf %1019, %1021 : vector<8x32xf32>
    %1023 = math.tanh %1022 : vector<8x32xf32>
    %cst_483 = arith.constant 1.000000e+00 : f32
    %1024 = vector.broadcast %cst_483 : f32 to vector<8x32xf32>
    %1025 = arith.subf %1024, %1018 : vector<8x32xf32>
    %1026 = arith.mulf %1025, %1023 : vector<8x32xf32>
    %1027 = arith.mulf %1018, %961 : vector<8x32xf32>
    %1028 = arith.addf %1026, %1027 : vector<8x32xf32>
    %1029 = tpu.concatenate %1028, %985 in 1 : vector<8x32xf32>, vector<8x32xf32> -> vector<8x64xf32>
    %c0_484 = arith.constant 0 : index
    %c0_485 = arith.constant 0 : index
    %1030 = vector.load %arg8[%c0_484, %c0_485] : memref<64x128xf32, #tpu.memory_space<vmem>>, vector<64x128xf32>
    %cst_486 = arith.constant dense<0.000000e+00> : vector<8x128xf32>
    %1031 = tpu.matmul %1029, %1030, %cst_486 {dimension_numbers = #tpu.dot_dimension_numbers<[1], [0], [0], [1], [0, 0, 1, 1], [], []>} : vector<8x64xf32>, vector<64x128xf32>, vector<8x128xf32> -> vector<8x128xf32>
    %c0_487 = arith.constant 0 : index
    %c0_488 = arith.constant 0 : index
    %1032 = vector.load %arg9[%c0_487, %c0_488] : memref<1x128xf32, #tpu.memory_space<vmem>>, vector<1x128xf32>
    %1033 = vector.broadcast %1032 : vector<1x128xf32> to vector<8x128xf32>
    %1034 = arith.addf %1031, %1033 : vector<8x128xf32>
    %1035 = vector.extract_strided_slice %1034 {offsets = [0, 0], sizes = [8, 64], strides = [1, 1]} : vector<8x128xf32> to vector<8x64xf32>
    %1036 = arith.negf %1035 : vector<8x64xf32>
    %1037 = math.exp %1036 : vector<8x64xf32>
    %cst_489 = arith.constant 1.000000e+00 : f32
    %1038 = vector.broadcast %cst_489 : f32 to vector<8x64xf32>
    %1039 = arith.addf %1038, %1037 : vector<8x64xf32>
    %1040 = arith.divf %1038, %1039 : vector<8x64xf32>
    %1041 = vector.extract_strided_slice %1040 {offsets = [0, 0], sizes = [8, 32], strides = [1, 1]} : vector<8x64xf32> to vector<8x32xf32>
    %1042 = vector.extract_strided_slice %1040 {offsets = [0, 32], sizes = [8, 32], strides = [1, 1]} : vector<8x64xf32> to vector<8x32xf32>
    %1043 = vector.extract_strided_slice %1034 {offsets = [0, 64], sizes = [8, 32], strides = [1, 1]} : vector<8x128xf32> to vector<8x32xf32>
    %1044 = vector.extract_strided_slice %1034 {offsets = [0, 96], sizes = [8, 32], strides = [1, 1]} : vector<8x128xf32> to vector<8x32xf32>
    %1045 = arith.mulf %1041, %1044 : vector<8x32xf32>
    %1046 = arith.addf %1043, %1045 : vector<8x32xf32>
    %1047 = math.tanh %1046 : vector<8x32xf32>
    %cst_490 = arith.constant 1.000000e+00 : f32
    %1048 = vector.broadcast %cst_490 : f32 to vector<8x32xf32>
    %1049 = arith.subf %1048, %1042 : vector<8x32xf32>
    %1050 = arith.mulf %1049, %1047 : vector<8x32xf32>
    %1051 = arith.mulf %1042, %985 : vector<8x32xf32>
    %1052 = arith.addf %1050, %1051 : vector<8x32xf32>
    %c0_491 = arith.constant 0 : index
    %c0_492 = arith.constant 0 : index
    %1053 = vector.load %arg10[%c0_491, %c0_492] : memref<32x32xf32, #tpu.memory_space<vmem>>, vector<32x32xf32>
    %cst_493 = arith.constant dense<0.000000e+00> : vector<8x32xf32>
    %1054 = tpu.matmul %1052, %1053, %cst_493 {dimension_numbers = #tpu.dot_dimension_numbers<[1], [0], [0], [1], [0, 0, 1, 1], [], []>} : vector<8x32xf32>, vector<32x32xf32>, vector<8x32xf32> -> vector<8x32xf32>
    %c0_494 = arith.constant 0 : index
    %c0_495 = arith.constant 0 : index
    %1055 = vector.load %arg11[%c0_494, %c0_495] : memref<1x32xf32, #tpu.memory_space<vmem>>, vector<1x32xf32>
    %1056 = vector.broadcast %1055 : vector<1x32xf32> to vector<8x32xf32>
    %1057 = arith.addf %1054, %1056 : vector<8x32xf32>
    %cst_496 = arith.constant 0.000000e+00 : f32
    %1058 = vector.broadcast %cst_496 : f32 to vector<8x32xf32>
    %1059 = arith.maximumf %1057, %1058 : vector<8x32xf32>
    %c0_497 = arith.constant 0 : index
    %c0_498 = arith.constant 0 : index
    %1060 = vector.load %arg12[%c0_497, %c0_498] : memref<32x32xf32, #tpu.memory_space<vmem>>, vector<32x32xf32>
    %cst_499 = arith.constant dense<0.000000e+00> : vector<8x32xf32>
    %1061 = tpu.matmul %1059, %1060, %cst_499 {dimension_numbers = #tpu.dot_dimension_numbers<[1], [0], [0], [1], [0, 0, 1, 1], [], []>} : vector<8x32xf32>, vector<32x32xf32>, vector<8x32xf32> -> vector<8x32xf32>
    %c0_500 = arith.constant 0 : index
    %c0_501 = arith.constant 0 : index
    %1062 = vector.load %arg13[%c0_500, %c0_501] : memref<1x32xf32, #tpu.memory_space<vmem>>, vector<1x32xf32>
    %1063 = vector.broadcast %1062 : vector<1x32xf32> to vector<8x32xf32>
    %1064 = arith.addf %1061, %1063 : vector<8x32xf32>
    %cst_502 = arith.constant 0.000000e+00 : f32
    %1065 = vector.broadcast %cst_502 : f32 to vector<8x32xf32>
    %1066 = arith.maximumf %1064, %1065 : vector<8x32xf32>
    %c0_503 = arith.constant 0 : index
    %c0_504 = arith.constant 0 : index
    %1067 = vector.load %arg14[%c0_503, %c0_504] : memref<32x8xf32, #tpu.memory_space<vmem>>, vector<32x8xf32>
    %cst_505 = arith.constant dense<0.000000e+00> : vector<8x8xf32>
    %1068 = tpu.matmul %1066, %1067, %cst_505 {dimension_numbers = #tpu.dot_dimension_numbers<[1], [0], [0], [1], [0, 0, 1, 1], [], []>} : vector<8x32xf32>, vector<32x8xf32>, vector<8x8xf32> -> vector<8x8xf32>
    %c0_506 = arith.constant 0 : index
    %c0_507 = arith.constant 0 : index
    %1069 = vector.load %arg15[%c0_506, %c0_507] : memref<1x8xf32, #tpu.memory_space<vmem>>, vector<1x8xf32>
    %1070 = vector.broadcast %1069 : vector<1x8xf32> to vector<8x8xf32>
    %1071 = arith.addf %1068, %1070 : vector<8x8xf32>
    %1072 = tpu.concatenate %937, %1004, %1071 in 1 : vector<8x8xf32>, vector<8x8xf32>, vector<8x8xf32> -> vector<8x24xf32>
    %1073 = arith.index_cast %c4_i32 : i32 to index
    %c0_508 = arith.constant 0 : index
    %c0_509 = arith.constant 0 : index
    %1074 = vector.load %arg16[%1073, %c0_508, %c0_509] : memref<6x8x24xf32, #tpu.memory_space<vmem>>, vector<1x8x24xf32>
    %1075 = vector.shape_cast %1074 : vector<1x8x24xf32> to vector<8x24xf32>
    %1076 = vector.shape_cast %1072 : vector<8x24xf32> to vector<1x8x24xf32>
    tpu.vector_store %arg16[%1073, %c0_508, %c0_509], %1076 {strides = array<i32>} : memref<6x8x24xf32, #tpu.memory_space<vmem>>, vector<1x8x24xf32>,
    %c5_i32 = arith.constant 5 : i32
    %1077 = arith.index_cast %c5_i32 : i32 to index
    %c0_510 = arith.constant 0 : index
    %c0_511 = arith.constant 0 : index
    %1078 = vector.load %arg1[%1077, %c0_510, %c0_511] : memref<6x8x8xf32, #tpu.memory_space<vmem>>, vector<1x8x8xf32>
    %1079 = vector.shape_cast %1078 : vector<1x8x8xf32> to vector<8x8xf32>
    %c0_512 = arith.constant 0 : index
    %c0_513 = arith.constant 0 : index
    %1080 = vector.load %arg2[%c0_512, %c0_513] : memref<8x96xf32, #tpu.memory_space<vmem>>, vector<8x96xf32>
    %cst_514 = arith.constant dense<0.000000e+00> : vector<8x96xf32>
    %1081 = tpu.matmul %1079, %1080, %cst_514 {dimension_numbers = #tpu.dot_dimension_numbers<[1], [0], [0], [1], [0, 0, 1, 1], [], []>} : vector<8x8xf32>, vector<8x96xf32>, vector<8x96xf32> -> vector<8x96xf32>
    %c0_515 = arith.constant 0 : index
    %c0_516 = arith.constant 0 : index
    %1082 = vector.load %arg3[%c0_515, %c0_516] : memref<1x96xf32, #tpu.memory_space<vmem>>, vector<1x96xf32>
    %1083 = vector.broadcast %1082 : vector<1x96xf32> to vector<8x96xf32>
    %1084 = arith.addf %1081, %1083 : vector<8x96xf32>
    %c0_517 = arith.constant 0 : index
    %c0_518 = arith.constant 0 : index
    %1085 = vector.load %arg4[%c0_517, %c0_518] : memref<32x96xf32, #tpu.memory_space<vmem>>, vector<32x96xf32>
    %cst_519 = arith.constant dense<0.000000e+00> : vector<8x96xf32>
    %1086 = tpu.matmul %894, %1085, %cst_519 {dimension_numbers = #tpu.dot_dimension_numbers<[1], [0], [0], [1], [0, 0, 1, 1], [], []>} : vector<8x32xf32>, vector<32x96xf32>, vector<8x96xf32> -> vector<8x96xf32>
    %1087 = vector.extract_strided_slice %1084 {offsets = [0, 0], sizes = [8, 64], strides = [1, 1]} : vector<8x96xf32> to vector<8x64xf32>
    %1088 = vector.extract_strided_slice %1086 {offsets = [0, 0], sizes = [8, 64], strides = [1, 1]} : vector<8x96xf32> to vector<8x64xf32>
    %1089 = arith.addf %1087, %1088 : vector<8x64xf32>
    %1090 = arith.negf %1089 : vector<8x64xf32>
    %1091 = math.exp %1090 : vector<8x64xf32>
    %cst_520 = arith.constant 1.000000e+00 : f32
    %1092 = vector.broadcast %cst_520 : f32 to vector<8x64xf32>
    %1093 = arith.addf %1092, %1091 : vector<8x64xf32>
    %1094 = arith.divf %1092, %1093 : vector<8x64xf32>
    %1095 = vector.extract_strided_slice %1094 {offsets = [0, 0], sizes = [8, 32], strides = [1, 1]} : vector<8x64xf32> to vector<8x32xf32>
    %1096 = vector.extract_strided_slice %1094 {offsets = [0, 32], sizes = [8, 32], strides = [1, 1]} : vector<8x64xf32> to vector<8x32xf32>
    %1097 = vector.extract_strided_slice %1084 {offsets = [0, 64], sizes = [8, 32], strides = [1, 1]} : vector<8x96xf32> to vector<8x32xf32>
    %1098 = vector.extract_strided_slice %1086 {offsets = [0, 64], sizes = [8, 32], strides = [1, 1]} : vector<8x96xf32> to vector<8x32xf32>
    %c0_521 = arith.constant 0 : index
    %c0_522 = arith.constant 0 : index
    %1099 = vector.load %arg5[%c0_521, %c0_522] : memref<1x32xf32, #tpu.memory_space<vmem>>, vector<1x32xf32>
    %1100 = vector.broadcast %1099 : vector<1x32xf32> to vector<8x32xf32>
    %1101 = arith.addf %1098, %1100 : vector<8x32xf32>
    %1102 = arith.mulf %1095, %1101 : vector<8x32xf32>
    %1103 = arith.addf %1097, %1102 : vector<8x32xf32>
    %1104 = math.tanh %1103 : vector<8x32xf32>
    %cst_523 = arith.constant 1.000000e+00 : f32
    %1105 = vector.broadcast %cst_523 : f32 to vector<8x32xf32>
    %1106 = arith.subf %1105, %1096 : vector<8x32xf32>
    %1107 = arith.mulf %1106, %1104 : vector<8x32xf32>
    %1108 = arith.mulf %1096, %894 : vector<8x32xf32>
    %1109 = arith.addf %1107, %1108 : vector<8x32xf32>
    %1110 = tpu.concatenate %1109, %918 in 1 : vector<8x32xf32>, vector<8x32xf32> -> vector<8x64xf32>
    %c0_524 = arith.constant 0 : index
    %c0_525 = arith.constant 0 : index
    %1111 = vector.load %arg8[%c0_524, %c0_525] : memref<64x128xf32, #tpu.memory_space<vmem>>, vector<64x128xf32>
    %cst_526 = arith.constant dense<0.000000e+00> : vector<8x128xf32>
    %1112 = tpu.matmul %1110, %1111, %cst_526 {dimension_numbers = #tpu.dot_dimension_numbers<[1], [0], [0], [1], [0, 0, 1, 1], [], []>} : vector<8x64xf32>, vector<64x128xf32>, vector<8x128xf32> -> vector<8x128xf32>
    %c0_527 = arith.constant 0 : index
    %c0_528 = arith.constant 0 : index
    %1113 = vector.load %arg9[%c0_527, %c0_528] : memref<1x128xf32, #tpu.memory_space<vmem>>, vector<1x128xf32>
    %1114 = vector.broadcast %1113 : vector<1x128xf32> to vector<8x128xf32>
    %1115 = arith.addf %1112, %1114 : vector<8x128xf32>
    %1116 = vector.extract_strided_slice %1115 {offsets = [0, 0], sizes = [8, 64], strides = [1, 1]} : vector<8x128xf32> to vector<8x64xf32>
    %1117 = arith.negf %1116 : vector<8x64xf32>
    %1118 = math.exp %1117 : vector<8x64xf32>
    %cst_529 = arith.constant 1.000000e+00 : f32
    %1119 = vector.broadcast %cst_529 : f32 to vector<8x64xf32>
    %1120 = arith.addf %1119, %1118 : vector<8x64xf32>
    %1121 = arith.divf %1119, %1120 : vector<8x64xf32>
    %1122 = vector.extract_strided_slice %1121 {offsets = [0, 0], sizes = [8, 32], strides = [1, 1]} : vector<8x64xf32> to vector<8x32xf32>
    %1123 = vector.extract_strided_slice %1121 {offsets = [0, 32], sizes = [8, 32], strides = [1, 1]} : vector<8x64xf32> to vector<8x32xf32>
    %1124 = vector.extract_strided_slice %1115 {offsets = [0, 64], sizes = [8, 32], strides = [1, 1]} : vector<8x128xf32> to vector<8x32xf32>
    %1125 = vector.extract_strided_slice %1115 {offsets = [0, 96], sizes = [8, 32], strides = [1, 1]} : vector<8x128xf32> to vector<8x32xf32>
    %1126 = arith.mulf %1122, %1125 : vector<8x32xf32>
    %1127 = arith.addf %1124, %1126 : vector<8x32xf32>
    %1128 = math.tanh %1127 : vector<8x32xf32>
    %cst_530 = arith.constant 1.000000e+00 : f32
    %1129 = vector.broadcast %cst_530 : f32 to vector<8x32xf32>
    %1130 = arith.subf %1129, %1123 : vector<8x32xf32>
    %1131 = arith.mulf %1130, %1128 : vector<8x32xf32>
    %1132 = arith.mulf %1123, %918 : vector<8x32xf32>
    %1133 = arith.addf %1131, %1132 : vector<8x32xf32>
    %c0_531 = arith.constant 0 : index
    %c0_532 = arith.constant 0 : index
    %1134 = vector.load %arg10[%c0_531, %c0_532] : memref<32x32xf32, #tpu.memory_space<vmem>>, vector<32x32xf32>
    %cst_533 = arith.constant dense<0.000000e+00> : vector<8x32xf32>
    %1135 = tpu.matmul %1133, %1134, %cst_533 {dimension_numbers = #tpu.dot_dimension_numbers<[1], [0], [0], [1], [0, 0, 1, 1], [], []>} : vector<8x32xf32>, vector<32x32xf32>, vector<8x32xf32> -> vector<8x32xf32>
    %c0_534 = arith.constant 0 : index
    %c0_535 = arith.constant 0 : index
    %1136 = vector.load %arg11[%c0_534, %c0_535] : memref<1x32xf32, #tpu.memory_space<vmem>>, vector<1x32xf32>
    %1137 = vector.broadcast %1136 : vector<1x32xf32> to vector<8x32xf32>
    %1138 = arith.addf %1135, %1137 : vector<8x32xf32>
    %cst_536 = arith.constant 0.000000e+00 : f32
    %1139 = vector.broadcast %cst_536 : f32 to vector<8x32xf32>
    %1140 = arith.maximumf %1138, %1139 : vector<8x32xf32>
    %c0_537 = arith.constant 0 : index
    %c0_538 = arith.constant 0 : index
    %1141 = vector.load %arg12[%c0_537, %c0_538] : memref<32x32xf32, #tpu.memory_space<vmem>>, vector<32x32xf32>
    %cst_539 = arith.constant dense<0.000000e+00> : vector<8x32xf32>
    %1142 = tpu.matmul %1140, %1141, %cst_539 {dimension_numbers = #tpu.dot_dimension_numbers<[1], [0], [0], [1], [0, 0, 1, 1], [], []>} : vector<8x32xf32>, vector<32x32xf32>, vector<8x32xf32> -> vector<8x32xf32>
    %c0_540 = arith.constant 0 : index
    %c0_541 = arith.constant 0 : index
    %1143 = vector.load %arg13[%c0_540, %c0_541] : memref<1x32xf32, #tpu.memory_space<vmem>>, vector<1x32xf32>
    %1144 = vector.broadcast %1143 : vector<1x32xf32> to vector<8x32xf32>
    %1145 = arith.addf %1142, %1144 : vector<8x32xf32>
    %cst_542 = arith.constant 0.000000e+00 : f32
    %1146 = vector.broadcast %cst_542 : f32 to vector<8x32xf32>
    %1147 = arith.maximumf %1145, %1146 : vector<8x32xf32>
    %c0_543 = arith.constant 0 : index
    %c0_544 = arith.constant 0 : index
    %1148 = vector.load %arg14[%c0_543, %c0_544] : memref<32x8xf32, #tpu.memory_space<vmem>>, vector<32x8xf32>
    %cst_545 = arith.constant dense<0.000000e+00> : vector<8x8xf32>
    %1149 = tpu.matmul %1147, %1148, %cst_545 {dimension_numbers = #tpu.dot_dimension_numbers<[1], [0], [0], [1], [0, 0, 1, 1], [], []>} : vector<8x32xf32>, vector<32x8xf32>, vector<8x8xf32> -> vector<8x8xf32>
    %c0_546 = arith.constant 0 : index
    %c0_547 = arith.constant 0 : index
    %1150 = vector.load %arg15[%c0_546, %c0_547] : memref<1x8xf32, #tpu.memory_space<vmem>>, vector<1x8xf32>
    %1151 = vector.broadcast %1150 : vector<1x8xf32> to vector<8x8xf32>
    %1152 = arith.addf %1149, %1151 : vector<8x8xf32>
    %1153 = tpu.concatenate %1152, %1109 in 1 : vector<8x8xf32>, vector<8x32xf32> -> vector<8x40xf32>
    %c0_548 = arith.constant 0 : index
    %c0_549 = arith.constant 0 : index
    %1154 = vector.load %arg6[%c0_548, %c0_549] : memref<40x128xf32, #tpu.memory_space<vmem>>, vector<40x128xf32>
    %cst_550 = arith.constant dense<0.000000e+00> : vector<8x128xf32>
    %1155 = tpu.matmul %1153, %1154, %cst_550 {dimension_numbers = #tpu.dot_dimension_numbers<[1], [0], [0], [1], [0, 0, 1, 1], [], []>} : vector<8x40xf32>, vector<40x128xf32>, vector<8x128xf32> -> vector<8x128xf32>
    %c0_551 = arith.constant 0 : index
    %c0_552 = arith.constant 0 : index
    %1156 = vector.load %arg7[%c0_551, %c0_552] : memref<1x128xf32, #tpu.memory_space<vmem>>, vector<1x128xf32>
    %1157 = vector.broadcast %1156 : vector<1x128xf32> to vector<8x128xf32>
    %1158 = arith.addf %1155, %1157 : vector<8x128xf32>
    %1159 = vector.extract_strided_slice %1158 {offsets = [0, 0], sizes = [8, 64], strides = [1, 1]} : vector<8x128xf32> to vector<8x64xf32>
    %1160 = arith.negf %1159 : vector<8x64xf32>
    %1161 = math.exp %1160 : vector<8x64xf32>
    %cst_553 = arith.constant 1.000000e+00 : f32
    %1162 = vector.broadcast %cst_553 : f32 to vector<8x64xf32>
    %1163 = arith.addf %1162, %1161 : vector<8x64xf32>
    %1164 = arith.divf %1162, %1163 : vector<8x64xf32>
    %1165 = vector.extract_strided_slice %1164 {offsets = [0, 0], sizes = [8, 32], strides = [1, 1]} : vector<8x64xf32> to vector<8x32xf32>
    %1166 = vector.extract_strided_slice %1164 {offsets = [0, 32], sizes = [8, 32], strides = [1, 1]} : vector<8x64xf32> to vector<8x32xf32>
    %1167 = vector.extract_strided_slice %1158 {offsets = [0, 64], sizes = [8, 32], strides = [1, 1]} : vector<8x128xf32> to vector<8x32xf32>
    %1168 = vector.extract_strided_slice %1158 {offsets = [0, 96], sizes = [8, 32], strides = [1, 1]} : vector<8x128xf32> to vector<8x32xf32>
    %1169 = arith.mulf %1165, %1168 : vector<8x32xf32>
    %1170 = arith.addf %1167, %1169 : vector<8x32xf32>
    %1171 = math.tanh %1170 : vector<8x32xf32>
    %cst_554 = arith.constant 1.000000e+00 : f32
    %1172 = vector.broadcast %cst_554 : f32 to vector<8x32xf32>
    %1173 = arith.subf %1172, %1166 : vector<8x32xf32>
    %1174 = arith.mulf %1173, %1171 : vector<8x32xf32>
    %1175 = arith.mulf %1166, %1109 : vector<8x32xf32>
    %1176 = arith.addf %1174, %1175 : vector<8x32xf32>
    %1177 = tpu.concatenate %1176, %1133 in 1 : vector<8x32xf32>, vector<8x32xf32> -> vector<8x64xf32>
    %c0_555 = arith.constant 0 : index
    %c0_556 = arith.constant 0 : index
    %1178 = vector.load %arg8[%c0_555, %c0_556] : memref<64x128xf32, #tpu.memory_space<vmem>>, vector<64x128xf32>
    %cst_557 = arith.constant dense<0.000000e+00> : vector<8x128xf32>
    %1179 = tpu.matmul %1177, %1178, %cst_557 {dimension_numbers = #tpu.dot_dimension_numbers<[1], [0], [0], [1], [0, 0, 1, 1], [], []>} : vector<8x64xf32>, vector<64x128xf32>, vector<8x128xf32> -> vector<8x128xf32>
    %c0_558 = arith.constant 0 : index
    %c0_559 = arith.constant 0 : index
    %1180 = vector.load %arg9[%c0_558, %c0_559] : memref<1x128xf32, #tpu.memory_space<vmem>>, vector<1x128xf32>
    %1181 = vector.broadcast %1180 : vector<1x128xf32> to vector<8x128xf32>
    %1182 = arith.addf %1179, %1181 : vector<8x128xf32>
    %1183 = vector.extract_strided_slice %1182 {offsets = [0, 0], sizes = [8, 64], strides = [1, 1]} : vector<8x128xf32> to vector<8x64xf32>
    %1184 = arith.negf %1183 : vector<8x64xf32>
    %1185 = math.exp %1184 : vector<8x64xf32>
    %cst_560 = arith.constant 1.000000e+00 : f32
    %1186 = vector.broadcast %cst_560 : f32 to vector<8x64xf32>
    %1187 = arith.addf %1186, %1185 : vector<8x64xf32>
    %1188 = arith.divf %1186, %1187 : vector<8x64xf32>
    %1189 = vector.extract_strided_slice %1188 {offsets = [0, 0], sizes = [8, 32], strides = [1, 1]} : vector<8x64xf32> to vector<8x32xf32>
    %1190 = vector.extract_strided_slice %1188 {offsets = [0, 32], sizes = [8, 32], strides = [1, 1]} : vector<8x64xf32> to vector<8x32xf32>
    %1191 = vector.extract_strided_slice %1182 {offsets = [0, 64], sizes = [8, 32], strides = [1, 1]} : vector<8x128xf32> to vector<8x32xf32>
    %1192 = vector.extract_strided_slice %1182 {offsets = [0, 96], sizes = [8, 32], strides = [1, 1]} : vector<8x128xf32> to vector<8x32xf32>
    %1193 = arith.mulf %1189, %1192 : vector<8x32xf32>
    %1194 = arith.addf %1191, %1193 : vector<8x32xf32>
    %1195 = math.tanh %1194 : vector<8x32xf32>
    %cst_561 = arith.constant 1.000000e+00 : f32
    %1196 = vector.broadcast %cst_561 : f32 to vector<8x32xf32>
    %1197 = arith.subf %1196, %1190 : vector<8x32xf32>
    %1198 = arith.mulf %1197, %1195 : vector<8x32xf32>
    %1199 = arith.mulf %1190, %1133 : vector<8x32xf32>
    %1200 = arith.addf %1198, %1199 : vector<8x32xf32>
    %c0_562 = arith.constant 0 : index
    %c0_563 = arith.constant 0 : index
    %1201 = vector.load %arg10[%c0_562, %c0_563] : memref<32x32xf32, #tpu.memory_space<vmem>>, vector<32x32xf32>
    %cst_564 = arith.constant dense<0.000000e+00> : vector<8x32xf32>
    %1202 = tpu.matmul %1200, %1201, %cst_564 {dimension_numbers = #tpu.dot_dimension_numbers<[1], [0], [0], [1], [0, 0, 1, 1], [], []>} : vector<8x32xf32>, vector<32x32xf32>, vector<8x32xf32> -> vector<8x32xf32>
    %c0_565 = arith.constant 0 : index
    %c0_566 = arith.constant 0 : index
    %1203 = vector.load %arg11[%c0_565, %c0_566] : memref<1x32xf32, #tpu.memory_space<vmem>>, vector<1x32xf32>
    %1204 = vector.broadcast %1203 : vector<1x32xf32> to vector<8x32xf32>
    %1205 = arith.addf %1202, %1204 : vector<8x32xf32>
    %cst_567 = arith.constant 0.000000e+00 : f32
    %1206 = vector.broadcast %cst_567 : f32 to vector<8x32xf32>
    %1207 = arith.maximumf %1205, %1206 : vector<8x32xf32>
    %c0_568 = arith.constant 0 : index
    %c0_569 = arith.constant 0 : index
    %1208 = vector.load %arg12[%c0_568, %c0_569] : memref<32x32xf32, #tpu.memory_space<vmem>>, vector<32x32xf32>
    %cst_570 = arith.constant dense<0.000000e+00> : vector<8x32xf32>
    %1209 = tpu.matmul %1207, %1208, %cst_570 {dimension_numbers = #tpu.dot_dimension_numbers<[1], [0], [0], [1], [0, 0, 1, 1], [], []>} : vector<8x32xf32>, vector<32x32xf32>, vector<8x32xf32> -> vector<8x32xf32>
    %c0_571 = arith.constant 0 : index
    %c0_572 = arith.constant 0 : index
    %1210 = vector.load %arg13[%c0_571, %c0_572] : memref<1x32xf32, #tpu.memory_space<vmem>>, vector<1x32xf32>
    %1211 = vector.broadcast %1210 : vector<1x32xf32> to vector<8x32xf32>
    %1212 = arith.addf %1209, %1211 : vector<8x32xf32>
    %cst_573 = arith.constant 0.000000e+00 : f32
    %1213 = vector.broadcast %cst_573 : f32 to vector<8x32xf32>
    %1214 = arith.maximumf %1212, %1213 : vector<8x32xf32>
    %c0_574 = arith.constant 0 : index
    %c0_575 = arith.constant 0 : index
    %1215 = vector.load %arg14[%c0_574, %c0_575] : memref<32x8xf32, #tpu.memory_space<vmem>>, vector<32x8xf32>
    %cst_576 = arith.constant dense<0.000000e+00> : vector<8x8xf32>
    %1216 = tpu.matmul %1214, %1215, %cst_576 {dimension_numbers = #tpu.dot_dimension_numbers<[1], [0], [0], [1], [0, 0, 1, 1], [], []>} : vector<8x32xf32>, vector<32x8xf32>, vector<8x8xf32> -> vector<8x8xf32>
    %c0_577 = arith.constant 0 : index
    %c0_578 = arith.constant 0 : index
    %1217 = vector.load %arg15[%c0_577, %c0_578] : memref<1x8xf32, #tpu.memory_space<vmem>>, vector<1x8xf32>
    %1218 = vector.broadcast %1217 : vector<1x8xf32> to vector<8x8xf32>
    %1219 = arith.addf %1216, %1218 : vector<8x8xf32>
    %1220 = tpu.concatenate %1219, %1176 in 1 : vector<8x8xf32>, vector<8x32xf32> -> vector<8x40xf32>
    %c0_579 = arith.constant 0 : index
    %c0_580 = arith.constant 0 : index
    %1221 = vector.load %arg6[%c0_579, %c0_580] : memref<40x128xf32, #tpu.memory_space<vmem>>, vector<40x128xf32>
    %cst_581 = arith.constant dense<0.000000e+00> : vector<8x128xf32>
    %1222 = tpu.matmul %1220, %1221, %cst_581 {dimension_numbers = #tpu.dot_dimension_numbers<[1], [0], [0], [1], [0, 0, 1, 1], [], []>} : vector<8x40xf32>, vector<40x128xf32>, vector<8x128xf32> -> vector<8x128xf32>
    %c0_582 = arith.constant 0 : index
    %c0_583 = arith.constant 0 : index
    %1223 = vector.load %arg7[%c0_582, %c0_583] : memref<1x128xf32, #tpu.memory_space<vmem>>, vector<1x128xf32>
    %1224 = vector.broadcast %1223 : vector<1x128xf32> to vector<8x128xf32>
    %1225 = arith.addf %1222, %1224 : vector<8x128xf32>
    %1226 = vector.extract_strided_slice %1225 {offsets = [0, 0], sizes = [8, 64], strides = [1, 1]} : vector<8x128xf32> to vector<8x64xf32>
    %1227 = arith.negf %1226 : vector<8x64xf32>
    %1228 = math.exp %1227 : vector<8x64xf32>
    %cst_584 = arith.constant 1.000000e+00 : f32
    %1229 = vector.broadcast %cst_584 : f32 to vector<8x64xf32>
    %1230 = arith.addf %1229, %1228 : vector<8x64xf32>
    %1231 = arith.divf %1229, %1230 : vector<8x64xf32>
    %1232 = vector.extract_strided_slice %1231 {offsets = [0, 0], sizes = [8, 32], strides = [1, 1]} : vector<8x64xf32> to vector<8x32xf32>
    %1233 = vector.extract_strided_slice %1231 {offsets = [0, 32], sizes = [8, 32], strides = [1, 1]} : vector<8x64xf32> to vector<8x32xf32>
    %1234 = vector.extract_strided_slice %1225 {offsets = [0, 64], sizes = [8, 32], strides = [1, 1]} : vector<8x128xf32> to vector<8x32xf32>
    %1235 = vector.extract_strided_slice %1225 {offsets = [0, 96], sizes = [8, 32], strides = [1, 1]} : vector<8x128xf32> to vector<8x32xf32>
    %1236 = arith.mulf %1232, %1235 : vector<8x32xf32>
    %1237 = arith.addf %1234, %1236 : vector<8x32xf32>
    %1238 = math.tanh %1237 : vector<8x32xf32>
    %cst_585 = arith.constant 1.000000e+00 : f32
    %1239 = vector.broadcast %cst_585 : f32 to vector<8x32xf32>
    %1240 = arith.subf %1239, %1233 : vector<8x32xf32>
    %1241 = arith.mulf %1240, %1238 : vector<8x32xf32>
    %1242 = arith.mulf %1233, %1176 : vector<8x32xf32>
    %1243 = arith.addf %1241, %1242 : vector<8x32xf32>
    %1244 = tpu.concatenate %1243, %1200 in 1 : vector<8x32xf32>, vector<8x32xf32> -> vector<8x64xf32>
    %c0_586 = arith.constant 0 : index
    %c0_587 = arith.constant 0 : index
    %1245 = vector.load %arg8[%c0_586, %c0_587] : memref<64x128xf32, #tpu.memory_space<vmem>>, vector<64x128xf32>
    %cst_588 = arith.constant dense<0.000000e+00> : vector<8x128xf32>
    %1246 = tpu.matmul %1244, %1245, %cst_588 {dimension_numbers = #tpu.dot_dimension_numbers<[1], [0], [0], [1], [0, 0, 1, 1], [], []>} : vector<8x64xf32>, vector<64x128xf32>, vector<8x128xf32> -> vector<8x128xf32>
    %c0_589 = arith.constant 0 : index
    %c0_590 = arith.constant 0 : index
    %1247 = vector.load %arg9[%c0_589, %c0_590] : memref<1x128xf32, #tpu.memory_space<vmem>>, vector<1x128xf32>
    %1248 = vector.broadcast %1247 : vector<1x128xf32> to vector<8x128xf32>
    %1249 = arith.addf %1246, %1248 : vector<8x128xf32>
    %1250 = vector.extract_strided_slice %1249 {offsets = [0, 0], sizes = [8, 64], strides = [1, 1]} : vector<8x128xf32> to vector<8x64xf32>
    %1251 = arith.negf %1250 : vector<8x64xf32>
    %1252 = math.exp %1251 : vector<8x64xf32>
    %cst_591 = arith.constant 1.000000e+00 : f32
    %1253 = vector.broadcast %cst_591 : f32 to vector<8x64xf32>
    %1254 = arith.addf %1253, %1252 : vector<8x64xf32>
    %1255 = arith.divf %1253, %1254 : vector<8x64xf32>
    %1256 = vector.extract_strided_slice %1255 {offsets = [0, 0], sizes = [8, 32], strides = [1, 1]} : vector<8x64xf32> to vector<8x32xf32>
    %1257 = vector.extract_strided_slice %1255 {offsets = [0, 32], sizes = [8, 32], strides = [1, 1]} : vector<8x64xf32> to vector<8x32xf32>
    %1258 = vector.extract_strided_slice %1249 {offsets = [0, 64], sizes = [8, 32], strides = [1, 1]} : vector<8x128xf32> to vector<8x32xf32>
    %1259 = vector.extract_strided_slice %1249 {offsets = [0, 96], sizes = [8, 32], strides = [1, 1]} : vector<8x128xf32> to vector<8x32xf32>
    %1260 = arith.mulf %1256, %1259 : vector<8x32xf32>
    %1261 = arith.addf %1258, %1260 : vector<8x32xf32>
    %1262 = math.tanh %1261 : vector<8x32xf32>
    %cst_592 = arith.constant 1.000000e+00 : f32
    %1263 = vector.broadcast %cst_592 : f32 to vector<8x32xf32>
    %1264 = arith.subf %1263, %1257 : vector<8x32xf32>
    %1265 = arith.mulf %1264, %1262 : vector<8x32xf32>
    %1266 = arith.mulf %1257, %1200 : vector<8x32xf32>
    %1267 = arith.addf %1265, %1266 : vector<8x32xf32>
    %c0_593 = arith.constant 0 : index
    %c0_594 = arith.constant 0 : index
    %1268 = vector.load %arg10[%c0_593, %c0_594] : memref<32x32xf32, #tpu.memory_space<vmem>>, vector<32x32xf32>
    %cst_595 = arith.constant dense<0.000000e+00> : vector<8x32xf32>
    %1269 = tpu.matmul %1267, %1268, %cst_595 {dimension_numbers = #tpu.dot_dimension_numbers<[1], [0], [0], [1], [0, 0, 1, 1], [], []>} : vector<8x32xf32>, vector<32x32xf32>, vector<8x32xf32> -> vector<8x32xf32>
    %c0_596 = arith.constant 0 : index
    %c0_597 = arith.constant 0 : index
    %1270 = vector.load %arg11[%c0_596, %c0_597] : memref<1x32xf32, #tpu.memory_space<vmem>>, vector<1x32xf32>
    %1271 = vector.broadcast %1270 : vector<1x32xf32> to vector<8x32xf32>
    %1272 = arith.addf %1269, %1271 : vector<8x32xf32>
    %cst_598 = arith.constant 0.000000e+00 : f32
    %1273 = vector.broadcast %cst_598 : f32 to vector<8x32xf32>
    %1274 = arith.maximumf %1272, %1273 : vector<8x32xf32>
    %c0_599 = arith.constant 0 : index
    %c0_600 = arith.constant 0 : index
    %1275 = vector.load %arg12[%c0_599, %c0_600] : memref<32x32xf32, #tpu.memory_space<vmem>>, vector<32x32xf32>
    %cst_601 = arith.constant dense<0.000000e+00> : vector<8x32xf32>
    %1276 = tpu.matmul %1274, %1275, %cst_601 {dimension_numbers = #tpu.dot_dimension_numbers<[1], [0], [0], [1], [0, 0, 1, 1], [], []>} : vector<8x32xf32>, vector<32x32xf32>, vector<8x32xf32> -> vector<8x32xf32>
    %c0_602 = arith.constant 0 : index
    %c0_603 = arith.constant 0 : index
    %1277 = vector.load %arg13[%c0_602, %c0_603] : memref<1x32xf32, #tpu.memory_space<vmem>>, vector<1x32xf32>
    %1278 = vector.broadcast %1277 : vector<1x32xf32> to vector<8x32xf32>
    %1279 = arith.addf %1276, %1278 : vector<8x32xf32>
    %cst_604 = arith.constant 0.000000e+00 : f32
    %1280 = vector.broadcast %cst_604 : f32 to vector<8x32xf32>
    %1281 = arith.maximumf %1279, %1280 : vector<8x32xf32>
    %c0_605 = arith.constant 0 : index
    %c0_606 = arith.constant 0 : index
    %1282 = vector.load %arg14[%c0_605, %c0_606] : memref<32x8xf32, #tpu.memory_space<vmem>>, vector<32x8xf32>
    %cst_607 = arith.constant dense<0.000000e+00> : vector<8x8xf32>
    %1283 = tpu.matmul %1281, %1282, %cst_607 {dimension_numbers = #tpu.dot_dimension_numbers<[1], [0], [0], [1], [0, 0, 1, 1], [], []>} : vector<8x32xf32>, vector<32x8xf32>, vector<8x8xf32> -> vector<8x8xf32>
    %c0_608 = arith.constant 0 : index
    %c0_609 = arith.constant 0 : index
    %1284 = vector.load %arg15[%c0_608, %c0_609] : memref<1x8xf32, #tpu.memory_space<vmem>>, vector<1x8xf32>
    %1285 = vector.broadcast %1284 : vector<1x8xf32> to vector<8x8xf32>
    %1286 = arith.addf %1283, %1285 : vector<8x8xf32>
    %1287 = tpu.concatenate %1152, %1219, %1286 in 1 : vector<8x8xf32>, vector<8x8xf32>, vector<8x8xf32> -> vector<8x24xf32>
    %1288 = arith.index_cast %c5_i32 : i32 to index
    %c0_610 = arith.constant 0 : index
    %c0_611 = arith.constant 0 : index
    %1289 = vector.load %arg16[%1288, %c0_610, %c0_611] : memref<6x8x24xf32, #tpu.memory_space<vmem>>, vector<1x8x24xf32>
    %1290 = vector.shape_cast %1289 : vector<1x8x24xf32> to vector<8x24xf32>
    %1291 = vector.shape_cast %1287 : vector<8x24xf32> to vector<1x8x24xf32>
    tpu.vector_store %arg16[%1288, %c0_610, %c0_611], %1291 {strides = array<i32>} : memref<6x8x24xf32, #tpu.memory_space<vmem>>, vector<1x8x24xf32>,
    %c6_i32 = arith.constant 6 : i32
    %1292 = vector.shape_cast %1109 : vector<8x32xf32> to vector<1x8x32xf32>
    %1293 = vector.shape_cast %1133 : vector<8x32xf32> to vector<1x8x32xf32>
    %1294 = tpu.concatenate %1292, %1293 in 0 : vector<1x8x32xf32>, vector<1x8x32xf32> -> vector<2x8x32xf32>
    %c0_612 = arith.constant 0 : index
    %c0_613 = arith.constant 0 : index
    %c0_614 = arith.constant 0 : index
    %1295 = vector.load %arg17[%c0_612, %c0_613, %c0_614] : memref<2x8x32xf32, #tpu.memory_space<vmem>>, vector<2x8x32xf32>
    tpu.vector_store %arg17[%c0_612, %c0_613, %c0_614], %1294 {strides = array<i32>} : memref<2x8x32xf32, #tpu.memory_space<vmem>>, vector<2x8x32xf32>,
    return
  }
  func.func @transform_0(%arg0: i32) -> (i32, i32, i32) {
    %c0_i32 = arith.constant 0 : i32
    %c0_i32_0 = arith.constant 0 : i32
    %c0_i32_1 = arith.constant 0 : i32
    %c0_i32_2 = arith.constant 0 : i32
    return %c0_i32, %c0_i32_0, %c0_i32_1 : i32, i32, i32
  }
  func.func @transform_1(%arg0: i32) -> (i32, i32) {
    %c0_i32 = arith.constant 0 : i32
    %c0_i32_0 = arith.constant 0 : i32
    %c0_i32_1 = arith.constant 0 : i32
    return %c0_i32, %c0_i32_0 : i32, i32
  }
  func.func @transform_2(%arg0: i32) -> (i32, i32) {
    %c0_i32 = arith.constant 0 : i32
    %c0_i32_0 = arith.constant 0 : i32
    %c0_i32_1 = arith.constant 0 : i32
    return %c0_i32, %c0_i32_0 : i32, i32
  }
  func.func @transform_3(%arg0: i32) -> (i32, i32) {
    %c0_i32 = arith.constant 0 : i32
    %c0_i32_0 = arith.constant 0 : i32
    %c0_i32_1 = arith.constant 0 : i32
    return %c0_i32, %c0_i32_0 : i32, i32
  }
  func.func @transform_4(%arg0: i32) -> (i32, i32) {
    %c0_i32 = arith.constant 0 : i32
    %c0_i32_0 = arith.constant 0 : i32
    %c0_i32_1 = arith.constant 0 : i32
    return %c0_i32, %c0_i32_0 : i32, i32
  }
  func.func @transform_5(%arg0: i32) -> (i32, i32) {
    %c0_i32 = arith.constant 0 : i32
    %c0_i32_0 = arith.constant 0 : i32
    %c0_i32_1 = arith.constant 0 : i32
    return %c0_i32, %c0_i32_0 : i32, i32
  }
  func.func @transform_6(%arg0: i32) -> (i32, i32) {
    %c0_i32 = arith.constant 0 : i32
    %c0_i32_0 = arith.constant 0 : i32
    %c0_i32_1 = arith.constant 0 : i32
    return %c0_i32, %c0_i32_0 : i32, i32
  }
  func.func @transform_7(%arg0: i32) -> (i32, i32) {
    %c0_i32 = arith.constant 0 : i32
    %c0_i32_0 = arith.constant 0 : i32
    %c0_i32_1 = arith.constant 0 : i32
    return %c0_i32, %c0_i32_0 : i32, i32
  }
  func.func @transform_8(%arg0: i32) -> (i32, i32) {
    %c0_i32 = arith.constant 0 : i32
    %c0_i32_0 = arith.constant 0 : i32
    %c0_i32_1 = arith.constant 0 : i32
    return %c0_i32, %c0_i32_0 : i32, i32
  }
  func.func @transform_9(%arg0: i32) -> (i32, i32) {
    %c0_i32 = arith.constant 0 : i32
    %c0_i32_0 = arith.constant 0 : i32
    %c0_i32_1 = arith.constant 0 : i32
    return %c0_i32, %c0_i32_0 : i32, i32
  }
  func.func @transform_10(%arg0: i32) -> (i32, i32) {
    %c0_i32 = arith.constant 0 : i32
    %c0_i32_0 = arith.constant 0 : i32
    %c0_i32_1 = arith.constant 0 : i32
    return %c0_i32, %c0_i32_0 : i32, i32
  }
  func.func @transform_11(%arg0: i32) -> (i32, i32) {
    %c0_i32 = arith.constant 0 : i32
    %c0_i32_0 = arith.constant 0 : i32
    %c0_i32_1 = arith.constant 0 : i32
    return %c0_i32, %c0_i32_0 : i32, i32
  }
  func.func @transform_12(%arg0: i32) -> (i32, i32) {
    %c0_i32 = arith.constant 0 : i32
    %c0_i32_0 = arith.constant 0 : i32
    %c0_i32_1 = arith.constant 0 : i32
    return %c0_i32, %c0_i32_0 : i32, i32
  }
  func.func @transform_13(%arg0: i32) -> (i32, i32) {
    %c0_i32 = arith.constant 0 : i32
    %c0_i32_0 = arith.constant 0 : i32
    %c0_i32_1 = arith.constant 0 : i32
    return %c0_i32, %c0_i32_0 : i32, i32
  }
  func.func @transform_14(%arg0: i32) -> (i32, i32) {
    %c0_i32 = arith.constant 0 : i32
    %c0_i32_0 = arith.constant 0 : i32
    %c0_i32_1 = arith.constant 0 : i32
    return %c0_i32, %c0_i32_0 : i32, i32
  }
  func.func @transform_15(%arg0: i32) -> (i32, i32, i32) {
    %c0_i32 = arith.constant 0 : i32
    %c0_i32_0 = arith.constant 0 : i32
    %c0_i32_1 = arith.constant 0 : i32
    %c0_i32_2 = arith.constant 0 : i32
    return %c0_i32, %c0_i32_0, %c0_i32_1 : i32, i32, i32
  }
  func.func @transform_16(%arg0: i32) -> (i32, i32, i32) {
    %c0_i32 = arith.constant 0 : i32
    %c0_i32_0 = arith.constant 0 : i32
    %c0_i32_1 = arith.constant 0 : i32
    %c0_i32_2 = arith.constant 0 : i32
    return %c0_i32, %c0_i32_0, %c0_i32_1 : i32, i32, i32
  }
}

</mosaic_0001>

<bundles_post_ra>
// kernel: p_rnn_forward.1
= control target key start
LH: loop header
LB: loop body
LE: loop exit
PB: predicated region body
PF: predicated region fallthrough
CT: control target
= control target key end

     0   :  { %s13746_s0 = inlined_call_operand.hbm [shape: f32[6,8,8], index: 0, kind: input, shape index: {}]   ;;  %s13747_s1 = inlined_call_operand.hbm [shape: f32[8,96], index: 1, kind: input, shape index: {}]   ;;  %s13748_s2 = inlined_call_operand.vmem [shape: f32[1,96], index: 2, kind: input, shape index: {}]   ;;  %s13749_s3 = inlined_call_operand.hbm [shape: f32[32,96], index: 3, kind: input, shape index: {}]   ;;  %s13750_s4 = inlined_call_operand.vmem [shape: f32[1,32], index: 4, kind: input, shape index: {}]   ;;  %s13751_s5 = inlined_call_operand.hbm [shape: f32[40,128], index: 5, kind: input, shape index: {}]   ;;  %s13752_s6 = inlined_call_operand.hbm [shape: f32[1,128], index: 6, kind: input, shape index: {}]   ;;  %s13753_s7 = inlined_call_operand.vmem [shape: f32[64,128], index: 7, kind: input, shape index: {}]   ;;  %s13754_s8 = inlined_call_operand.hbm [shape: f32[1,128], index: 8, kind: input, shape index: {}]   ;;  %s13755_s9 = inlined_call_operand.hbm [shape: f32[32,32], index: 9, kind: input, shape index: {}]   ;;  %s13756_s10 = inlined_call_operand.vmem [shape: f32[1,32], index: 10, kind: input, shape index: {}]   ;;  %s13757_s11 = inlined_call_operand.hbm [shape: f32[32,32], index: 11, kind: input, shape index: {}]   ;;  %s13758_s12 = inlined_call_operand.vmem [shape: f32[1,32], index: 12, kind: input, shape index: {}]   ;;  %s13759_s13 = inlined_call_operand.vmem [shape: f32[32,8], index: 13, kind: input, shape index: {}]   ;;  %s13760_s14 = inlined_call_operand.vmem [shape: f32[1,8], index: 14, kind: input, shape index: {}]   ;;  %s13761_s15 = inlined_call_operand.vmem [shape: f32[6,8,24], index: 15, kind: output, shape index: {0}]   ;;  %s13762_s16 = inlined_call_operand.hbm [shape: f32[2,8,32], index: 16, kind: output, shape index: {1}]  }
   0x1   :  { %13764 = sst [smem:[#allocation23_spill]] %s13746_s0 }
   0x2   :  { %22 = vsyncpa [#allocation3], 0 }
   0x3   :  { %23 = vsyncpa [#allocation6], 0 }
   0x4   :  { %24 = vsyncpa [#allocation9], 0 }
   0x5   :  { %25 = vsyncpa [#allocation12], 0 }
   0x6   :  { %26 = vsyncpa [#allocation15], 0 }
   0x7   :  { %27 = vsyncpa [#allocation4], 0  ;;  %s11900_s21 = smov [#allocation5]   ;;  %s11690_s25 = scalar_lea.hbm %s13747_s1, 128 }
   0x8   :  { %s46_s22 = sshll.u32 %s11900_s21, 4  ;;  %p11691_p0 = scmp.ne.s32.totalorder %s13747_s1, %s11690_s25  ;;  %s47_s22 = int_to_ptr.vmem [resolvable:$true] %s46_s22 }
   0x9   :  { %p11694_p1 = scmp.lt.u32.totalorder %s11690_s25, %s13747_s1 }
   0xb   :  { %p11696_p2 = pnand %p11694_p1, %p11691_p0 }
   0xd   :  { %11699 = shalt.err (!%p11696_p2)
}
   0xe   :  { %s11700_s30 = scalar_lea.vmem %s47_s22, 128  ;;  %p11705_p4 = scmp.lt.s32.totalorder %s47_s22, %s47_s22 }
   0xf   :  { %p11701_p3 = scmp.ne.s32.totalorder %s47_s22, %s11700_s30  ;;  %p11706_p5 = scmp.lt.s32.totalorder %s11700_s30, %s11700_s30 }
  0x11   :  { %p11707_p6 = por %p11706_p5, %p11705_p4 }
  0x13   :  { %p11708_p7 = pnand %p11707_p6, %p11701_p3 }
  0x15   :  { %11711 = shalt.err (!%p11708_p7)
}
  0x16   :  { %49 = dma.hbm_to_vmem [thread:$0]  %s13747_s1, 128, %s47_s22, [#allocation6]  }
  0x17   :  { %s11901_s18 = smov [#allocation8]   ;;  %s11902_s20 = smov [#allocation11]  }
  0x18   :  { %s71_s19 = sshll.u32 %s11901_s18, 4  ;;  %s96_s21 = sshll.u32 %s11902_s20, 4  ;;  %s72_s19 = int_to_ptr.vmem [resolvable:$true] %s71_s19  ;;  %s97_s21 = int_to_ptr.vmem [resolvable:$true] %s96_s21 }
  0x19   :  { %s11712_s25 = scalar_lea.hbm %s13751_s5, 640 }
  0x1a   :  { %p11713_p8 = scmp.ne.s32.totalorder %s13751_s5, %s11712_s25  ;;  %p11716_p9 = scmp.lt.u32.totalorder %s11712_s25, %s13751_s5 }
  0x1c   :  { %p11718_p10 = pnand %p11716_p9, %p11713_p8 }
  0x1e   :  { %11721 = shalt.err (!%p11718_p10)
}
  0x1f   :  { %s11722_s1 = scalar_lea.vmem %s72_s19, 640  ;;  %p11727_p12 = scmp.lt.s32.totalorder %s72_s19, %s72_s19 }
  0x20   :  { %p11723_p11 = scmp.ne.s32.totalorder %s72_s19, %s11722_s1  ;;  %p11728_p13 = scmp.lt.s32.totalorder %s11722_s1, %s11722_s1 }
  0x22   :  { %p11729_p0 = por %p11728_p13, %p11727_p12 }
  0x24   :  { %p11730_p1 = pnand %p11729_p0, %p11723_p11 }
  0x26   :  { %11733 = shalt.err (!%p11730_p1)
}
  0x27   :  { %s11903_s22 = smov 128   ;;  %s11904_s30 = smov 8  }
  0x28   :  { %77 = dma.hbm_to_vmem [thread:$0]  %s13751_s5, 640, %s72_s19, [#allocation9], %s11903_s22, %s11903_s22, %s11904_s30  }
  0x29   :  { %s11734_s23 = scalar_lea.hbm %s13754_s8, 16 }
  0x2a   :  { %p11735_p2 = scmp.ne.s32.totalorder %s13754_s8, %s11734_s23  ;;  %p11738_p3 = scmp.lt.u32.totalorder %s11734_s23, %s13754_s8 }
  0x2c   :  { %p11740_p4 = pnand %p11738_p3, %p11735_p2 }
  0x2e   :  { %11743 = shalt.err (!%p11740_p4)
}
  0x2f   :  { %s11744_s28 = scalar_lea.vmem %s97_s21, 16  ;;  %s11748_s29 = scalar_lea.vmem %s97_s21, 32 }
  0x30   :  { %p11745_p5 = scmp.ne.s32.totalorder %s97_s21, %s11744_s28  ;;  %p11749_p6 = scmp.lt.s32.totalorder %s97_s21, %s97_s21 }
  0x31   :  { %p11750_p7 = scmp.lt.s32.totalorder %s11748_s29, %s11744_s28 }
  0x33   :  { %p11751_p8 = por %p11750_p7, %p11749_p6 }
  0x35   :  { %p11752_p9 = pnand %p11751_p8, %p11745_p5 }
  0x37   :  { %11755 = shalt.err (!%p11752_p9)
}
  0x38   :  { %99 = dma.hbm_to_vmem [thread:$0]  %s13754_s8, 16, %s97_s21, [#allocation12]  }
  0x39   :  { %s11905_s1 = smov [#allocation2]   ;;  %s11906_s17 = smov [#allocation7]  }
  0x3a   :  { %s33_s0 = sshll.u32 %s11905_s1, 4  ;;  %s57_s18 = sshll.u32 %s11906_s17, 4  ;;  %s34_s0 = int_to_ptr.vmem [resolvable:$true] %s33_s0  ;;  %s58_s18 = int_to_ptr.vmem [resolvable:$true] %s57_s18 }
  0x3b   :  { %s13765_s24 = sld [smem:[#allocation23_spill]] }
  0x41   :  { %s11756_s25 = scalar_lea.hbm %s13765_s24, 768 }
  0x42   :  { %p11757_p10 = scmp.ne.s32.totalorder %s13765_s24, %s11756_s25  ;;  %p11760_p11 = scmp.lt.u32.totalorder %s11756_s25, %s13765_s24 }
  0x44   :  { %p11762_p12 = pnand %p11760_p11, %p11757_p10 }
  0x46   :  { %11765 = shalt.err (!%p11762_p12)
}
  0x47   :  { %s11766_s8 = scalar_lea.vmem %s34_s0, 768  ;;  %p11771_p0 = scmp.lt.s32.totalorder %s34_s0, %s34_s0 }
  0x48   :  { %p11767_p13 = scmp.ne.s32.totalorder %s34_s0, %s11766_s8  ;;  %p11772_p1 = scmp.lt.s32.totalorder %s11766_s8, %s11766_s8 }
  0x4a   :  { %p11773_p2 = por %p11772_p1, %p11771_p0 }
  0x4c   :  { %p11774_p3 = pnand %p11773_p2, %p11767_p13 }
  0x4e   :  { %11777 = shalt.err (!%p11774_p3)
}
  0x4f   :  { %39 = dma.hbm_to_vmem [thread:$0]  %s13765_s24, 768, %s34_s0, [#allocation3], %s11903_s22, %s11903_s22, %s11904_s30  }
  0x50   :  { %s11778_s17 = scalar_lea.hbm %s13749_s3, 512 }
  0x51   :  { %p11779_p4 = scmp.ne.s32.totalorder %s13749_s3, %s11778_s17  ;;  %p11782_p5 = scmp.lt.u32.totalorder %s11778_s17, %s13749_s3 }
  0x53   :  { %p11784_p6 = pnand %p11782_p5, %p11779_p4 }
  0x55   :  { %11787 = shalt.err (!%p11784_p6)
}
  0x56   :  { %s11788_s27 = scalar_lea.vmem %s58_s18, 512  ;;  %p11793_p8 = scmp.lt.s32.totalorder %s58_s18, %s58_s18 }
  0x57   :  { %p11789_p7 = scmp.ne.s32.totalorder %s58_s18, %s11788_s27  ;;  %p11794_p9 = scmp.lt.s32.totalorder %s11788_s27, %s11788_s27 }
  0x59   :  { %p11795_p10 = por %p11794_p9, %p11793_p8 }
  0x5b   :  { %p11796_p11 = pnand %p11795_p10, %p11789_p7 }
  0x5d   :  { %11799 = shalt.err (!%p11796_p11)
}
  0x5e   :  { %63 = dma.hbm_to_vmem [thread:$0]  %s13749_s3, 512, %s58_s18, [#allocation6], %s11903_s22, %s11903_s22, %s11904_s30  }
  0x5f   :  { %s11907_s28 = smov [#allocation10]   ;;  %s11908_s8 = smov [#allocation13]  }
  0x60   :  { %s84_s29 = sshll.u32 %s11907_s28, 4  ;;  %s105_s21 = sshll.u32 %s11908_s8, 4  ;;  %s85_s29 = int_to_ptr.vmem [resolvable:$true] %s84_s29  ;;  %s106_s21 = int_to_ptr.vmem [resolvable:$true] %s105_s21 }
  0x61   :  { %s11800_s1 = scalar_lea.hbm %s13752_s6, 16 }
  0x62   :  { %p11801_p12 = scmp.ne.s32.totalorder %s13752_s6, %s11800_s1  ;;  %p11804_p13 = scmp.lt.u32.totalorder %s11800_s1, %s13752_s6 }
  0x64   :  { %p11806_p0 = pnand %p11804_p13, %p11801_p12 }
  0x66   :  { %11809 = shalt.err (!%p11806_p0)
}
  0x67   :  { %s11810_s3 = scalar_lea.vmem %s85_s29, 16  ;;  %s11814_s18 = scalar_lea.vmem %s85_s29, 32 }
  0x68   :  { %p11811_p1 = scmp.ne.s32.totalorder %s85_s29, %s11810_s3  ;;  %p11815_p2 = scmp.lt.s32.totalorder %s85_s29, %s85_s29 }
  0x69   :  { %p11816_p3 = scmp.lt.s32.totalorder %s11814_s18, %s11810_s3 }
  0x6b   :  { %p11817_p4 = por %p11816_p3, %p11815_p2 }
  0x6d   :  { %p11818_p5 = pnand %p11817_p4, %p11811_p1 }
  0x6f   :  { %11821 = shalt.err (!%p11818_p5)
}
  0x70   :  { %87 = dma.hbm_to_vmem [thread:$0]  %s13752_s6, 16, %s85_s29, [#allocation9]  }
  0x71   :  { %s11822_s28 = scalar_lea.hbm %s13755_s9, 512 }
  0x72   :  { %p11823_p6 = scmp.ne.s32.totalorder %s13755_s9, %s11822_s28  ;;  %p11826_p7 = scmp.lt.u32.totalorder %s11822_s28, %s13755_s9 }
  0x74   :  { %p11828_p8 = pnand %p11826_p7, %p11823_p6 }
  0x76   :  { %11831 = shalt.err (!%p11828_p8)
}
  0x77   :  { %s11832_s17 = scalar_lea.vmem %s106_s21, 512  ;;  %p11837_p10 = scmp.lt.s32.totalorder %s106_s21, %s106_s21 }
  0x78   :  { %p11833_p9 = scmp.ne.s32.totalorder %s106_s21, %s11832_s17  ;;  %p11838_p11 = scmp.lt.s32.totalorder %s11832_s17, %s11832_s17 }
  0x7a   :  { %p11839_p12 = por %p11838_p11, %p11837_p10 }
  0x7c   :  { %p11840_p13 = pnand %p11839_p12, %p11833_p9 }
  0x7e   :  { %11843 = shalt.err (!%p11840_p13)
}
  0x7f   :  { %111 = dma.hbm_to_vmem [thread:$0]  %s13755_s9, 512, %s106_s21, [#allocation12], %s11903_s22, %s11903_s22, %s11904_s30  }
  0x80   :  { %s11909_s20 = smov [#allocation14]   ;;  %s11844_s18 = scalar_lea.hbm %s13757_s11, 512 }
  0x81   :  { %s119_s23 = sshll.u32 %s11909_s20, 4  ;;  %p11845_p0 = scmp.ne.s32.totalorder %s13757_s11, %s11844_s18  ;;  %s120_s23 = int_to_ptr.vmem [resolvable:$true] %s119_s23 }
  0x82   :  { %p11848_p1 = scmp.lt.u32.totalorder %s11844_s18, %s13757_s11 }
  0x84   :  { %p11850_p2 = pnand %p11848_p1, %p11845_p0 }
  0x86   :  { %11853 = shalt.err (!%p11850_p2)
}
  0x87   :  { %s11854_s28 = scalar_lea.vmem %s120_s23, 512  ;;  %p11859_p4 = scmp.lt.s32.totalorder %s120_s23, %s120_s23 }
  0x88   :  { %p11855_p3 = scmp.ne.s32.totalorder %s120_s23, %s11854_s28  ;;  %p11860_p5 = scmp.lt.s32.totalorder %s11854_s28, %s11854_s28 }
  0x8a   :  { %p11861_p6 = por %p11860_p5, %p11859_p4 }
  0x8c   :  { %p11862_p7 = pnand %p11861_p6, %p11855_p3 }
  0x8e   :  { %11865 = shalt.err (!%p11862_p7)
}
  0x8f   :  { %125 = dma.hbm_to_vmem [thread:$0]  %s13757_s11, 512, %s120_s23, [#allocation15], %s11903_s22, %s11903_s22, %s11904_s30  }
  0x90   :  { %11888 = dma.done.wait [#allocation3], 768  }
  0x91   :  { %11889 = vsyncadd [#allocation3], 4294966528 }
  0x92   :  { %11890 = dma.done.wait [#allocation6], 640  }
  0x93   :  { %11891 = vsyncadd [#allocation6], 4294966656 }
  0x94   :  { %11892 = dma.done.wait [#allocation9], 656  }
  0x95   :  { %11893 = vsyncadd [#allocation9], 4294966640 }
  0x96   :  { %11894 = dma.done.wait [#allocation12], 528  }
  0x97   :  { %11895 = vsyncadd [#allocation12], 4294966768 }
  0x98   :  { %11896 = dma.done.wait [#allocation15], 512  }
  0x99   :  { %11897 = vsyncadd [#allocation15], 4294966784  ;;  %v11910_v0 = vmov 0.0|0.0   ;;  %v11911_v1 = vmov 0.0   ;;  %vm11912_vm0 = vmmov 0   ;;  %vm165_vm1 = vcmask 64512  }
  0x9a   :  { %10795 = vmatprep.subr.bf16.mxu1 %v11910_v0  ;;  %9607 = vmatprep.subr.mxu0 %v11911_v1  ;;  %v239_v2 = vld [vmem:[#allocation7] sm:$0xff]  ;;  %v240_v3 = vld [vmem:[#allocation7 + $0x8] sm:$0xff]  ;;  %v12121_v4 = vld [vmem:[#allocation5] sm:$0xff]  ;;  %s11913_s5 = smov 64   ;;  %s11914_s8 = smov 96   ;;  %vm243_vm2 = vcmask 261120  }
  0x9b   :  { %9609 = vmatprep.mubr.msk.f32.mxu0 %vm11912_vm0, %v11911_v1  ;;  %9620 = vmatprep.mubr.msk.f32.mxu1 %vm11912_vm0, %v11911_v1  ;;  %v12123_v5 = vpack.c.bf16 %v240_v3, %v239_v2  ;;  %v241_v6 = vld [vmem:[#allocation7 + $0x10] sm:$0xff]  ;;  %v242_v7 = vld [vmem:[#allocation7 + $0x18] sm:$0xff]  ;;  %v156_v8 = vld [vmem:[#allocation2] sm:$0xff]  ;;  %vm373_vm3 = vcmask 523264   ;;  %s11915_s19 = smov 32   ;;  %s11916_s1 = smov 104  }
  0x9c   :  { %9608 = vmatpush3.msra.mxu0 %v12121_v4  ;;  %v12130_v9 = vld [vmem:[%s13750_s4] ss:$0 sm:$0xff]  ;;  %v12134_v10 = vpack.c.bf16 %v242_v7, %v241_v6  ;;  %v359_v29 = vld [vmem:[%s13753_s7 + $0x8] sm:$0xff]  ;;  %v360_v30 = vld [vmem:[%s13753_s7 + $0x10] sm:$0xff]  ;;  %vm744_vm4 = vcmask 326656   ;;  %vm1606_vm5 = vcmask 130048  }
  0x9d   :  { %9610 = vmatmul.mubr.msk.f32.vlgmr.msra.gmra.mrb[0].mxu0 %vm165_vm1, %v156_v8  ;;  %10801 = vmatprep.subr.bf16.mxu0 %v11910_v0  ;;  %v12150_v17 = vld [vmem:[%s13748_s2] ss:$0 sm:$0xff]  ;;  %v361_v32 = vld [vmem:[%s13753_s7 + $0x18] sm:$0xff]  ;;  %v363_v35 = vld [vmem:[%s13753_s7 + $0x28] sm:$0xff]  ;;  %vm1608_vm6 = vcmask 195584   ;;  %s11918_s17 = smov [#allocation16]  }
  0x9e   :  { %10797 = vmatpush3.bf16.msra.mxu1 %v12123_v5  ;;  %330 = vrot.lane.b32.xlu0 %v12130_v9, %s11913_s5  ;;  %v358_v28 = vld [vmem:[%s13753_s7] sm:$0xff]  ;;  %v12169_v33 = vpack.c.bf16 %v361_v32, %v360_v30  ;;  %v364_v38 = vld [vmem:[%s13753_s7 + $0x30] sm:$0xff]  ;;  %v365_v39 = vld [vmem:[%s13753_s7 + $0x38] sm:$0xff] }
  0x9f   :  { %10798 = vmatprep.subr.bf16.mxu1 %v11910_v0  ;;  %9639 = vmatprep.mubr.msk.f32.mxu0 %vm11912_vm0, %v11911_v1  ;;  %v12163_v31 = vpack.c.bf16 %v359_v29, %v358_v28  ;;  %v362_v34 = vld [vmem:[%s13753_s7 + $0x20] sm:$0xff]  ;;  %v12190_v40 = vpack.c.bf16 %v365_v39, %v364_v38  ;;  %v473_v61 = vld [vmem:[#allocation13 + $0x8] sm:$0xff]  ;;  %v474_v62 = vld [vmem:[#allocation13 + $0x10] sm:$0xff] }
  0xa0   :  { %v12179_v36 = vpack.c.bf16 %v363_v35, %v362_v34  ;;  %v12206_v48 = vld [vmem:[#allocation11] ss:$0 sm:$0xff]  ;;  %v472_v60 = vld [vmem:[#allocation13] sm:$0xff]  ;;  %v646_v30 = vld [vmem:[%s13759_s13 + $0x10] sm:$0xff] }
  0xa1   :  { %10803 = vmatpush3.bf16.msra.mxu0 %v12163_v31  ;;  %v12211_v63 = vpack.c.bf16 %v473_v61, %v472_v60  ;;  %v475_v2 = vld [vmem:[#allocation13 + $0x18] sm:$0xff]  ;;  %v734_v38 = vld [vmem:[#allocation8 + $0x10] sm:$0xff] }
  0xa2   :  { %10800 = vmatpush3.bf16.msra.mxu1 %v12134_v10  ;;  %10804 = vmatprep.subr.bf16.mxu0 %v11910_v0  ;;  %v12214_v3 = vpack.c.bf16 %v475_v2, %v474_v62  ;;  %v647_v32 = vld [vmem:[%s13759_s13 + $0x18] sm:$0xff] }
  0xa3   :  { %10813 = vmatprep.subr.bf16.mxu1 %v11910_v0  ;;  %v12262_v34 = vpack.c.bf16 %v647_v32, %v646_v30  ;;  %v732_v35 = vld [vmem:[#allocation8] sm:$0xff] }
  0xa5   :  { %9621 = vmatmul.mubr.f32.vlgmr.msra.gmra.mrb[0].mxu1 %v11911_v1  ;;  %10806 = vmatpush3.bf16.msra.mxu0 %v12169_v33 }
  0xa6   :  { %9650 = vmatprep.mubr.msk.f32.mxu1 %vm11912_vm0, %v11911_v1  ;;  %10807 = vmatprep.subr.bf16.mxu0 %v11910_v0 }
  0xa7   :  { %10815 = vmatpush3.bf16.msra.mxu1 %v12211_v63 }
  0xa8   :  { %10816 = vmatprep.subr.bf16.mxu1 %v11910_v0 }
  0xa9   :  { %10809 = vmatpush3.bf16.msra.mxu0 %v12179_v36 }
  0xaa   :  { %10810 = vmatprep.subr.bf16.mxu0 %v11910_v0 }
  0xab   :  { %10818 = vmatpush3.bf16.msra.mxu1 %v12214_v3 }
  0xac   :  { %10819 = vmatprep.subr.bf16.mxu1 %v11910_v0 }
  0xad   :  { %10812 = vmatpush3.bf16.msra.mxu0 %v12190_v40 }
  0xae   :  { %10825 = vmatprep.subr.bf16.mxu0 %v11910_v0 }
 0x110   :  { %v331_v13 = vpop.permute.xlu0 %330 }
 0x170   :  { %v235_v11 = vpop.f32.mrb[0].mxu0 }
 0x171   :  { %v9611_v12 = vpop.f32.mrb[1].mxu0  ;;  %v236_v18 = vadd.f32 %v12150_v17, %v235_v11 }
 0x178   :  { %v313_v14 = vpop.f32.mrb[0].mxu1 }
 0x179   :  { %v333_v15 = vadd.f32 %v331_v13, %v313_v14  ;;  %v9622_v16 = vpop.f32.mrb[1].mxu1  ;;  %v317_v19 = vadd.f32 %v313_v14, %v236_v18  ;;  %v559_v14 = vld [vmem:[#allocation14] sm:$0xff] }
 0x17b   :  { %335 = vrot.lane.b32.xlu0 %v333_v15, %s11913_s5  ;;  %v8885_v20 = vmul.f32 -1.442695, %v317_v19  ;;  %v560_v15 = vld [vmem:[#allocation14 + $0x8] sm:$0xff]  ;;  %v561_v19 = vld [vmem:[#allocation14 + $0x10] sm:$0xff] }
 0x17c   :  { %v12226_v16 = vpack.c.bf16 %v560_v15, %v559_v14 }
 0x17d   :  { %11462 = vpow2.f32 %v8885_v20  ;;  %v562_v20 = vld [vmem:[#allocation14 + $0x18] sm:$0xff] }
 0x187   :  { %v11463_v21 = vpop.eup %11462 }
 0x188   :  { %v321_v22 = vadd.f32 1.0, %v11463_v21  ;;  %v12233_v21 = vpack.c.bf16 %v562_v20, %v561_v19 }
 0x18a   :  { %11464 = vrcp.f32 %v321_v22  ;;  %v644_v22 = vld [vmem:[%s13759_s13] sm:$0xff] }
 0x194   :  { %v11465_v23 = vpop.eup %11464 }
 0x195   :  { %v345_v41 = vsub.f32 1.0, %v11465_v23  ;;  %v351_v43 = vmul.f32 0.0, %v11465_v23 }
 0x1ed   :  { %v336_v24 = vpop.permute.xlu0 %335 }
 0x1ee   :  { %v338_v25 = vmul.f32 %v11465_v23, %v336_v24  ;;  %v645_v23 = vld [vmem:[%s13759_s13 + $0x8] sm:$0xff] }
 0x1ef   :  { %v12243_v24 = vpack.c.bf16 %v645_v23, %v644_v22 }
 0x1f0   :  { %340 = vrot.lane.b32.xlu1 %v338_v25, %s11913_s5  ;;  %v12250_v25 = vld [vmem:[%s13756_s10] ss:$0 sm:$0xff] }
 0x262   :  { %v341_v26 = vpop.permute.xlu1 %340 }
 0x263   :  { %v343_v27 = vadd.f32 %v341_v26, %v236_v18 }
 0x265   :  { %11466 = vtanh.f32 %v343_v27 }
 0x26f   :  { %v11467_v37 = vpop.eup %11466 }
 0x270   :  { %347 = vrot.lane.b32.xlu1 %v11467_v37, %s11914_s8  ;;  %v733_v37 = vld [vmem:[#allocation8 + $0x8] sm:$0xff] }
 0x271   :  { %v12266_v39 = vpack.c.bf16 %v733_v37, %v732_v35 }
 0x2e2   :  { %v348_v42 = vpop.permute.xlu1 %347 }
 0x2e3   :  { %v350_v44 = vmul.f32 %v348_v42, %v345_v41  ;;  %v735_v41 = vld [vmem:[#allocation8 + $0x18] sm:$0xff] }
 0x2e4   :  { %v12269_v42 = vpack.c.bf16 %v735_v41, %v734_v38 }
 0x2e5   :  { %v12195_v45 = vadd.f32 %v351_v43, %v350_v44  ;;  %v12277_v43 = vld [vmem:[%s13758_s12] ss:$0 sm:$0xff] }
 0x2e7   :  { %354 = vrot.lane.b32.xlu0 %v12195_v45, %s11914_s8 }
 0x359   :  { %v12199_v46 = vpop.permute.xlu0 %354 }
 0x35a   :  { %v357_v47 = vsel %vm243_vm2, %v12199_v46, 0.0 }
 0x35b   :  { %9640 = vmatmul.mubr.msk.f32.vlgmr.msra.gmra.mrb[2].mxu0 %vm373_vm3, %v357_v47 }
 0x35c   :  { %9672 = vmatprep.mubr.msk.f32.mxu0 %vm11912_vm0, %v11911_v1  ;;  %10827 = vmatpush3.bf16.msra.mxu0 %v12243_v24 }
 0x35d   :  { %10828 = vmatprep.subr.bf16.mxu0 %v11910_v0 }
 0x360   :  { %10830 = vmatpush3.bf16.msra.mxu0 %v12262_v34 }
 0x361   :  { %10837 = vmatprep.subr.bf16.mxu0 %v11910_v0 }
 0x42e   :  { %v443_v49 = vpop.f32.mrb[2].mxu0 }
 0x42f   :  { %v444_v50 = vadd.f32 %v12206_v48, %v443_v49  ;;  %v9641_v51 = vpop.f32.mrb[3].mxu0 }
 0x430   :  { %v12291_v51 = vld [vmem:[#allocation8 + $0x20] sm:$0xff] }
 0x431   :  { %454 = vrot.lane.b32.xlu1 %v444_v50, %s11915_s19  ;;  %v8889_v52 = vmul.f32 -1.442695, %v444_v50 }
 0x433   :  { %11468 = vpow2.f32 %v8889_v52  ;;  %v12298_v52 = vld [vmem:[%s13760_s14] ss:$0 sm:$0xff] }
 0x43d   :  { %v11469_v53 = vpop.eup %11468 }
 0x43e   :  { %v450_v54 = vadd.f32 1.0, %v11469_v53 }
 0x440   :  { %11470 = vrcp.f32 %v450_v54 }
 0x44a   :  { %v11471_v55 = vpop.eup %11470 }
 0x44b   :  { %v464_v7 = vsub.f32 1.0, %v11471_v55  ;;  %v470_v11 = vmul.f32 0.0, %v11471_v55 }
 0x4a3   :  { %v455_v56 = vpop.permute.xlu1 %454 }
 0x4a4   :  { %v457_v57 = vmul.f32 %v11471_v55, %v455_v56 }
 0x4a6   :  { %459 = vrot.lane.b32.xlu0 %v457_v57, %s11913_s5 }
 0x518   :  { %v460_v58 = vpop.permute.xlu0 %459 }
 0x519   :  { %v462_v59 = vadd.f32 %v460_v58, %v444_v50  ;;  %v12312_v58 = vld [vmem:[#allocation10] ss:$0 sm:$0xff] }
 0x51b   :  { %11472 = vtanh.f32 %v462_v59 }
 0x525   :  { %v11473_v6 = vpop.eup %11472 }
 0x526   :  { %466 = vrot.lane.b32.xlu1 %v11473_v6, %s11914_s8 }
 0x52a   :  { %728 = vrot.lane.b32.xlu1 %v12195_v45, %s11916_s1 }
 0x598   :  { %v467_v8 = vpop.permute.xlu1 %466 }
 0x599   :  { %v469_v12 = vmul.f32 %v467_v8, %v464_v7 }
 0x59b   :  { %v12222_v13 = vadd.f32 %v470_v11, %v469_v12 }
 0x59c   :  { %v729_v56 = vpop.permute.xlu1 %728 }
 0x59d   :  { %484 = vrot.lane.b32.xlu0 %v12222_v13, %s11914_s8 }
 0x60f   :  { %v485_v18 = vpop.permute.xlu0 %484 }
 0x610   :  { %9651 = vmatmul.mubr.msk.f32.vlgmr.msra.gmra.mrb[2].mxu1 %vm243_vm2, %v485_v18 }
 0x611   :  { %10821 = vmatpush3.bf16.msra.mxu1 %v12226_v16  ;;  %9661 = vmatprep.mubr.msk.f32.mxu1 %vm11912_vm0, %v11911_v1 }
 0x612   :  { %10822 = vmatprep.subr.bf16.mxu1 %v11910_v0 }
 0x615   :  { %10824 = vmatpush3.bf16.msra.mxu1 %v12233_v21 }
 0x616   :  { %10831 = vmatprep.subr.bf16.mxu1 %v11910_v0 }
 0x6e3   :  { %v554_v26 = vpop.f32.mrb[2].mxu1 }
 0x6e4   :  { %v555_v27 = vadd.f32 %v12250_v25, %v554_v26  ;;  %v9652_v28 = vpop.f32.mrb[3].mxu1 }
 0x6e6   :  { %v558_v29 = vmax.f32 %v555_v27, 0.0 }
 0x6e8   :  { %9662 = vmatmul.mubr.msk.f32.vlgmr.msra.gmra.mrb[4].mxu1 %vm243_vm2, %v558_v29 }
 0x6e9   :  { %9685 = vmatprep.mubr.msk.f32.mxu1 %vm11912_vm0, %v11911_v1  ;;  %10833 = vmatpush3.bf16.msra.mxu1 %v12266_v39 }
 0x6ea   :  { %10834 = vmatprep.subr.bf16.mxu1 %v11910_v0 }
 0x6ed   :  { %10836 = vmatpush3.bf16.msra.mxu1 %v12269_v42 }
 0x6ee   :  { %9683 = vmatprep.subr.mxu1 %v11911_v1 }
 0x6f1   :  { %9684 = vmatpush3.msra.mxu1 %v12291_v51 }
 0x6f2   :  { %10849 = vmatprep.subr.bf16.mxu1 %v11910_v0 }
 0x7bb   :  { %v639_v44 = vpop.f32.mrb[4].mxu1 }
 0x7bc   :  { %v640_v47 = vadd.f32 %v12277_v43, %v639_v44  ;;  %v9663_v49 = vpop.f32.mrb[5].mxu1 }
 0x7be   :  { %v643_v50 = vmax.f32 %v640_v47, 0.0 }
 0x7c0   :  { %9673 = vmatmul.mubr.msk.f32.vlgmr.msra.gmra.mrb[4].mxu0 %vm243_vm2, %v643_v50 }
 0x7c1   :  { %10839 = vmatpush3.bf16.msra.mxu0 %v12163_v31  ;;  %9704 = vmatprep.mubr.msk.f32.mxu0 %vm11912_vm0, %v11911_v1 }
 0x7c2   :  { %10840 = vmatprep.subr.bf16.mxu0 %v11910_v0 }
 0x7c5   :  { %10842 = vmatpush3.bf16.msra.mxu0 %v12169_v33 }
 0x7c6   :  { %10843 = vmatprep.subr.bf16.mxu0 %v11910_v0 }
 0x7c9   :  { %10845 = vmatpush3.bf16.msra.mxu0 %v12179_v36 }
 0x7ca   :  { %10846 = vmatprep.subr.bf16.mxu0 %v11910_v0 }
 0x7cd   :  { %10848 = vmatpush3.bf16.msra.mxu0 %v12190_v40 }
 0x7ce   :  { %10855 = vmatprep.subr.bf16.mxu0 %v11910_v0 }
 0x893   :  { %v724_v53 = vpop.f32.mrb[4].mxu0 }
 0x894   :  { %v12301_v54 = vadd.f32 %v12298_v52, %v724_v53  ;;  %v9674_v55 = vpop.f32.mrb[5].mxu0 }
 0x896   :  { %v731_v57 = vsel %vm165_vm1, %v12301_v54, %v729_v56 }
 0x897   :  { %9686 = vmatmul.mubr.msk.f32.vlgmr.msra.gmra.mrb[6].mxu1 %vm744_vm4, %v731_v57 }
 0x898   :  { %10851 = vmatpush3.bf16.msra.mxu1 %v12211_v63  ;;  %9715 = vmatprep.mubr.msk.f32.mxu1 %vm11912_vm0, %v11911_v1 }
 0x899   :  { %10852 = vmatprep.subr.bf16.mxu1 %v11910_v0 }
 0x89c   :  { %10854 = vmatpush3.bf16.msra.mxu1 %v12214_v3 }
 0x89d   :  { %10861 = vmatprep.subr.bf16.mxu1 %v11910_v0 }
 0x96a   :  { %v814_v59 = vpop.f32.mrb[6].mxu1 }
 0x96b   :  { %v815_v60 = vadd.f32 %v12312_v58, %v814_v59  ;;  %v9687_v61 = vpop.f32.mrb[7].mxu1 }
 0x96d   :  { %825 = vrot.lane.b32.xlu0 %v815_v60, %s11915_s19  ;;  %v8898_v62 = vmul.f32 -1.442695, %v815_v60 }
 0x96f   :  { %11474 = vpow2.f32 %v8898_v62 }
 0x979   :  { %v11475_v2 = vpop.eup %11474 }
 0x97a   :  { %v821_v6 = vadd.f32 1.0, %v11475_v2 }
 0x97c   :  { %11476 = vrcp.f32 %v821_v6 }
 0x986   :  { %v11477_v7 = vpop.eup %11476 }
 0x987   :  { %v835_v18 = vsub.f32 1.0, %v11477_v7  ;;  %v841_v20 = vmul.f32 %v11477_v7, %v12195_v45 }
 0x9df   :  { %v826_v8 = vpop.permute.xlu0 %825 }
 0x9e0   :  { %v828_v11 = vmul.f32 %v11477_v7, %v826_v8 }
 0x9e2   :  { %830 = vrot.lane.b32.xlu1 %v828_v11, %s11913_s5 }
 0xa54   :  { %v831_v12 = vpop.permute.xlu1 %830 }
 0xa55   :  { %v833_v14 = vadd.f32 %v831_v12, %v815_v60 }
 0xa57   :  { %11478 = vtanh.f32 %v833_v14 }
 0xa61   :  { %v11479_v15 = vpop.eup %11478 }
 0xa62   :  { %837 = vrot.lane.b32.xlu0 %v11479_v15, %s11914_s8 }
 0xad4   :  { %v838_v19 = vpop.permute.xlu0 %837 }
 0xad5   :  { %v840_v22 = vmul.f32 %v838_v19, %v835_v18 }
 0xad7   :  { %v12319_v23 = vadd.f32 %v841_v20, %v840_v22 }
 0xad9   :  { %844 = vrot.lane.b32.xlu1 %v12319_v23, %s11914_s8 }
 0xb4b   :  { %v845_v26 = vpop.permute.xlu1 %844 }
 0xb4c   :  { %v847_v27 = vsel %vm243_vm2, %v845_v26, %v12222_v13 }
 0xb4d   :  { %9705 = vmatmul.mubr.msk.f32.vlgmr.msra.gmra.mrb[6].mxu0 %vm373_vm3, %v847_v27 }
 0xb4e   :  { %10857 = vmatpush3.bf16.msra.mxu0 %v12226_v16  ;;  %9726 = vmatprep.mubr.msk.f32.mxu0 %vm11912_vm0, %v11911_v1 }
 0xb4f   :  { %10858 = vmatprep.subr.bf16.mxu0 %v11910_v0 }
 0xb52   :  { %10860 = vmatpush3.bf16.msra.mxu0 %v12233_v21 }
 0xb53   :  { %10867 = vmatprep.subr.bf16.mxu0 %v11910_v0 }
 0xc20   :  { %v917_v28 = vpop.f32.mrb[6].mxu0 }
 0xc21   :  { %v918_v29 = vadd.f32 %v12206_v48, %v917_v28  ;;  %v9706_v30 = vpop.f32.mrb[7].mxu0 }
 0xc23   :  { %928 = vrot.lane.b32.xlu0 %v918_v29, %s11915_s19  ;;  %v8900_v32 = vmul.f32 -1.442695, %v918_v29 }
 0xc25   :  { %11480 = vpow2.f32 %v8900_v32 }
 0xc2f   :  { %v11481_v35 = vpop.eup %11480 }
 0xc30   :  { %v924_v37 = vadd.f32 1.0, %v11481_v35 }
 0xc32   :  { %11482 = vrcp.f32 %v924_v37 }
 0xc3c   :  { %v11483_v38 = vpop.eup %11482 }
 0xc3d   :  { %v938_v53 = vsub.f32 1.0, %v11483_v38  ;;  %v944_v56 = vmul.f32 %v11483_v38, %v12222_v13 }
 0xc95   :  { %v929_v41 = vpop.permute.xlu0 %928 }
 0xc96   :  { %v931_v44 = vmul.f32 %v11483_v38, %v929_v41 }
 0xc98   :  { %933 = vrot.lane.b32.xlu1 %v931_v44, %s11913_s5 }
 0xd0a   :  { %v934_v47 = vpop.permute.xlu1 %933 }
 0xd0b   :  { %v936_v49 = vadd.f32 %v934_v47, %v918_v29 }
 0xd0d   :  { %11484 = vtanh.f32 %v936_v49 }
 0xd17   :  { %v11485_v50 = vpop.eup %11484 }
 0xd18   :  { %940 = vrot.lane.b32.xlu0 %v11485_v50, %s11914_s8 }
 0xd1c   :  { %1169 = vrot.lane.b32.xlu0 %v12319_v23, %s11916_s1 }
 0xd8a   :  { %v941_v55 = vpop.permute.xlu0 %940 }
 0xd8b   :  { %v943_v57 = vmul.f32 %v941_v55, %v938_v53 }
 0xd8d   :  { %v12339_v59 = vadd.f32 %v944_v56, %v943_v57 }
 0xd8e   :  { %v1170_v19 = vpop.permute.xlu0 %1169 }
 0xd8f   :  { %947 = vrot.lane.b32.xlu1 %v12339_v59, %s11914_s8 }
 0xe01   :  { %v948_v60 = vpop.permute.xlu1 %947 }
 0xe02   :  { %9716 = vmatmul.mubr.msk.f32.vlgmr.msra.gmra.mrb[8].mxu1 %vm243_vm2, %v948_v60 }
 0xe03   :  { %10863 = vmatpush3.bf16.msra.mxu1 %v12243_v24  ;;  %9737 = vmatprep.mubr.msk.f32.mxu1 %vm11912_vm0, %v11911_v1 }
 0xe04   :  { %10864 = vmatprep.subr.bf16.mxu1 %v11910_v0 }
 0xe07   :  { %10866 = vmatpush3.bf16.msra.mxu1 %v12262_v34 }
 0xe08   :  { %10873 = vmatprep.subr.bf16.mxu1 %v11910_v0 }
 0xed5   :  { %v1017_v61 = vpop.f32.mrb[8].mxu1 }
 0xed6   :  { %v1018_v62 = vadd.f32 %v12250_v25, %v1017_v61  ;;  %v9717_v2 = vpop.f32.mrb[9].mxu1 }
 0xed8   :  { %v1021_v6 = vmax.f32 %v1018_v62, 0.0 }
 0xeda   :  { %9727 = vmatmul.mubr.msk.f32.vlgmr.msra.gmra.mrb[8].mxu0 %vm243_vm2, %v1021_v6 }
 0xedb   :  { %10869 = vmatpush3.bf16.msra.mxu0 %v12266_v39  ;;  %9750 = vmatprep.mubr.msk.f32.mxu0 %vm11912_vm0, %v11911_v1 }
 0xedc   :  { %10870 = vmatprep.subr.bf16.mxu0 %v11910_v0 }
 0xedf   :  { %10872 = vmatpush3.bf16.msra.mxu0 %v12269_v42 }
 0xee0   :  { %9748 = vmatprep.subr.mxu0 %v11911_v1 }
 0xee3   :  { %9749 = vmatpush3.msra.mxu0 %v12291_v51 }
 0xee4   :  { %10885 = vmatprep.subr.bf16.mxu0 %v11910_v0 }
 0xfad   :  { %v1091_v7 = vpop.f32.mrb[8].mxu0 }
 0xfae   :  { %v1092_v8 = vadd.f32 %v12277_v43, %v1091_v7  ;;  %v9728_v11 = vpop.f32.mrb[9].mxu0 }
 0xfb0   :  { %v1095_v12 = vmax.f32 %v1092_v8, 0.0 }
 0xfb2   :  { %9738 = vmatmul.mubr.msk.f32.vlgmr.msra.gmra.mrb[10].mxu1 %vm243_vm2, %v1095_v12 }
 0xfb3   :  { %10875 = vmatpush3.bf16.msra.mxu1 %v12163_v31  ;;  %9769 = vmatprep.mubr.msk.f32.mxu1 %vm11912_vm0, %v11911_v1 }
 0xfb4   :  { %10876 = vmatprep.subr.bf16.mxu1 %v11910_v0 }
 0xfb7   :  { %10878 = vmatpush3.bf16.msra.mxu1 %v12169_v33 }
 0xfb8   :  { %10879 = vmatprep.subr.bf16.mxu1 %v11910_v0 }
 0xfbb   :  { %10881 = vmatpush3.bf16.msra.mxu1 %v12179_v36 }
 0xfbc   :  { %10882 = vmatprep.subr.bf16.mxu1 %v11910_v0 }
 0xfbf   :  { %10884 = vmatpush3.bf16.msra.mxu1 %v12190_v40 }
 0xfc0   :  { %10891 = vmatprep.subr.bf16.mxu1 %v11910_v0 }
0x1085   :  { %v1165_v14 = vpop.f32.mrb[10].mxu1 }
0x1086   :  { %v12373_v15 = vadd.f32 %v12298_v52, %v1165_v14  ;;  %v9739_v18 = vpop.f32.mrb[11].mxu1 }
0x1088   :  { %v1172_v20 = vsel %vm165_vm1, %v12373_v15, %v1170_v19 }
0x1089   :  { %9751 = vmatmul.mubr.msk.f32.vlgmr.msra.gmra.mrb[10].mxu0 %vm744_vm4, %v1172_v20 }
0x108a   :  { %10887 = vmatpush3.bf16.msra.mxu0 %v12211_v63  ;;  %9780 = vmatprep.mubr.msk.f32.mxu0 %vm11912_vm0, %v11911_v1 }
0x108b   :  { %10888 = vmatprep.subr.bf16.mxu0 %v11910_v0 }
0x108e   :  { %10890 = vmatpush3.bf16.msra.mxu0 %v12214_v3 }
0x108f   :  { %10897 = vmatprep.subr.bf16.mxu0 %v11910_v0 }
0x115c   :  { %v1242_v22 = vpop.f32.mrb[10].mxu0 }
0x115d   :  { %v1243_v26 = vadd.f32 %v12312_v58, %v1242_v22  ;;  %v9752_v27 = vpop.f32.mrb[11].mxu0 }
0x115f   :  { %1253 = vrot.lane.b32.xlu1 %v1243_v26, %s11915_s19  ;;  %v8905_v28 = vmul.f32 -1.442695, %v1243_v26 }
0x1161   :  { %11486 = vpow2.f32 %v8905_v28 }
0x116b   :  { %v11487_v29 = vpop.eup %11486 }
0x116c   :  { %v1249_v30 = vadd.f32 1.0, %v11487_v29 }
0x116e   :  { %11488 = vrcp.f32 %v1249_v30 }
0x1178   :  { %v11489_v32 = vpop.eup %11488 }
0x1179   :  { %v1263_v47 = vsub.f32 1.0, %v11489_v32  ;;  %v1269_v50 = vmul.f32 %v11489_v32, %v12319_v23 }
0x11d1   :  { %v1254_v35 = vpop.permute.xlu1 %1253 }
0x11d2   :  { %v1256_v37 = vmul.f32 %v11489_v32, %v1254_v35  ;;  %v1611_v32 = vld [vmem:[#allocation2 + $0x8] sm:$0xff] }
0x11d4   :  { %1258 = vrot.lane.b32.xlu0 %v1256_v37, %s11913_s5 }
0x1246   :  { %v1259_v38 = vpop.permute.xlu0 %1258 }
0x1247   :  { %v1261_v41 = vadd.f32 %v1259_v38, %v1243_v26 }
0x1249   :  { %11490 = vtanh.f32 %v1261_v41 }
0x1253   :  { %v11491_v44 = vpop.eup %11490 }
0x1254   :  { %1265 = vrot.lane.b32.xlu1 %v11491_v44, %s11914_s8 }
0x12c6   :  { %v1266_v49 = vpop.permute.xlu1 %1265 }
0x12c7   :  { %v1268_v53 = vmul.f32 %v1266_v49, %v1263_v47 }
0x12c9   :  { %v1270_v55 = vadd.f32 %v1269_v50, %v1268_v53 }
0x12cb   :  { %1272 = vrot.lane.b32.xlu0 %v1270_v55, %s11914_s8 }
0x133d   :  { %v1273_v56 = vpop.permute.xlu0 %1272 }
0x133e   :  { %v1275_v57 = vsel %vm243_vm2, %v1273_v56, %v12339_v59 }
0x133f   :  { %9770 = vmatmul.mubr.msk.f32.vlgmr.msra.gmra.mrb[12].mxu1 %vm373_vm3, %v1275_v57 }
0x1340   :  { %10893 = vmatpush3.bf16.msra.mxu1 %v12226_v16  ;;  %9791 = vmatprep.mubr.msk.f32.mxu1 %vm11912_vm0, %v11911_v1 }
0x1341   :  { %10894 = vmatprep.subr.bf16.mxu1 %v11910_v0 }
0x1344   :  { %10896 = vmatpush3.bf16.msra.mxu1 %v12233_v21 }
0x1345   :  { %9805 = vmatprep.subr.mxu1 %v11911_v1 }
0x1412   :  { %v1345_v23 = vpop.f32.mrb[12].mxu1 }
0x1413   :  { %v1346_v60 = vadd.f32 %v12206_v48, %v1345_v23  ;;  %v9771_v61 = vpop.f32.mrb[13].mxu1 }
0x1415   :  { %1356 = vrot.lane.b32.xlu1 %v1346_v60, %s11915_s19  ;;  %v8907_v62 = vmul.f32 -1.442695, %v1346_v60 }
0x1417   :  { %11492 = vpow2.f32 %v8907_v62 }
0x1421   :  { %v11493_v2 = vpop.eup %11492 }
0x1422   :  { %v1352_v6 = vadd.f32 1.0, %v11493_v2 }
0x1424   :  { %11494 = vrcp.f32 %v1352_v6 }
0x142e   :  { %v11495_v7 = vpop.eup %11494 }
0x142f   :  { %v1366_v19 = vsub.f32 1.0, %v11495_v7  ;;  %v1372_v22 = vmul.f32 %v11495_v7, %v12339_v59 }
0x1487   :  { %v1357_v8 = vpop.permute.xlu1 %1356 }
0x1488   :  { %v1359_v11 = vmul.f32 %v11495_v7, %v1357_v8 }
0x148a   :  { %1361 = vrot.lane.b32.xlu0 %v1359_v11, %s11913_s5 }
0x14fc   :  { %v1362_v12 = vpop.permute.xlu0 %1361 }
0x14fd   :  { %v1364_v14 = vadd.f32 %v1362_v12, %v1346_v60 }
0x14ff   :  { %11496 = vtanh.f32 %v1364_v14 }
0x1509   :  { %v11497_v18 = vpop.eup %11496 }
0x150a   :  { %1368 = vrot.lane.b32.xlu1 %v11497_v18, %s11914_s8 }
0x150e   :  { %1782 = vrot.lane.b32.xlu1 %v12130_v9, %s11913_s5 }
0x157c   :  { %v1369_v20 = vpop.permute.xlu1 %1368 }
0x157d   :  { %v1371_v26 = vmul.f32 %v1369_v20, %v1366_v19 }
0x157f   :  { %v1373_v27 = vadd.f32 %v1372_v22, %v1371_v26 }
0x1580   :  { %v1783_v47 = vpop.permute.xlu1 %1782 }
0x1581   :  { %1375 = vrot.lane.b32.xlu0 %v1373_v27, %s11914_s8 }
0x15f3   :  { %v1376_v28 = vpop.permute.xlu0 %1375 }
0x15f4   :  { %9781 = vmatmul.mubr.msk.f32.vlgmr.msra.gmra.mrb[12].mxu0 %vm243_vm2, %v1376_v28 }
0x15f5   :  { %10899 = vmatpush3.bf16.msra.mxu0 %v12243_v24  ;;  %9802 = vmatprep.mubr.msk.f32.mxu0 %vm11912_vm0, %v11911_v1 }
0x15f6   :  { %10900 = vmatprep.subr.bf16.mxu0 %v11910_v0 }
0x15f9   :  { %10902 = vmatpush3.bf16.msra.mxu0 %v12262_v34 }
0x15fa   :  { %10903 = vmatprep.subr.bf16.mxu0 %v11910_v0 }
0x16c7   :  { %v1445_v9 = vpop.f32.mrb[12].mxu0 }
0x16c8   :  { %v1446_v59 = vadd.f32 %v12250_v25, %v1445_v9  ;;  %v9782_v29 = vpop.f32.mrb[13].mxu0 }
0x16ca   :  { %v1449_v30 = vmax.f32 %v1446_v59, 0.0 }
0x16cc   :  { %9792 = vmatmul.mubr.msk.f32.vlgmr.msra.gmra.mrb[14].mxu1 %vm243_vm2, %v1449_v30 }
0x16cd   :  { %9806 = vmatpush3.msra.mxu1 %v12121_v4  ;;  %9807 = vmatprep.mubr.msk.f32.mxu1 %vm11912_vm0, %v11911_v1 }
0x16ce   :  { %10909 = vmatprep.subr.bf16.mxu1 %v11910_v0 }
0x16d0   :  { %9808 = vmatmul.mubr.msk.f32.vlgmr.msra.gmra.mrb[16].mxu1 %vm165_vm1, %v1611_v32 }
0x16d1   :  { %10911 = vmatpush3.bf16.msra.mxu1 %v12163_v31  ;;  %9837 = vmatprep.mubr.msk.f32.mxu1 %vm11912_vm0, %v11911_v1 }
0x16d2   :  { %10912 = vmatprep.subr.bf16.mxu1 %v11910_v0 }
0x16d5   :  { %10914 = vmatpush3.bf16.msra.mxu1 %v12169_v33 }
0x16d6   :  { %10915 = vmatprep.subr.bf16.mxu1 %v11910_v0 }
0x16d9   :  { %10917 = vmatpush3.bf16.msra.mxu1 %v12179_v36 }
0x16da   :  { %10918 = vmatprep.subr.bf16.mxu1 %v11910_v0 }
0x16dd   :  { %10920 = vmatpush3.bf16.msra.mxu1 %v12190_v40 }
0x16de   :  { %10933 = vmatprep.subr.bf16.mxu1 %v11910_v0 }
0x179f   :  { %v1519_v4 = vpop.f32.mrb[14].mxu1 }
0x17a0   :  { %v1520_v35 = vadd.f32 %v12277_v43, %v1519_v4  ;;  %v9793_v37 = vpop.f32.mrb[15].mxu1 }
0x17a2   :  { %v1523_v38 = vmax.f32 %v1520_v35, 0.0 }
0x17a4   :  { %9803 = vmatmul.mubr.msk.f32.vlgmr.msra.gmra.mrb[14].mxu0 %vm243_vm2, %v1523_v38 }
0x17a5   :  { %10905 = vmatpush3.bf16.msra.mxu0 %v12123_v5  ;;  %9818 = vmatprep.mubr.msk.f32.mxu0 %vm11912_vm0, %v11911_v1  ;;  %v1689_v5 = vpop.f32.mrb[16].mxu1 }
0x17a6   :  { %10906 = vmatprep.subr.bf16.mxu0 %v11910_v0  ;;  %v9809_v41 = vpop.f32.mrb[17].mxu1  ;;  %v1690_v53 = vadd.f32 %v12150_v17, %v1689_v5 }
0x17a9   :  { %10908 = vmatpush3.bf16.msra.mxu0 %v12134_v10 }
0x17aa   :  { %10921 = vmatprep.subr.bf16.mxu0 %v11910_v0 }
0x17ac   :  { %9819 = vmatmul.mubr.msk.f32.vlgmr.msra.gmra.mrb[16].mxu0 %vm243_vm2, %v12199_v46 }
0x17ad   :  { %10923 = vmatpush3.bf16.msra.mxu0 %v12211_v63  ;;  %9848 = vmatprep.mubr.msk.f32.mxu0 %vm11912_vm0, %v11911_v1 }
0x17ae   :  { %10924 = vmatprep.subr.bf16.mxu0 %v11910_v0 }
0x17b1   :  { %10926 = vmatpush3.bf16.msra.mxu0 %v12214_v3 }
0x17b2   :  { %10927 = vmatprep.subr.bf16.mxu0 %v11910_v0 }
0x1877   :  { %v12447_v44 = vpop.f32.mrb[14].mxu0 }
0x1878   :  { %v9804_v10 = vpop.f32.mrb[15].mxu0 }
0x187f   :  { %v1765_v49 = vpop.f32.mrb[16].mxu0 }
0x1880   :  { %v1785_v50 = vadd.f32 %v1783_v47, %v1765_v49  ;;  %v9820_v46 = vpop.f32.mrb[17].mxu0  ;;  %v1769_v55 = vadd.f32 %v1765_v49, %v1690_v53 }
0x1882   :  { %1787 = vrot.lane.b32.xlu0 %v1785_v50, %s11913_s5  ;;  %v8914_v56 = vmul.f32 -1.442695, %v1769_v55 }
0x1884   :  { %11498 = vpow2.f32 %v8914_v56 }
0x188e   :  { %v11499_v57 = vpop.eup %11498 }
0x188f   :  { %v1773_v23 = vadd.f32 1.0, %v11499_v57 }
0x1891   :  { %11500 = vrcp.f32 %v1773_v23 }
0x189b   :  { %v11501_v60 = vpop.eup %11500 }
0x189c   :  { %v1797_v8 = vsub.f32 1.0, %v11501_v60  ;;  %v1803_v17 = vmul.f32 %v11501_v60, %v12195_v45 }
0x18f4   :  { %v1788_v61 = vpop.permute.xlu0 %1787 }
0x18f5   :  { %v1790_v62 = vmul.f32 %v11501_v60, %v1788_v61 }
0x18f7   :  { %1792 = vrot.lane.b32.xlu1 %v1790_v62, %s11913_s5 }
0x1969   :  { %v1793_v2 = vpop.permute.xlu1 %1792 }
0x196a   :  { %v1795_v6 = vadd.f32 %v1793_v2, %v1690_v53 }
0x196c   :  { %11502 = vtanh.f32 %v1795_v6 }
0x1976   :  { %v11503_v7 = vpop.eup %11502 }
0x1977   :  { %1799 = vrot.lane.b32.xlu0 %v11503_v7, %s11914_s8 }
0x19e9   :  { %v1800_v11 = vpop.permute.xlu0 %1799 }
0x19ea   :  { %v1802_v12 = vmul.f32 %v1800_v11, %v1797_v8 }
0x19ec   :  { %v12454_v14 = vadd.f32 %v1803_v17, %v1802_v12 }
0x19ee   :  { %1806 = vrot.lane.b32.xlu1 %v12454_v14, %s11914_s8 }
0x1a60   :  { %v12458_v18 = vpop.permute.xlu1 %1806 }
0x1a61   :  { %v1809_v19 = vsel %vm243_vm2, %v12458_v18, %v12222_v13 }
0x1a62   :  { %9838 = vmatmul.mubr.msk.f32.vlgmr.msra.gmra.mrb[18].mxu1 %vm373_vm3, %v1809_v19 }
0x1a63   :  { %10935 = vmatpush3.bf16.msra.mxu1 %v12243_v24  ;;  %9870 = vmatprep.mubr.msk.f32.mxu1 %vm11912_vm0, %v11911_v1 }
0x1a64   :  { %10936 = vmatprep.subr.bf16.mxu1 %v11910_v0 }
0x1a67   :  { %10938 = vmatpush3.bf16.msra.mxu1 %v12262_v34 }
0x1a68   :  { %10945 = vmatprep.subr.bf16.mxu1 %v11910_v0 }
0x1b35   :  { %v1894_v45 = vpop.f32.mrb[18].mxu1 }
0x1b36   :  { %v1895_v20 = vadd.f32 %v12206_v48, %v1894_v45  ;;  %v9839_v22 = vpop.f32.mrb[19].mxu1 }
0x1b38   :  { %1905 = vrot.lane.b32.xlu0 %v1895_v20, %s11915_s19  ;;  %v8918_v26 = vmul.f32 -1.442695, %v1895_v20 }
0x1b3a   :  { %11504 = vpow2.f32 %v8918_v26 }
0x1b44   :  { %v11505_v27 = vpop.eup %11504 }
0x1b45   :  { %v1901_v28 = vadd.f32 1.0, %v11505_v27 }
0x1b47   :  { %11506 = vrcp.f32 %v1901_v28 }
0x1b51   :  { %v11507_v9 = vpop.eup %11506 }
0x1b52   :  { %v1915_v35 = vsub.f32 1.0, %v11507_v9  ;;  %v1921_v38 = vmul.f32 %v11507_v9, %v12222_v13 }
0x1baa   :  { %v1906_v59 = vpop.permute.xlu0 %1905 }
0x1bab   :  { %v1908_v29 = vmul.f32 %v11507_v9, %v1906_v59 }
0x1bad   :  { %1910 = vrot.lane.b32.xlu1 %v1908_v29, %s11913_s5 }
0x1c1f   :  { %v1911_v30 = vpop.permute.xlu1 %1910 }
0x1c20   :  { %v1913_v32 = vadd.f32 %v1911_v30, %v1895_v20 }
0x1c22   :  { %11508 = vtanh.f32 %v1913_v32 }
0x1c2c   :  { %v11509_v4 = vpop.eup %11508 }
0x1c2d   :  { %1917 = vrot.lane.b32.xlu0 %v11509_v4, %s11914_s8 }
0x1c31   :  { %2179 = vrot.lane.b32.xlu0 %v12454_v14, %s11916_s1 }
0x1c9f   :  { %v1918_v37 = vpop.permute.xlu0 %1917 }
0x1ca0   :  { %v1920_v5 = vmul.f32 %v1918_v37, %v1915_v35 }
0x1ca2   :  { %v12477_v41 = vadd.f32 %v1921_v38, %v1920_v5 }
0x1ca3   :  { %v2180_v61 = vpop.permute.xlu0 %2179 }
0x1ca4   :  { %1935 = vrot.lane.b32.xlu1 %v12477_v41, %s11914_s8 }
0x1d16   :  { %v1936_v10 = vpop.permute.xlu1 %1935 }
0x1d17   :  { %9849 = vmatmul.mubr.msk.f32.vlgmr.msra.gmra.mrb[18].mxu0 %vm243_vm2, %v1936_v10 }
0x1d18   :  { %10929 = vmatpush3.bf16.msra.mxu0 %v12226_v16  ;;  %9859 = vmatprep.mubr.msk.f32.mxu0 %vm11912_vm0, %v11911_v1 }
0x1d19   :  { %10930 = vmatprep.subr.bf16.mxu0 %v11910_v0 }
0x1d1c   :  { %10932 = vmatpush3.bf16.msra.mxu0 %v12233_v21 }
0x1d1d   :  { %10939 = vmatprep.subr.bf16.mxu0 %v11910_v0 }
0x1dea   :  { %v2005_v13 = vpop.f32.mrb[18].mxu0 }
0x1deb   :  { %v2006_v47 = vadd.f32 %v12250_v25, %v2005_v13  ;;  %v9850_v49 = vpop.f32.mrb[19].mxu0 }
0x1ded   :  { %v2009_v50 = vmax.f32 %v2006_v47, 0.0 }
0x1def   :  { %9860 = vmatmul.mubr.msk.f32.vlgmr.msra.gmra.mrb[20].mxu0 %vm243_vm2, %v2009_v50 }
0x1df0   :  { %10941 = vmatpush3.bf16.msra.mxu0 %v12266_v39  ;;  %9883 = vmatprep.mubr.msk.f32.mxu0 %vm11912_vm0, %v11911_v1 }
0x1df1   :  { %10942 = vmatprep.subr.bf16.mxu0 %v11910_v0 }
0x1df4   :  { %10944 = vmatpush3.bf16.msra.mxu0 %v12269_v42 }
0x1df5   :  { %9881 = vmatprep.subr.mxu0 %v11911_v1 }
0x1df8   :  { %9882 = vmatpush3.msra.mxu0 %v12291_v51 }
0x1df9   :  { %10957 = vmatprep.subr.bf16.mxu0 %v11910_v0 }
0x1ec2   :  { %v2090_v46 = vpop.f32.mrb[20].mxu0 }
0x1ec3   :  { %v2091_v53 = vadd.f32 %v12277_v43, %v2090_v46  ;;  %v9861_v55 = vpop.f32.mrb[21].mxu0 }
0x1ec5   :  { %v2094_v56 = vmax.f32 %v2091_v53, 0.0 }
0x1ec7   :  { %9871 = vmatmul.mubr.msk.f32.vlgmr.msra.gmra.mrb[20].mxu1 %vm243_vm2, %v2094_v56 }
0x1ec8   :  { %10947 = vmatpush3.bf16.msra.mxu1 %v12163_v31  ;;  %9902 = vmatprep.mubr.msk.f32.mxu1 %vm11912_vm0, %v11911_v1 }
0x1ec9   :  { %10948 = vmatprep.subr.bf16.mxu1 %v11910_v0 }
0x1ecc   :  { %10950 = vmatpush3.bf16.msra.mxu1 %v12169_v33 }
0x1ecd   :  { %10951 = vmatprep.subr.bf16.mxu1 %v11910_v0 }
0x1ed0   :  { %10953 = vmatpush3.bf16.msra.mxu1 %v12179_v36 }
0x1ed1   :  { %10954 = vmatprep.subr.bf16.mxu1 %v11910_v0 }
0x1ed4   :  { %10956 = vmatpush3.bf16.msra.mxu1 %v12190_v40 }
0x1ed5   :  { %10969 = vmatprep.subr.bf16.mxu1 %v11910_v0 }
0x1f9a   :  { %v2175_v57 = vpop.f32.mrb[20].mxu1 }
0x1f9b   :  { %v12511_v23 = vadd.f32 %v12298_v52, %v2175_v57  ;;  %v9872_v60 = vpop.f32.mrb[21].mxu1 }
0x1f9d   :  { %v2182_v62 = vsel %vm165_vm1, %v12511_v23, %v2180_v61 }
0x1f9e   :  { %9884 = vmatmul.mubr.msk.f32.vlgmr.msra.gmra.mrb[22].mxu0 %vm744_vm4, %v2182_v62 }
0x1f9f   :  { %10959 = vmatpush3.bf16.msra.mxu0 %v12211_v63  ;;  %9913 = vmatprep.mubr.msk.f32.mxu0 %vm11912_vm0, %v11911_v1 }
0x1fa0   :  { %10960 = vmatprep.subr.bf16.mxu0 %v11910_v0 }
0x1fa3   :  { %10962 = vmatpush3.bf16.msra.mxu0 %v12214_v3 }
0x1fa4   :  { %10963 = vmatprep.subr.bf16.mxu0 %v11910_v0 }
0x2071   :  { %v2264_v2 = vpop.f32.mrb[22].mxu0 }
0x2072   :  { %v2265_v6 = vadd.f32 %v12312_v58, %v2264_v2  ;;  %v9885_v7 = vpop.f32.mrb[23].mxu0 }
0x2074   :  { %2275 = vrot.lane.b32.xlu1 %v2265_v6, %s11915_s19  ;;  %v8927_v8 = vmul.f32 -1.442695, %v2265_v6 }
0x2076   :  { %11510 = vpow2.f32 %v8927_v8 }
0x2080   :  { %v11511_v11 = vpop.eup %11510 }
0x2081   :  { %v2271_v17 = vadd.f32 1.0, %v11511_v11 }
0x2083   :  { %11512 = vrcp.f32 %v2271_v17 }
0x208d   :  { %v11513_v12 = vpop.eup %11512 }
0x208e   :  { %v2285_v27 = vsub.f32 1.0, %v11513_v12  ;;  %v2291_v9 = vmul.f32 %v11513_v12, %v12454_v14 }
0x20e6   :  { %v2276_v19 = vpop.permute.xlu1 %2275 }
0x20e7   :  { %v2278_v45 = vmul.f32 %v11513_v12, %v2276_v19 }
0x20e9   :  { %2280 = vrot.lane.b32.xlu0 %v2278_v45, %s11913_s5 }
0x215b   :  { %v2281_v20 = vpop.permute.xlu0 %2280 }
0x215c   :  { %v2283_v22 = vadd.f32 %v2281_v20, %v2265_v6 }
0x215e   :  { %11514 = vtanh.f32 %v2283_v22 }
0x2168   :  { %v11515_v26 = vpop.eup %11514 }
0x2169   :  { %2287 = vrot.lane.b32.xlu1 %v11515_v26, %s11914_s8 }
0x21db   :  { %v2288_v28 = vpop.permute.xlu1 %2287 }
0x21dc   :  { %v2290_v59 = vmul.f32 %v2288_v28, %v2285_v27 }
0x21de   :  { %v12527_v29 = vadd.f32 %v2291_v9, %v2290_v59 }
0x21e0   :  { %2294 = vrot.lane.b32.xlu0 %v12527_v29, %s11914_s8 }
0x2252   :  { %v2295_v30 = vpop.permute.xlu0 %2294 }
0x2253   :  { %v2297_v32 = vsel %vm243_vm2, %v2295_v30, %v12477_v41 }
0x2254   :  { %9903 = vmatmul.mubr.msk.f32.vlgmr.msra.gmra.mrb[22].mxu1 %vm373_vm3, %v2297_v32 }
0x2255   :  { %10971 = vmatpush3.bf16.msra.mxu1 %v12243_v24  ;;  %9935 = vmatprep.mubr.msk.f32.mxu1 %vm11912_vm0, %v11911_v1 }
0x2256   :  { %10972 = vmatprep.subr.bf16.mxu1 %v11910_v0 }
0x2259   :  { %10974 = vmatpush3.bf16.msra.mxu1 %v12262_v34 }
0x225a   :  { %10981 = vmatprep.subr.bf16.mxu1 %v11910_v0 }
0x2327   :  { %v2367_v4 = vpop.f32.mrb[22].mxu1 }
0x2328   :  { %v2368_v35 = vadd.f32 %v12206_v48, %v2367_v4  ;;  %v9904_v37 = vpop.f32.mrb[23].mxu1  ;;  %v11678_v4 = vld [vmem:[#allocation11] ss:$0 sm:$0xff] }
0x232a   :  { %2378 = vrot.lane.b32.xlu1 %v2368_v35, %s11915_s19  ;;  %v8929_v38 = vmul.f32 -1.442695, %v2368_v35 }
0x232c   :  { %11516 = vpow2.f32 %v8929_v38 }
0x2336   :  { %v11517_v5 = vpop.eup %11516 }
0x2337   :  { %v2374_v10 = vadd.f32 1.0, %v11517_v5 }
0x2339   :  { %11518 = vrcp.f32 %v2374_v10 }
0x2343   :  { %v11519_v13 = vpop.eup %11518 }
0x2344   :  { %v2388_v48 = vsub.f32 1.0, %v11519_v13  ;;  %v2394_v56 = vmul.f32 %v11519_v13, %v12477_v41 }
0x239c   :  { %v2379_v47 = vpop.permute.xlu1 %2378 }
0x239d   :  { %v2381_v49 = vmul.f32 %v11519_v13, %v2379_v47 }
0x239f   :  { %2383 = vrot.lane.b32.xlu0 %v2381_v49, %s11913_s5 }
0x2411   :  { %v2384_v50 = vpop.permute.xlu0 %2383 }
0x2412   :  { %v2386_v46 = vadd.f32 %v2384_v50, %v2368_v35 }
0x2414   :  { %11520 = vtanh.f32 %v2386_v46 }
0x241e   :  { %v11521_v53 = vpop.eup %11520 }
0x241f   :  { %2390 = vrot.lane.b32.xlu1 %v11521_v53, %s11914_s8 }
0x2423   :  { %2619 = vrot.lane.b32.xlu1 %v12527_v29, %s11916_s1 }
0x2491   :  { %v2391_v55 = vpop.permute.xlu1 %2390 }
0x2492   :  { %v2393_v57 = vmul.f32 %v2391_v55, %v2388_v48 }
0x2494   :  { %v12547_v60 = vadd.f32 %v2394_v56, %v2393_v57 }
0x2496   :  { %2397 = vrot.lane.b32.xlu0 %v12547_v60, %s11914_s8 }
0x2508   :  { %v2398_v61 = vpop.permute.xlu0 %2397 }
0x2509   :  { %9914 = vmatmul.mubr.msk.f32.vlgmr.msra.gmra.mrb[24].mxu0 %vm243_vm2, %v2398_v61 }
0x250a   :  { %10965 = vmatpush3.bf16.msra.mxu0 %v12226_v16  ;;  %9924 = vmatprep.mubr.msk.f32.mxu0 %vm11912_vm0, %v11911_v1 }
0x250b   :  { %10966 = vmatprep.subr.bf16.mxu0 %v11910_v0 }
0x250e   :  { %10968 = vmatpush3.bf16.msra.mxu0 %v12233_v21 }
0x250f   :  { %10975 = vmatprep.subr.bf16.mxu0 %v11910_v0 }
0x25dc   :  { %v2467_v62 = vpop.f32.mrb[24].mxu0 }
0x25dd   :  { %v2468_v2 = vadd.f32 %v12250_v25, %v2467_v62  ;;  %v9915_v6 = vpop.f32.mrb[25].mxu0 }
0x25df   :  { %v2471_v7 = vmax.f32 %v2468_v2, 0.0 }
0x25e1   :  { %9925 = vmatmul.mubr.msk.f32.vlgmr.msra.gmra.mrb[26].mxu0 %vm243_vm2, %v2471_v7  ;;  %v12635_v7 = vld [vmem:[%s13750_s4] ss:$0 sm:$0xff] }
0x25e2   :  { %10977 = vmatpush3.bf16.msra.mxu0 %v12266_v39  ;;  %9948 = vmatprep.mubr.msk.f32.mxu0 %vm11912_vm0, %v11911_v1 }
0x25e3   :  { %10978 = vmatprep.subr.bf16.mxu0 %v11910_v0 }
0x25e6   :  { %10980 = vmatpush3.bf16.msra.mxu0 %v12269_v42 }
0x25e7   :  { %9946 = vmatprep.subr.mxu0 %v11911_v1 }
0x25ea   :  { %9947 = vmatpush3.msra.mxu0 %v12291_v51 }
0x25eb   :  { %10993 = vmatprep.subr.bf16.mxu0 %v11910_v0 }
0x26b4   :  { %v2541_v25 = vpop.f32.mrb[26].mxu0 }
0x26b5   :  { %v2542_v8 = vadd.f32 %v12277_v43, %v2541_v25  ;;  %v9926_v11 = vpop.f32.mrb[27].mxu0  ;;  %v2620_v43 = vpop.permute.xlu1 %2619  ;;  %v3142_v25 = vld [vmem:[#allocation7] sm:$0xff] }
0x26b7   :  { %v2545_v17 = vmax.f32 %v2542_v8, 0.0  ;;  %v3143_v8 = vld [vmem:[#allocation7 + $0x8] sm:$0xff] }
0x26b9   :  { %9936 = vmatmul.mubr.msk.f32.vlgmr.msra.gmra.mrb[24].mxu1 %vm243_vm2, %v2545_v17  ;;  %v11680_v17 = vld [vmem:[%s13758_s12] ss:$0 sm:$0xff] }
0x26ba   :  { %10983 = vmatpush3.bf16.msra.mxu1 %v12163_v31  ;;  %9967 = vmatprep.mubr.msk.f32.mxu1 %vm11912_vm0, %v11911_v1 }
0x26bb   :  { %10984 = vmatprep.subr.bf16.mxu1 %v11910_v0 }
0x26be   :  { %10986 = vmatpush3.bf16.msra.mxu1 %v12169_v33 }
0x26bf   :  { %10987 = vmatprep.subr.bf16.mxu1 %v11910_v0 }
0x26c2   :  { %10989 = vmatpush3.bf16.msra.mxu1 %v12179_v36 }
0x26c3   :  { %10990 = vmatprep.subr.bf16.mxu1 %v11910_v0 }
0x26c6   :  { %10992 = vmatpush3.bf16.msra.mxu1 %v12190_v40 }
0x26c7   :  { %10999 = vmatprep.subr.bf16.mxu1 %v11910_v0 }
0x278c   :  { %v2615_v39 = vpop.f32.mrb[24].mxu1 }
0x278d   :  { %v12581_v31 = vadd.f32 %v12298_v52, %v2615_v39  ;;  %v9937_v42 = vpop.f32.mrb[25].mxu1 }
0x278f   :  { %v2622_v51 = vsel %vm165_vm1, %v12581_v31, %v2620_v43  ;;  %v12642_v43 = vpack.c.bf16 %v3143_v8, %v3142_v25 }
0x2790   :  { %9949 = vmatmul.mubr.msk.f32.vlgmr.msra.gmra.mrb[28].mxu0 %vm744_vm4, %v2622_v51 }
0x2791   :  { %10995 = vmatpush3.bf16.msra.mxu0 %v12211_v63  ;;  %9978 = vmatprep.mubr.msk.f32.mxu0 %vm11912_vm0, %v11911_v1 }
0x2792   :  { %10996 = vmatprep.subr.bf16.mxu0 %v11910_v0 }
0x2795   :  { %10998 = vmatpush3.bf16.msra.mxu0 %v12214_v3 }
0x2796   :  { %11005 = vmatprep.subr.bf16.mxu0 %v11910_v0 }
0x2863   :  { %v2692_v33 = vpop.f32.mrb[28].mxu0 }
0x2864   :  { %v2693_v36 = vadd.f32 %v12312_v58, %v2692_v33  ;;  %v9950_v40 = vpop.f32.mrb[29].mxu0  ;;  %v3144_v33 = vld [vmem:[#allocation7 + $0x10] sm:$0xff] }
0x2866   :  { %2703 = vrot.lane.b32.xlu0 %v2693_v36, %s11915_s19  ;;  %v8934_v52 = vmul.f32 -1.442695, %v2693_v36 }
0x2868   :  { %11522 = vpow2.f32 %v8934_v52 }
0x2872   :  { %v11523_v12 = vpop.eup %11522 }
0x2873   :  { %v2699_v19 = vadd.f32 1.0, %v11523_v12 }
0x2875   :  { %11524 = vrcp.f32 %v2699_v19 }
0x287f   :  { %v11525_v63 = vpop.eup %11524 }
0x2880   :  { %v2713_v58 = vsub.f32 1.0, %v11525_v63  ;;  %v2719_v28 = vmul.f32 %v11525_v63, %v12527_v29 }
0x28d8   :  { %v2704_v45 = vpop.permute.xlu0 %2703 }
0x28d9   :  { %v2706_v20 = vmul.f32 %v11525_v63, %v2704_v45 }
0x28db   :  { %2708 = vrot.lane.b32.xlu1 %v2706_v20, %s11913_s5 }
0x294d   :  { %v2709_v22 = vpop.permute.xlu1 %2708 }
0x294e   :  { %v2711_v3 = vadd.f32 %v2709_v22, %v2693_v36  ;;  %v3145_v36 = vld [vmem:[#allocation7 + $0x18] sm:$0xff] }
0x294f   :  { %v12646_v40 = vpack.c.bf16 %v3145_v36, %v3144_v33  ;;  %v3372_v36 = vld [vmem:[#allocation13] sm:$0xff] }
0x2950   :  { %11526 = vtanh.f32 %v2711_v3 }
0x295a   :  { %v11527_v26 = vpop.eup %11526 }
0x295b   :  { %2715 = vrot.lane.b32.xlu0 %v11527_v26, %s11914_s8  ;;  %v12663_v26 = vld [vmem:[%s13748_s2] ss:$0 sm:$0xff] }
0x29cd   :  { %v2716_v27 = vpop.permute.xlu0 %2715 }
0x29ce   :  { %v2718_v9 = vmul.f32 %v2716_v27, %v2713_v58 }
0x29d0   :  { %v2720_v59 = vadd.f32 %v2719_v28, %v2718_v9 }
0x29d2   :  { %2722 = vrot.lane.b32.xlu1 %v2720_v59, %s11914_s8 }
0x2a44   :  { %v2723_v30 = vpop.permute.xlu1 %2722 }
0x2a45   :  { %v2725_v32 = vsel %vm243_vm2, %v2723_v30, %v12547_v60 }
0x2a46   :  { %9968 = vmatmul.mubr.msk.f32.vlgmr.msra.gmra.mrb[26].mxu1 %vm373_vm3, %v2725_v32 }
0x2a47   :  { %11001 = vmatpush3.bf16.msra.mxu1 %v12226_v16  ;;  %9989 = vmatprep.mubr.msk.f32.mxu1 %vm11912_vm0, %v11911_v1 }
0x2a48   :  { %11002 = vmatprep.subr.bf16.mxu1 %v11910_v0 }
0x2a4b   :  { %11004 = vmatpush3.bf16.msra.mxu1 %v12233_v21 }
0x2a4c   :  { %10003 = vmatprep.subr.mxu1 %v11911_v1 }
0x2b19   :  { %v2795_v29 = vpop.f32.mrb[26].mxu1 }
0x2b1a   :  { %v2796_v35 = vadd.f32 %v11678_v4, %v2795_v29  ;;  %v9969_v37 = vpop.f32.mrb[27].mxu1 }
0x2b1b   :  { %v3260_v37 = vld [vmem:[%s13753_s7 + $0x8] sm:$0xff] }
0x2b1c   :  { %2806 = vrot.lane.b32.xlu0 %v2796_v35, %s11915_s19  ;;  %v8936_v38 = vmul.f32 -1.442695, %v2796_v35 }
0x2b1e   :  { %11528 = vpow2.f32 %v8936_v38  ;;  %v3261_v38 = vld [vmem:[%s13753_s7 + $0x10] sm:$0xff] }
0x2b28   :  { %v11529_v5 = vpop.eup %11528 }
0x2b29   :  { %v2802_v10 = vadd.f32 1.0, %v11529_v5 }
0x2b2b   :  { %11530 = vrcp.f32 %v2802_v10  ;;  %v3262_v10 = vld [vmem:[%s13753_s7 + $0x18] sm:$0xff] }
0x2b35   :  { %v11531_v16 = vpop.eup %11530 }
0x2b36   :  { %v2816_v46 = vsub.f32 1.0, %v11531_v16  ;;  %v2822_v48 = vmul.f32 %v11531_v16, %v12547_v60  ;;  %v11679_v60 = vld [vmem:[%s13756_s10] ss:$0 sm:$0xff] }
0x2b8e   :  { %v2807_v13 = vpop.permute.xlu0 %2806 }
0x2b8f   :  { %v2809_v47 = vmul.f32 %v11531_v16, %v2807_v13  ;;  %v12682_v16 = vpack.c.bf16 %v3262_v10, %v3261_v38  ;;  %v3263_v13 = vld [vmem:[%s13753_s7 + $0x20] sm:$0xff] }
0x2b90   :  { %v12766_v10 = vld [vmem:[%s13756_s10] ss:$0 sm:$0xff] }
0x2b91   :  { %2811 = vrot.lane.b32.xlu1 %v2809_v47, %s11913_s5  ;;  %v3264_v47 = vld [vmem:[%s13753_s7 + $0x28] sm:$0xff] }
0x2c03   :  { %v2812_v49 = vpop.permute.xlu1 %2811 }
0x2c04   :  { %v2814_v21 = vadd.f32 %v2812_v49, %v2796_v35  ;;  %v3259_v35 = vld [vmem:[%s13753_s7] sm:$0xff]  ;;  %v12692_v49 = vpack.c.bf16 %v3264_v47, %v3263_v13 }
0x2c05   :  { %v12676_v5 = vpack.c.bf16 %v3260_v37, %v3259_v35  ;;  %v3544_v35 = vld [vmem:[%s13759_s13] sm:$0xff]  ;;  %v3545_v37 = vld [vmem:[%s13759_s13 + $0x8] sm:$0xff] }
0x2c06   :  { %11532 = vtanh.f32 %v2814_v21  ;;  %v12759_v38 = vpack.c.bf16 %v3545_v37, %v3544_v35 }
0x2c10   :  { %v11533_v50 = vpop.eup %11532 }
0x2c11   :  { %2818 = vrot.lane.b32.xlu0 %v11533_v50, %s11914_s8  ;;  %v3265_v50 = vld [vmem:[%s13753_s7 + $0x30] sm:$0xff] }
0x2c15   :  { %3231 = vrot.lane.b32.xlu0 %v12635_v7, %s11913_s5 }
0x2c83   :  { %v2819_v53 = vpop.permute.xlu0 %2818 }
0x2c84   :  { %v2821_v55 = vmul.f32 %v2819_v53, %v2816_v46  ;;  %v3266_v46 = vld [vmem:[%s13753_s7 + $0x38] sm:$0xff] }
0x2c85   :  { %v12703_v53 = vpack.c.bf16 %v3266_v46, %v3265_v50  ;;  %v3546_v46 = vld [vmem:[%s13759_s13 + $0x10] sm:$0xff] }
0x2c86   :  { %v2823_v56 = vadd.f32 %v2822_v48, %v2821_v55 }
0x2c87   :  { %v3232_v45 = vpop.permute.xlu0 %3231 }
0x2c88   :  { %2825 = vrot.lane.b32.xlu1 %v2823_v56, %s11914_s8 }
0x2cfa   :  { %v2826_v57 = vpop.permute.xlu1 %2825 }
0x2cfb   :  { %9979 = vmatmul.mubr.msk.f32.vlgmr.msra.gmra.mrb[30].mxu0 %vm243_vm2, %v2826_v57 }
0x2cfc   :  { %11007 = vmatpush3.bf16.msra.mxu0 %v12243_v24  ;;  %10000 = vmatprep.mubr.msk.f32.mxu0 %vm11912_vm0, %v11911_v1  ;;  %v12625_v24 = vld [vmem:[#allocation5] sm:$0xff] }
0x2cfd   :  { %11008 = vmatprep.subr.bf16.mxu0 %v11910_v0 }
0x2d00   :  { %11010 = vmatpush3.bf16.msra.mxu0 %v12262_v34  ;;  %v3060_v34 = vld [vmem:[#allocation2 + $0x10] sm:$0xff] }
0x2d01   :  { %11011 = vmatprep.subr.bf16.mxu0 %v11910_v0 }
0x2dce   :  { %v2895_v61 = vpop.f32.mrb[30].mxu0 }
0x2dcf   :  { %v2896_v62 = vadd.f32 %v11679_v60, %v2895_v61  ;;  %v9980_v2 = vpop.f32.mrb[31].mxu0 }
0x2dd0   :  { %v12721_v2 = vld [vmem:[#allocation11] ss:$0 sm:$0xff] }
0x2dd1   :  { %v2899_v6 = vmax.f32 %v2896_v62, 0.0 }
0x2dd3   :  { %9990 = vmatmul.mubr.msk.f32.vlgmr.msra.gmra.mrb[28].mxu1 %vm243_vm2, %v2899_v6 }
0x2dd4   :  { %10005 = vmatprep.mubr.msk.f32.mxu1 %vm11912_vm0, %v11911_v1  ;;  %10004 = vmatpush3.msra.mxu1 %v12625_v24 }
0x2dd5   :  { %11017 = vmatprep.subr.bf16.mxu1 %v11910_v0 }
0x2dd7   :  { %10006 = vmatmul.mubr.msk.f32.vlgmr.msra.gmra.mrb[30].mxu1 %vm165_vm1, %v3060_v34 }
0x2dd8   :  { %10035 = vmatprep.mubr.msk.f32.mxu1 %vm11912_vm0, %v11911_v1  ;;  %11019 = vmatpush3.bf16.msra.mxu1 %v12676_v5 }
0x2dd9   :  { %11020 = vmatprep.subr.bf16.mxu1 %v11910_v0 }
0x2ddc   :  { %11022 = vmatpush3.bf16.msra.mxu1 %v12682_v16 }
0x2ddd   :  { %11023 = vmatprep.subr.bf16.mxu1 %v11910_v0 }
0x2de0   :  { %11025 = vmatpush3.bf16.msra.mxu1 %v12692_v49 }
0x2de1   :  { %11026 = vmatprep.subr.bf16.mxu1 %v11910_v0 }
0x2de4   :  { %11028 = vmatpush3.bf16.msra.mxu1 %v12703_v53 }
0x2de5   :  { %11041 = vmatprep.subr.bf16.mxu1 %v11910_v0 }
0x2ea6   :  { %v2969_v11 = vpop.f32.mrb[28].mxu1 }
0x2ea7   :  { %v2970_v39 = vadd.f32 %v11680_v17, %v2969_v11  ;;  %v9991_v42 = vpop.f32.mrb[29].mxu1 }
0x2ea9   :  { %v2973_v51 = vmax.f32 %v2970_v39, 0.0 }
0x2eaa   :  { %v3138_v52 = vpop.f32.mrb[30].mxu1 }
0x2eab   :  { %10001 = vmatmul.mubr.msk.f32.vlgmr.msra.gmra.mrb[32].mxu0 %vm243_vm2, %v2973_v51  ;;  %v10007_v12 = vpop.f32.mrb[31].mxu1 }
0x2eac   :  { %11013 = vmatpush3.bf16.msra.mxu0 %v12642_v43  ;;  %10016 = vmatprep.mubr.msk.f32.mxu0 %vm11912_vm0, %v11911_v1  ;;  %v3374_v12 = vld [vmem:[#allocation13 + $0x10] sm:$0xff] }
0x2ead   :  { %11014 = vmatprep.subr.bf16.mxu0 %v11910_v0 }
0x2eb0   :  { %11016 = vmatpush3.bf16.msra.mxu0 %v12646_v40 }
0x2eb1   :  { %11029 = vmatprep.subr.bf16.mxu0 %v11910_v0 }
0x2eb3   :  { %10017 = vmatmul.mubr.msk.f32.vlgmr.msra.gmra.mrb[34].mxu0 %vm243_vm2, %v12458_v18  ;;  %v3139_v18 = vadd.f32 %v12663_v26, %v3138_v52  ;;  %v3373_v52 = vld [vmem:[#allocation13 + $0x8] sm:$0xff] }
0x2eb4   :  { %10046 = vmatprep.mubr.msk.f32.mxu0 %vm11912_vm0, %v11911_v1 }
0x2f7e   :  { %v12657_v19 = vpop.f32.mrb[32].mxu0 }
0x2f7f   :  { %v10002_v63 = vpop.f32.mrb[33].mxu0 }
0x2f80   :  { %v12726_v63 = vpack.c.bf16 %v3373_v52, %v3372_v36 }
0x2f82   :  { %11031 = vmatpush3.bf16.msra.mxu0 %v12726_v63 }
0x2f83   :  { %11032 = vmatprep.subr.bf16.mxu0 %v11910_v0 }
0x2f86   :  { %v3214_v20 = vpop.f32.mrb[34].mxu0 }
0x2f87   :  { %v3234_v22 = vadd.f32 %v3232_v45, %v3214_v20  ;;  %v10018_v3 = vpop.f32.mrb[35].mxu0  ;;  %v3218_v58 = vadd.f32 %v3214_v20, %v3139_v18  ;;  %v3375_v45 = vld [vmem:[#allocation13 + $0x18] sm:$0xff] }
0x2f88   :  { %v12729_v20 = vpack.c.bf16 %v3375_v45, %v3374_v12 }
0x2f89   :  { %3236 = vrot.lane.b32.xlu1 %v3234_v22, %s11913_s5  ;;  %v8944_v27 = vmul.f32 -1.442695, %v3218_v58 }
0x2f8a   :  { %11034 = vmatpush3.bf16.msra.mxu0 %v12729_v20 }
0x2f8b   :  { %11534 = vpow2.f32 %v8944_v27  ;;  %11035 = vmatprep.subr.bf16.mxu0 %v11910_v0 }
0x2f95   :  { %v11535_v28 = vpop.eup %11534 }
0x2f96   :  { %v3222_v9 = vadd.f32 1.0, %v11535_v28 }
0x2f98   :  { %11536 = vrcp.f32 %v3222_v9  ;;  %v3459_v9 = vld [vmem:[#allocation14] sm:$0xff] }
0x2fa2   :  { %v11537_v59 = vpop.eup %11536 }
0x2fa3   :  { %v3246_v48 = vsub.f32 1.0, %v11537_v59  ;;  %v3252_v56 = vmul.f32 %v11537_v59, %v12454_v14 }
0x2ffb   :  { %v3237_v30 = vpop.permute.xlu1 %3236 }
0x2ffc   :  { %v3239_v32 = vmul.f32 %v11537_v59, %v3237_v30  ;;  %v3460_v59 = vld [vmem:[#allocation14 + $0x8] sm:$0xff] }
0x2ffd   :  { %v12742_v30 = vpack.c.bf16 %v3460_v59, %v3459_v9 }
0x2ffe   :  { %3241 = vrot.lane.b32.xlu0 %v3239_v32, %s11913_s5 }
0x3070   :  { %v3242_v29 = vpop.permute.xlu0 %3241 }
0x3071   :  { %v3244_v4 = vadd.f32 %v3242_v29, %v3139_v18  ;;  %v3462_v29 = vld [vmem:[#allocation14 + $0x18] sm:$0xff] }
0x3073   :  { %11538 = vtanh.f32 %v3244_v4 }
0x307d   :  { %v11539_v21 = vpop.eup %11538 }
0x307e   :  { %3248 = vrot.lane.b32.xlu1 %v11539_v21, %s11914_s8 }
0x30f0   :  { %v3249_v55 = vpop.permute.xlu1 %3248 }
0x30f1   :  { %v3251_v57 = vmul.f32 %v3249_v55, %v3246_v48  ;;  %v3547_v48 = vld [vmem:[%s13759_s13 + $0x18] sm:$0xff] }
0x30f2   :  { %v12778_v55 = vpack.c.bf16 %v3547_v48, %v3546_v46 }
0x30f3   :  { %v12709_v61 = vadd.f32 %v3252_v56, %v3251_v57  ;;  %v3632_v56 = vld [vmem:[#allocation8] sm:$0xff]  ;;  %v3633_v57 = vld [vmem:[#allocation8 + $0x8] sm:$0xff] }
0x30f5   :  { %3255 = vrot.lane.b32.xlu0 %v12709_v61, %s11914_s8 }
0x3167   :  { %v12713_v60 = vpop.permute.xlu0 %3255 }
0x3168   :  { %v3258_v62 = vsel %vm243_vm2, %v12713_v60, %v12477_v41 }
0x3169   :  { %10036 = vmatmul.mubr.msk.f32.vlgmr.msra.gmra.mrb[32].mxu1 %vm373_vm3, %v3258_v62  ;;  %v3634_v62 = vld [vmem:[#allocation8 + $0x10] sm:$0xff] }
0x316a   :  { %10068 = vmatprep.mubr.msk.f32.mxu1 %vm11912_vm0, %v11911_v1  ;;  %11043 = vmatpush3.bf16.msra.mxu1 %v12759_v38 }
0x316b   :  { %11044 = vmatprep.subr.bf16.mxu1 %v11910_v0 }
0x316e   :  { %11046 = vmatpush3.bf16.msra.mxu1 %v12778_v55 }
0x316f   :  { %11053 = vmatprep.subr.bf16.mxu1 %v11910_v0 }
0x323c   :  { %v3343_v14 = vpop.f32.mrb[32].mxu1 }
0x323d   :  { %v3344_v6 = vadd.f32 %v12721_v2, %v3343_v14  ;;  %v10037_v34 = vpop.f32.mrb[33].mxu1  ;;  %v12782_v14 = vpack.c.bf16 %v3633_v57, %v3632_v56 }
0x323f   :  { %3354 = vrot.lane.b32.xlu1 %v3344_v6, %s11915_s19  ;;  %v8948_v25 = vmul.f32 -1.442695, %v3344_v6 }
0x3241   :  { %11540 = vpow2.f32 %v8948_v25  ;;  %v12793_v25 = vld [vmem:[%s13758_s12] ss:$0 sm:$0xff] }
0x324b   :  { %v11541_v8 = vpop.eup %11540 }
0x324c   :  { %v3350_v11 = vadd.f32 1.0, %v11541_v8 }
0x324e   :  { %11542 = vrcp.f32 %v3350_v11 }
0x3258   :  { %v11543_v17 = vpop.eup %11542 }
0x3259   :  { %v3364_v3 = vsub.f32 1.0, %v11543_v17  ;;  %v3370_v58 = vmul.f32 %v11543_v17, %v12477_v41  ;;  %v3461_v41 = vld [vmem:[#allocation14 + $0x10] sm:$0xff] }
0x325a   :  { %v12749_v4 = vpack.c.bf16 %v3462_v29, %v3461_v41 }
0x32b1   :  { %v3355_v39 = vpop.permute.xlu1 %3354 }
0x32b2   :  { %v3357_v42 = vmul.f32 %v11543_v17, %v3355_v39 }
0x32b4   :  { %3359 = vrot.lane.b32.xlu0 %v3357_v42, %s11913_s5  ;;  %v12807_v42 = vld [vmem:[#allocation8 + $0x20] sm:$0xff] }
0x3326   :  { %v3360_v51 = vpop.permute.xlu0 %3359 }
0x3327   :  { %v3362_v33 = vadd.f32 %v3360_v51, %v3344_v6  ;;  %v3635_v6 = vld [vmem:[#allocation8 + $0x18] sm:$0xff]  ;;  %v12814_v51 = vld [vmem:[%s13760_s14] ss:$0 sm:$0xff] }
0x3328   :  { %v12785_v34 = vpack.c.bf16 %v3635_v6, %v3634_v62 }
0x3329   :  { %11544 = vtanh.f32 %v3362_v33 }
0x3333   :  { %v11545_v22 = vpop.eup %11544 }
0x3334   :  { %3366 = vrot.lane.b32.xlu1 %v11545_v22, %s11914_s8  ;;  %v12828_v22 = vld [vmem:[#allocation10] ss:$0 sm:$0xff] }
0x3338   :  { %3628 = vrot.lane.b32.xlu1 %v12709_v61, %s11916_s1 }
0x33a6   :  { %v3367_v18 = vpop.permute.xlu1 %3366 }
0x33a7   :  { %v3369_v27 = vmul.f32 %v3367_v18, %v3364_v3 }
0x33a9   :  { %v12738_v28 = vadd.f32 %v3370_v58, %v3369_v27 }
0x33aa   :  { %v3629_v12 = vpop.permute.xlu1 %3628 }
0x33ab   :  { %3384 = vrot.lane.b32.xlu0 %v12738_v28, %s11914_s8 }
0x341d   :  { %v3385_v32 = vpop.permute.xlu0 %3384 }
0x341e   :  { %10047 = vmatmul.mubr.msk.f32.vlgmr.msra.gmra.mrb[36].mxu0 %vm243_vm2, %v3385_v32 }
0x341f   :  { %11037 = vmatpush3.bf16.msra.mxu0 %v12742_v30  ;;  %10057 = vmatprep.mubr.msk.f32.mxu0 %vm11912_vm0, %v11911_v1 }
0x3420   :  { %11038 = vmatprep.subr.bf16.mxu0 %v11910_v0 }
0x3423   :  { %11040 = vmatpush3.bf16.msra.mxu0 %v12749_v4 }
0x3424   :  { %11047 = vmatprep.subr.bf16.mxu0 %v11910_v0 }
0x34f1   :  { %v3454_v13 = vpop.f32.mrb[36].mxu0 }
0x34f2   :  { %v3455_v47 = vadd.f32 %v12766_v10, %v3454_v13  ;;  %v10048_v21 = vpop.f32.mrb[37].mxu0 }
0x34f4   :  { %v3458_v50 = vmax.f32 %v3455_v47, 0.0 }
0x34f6   :  { %10058 = vmatmul.mubr.msk.f32.vlgmr.msra.gmra.mrb[38].mxu0 %vm243_vm2, %v3458_v50 }
0x34f7   :  { %10081 = vmatprep.mubr.msk.f32.mxu0 %vm11912_vm0, %v11911_v1  ;;  %11049 = vmatpush3.bf16.msra.mxu0 %v12782_v14 }
0x34f8   :  { %11050 = vmatprep.subr.bf16.mxu0 %v11910_v0 }
0x34fb   :  { %11052 = vmatpush3.bf16.msra.mxu0 %v12785_v34 }
0x34fc   :  { %10079 = vmatprep.subr.mxu0 %v11911_v1 }
0x34ff   :  { %10080 = vmatpush3.msra.mxu0 %v12807_v42 }
0x3500   :  { %11065 = vmatprep.subr.bf16.mxu0 %v11910_v0 }
0x35c9   :  { %v3539_v8 = vpop.f32.mrb[38].mxu0 }
0x35ca   :  { %v3540_v11 = vadd.f32 %v12793_v25, %v3539_v8  ;;  %v10059_v17 = vpop.f32.mrb[39].mxu0 }
0x35cc   :  { %v3543_v39 = vmax.f32 %v3540_v11, 0.0 }
0x35ce   :  { %10069 = vmatmul.mubr.msk.f32.vlgmr.msra.gmra.mrb[34].mxu1 %vm243_vm2, %v3543_v39 }
0x35cf   :  { %11055 = vmatpush3.bf16.msra.mxu1 %v12676_v5  ;;  %10100 = vmatprep.mubr.msk.f32.mxu1 %vm11912_vm0, %v11911_v1 }
0x35d0   :  { %11056 = vmatprep.subr.bf16.mxu1 %v11910_v0 }
0x35d3   :  { %11058 = vmatpush3.bf16.msra.mxu1 %v12682_v16 }
0x35d4   :  { %11059 = vmatprep.subr.bf16.mxu1 %v11910_v0 }
0x35d7   :  { %11061 = vmatpush3.bf16.msra.mxu1 %v12692_v49 }
0x35d8   :  { %11062 = vmatprep.subr.bf16.mxu1 %v11910_v0 }
0x35db   :  { %11064 = vmatpush3.bf16.msra.mxu1 %v12703_v53 }
0x35dc   :  { %11077 = vmatprep.subr.bf16.mxu1 %v11910_v0 }
0x36a1   :  { %v3624_v33 = vpop.f32.mrb[34].mxu1 }
0x36a2   :  { %v12817_v36 = vadd.f32 %v12814_v51, %v3624_v33  ;;  %v10070_v52 = vpop.f32.mrb[35].mxu1 }
0x36a4   :  { %v3631_v45 = vsel %vm165_vm1, %v12817_v36, %v3629_v12 }
0x36a5   :  { %10082 = vmatmul.mubr.msk.f32.vlgmr.msra.gmra.mrb[40].mxu0 %vm744_vm4, %v3631_v45 }
0x36a6   :  { %11067 = vmatpush3.bf16.msra.mxu0 %v12726_v63  ;;  %10111 = vmatprep.mubr.msk.f32.mxu0 %vm11912_vm0, %v11911_v1 }
0x36a7   :  { %11068 = vmatprep.subr.bf16.mxu0 %v11910_v0 }
0x36aa   :  { %11070 = vmatpush3.bf16.msra.mxu0 %v12729_v20 }
0x36ab   :  { %11071 = vmatprep.subr.bf16.mxu0 %v11910_v0 }
0x3778   :  { %v3713_v3 = vpop.f32.mrb[40].mxu0 }
0x3779   :  { %v3714_v18 = vadd.f32 %v12828_v22, %v3713_v3  ;;  %v10083_v58 = vpop.f32.mrb[41].mxu0 }
0x377b   :  { %3724 = vrot.lane.b32.xlu0 %v3714_v18, %s11915_s19  ;;  %v8957_v27 = vmul.f32 -1.442695, %v3714_v18 }
0x377d   :  { %11546 = vpow2.f32 %v8957_v27 }
0x3787   :  { %v11547_v9 = vpop.eup %11546 }
0x3788   :  { %v3720_v59 = vadd.f32 1.0, %v11547_v9 }
0x378a   :  { %11548 = vrcp.f32 %v3720_v59 }
0x3794   :  { %v11549_v32 = vpop.eup %11548 }
0x3795   :  { %v3734_v47 = vsub.f32 1.0, %v11549_v32  ;;  %v3740_v50 = vmul.f32 %v11549_v32, %v12709_v61 }
0x37ed   :  { %v3725_v41 = vpop.permute.xlu0 %3724 }
0x37ee   :  { %v3727_v29 = vmul.f32 %v11549_v32, %v3725_v41 }
0x37f0   :  { %3729 = vrot.lane.b32.xlu1 %v3727_v29, %s11913_s5 }
0x3862   :  { %v3730_v35 = vpop.permute.xlu1 %3729 }
0x3863   :  { %v3732_v37 = vadd.f32 %v3730_v35, %v3714_v18 }
0x3865   :  { %11550 = vtanh.f32 %v3732_v37 }
0x386f   :  { %v11551_v13 = vpop.eup %11550 }
0x3870   :  { %3736 = vrot.lane.b32.xlu0 %v11551_v13, %s11914_s8 }
0x38e2   :  { %v3737_v21 = vpop.permute.xlu0 %3736 }
0x38e3   :  { %v3739_v46 = vmul.f32 %v3737_v21, %v3734_v47 }
0x38e5   :  { %v12835_v48 = vadd.f32 %v3740_v50, %v3739_v46 }
0x38e7   :  { %3743 = vrot.lane.b32.xlu1 %v12835_v48, %s11914_s8 }
0x3959   :  { %v3744_v56 = vpop.permute.xlu1 %3743 }
0x395a   :  { %v3746_v57 = vsel %vm243_vm2, %v3744_v56, %v12738_v28 }
0x395b   :  { %10101 = vmatmul.mubr.msk.f32.vlgmr.msra.gmra.mrb[36].mxu1 %vm373_vm3, %v3746_v57 }
0x395c   :  { %11079 = vmatpush3.bf16.msra.mxu1 %v12759_v38  ;;  %10133 = vmatprep.mubr.msk.f32.mxu1 %vm11912_vm0, %v11911_v1 }
0x395d   :  { %11080 = vmatprep.subr.bf16.mxu1 %v11910_v0 }
0x3960   :  { %11082 = vmatpush3.bf16.msra.mxu1 %v12778_v55 }
0x3961   :  { %11089 = vmatprep.subr.bf16.mxu1 %v11910_v0 }
0x3a2e   :  { %v3816_v62 = vpop.f32.mrb[36].mxu1 }
0x3a2f   :  { %v3817_v6 = vadd.f32 %v12721_v2, %v3816_v62  ;;  %v10102_v8 = vpop.f32.mrb[37].mxu1 }
0x3a31   :  { %3827 = vrot.lane.b32.xlu0 %v3817_v6, %s11915_s19  ;;  %v8959_v11 = vmul.f32 -1.442695, %v3817_v6 }
0x3a33   :  { %11552 = vpow2.f32 %v8959_v11 }
0x3a3d   :  { %v11553_v17 = vpop.eup %11552 }
0x3a3e   :  { %v3823_v39 = vadd.f32 1.0, %v11553_v17 }
0x3a40   :  { %11554 = vrcp.f32 %v3823_v39 }
0x3a4a   :  { %v11555_v33 = vpop.eup %11554 }
0x3a4b   :  { %v3837_v58 = vsub.f32 1.0, %v11555_v33  ;;  %v3843_v9 = vmul.f32 %v11555_v33, %v12738_v28 }
0x3aa3   :  { %v3828_v52 = vpop.permute.xlu0 %3827 }
0x3aa4   :  { %v3830_v12 = vmul.f32 %v11555_v33, %v3828_v52 }
0x3aa6   :  { %3832 = vrot.lane.b32.xlu1 %v3830_v12, %s11913_s5 }
0x3b18   :  { %v3833_v45 = vpop.permute.xlu1 %3832 }
0x3b19   :  { %v3835_v3 = vadd.f32 %v3833_v45, %v3817_v6 }
0x3b1b   :  { %11556 = vtanh.f32 %v3835_v3 }
0x3b25   :  { %v11557_v18 = vpop.eup %11556 }
0x3b26   :  { %3839 = vrot.lane.b32.xlu0 %v11557_v18, %s11914_s8 }
0x3b2a   :  { %4068 = vrot.lane.b32.xlu0 %v12835_v48, %s11916_s1 }
0x3b98   :  { %v3840_v27 = vpop.permute.xlu0 %3839 }
0x3b99   :  { %v3842_v59 = vmul.f32 %v3840_v27, %v3837_v58 }
0x3b9b   :  { %v12855_v32 = vadd.f32 %v3843_v9, %v3842_v59 }
0x3b9c   :  { %v4069_v6 = vpop.permute.xlu0 %4068 }
0x3b9d   :  { %3846 = vrot.lane.b32.xlu1 %v12855_v32, %s11914_s8 }
0x3c0f   :  { %v3847_v41 = vpop.permute.xlu1 %3846 }
0x3c10   :  { %10112 = vmatmul.mubr.msk.f32.vlgmr.msra.gmra.mrb[42].mxu0 %vm243_vm2, %v3847_v41 }
0x3c11   :  { %11073 = vmatpush3.bf16.msra.mxu0 %v12742_v30  ;;  %10122 = vmatprep.mubr.msk.f32.mxu0 %vm11912_vm0, %v11911_v1 }
0x3c12   :  { %11074 = vmatprep.subr.bf16.mxu0 %v11910_v0 }
0x3c15   :  { %11076 = vmatpush3.bf16.msra.mxu0 %v12749_v4 }
0x3c16   :  { %11083 = vmatprep.subr.bf16.mxu0 %v11910_v0 }
0x3ce3   :  { %v3916_v29 = vpop.f32.mrb[42].mxu0 }
0x3ce4   :  { %v3917_v35 = vadd.f32 %v12766_v10, %v3916_v29  ;;  %v10113_v37 = vpop.f32.mrb[43].mxu0 }
0x3ce6   :  { %v3920_v13 = vmax.f32 %v3917_v35, 0.0 }
0x3ce8   :  { %10123 = vmatmul.mubr.msk.f32.vlgmr.msra.gmra.mrb[44].mxu0 %vm243_vm2, %v3920_v13 }
0x3ce9   :  { %11085 = vmatpush3.bf16.msra.mxu0 %v12782_v14  ;;  %10146 = vmatprep.mubr.msk.f32.mxu0 %vm11912_vm0, %v11911_v1 }
0x3cea   :  { %11086 = vmatprep.subr.bf16.mxu0 %v11910_v0 }
0x3ced   :  { %11088 = vmatpush3.bf16.msra.mxu0 %v12785_v34 }
0x3cee   :  { %10144 = vmatprep.subr.mxu0 %v11911_v1 }
0x3cf1   :  { %10145 = vmatpush3.msra.mxu0 %v12807_v42 }
0x3cf2   :  { %11101 = vmatprep.subr.bf16.mxu0 %v11910_v0 }
0x3dbb   :  { %v3990_v47 = vpop.f32.mrb[44].mxu0 }
0x3dbc   :  { %v3991_v21 = vadd.f32 %v12793_v25, %v3990_v47  ;;  %v10124_v50 = vpop.f32.mrb[45].mxu0 }
0x3dbe   :  { %v3994_v46 = vmax.f32 %v3991_v21, 0.0 }
0x3dc0   :  { %10134 = vmatmul.mubr.msk.f32.vlgmr.msra.gmra.mrb[38].mxu1 %vm243_vm2, %v3994_v46 }
0x3dc1   :  { %11091 = vmatpush3.bf16.msra.mxu1 %v12676_v5  ;;  %10165 = vmatprep.mubr.msk.f32.mxu1 %vm11912_vm0, %v11911_v1 }
0x3dc2   :  { %11092 = vmatprep.subr.bf16.mxu1 %v11910_v0 }
0x3dc5   :  { %11094 = vmatpush3.bf16.msra.mxu1 %v12682_v16 }
0x3dc6   :  { %11095 = vmatprep.subr.bf16.mxu1 %v11910_v0 }
0x3dc9   :  { %11097 = vmatpush3.bf16.msra.mxu1 %v12692_v49 }
0x3dca   :  { %11098 = vmatprep.subr.bf16.mxu1 %v11910_v0 }
0x3dcd   :  { %11100 = vmatpush3.bf16.msra.mxu1 %v12703_v53 }
0x3dce   :  { %11107 = vmatprep.subr.bf16.mxu1 %v11910_v0 }
0x3e93   :  { %v4064_v56 = vpop.f32.mrb[38].mxu1 }
0x3e94   :  { %v12889_v57 = vadd.f32 %v12814_v51, %v4064_v56  ;;  %v10135_v62 = vpop.f32.mrb[39].mxu1 }
0x3e96   :  { %v4071_v8 = vsel %vm165_vm1, %v12889_v57, %v4069_v6 }
0x3e97   :  { %10147 = vmatmul.mubr.msk.f32.vlgmr.msra.gmra.mrb[46].mxu0 %vm744_vm4, %v4071_v8 }
0x3e98   :  { %11103 = vmatpush3.bf16.msra.mxu0 %v12726_v63  ;;  %10176 = vmatprep.mubr.msk.f32.mxu0 %vm11912_vm0, %v11911_v1 }
0x3e99   :  { %11104 = vmatprep.subr.bf16.mxu0 %v11910_v0 }
0x3e9c   :  { %11106 = vmatpush3.bf16.msra.mxu0 %v12729_v20 }
0x3e9d   :  { %11113 = vmatprep.subr.bf16.mxu0 %v11910_v0 }
0x3f6a   :  { %v4141_v11 = vpop.f32.mrb[46].mxu0 }
0x3f6b   :  { %v4142_v17 = vadd.f32 %v12828_v22, %v4141_v11  ;;  %v10148_v39 = vpop.f32.mrb[47].mxu0 }
0x3f6d   :  { %4152 = vrot.lane.b32.xlu1 %v4142_v17, %s11915_s19  ;;  %v8964_v33 = vmul.f32 -1.442695, %v4142_v17 }
0x3f6f   :  { %11558 = vpow2.f32 %v8964_v33 }
0x3f79   :  { %v11559_v52 = vpop.eup %11558 }
0x3f7a   :  { %v4148_v12 = vadd.f32 1.0, %v11559_v52 }
0x3f7c   :  { %11560 = vrcp.f32 %v4148_v12 }
0x3f86   :  { %v11561_v45 = vpop.eup %11560 }
0x3f87   :  { %v4162_v59 = vsub.f32 1.0, %v11561_v45  ;;  %v4168_v29 = vmul.f32 %v11561_v45, %v12835_v48 }
0x3fdf   :  { %v4153_v3 = vpop.permute.xlu1 %4152 }
0x3fe0   :  { %v4155_v18 = vmul.f32 %v11561_v45, %v4153_v3 }
0x3fe2   :  { %4157 = vrot.lane.b32.xlu0 %v4155_v18, %s11913_s5 }
0x4054   :  { %v4158_v58 = vpop.permute.xlu0 %4157 }
0x4055   :  { %v4160_v27 = vadd.f32 %v4158_v58, %v4142_v17 }
0x4057   :  { %11562 = vtanh.f32 %v4160_v27 }
0x4061   :  { %v11563_v9 = vpop.eup %11562 }
0x4062   :  { %4164 = vrot.lane.b32.xlu1 %v11563_v9, %s11914_s8 }
0x40d4   :  { %v4165_v41 = vpop.permute.xlu1 %4164 }
0x40d5   :  { %v4167_v35 = vmul.f32 %v4165_v41, %v4162_v59  ;;  %v4509_v59 = vld [vmem:[#allocation2 + $0x18] sm:$0xff] }
0x40d7   :  { %v4169_v37 = vadd.f32 %v4168_v29, %v4167_v35 }
0x40d9   :  { %4171 = vrot.lane.b32.xlu0 %v4169_v37, %s11914_s8 }
0x414b   :  { %v4172_v13 = vpop.permute.xlu0 %4171 }
0x414c   :  { %v4174_v47 = vsel %vm243_vm2, %v4172_v13, %v12855_v32 }
0x414d   :  { %10166 = vmatmul.mubr.msk.f32.vlgmr.msra.gmra.mrb[40].mxu1 %vm373_vm3, %v4174_v47 }
0x414e   :  { %11109 = vmatpush3.bf16.msra.mxu1 %v12742_v30  ;;  %10187 = vmatprep.mubr.msk.f32.mxu1 %vm11912_vm0, %v11911_v1 }
0x414f   :  { %11110 = vmatprep.subr.bf16.mxu1 %v11910_v0 }
0x4152   :  { %11112 = vmatpush3.bf16.msra.mxu1 %v12749_v4 }
0x4153   :  { %10201 = vmatprep.subr.mxu1 %v11911_v1 }
0x4220   :  { %v4244_v48 = vpop.f32.mrb[40].mxu1 }
0x4221   :  { %v4245_v21 = vadd.f32 %v12721_v2, %v4244_v48  ;;  %v10167_v50 = vpop.f32.mrb[41].mxu1 }
0x4223   :  { %4255 = vrot.lane.b32.xlu1 %v4245_v21, %s11915_s19  ;;  %v8966_v46 = vmul.f32 -1.442695, %v4245_v21 }
0x4225   :  { %11564 = vpow2.f32 %v8966_v46 }
0x422f   :  { %v11565_v56 = vpop.eup %11564 }
0x4230   :  { %v4251_v62 = vadd.f32 1.0, %v11565_v56 }
0x4232   :  { %11566 = vrcp.f32 %v4251_v62 }
0x423c   :  { %v11567_v6 = vpop.eup %11566 }
0x423d   :  { %v4265_v52 = vsub.f32 1.0, %v11567_v6  ;;  %v4271_v45 = vmul.f32 %v11567_v6, %v12855_v32 }
0x4295   :  { %v4256_v8 = vpop.permute.xlu1 %4255 }
0x4296   :  { %v4258_v11 = vmul.f32 %v11567_v6, %v4256_v8 }
0x4298   :  { %4260 = vrot.lane.b32.xlu0 %v4258_v11, %s11913_s5 }
0x430a   :  { %v4261_v17 = vpop.permute.xlu0 %4260 }
0x430b   :  { %v4263_v39 = vadd.f32 %v4261_v17, %v4245_v21 }
0x430d   :  { %11568 = vtanh.f32 %v4263_v39 }
0x4317   :  { %v11569_v33 = vpop.eup %11568 }
0x4318   :  { %4267 = vrot.lane.b32.xlu1 %v11569_v33, %s11914_s8 }
0x431c   :  { %4680 = vrot.lane.b32.xlu1 %v12635_v7, %s11913_s5 }
0x438a   :  { %v4268_v12 = vpop.permute.xlu1 %4267 }
0x438b   :  { %v4270_v3 = vmul.f32 %v4268_v12, %v4265_v52 }
0x438d   :  { %v4272_v18 = vadd.f32 %v4271_v45, %v4270_v3 }
0x438e   :  { %v4681_v47 = vpop.permute.xlu1 %4680 }
0x438f   :  { %4274 = vrot.lane.b32.xlu0 %v4272_v18, %s11914_s8 }
0x4401   :  { %v4275_v58 = vpop.permute.xlu0 %4274 }
0x4402   :  { %10177 = vmatmul.mubr.msk.f32.vlgmr.msra.gmra.mrb[48].mxu0 %vm243_vm2, %v4275_v58 }
0x4403   :  { %11115 = vmatpush3.bf16.msra.mxu0 %v12759_v38  ;;  %10198 = vmatprep.mubr.msk.f32.mxu0 %vm11912_vm0, %v11911_v1 }
0x4404   :  { %11116 = vmatprep.subr.bf16.mxu0 %v11910_v0 }
0x4407   :  { %11118 = vmatpush3.bf16.msra.mxu0 %v12778_v55 }
0x4408   :  { %11119 = vmatprep.subr.bf16.mxu0 %v11910_v0 }
0x44d5   :  { %v4344_v7 = vpop.f32.mrb[48].mxu0 }
0x44d6   :  { %v4345_v32 = vadd.f32 %v12766_v10, %v4344_v7  ;;  %v10178_v27 = vpop.f32.mrb[49].mxu0 }
0x44d8   :  { %v4348_v9 = vmax.f32 %v4345_v32, 0.0 }
0x44da   :  { %10188 = vmatmul.mubr.msk.f32.vlgmr.msra.gmra.mrb[42].mxu1 %vm243_vm2, %v4348_v9 }
0x44db   :  { %10202 = vmatpush3.msra.mxu1 %v12625_v24  ;;  %10203 = vmatprep.mubr.msk.f32.mxu1 %vm11912_vm0, %v11911_v1 }
0x44dc   :  { %11125 = vmatprep.subr.bf16.mxu1 %v11910_v0 }
0x44de   :  { %10204 = vmatmul.mubr.msk.f32.vlgmr.msra.gmra.mrb[44].mxu1 %vm165_vm1, %v4509_v59 }
0x44df   :  { %11127 = vmatpush3.bf16.msra.mxu1 %v12676_v5  ;;  %10233 = vmatprep.mubr.msk.f32.mxu1 %vm11912_vm0, %v11911_v1 }
0x44e0   :  { %11128 = vmatprep.subr.bf16.mxu1 %v11910_v0 }
0x44e3   :  { %11130 = vmatpush3.bf16.msra.mxu1 %v12682_v16 }
0x44e4   :  { %11131 = vmatprep.subr.bf16.mxu1 %v11910_v0 }
0x44e7   :  { %11133 = vmatpush3.bf16.msra.mxu1 %v12692_v49 }
0x44e8   :  { %11134 = vmatprep.subr.bf16.mxu1 %v11910_v0 }
0x44eb   :  { %11136 = vmatpush3.bf16.msra.mxu1 %v12703_v53 }
0x44ec   :  { %11149 = vmatprep.subr.bf16.mxu1 %v11910_v0 }
0x45ad   :  { %v4418_v24 = vpop.f32.mrb[42].mxu1 }
0x45ae   :  { %v4419_v41 = vadd.f32 %v12793_v25, %v4418_v24  ;;  %v10189_v29 = vpop.f32.mrb[43].mxu1 }
0x45b0   :  { %v4422_v35 = vmax.f32 %v4419_v41, 0.0 }
0x45b2   :  { %10199 = vmatmul.mubr.msk.f32.vlgmr.msra.gmra.mrb[50].mxu0 %vm243_vm2, %v4422_v35 }
0x45b3   :  { %11121 = vmatpush3.bf16.msra.mxu0 %v12642_v43  ;;  %10214 = vmatprep.mubr.msk.f32.mxu0 %vm11912_vm0, %v11911_v1  ;;  %v4587_v43 = vpop.f32.mrb[44].mxu1 }
0x45b4   :  { %11122 = vmatprep.subr.bf16.mxu0 %v11910_v0  ;;  %v10205_v37 = vpop.f32.mrb[45].mxu1  ;;  %v4588_v50 = vadd.f32 %v12663_v26, %v4587_v43 }
0x45b7   :  { %11124 = vmatpush3.bf16.msra.mxu0 %v12646_v40 }
0x45b8   :  { %11137 = vmatprep.subr.bf16.mxu0 %v11910_v0 }
0x45ba   :  { %10215 = vmatmul.mubr.msk.f32.vlgmr.msra.gmra.mrb[52].mxu0 %vm243_vm2, %v12713_v60 }
0x45bb   :  { %11139 = vmatpush3.bf16.msra.mxu0 %v12726_v63  ;;  %10244 = vmatprep.mubr.msk.f32.mxu0 %vm11912_vm0, %v11911_v1 }
0x45bc   :  { %11140 = vmatprep.subr.bf16.mxu0 %v11910_v0 }
0x45bf   :  { %11142 = vmatpush3.bf16.msra.mxu0 %v12729_v20 }
0x45c0   :  { %11143 = vmatprep.subr.bf16.mxu0 %v11910_v0 }
0x4685   :  { %v12963_v13 = vpop.f32.mrb[50].mxu0 }
0x4686   :  { %v10200_v40 = vpop.f32.mrb[51].mxu0 }
0x468d   :  { %v4663_v48 = vpop.f32.mrb[52].mxu0 }
0x468e   :  { %v4683_v21 = vadd.f32 %v4681_v47, %v4663_v48  ;;  %v10216_v60 = vpop.f32.mrb[53].mxu0  ;;  %v4667_v46 = vadd.f32 %v4663_v48, %v4588_v50 }
0x4690   :  { %4685 = vrot.lane.b32.xlu0 %v4683_v21, %s11913_s5  ;;  %v8974_v56 = vmul.f32 -1.442695, %v4667_v46 }
0x4692   :  { %11570 = vpow2.f32 %v8974_v56 }
0x469c   :  { %v11571_v62 = vpop.eup %11570 }
0x469d   :  { %v4671_v6 = vadd.f32 1.0, %v11571_v62 }
0x469f   :  { %11572 = vrcp.f32 %v4671_v6 }
0x46a9   :  { %v11573_v8 = vpop.eup %11572 }
0x46aa   :  { %v4695_v12 = vsub.f32 1.0, %v11573_v8  ;;  %v4701_v26 = vmul.f32 %v11573_v8, %v12709_v61 }
0x4702   :  { %v4686_v11 = vpop.permute.xlu0 %4685 }
0x4703   :  { %v4688_v17 = vmul.f32 %v11573_v8, %v4686_v11 }
0x4705   :  { %4690 = vrot.lane.b32.xlu1 %v4688_v17, %s11913_s5 }
0x4777   :  { %v4691_v39 = vpop.permute.xlu1 %4690 }
0x4778   :  { %v4693_v33 = vadd.f32 %v4691_v39, %v4588_v50 }
0x477a   :  { %11574 = vtanh.f32 %v4693_v33 }
0x4784   :  { %v11575_v52 = vpop.eup %11574 }
0x4785   :  { %4697 = vrot.lane.b32.xlu0 %v11575_v52, %s11914_s8 }
0x47f7   :  { %v4698_v45 = vpop.permute.xlu0 %4697 }
0x47f8   :  { %v4700_v3 = vmul.f32 %v4698_v45, %v4695_v12 }
0x47fa   :  { %v12970_v18 = vadd.f32 %v4701_v26, %v4700_v3 }
0x47fc   :  { %4704 = vrot.lane.b32.xlu1 %v12970_v18, %s11914_s8 }
0x486e   :  { %v12974_v58 = vpop.permute.xlu1 %4704 }
0x486f   :  { %v4707_v7 = vsel %vm243_vm2, %v12974_v58, %v12738_v28 }
0x4870   :  { %10234 = vmatmul.mubr.msk.f32.vlgmr.msra.gmra.mrb[46].mxu1 %vm373_vm3, %v4707_v7 }
0x4871   :  { %11151 = vmatpush3.bf16.msra.mxu1 %v12759_v38  ;;  %10266 = vmatprep.mubr.msk.f32.mxu1 %vm11912_vm0, %v11911_v1 }
0x4872   :  { %11152 = vmatprep.subr.bf16.mxu1 %v11910_v0 }
0x4875   :  { %11154 = vmatpush3.bf16.msra.mxu1 %v12778_v55 }
0x4876   :  { %11161 = vmatprep.subr.bf16.mxu1 %v11910_v0 }
0x4943   :  { %v4792_v61 = vpop.f32.mrb[46].mxu1 }
0x4944   :  { %v4793_v32 = vadd.f32 %v12721_v2, %v4792_v61  ;;  %v10235_v27 = vpop.f32.mrb[47].mxu1 }
0x4946   :  { %4803 = vrot.lane.b32.xlu0 %v4793_v32, %s11915_s19  ;;  %v8978_v9 = vmul.f32 -1.442695, %v4793_v32 }
0x4948   :  { %11576 = vpow2.f32 %v8978_v9 }
0x4952   :  { %v11577_v59 = vpop.eup %11576 }
0x4953   :  { %v4799_v24 = vadd.f32 1.0, %v11577_v59 }
0x4955   :  { %11578 = vrcp.f32 %v4799_v24 }
0x495f   :  { %v11579_v41 = vpop.eup %11578 }
0x4960   :  { %v4813_v47 = vsub.f32 1.0, %v11579_v41  ;;  %v4819_v21 = vmul.f32 %v11579_v41, %v12738_v28 }
0x49b8   :  { %v4804_v29 = vpop.permute.xlu0 %4803 }
0x49b9   :  { %v4806_v35 = vmul.f32 %v11579_v41, %v4804_v29 }
0x49bb   :  { %4808 = vrot.lane.b32.xlu1 %v4806_v35, %s11913_s5 }
0x4a2d   :  { %v4809_v43 = vpop.permute.xlu1 %4808 }
0x4a2e   :  { %v4811_v37 = vadd.f32 %v4809_v43, %v4793_v32 }
0x4a30   :  { %11580 = vtanh.f32 %v4811_v37 }
0x4a3a   :  { %v11581_v40 = vpop.eup %11580 }
0x4a3b   :  { %4815 = vrot.lane.b32.xlu0 %v11581_v40, %s11914_s8 }
0x4a3f   :  { %5077 = vrot.lane.b32.xlu0 %v12970_v18, %s11916_s1 }
0x4aad   :  { %v4816_v48 = vpop.permute.xlu0 %4815 }
0x4aae   :  { %v4818_v60 = vmul.f32 %v4816_v48, %v4813_v47 }
0x4ab0   :  { %v12993_v50 = vadd.f32 %v4819_v21, %v4818_v60 }
0x4ab1   :  { %v5078_v45 = vpop.permute.xlu0 %5077 }
0x4ab2   :  { %4833 = vrot.lane.b32.xlu1 %v12993_v50, %s11914_s8 }
0x4b24   :  { %v4834_v46 = vpop.permute.xlu1 %4833 }
0x4b25   :  { %10245 = vmatmul.mubr.msk.f32.vlgmr.msra.gmra.mrb[54].mxu0 %vm243_vm2, %v4834_v46 }
0x4b26   :  { %11145 = vmatpush3.bf16.msra.mxu0 %v12742_v30  ;;  %10255 = vmatprep.mubr.msk.f32.mxu0 %vm11912_vm0, %v11911_v1 }
0x4b27   :  { %11146 = vmatprep.subr.bf16.mxu0 %v11910_v0 }
0x4b2a   :  { %11148 = vmatpush3.bf16.msra.mxu0 %v12749_v4 }
0x4b2b   :  { %11155 = vmatprep.subr.bf16.mxu0 %v11910_v0 }
0x4bf8   :  { %v4903_v28 = vpop.f32.mrb[54].mxu0 }
0x4bf9   :  { %v4904_v56 = vadd.f32 %v12766_v10, %v4903_v28  ;;  %v10246_v62 = vpop.f32.mrb[55].mxu0 }
0x4bfb   :  { %v4907_v6 = vmax.f32 %v4904_v56, 0.0 }
0x4bfd   :  { %10256 = vmatmul.mubr.msk.f32.vlgmr.msra.gmra.mrb[56].mxu0 %vm243_vm2, %v4907_v6 }
0x4bfe   :  { %11157 = vmatpush3.bf16.msra.mxu0 %v12782_v14  ;;  %10279 = vmatprep.mubr.msk.f32.mxu0 %vm11912_vm0, %v11911_v1 }
0x4bff   :  { %11158 = vmatprep.subr.bf16.mxu0 %v11910_v0 }
0x4c02   :  { %11160 = vmatpush3.bf16.msra.mxu0 %v12785_v34 }
0x4c03   :  { %10277 = vmatprep.subr.mxu0 %v11911_v1 }
0x4c06   :  { %10278 = vmatpush3.msra.mxu0 %v12807_v42 }
0x4c07   :  { %11173 = vmatprep.subr.bf16.mxu0 %v11910_v0 }
0x4cd0   :  { %v4988_v8 = vpop.f32.mrb[56].mxu0 }
0x4cd1   :  { %v4989_v11 = vadd.f32 %v12793_v25, %v4988_v8  ;;  %v10257_v17 = vpop.f32.mrb[57].mxu0 }
0x4cd3   :  { %v4992_v39 = vmax.f32 %v4989_v11, 0.0 }
0x4cd5   :  { %10267 = vmatmul.mubr.msk.f32.vlgmr.msra.gmra.mrb[48].mxu1 %vm243_vm2, %v4992_v39 }
0x4cd6   :  { %11163 = vmatpush3.bf16.msra.mxu1 %v12676_v5  ;;  %10298 = vmatprep.mubr.msk.f32.mxu1 %vm11912_vm0, %v11911_v1 }
0x4cd7   :  { %11164 = vmatprep.subr.bf16.mxu1 %v11910_v0 }
0x4cda   :  { %11166 = vmatpush3.bf16.msra.mxu1 %v12682_v16 }
0x4cdb   :  { %11167 = vmatprep.subr.bf16.mxu1 %v11910_v0 }
0x4cde   :  { %11169 = vmatpush3.bf16.msra.mxu1 %v12692_v49 }
0x4cdf   :  { %11170 = vmatprep.subr.bf16.mxu1 %v11910_v0 }
0x4ce2   :  { %11172 = vmatpush3.bf16.msra.mxu1 %v12703_v53 }
0x4ce3   :  { %11185 = vmatprep.subr.bf16.mxu1 %v11910_v0 }
0x4da8   :  { %v5073_v33 = vpop.f32.mrb[48].mxu1 }
0x4da9   :  { %v13027_v52 = vadd.f32 %v12814_v51, %v5073_v33  ;;  %v10268_v12 = vpop.f32.mrb[49].mxu1 }
0x4dab   :  { %v5080_v26 = vsel %vm165_vm1, %v13027_v52, %v5078_v45 }
0x4dac   :  { %10280 = vmatmul.mubr.msk.f32.vlgmr.msra.gmra.mrb[58].mxu0 %vm744_vm4, %v5080_v26 }
0x4dad   :  { %11175 = vmatpush3.bf16.msra.mxu0 %v12726_v63  ;;  %10309 = vmatprep.mubr.msk.f32.mxu0 %vm11912_vm0, %v11911_v1 }
0x4dae   :  { %11176 = vmatprep.subr.bf16.mxu0 %v11910_v0 }
0x4db1   :  { %11178 = vmatpush3.bf16.msra.mxu0 %v12729_v20 }
0x4db2   :  { %11179 = vmatprep.subr.bf16.mxu0 %v11910_v0 }
0x4e7f   :  { %v5162_v3 = vpop.f32.mrb[58].mxu0 }
0x4e80   :  { %v5163_v7 = vadd.f32 %v12828_v22, %v5162_v3  ;;  %v10281_v61 = vpop.f32.mrb[59].mxu0 }
0x4e82   :  { %5173 = vrot.lane.b32.xlu1 %v5163_v7, %s11915_s19  ;;  %v8987_v32 = vmul.f32 -1.442695, %v5163_v7 }
0x4e84   :  { %11582 = vpow2.f32 %v8987_v32 }
0x4e8e   :  { %v11583_v27 = vpop.eup %11582 }
0x4e8f   :  { %v5169_v9 = vadd.f32 1.0, %v11583_v27 }
0x4e91   :  { %11584 = vrcp.f32 %v5169_v9 }
0x4e9b   :  { %v11585_v59 = vpop.eup %11584 }
0x4e9c   :  { %v5183_v37 = vsub.f32 1.0, %v11585_v59  ;;  %v5189_v47 = vmul.f32 %v11585_v59, %v12970_v18 }
0x4ef4   :  { %v5174_v24 = vpop.permute.xlu1 %5173 }
0x4ef5   :  { %v5176_v41 = vmul.f32 %v11585_v59, %v5174_v24 }
0x4ef7   :  { %5178 = vrot.lane.b32.xlu0 %v5176_v41, %s11913_s5 }
0x4f69   :  { %v5179_v29 = vpop.permute.xlu0 %5178 }
0x4f6a   :  { %v5181_v35 = vadd.f32 %v5179_v29, %v5163_v7 }
0x4f6c   :  { %11586 = vtanh.f32 %v5181_v35 }
0x4f76   :  { %v11587_v43 = vpop.eup %11586 }
0x4f77   :  { %5185 = vrot.lane.b32.xlu1 %v11587_v43, %s11914_s8 }
0x4fe9   :  { %v5186_v40 = vpop.permute.xlu1 %5185 }
0x4fea   :  { %v5188_v48 = vmul.f32 %v5186_v40, %v5183_v37 }
0x4fec   :  { %v13043_v21 = vadd.f32 %v5189_v47, %v5188_v48 }
0x4fee   :  { %5192 = vrot.lane.b32.xlu0 %v13043_v21, %s11914_s8 }
0x5060   :  { %v5193_v60 = vpop.permute.xlu0 %5192 }
0x5061   :  { %v5195_v46 = vsel %vm243_vm2, %v5193_v60, %v12993_v50 }
0x5062   :  { %10299 = vmatmul.mubr.msk.f32.vlgmr.msra.gmra.mrb[50].mxu1 %vm373_vm3, %v5195_v46 }
0x5063   :  { %11187 = vmatpush3.bf16.msra.mxu1 %v12759_v38  ;;  %10331 = vmatprep.mubr.msk.f32.mxu1 %vm11912_vm0, %v11911_v1 }
0x5064   :  { %11188 = vmatprep.subr.bf16.mxu1 %v11910_v0 }
0x5067   :  { %11190 = vmatpush3.bf16.msra.mxu1 %v12778_v55 }
0x5068   :  { %11197 = vmatprep.subr.bf16.mxu1 %v11910_v0 }
0x5135   :  { %v5265_v28 = vpop.f32.mrb[50].mxu1 }
0x5136   :  { %v5266_v56 = vadd.f32 %v12721_v2, %v5265_v28  ;;  %v10300_v62 = vpop.f32.mrb[51].mxu1 }
0x5138   :  { %5276 = vrot.lane.b32.xlu1 %v5266_v56, %s11915_s19  ;;  %v8989_v6 = vmul.f32 -1.442695, %v5266_v56 }
0x513a   :  { %11588 = vpow2.f32 %v8989_v6 }
0x5144   :  { %v11589_v8 = vpop.eup %11588 }
0x5145   :  { %v5272_v11 = vadd.f32 1.0, %v11589_v8 }
0x5147   :  { %11590 = vrcp.f32 %v5272_v11 }
0x5151   :  { %v11591_v17 = vpop.eup %11590 }
0x5152   :  { %v5286_v2 = vsub.f32 1.0, %v11591_v17  ;;  %v5292_v7 = vmul.f32 %v11591_v17, %v12993_v50 }
0x51aa   :  { %v5277_v39 = vpop.permute.xlu1 %5276 }
0x51ab   :  { %v5279_v33 = vmul.f32 %v11591_v17, %v5277_v39  ;;  %v11681_v17 = vld [vmem:[#allocation11] ss:$0 sm:$0xff] }
0x51ad   :  { %5281 = vrot.lane.b32.xlu0 %v5279_v33, %s11913_s5 }
0x521f   :  { %v5282_v12 = vpop.permute.xlu0 %5281 }
0x5220   :  { %v5284_v45 = vadd.f32 %v5282_v12, %v5266_v56 }
0x5222   :  { %11592 = vtanh.f32 %v5284_v45 }
0x522c   :  { %v11593_v26 = vpop.eup %11592 }
0x522d   :  { %5288 = vrot.lane.b32.xlu1 %v11593_v26, %s11914_s8 }
0x5231   :  { %5517 = vrot.lane.b32.xlu1 %v13043_v21, %s11916_s1 }
0x529f   :  { %v5289_v3 = vpop.permute.xlu1 %5288 }
0x52a0   :  { %v5291_v61 = vmul.f32 %v5289_v3, %v5286_v2 }
0x52a2   :  { %v13063_v32 = vadd.f32 %v5292_v7, %v5291_v61 }
0x52a4   :  { %5295 = vrot.lane.b32.xlu0 %v13063_v32, %s11914_s8 }
0x5316   :  { %v5296_v27 = vpop.permute.xlu0 %5295 }
0x5317   :  { %10310 = vmatmul.mubr.msk.f32.vlgmr.msra.gmra.mrb[60].mxu0 %vm243_vm2, %v5296_v27 }
0x5318   :  { %11181 = vmatpush3.bf16.msra.mxu0 %v12742_v30  ;;  %10320 = vmatprep.mubr.msk.f32.mxu0 %vm11912_vm0, %v11911_v1 }
0x5319   :  { %11182 = vmatprep.subr.bf16.mxu0 %v11910_v0 }
0x531c   :  { %11184 = vmatpush3.bf16.msra.mxu0 %v12749_v4 }
0x531d   :  { %11191 = vmatprep.subr.bf16.mxu0 %v11910_v0 }
0x53ea   :  { %v5365_v9 = vpop.f32.mrb[60].mxu0 }
0x53eb   :  { %v5366_v59 = vadd.f32 %v12766_v10, %v5365_v9  ;;  %v10311_v24 = vpop.f32.mrb[61].mxu0 }
0x53ed   :  { %v5369_v41 = vmax.f32 %v5366_v59, 0.0 }
0x53ef   :  { %10321 = vmatmul.mubr.msk.f32.vlgmr.msra.gmra.mrb[62].mxu0 %vm243_vm2, %v5369_v41 }
0x53f0   :  { %11193 = vmatpush3.bf16.msra.mxu0 %v12782_v14  ;;  %10344 = vmatprep.mubr.msk.f32.mxu0 %vm11912_vm0, %v11911_v1 }
0x53f1   :  { %11194 = vmatprep.subr.bf16.mxu0 %v11910_v0 }
0x53f4   :  { %11196 = vmatpush3.bf16.msra.mxu0 %v12785_v34 }
0x53f5   :  { %10342 = vmatprep.subr.mxu0 %v11911_v1 }
0x53f8   :  { %10343 = vmatpush3.msra.mxu0 %v12807_v42 }
0x53f9   :  { %11209 = vmatprep.subr.bf16.mxu0 %v11910_v0 }
0x54c2   :  { %v5439_v10 = vpop.f32.mrb[62].mxu0 }
0x54c3   :  { %v5440_v29 = vadd.f32 %v12793_v25, %v5439_v10  ;;  %v10322_v35 = vpop.f32.mrb[63].mxu0  ;;  %v5518_v25 = vpop.permute.xlu1 %5517 }
0x54c5   :  { %v5443_v43 = vmax.f32 %v5440_v29, 0.0 }
0x54c7   :  { %10332 = vmatmul.mubr.msk.f32.vlgmr.msra.gmra.mrb[52].mxu1 %vm243_vm2, %v5443_v43 }
0x54c8   :  { %11199 = vmatpush3.bf16.msra.mxu1 %v12676_v5  ;;  %10363 = vmatprep.mubr.msk.f32.mxu1 %vm11912_vm0, %v11911_v1 }
0x54c9   :  { %11200 = vmatprep.subr.bf16.mxu1 %v11910_v0 }
0x54cc   :  { %11202 = vmatpush3.bf16.msra.mxu1 %v12682_v16 }
0x54cd   :  { %11203 = vmatprep.subr.bf16.mxu1 %v11910_v0 }
0x54d0   :  { %11205 = vmatpush3.bf16.msra.mxu1 %v12692_v49 }
0x54d1   :  { %11206 = vmatprep.subr.bf16.mxu1 %v11910_v0 }
0x54d4   :  { %11208 = vmatpush3.bf16.msra.mxu1 %v12703_v53 }
0x54d5   :  { %11215 = vmatprep.subr.bf16.mxu1 %v11910_v0 }
0x559a   :  { %v5513_v14 = vpop.f32.mrb[52].mxu1 }
0x559b   :  { %v13097_v5 = vadd.f32 %v12814_v51, %v5513_v14  ;;  %v10333_v34 = vpop.f32.mrb[53].mxu1 }
0x559c   :  { %v13151_v34 = vld [vmem:[%s13750_s4] ss:$0 sm:$0xff] }
0x559d   :  { %v5520_v42 = vsel %vm165_vm1, %v13097_v5, %v5518_v25  ;;  %v6040_v25 = vld [vmem:[#allocation7] sm:$0xff] }
0x559e   :  { %10345 = vmatmul.mubr.msk.f32.vlgmr.msra.gmra.mrb[64].mxu0 %vm744_vm4, %v5520_v42  ;;  %v6041_v42 = vld [vmem:[#allocation7 + $0x8] sm:$0xff] }
0x559f   :  { %11211 = vmatpush3.bf16.msra.mxu0 %v12726_v63  ;;  %10374 = vmatprep.mubr.msk.f32.mxu0 %vm11912_vm0, %v11911_v1 }
0x55a0   :  { %11212 = vmatprep.subr.bf16.mxu0 %v11910_v0 }
0x55a3   :  { %11214 = vmatpush3.bf16.msra.mxu0 %v12729_v20 }
0x55a4   :  { %11221 = vmatprep.subr.bf16.mxu0 %v11910_v0 }
0x5671   :  { %v5590_v16 = vpop.f32.mrb[64].mxu0 }
0x5672   :  { %v5591_v49 = vadd.f32 %v12828_v22, %v5590_v16  ;;  %v10346_v53 = vpop.f32.mrb[65].mxu0 }
0x5674   :  { %5601 = vrot.lane.b32.xlu0 %v5591_v49, %s11915_s19  ;;  %v8994_v51 = vmul.f32 -1.442695, %v5591_v49 }
0x5676   :  { %11594 = vpow2.f32 %v8994_v51 }
0x5680   :  { %v11595_v37 = vpop.eup %11594 }
0x5681   :  { %v5597_v40 = vadd.f32 1.0, %v11595_v37  ;;  %v13158_v37 = vpack.c.bf16 %v6041_v42, %v6040_v25 }
0x5683   :  { %11596 = vrcp.f32 %v5597_v40 }
0x568d   :  { %v11597_v63 = vpop.eup %11596 }
0x568e   :  { %v5611_v22 = vsub.f32 1.0, %v11597_v63  ;;  %v5617_v56 = vmul.f32 %v11597_v63, %v13043_v21 }
0x56e6   :  { %v5602_v47 = vpop.permute.xlu0 %5601 }
0x56e7   :  { %v5604_v48 = vmul.f32 %v11597_v63, %v5602_v47  ;;  %v6042_v63 = vld [vmem:[#allocation7 + $0x10] sm:$0xff]  ;;  %v6043_v47 = vld [vmem:[#allocation7 + $0x18] sm:$0xff] }
0x56e9   :  { %5606 = vrot.lane.b32.xlu1 %v5604_v48, %s11913_s5  ;;  %v13162_v48 = vpack.c.bf16 %v6043_v47, %v6042_v63 }
0x575b   :  { %v5607_v60 = vpop.permute.xlu1 %5606 }
0x575c   :  { %v5609_v20 = vadd.f32 %v5607_v60, %v5591_v49  ;;  %v11683_v49 = vld [vmem:[%s13758_s12] ss:$0 sm:$0xff] }
0x575e   :  { %11598 = vtanh.f32 %v5609_v20 }
0x5768   :  { %v11599_v46 = vpop.eup %11598 }
0x5769   :  { %5613 = vrot.lane.b32.xlu0 %v11599_v46, %s11914_s8 }
0x57db   :  { %v5614_v28 = vpop.permute.xlu0 %5613 }
0x57dc   :  { %v5616_v62 = vmul.f32 %v5614_v28, %v5611_v22 }
0x57de   :  { %v5618_v6 = vadd.f32 %v5617_v56, %v5616_v62 }
0x57e0   :  { %5620 = vrot.lane.b32.xlu1 %v5618_v6, %s11914_s8 }
0x5852   :  { %v5621_v8 = vpop.permute.xlu1 %5620 }
0x5853   :  { %v5623_v11 = vsel %vm243_vm2, %v5621_v8, %v13063_v32  ;;  %v13179_v8 = vld [vmem:[%s13748_s2] ss:$0 sm:$0xff] }
0x5854   :  { %10364 = vmatmul.mubr.msk.f32.vlgmr.msra.gmra.mrb[54].mxu1 %vm373_vm3, %v5623_v11 }
0x5855   :  { %11217 = vmatpush3.bf16.msra.mxu1 %v12742_v30  ;;  %10385 = vmatprep.mubr.msk.f32.mxu1 %vm11912_vm0, %v11911_v1 }
0x5856   :  { %11218 = vmatprep.subr.bf16.mxu1 %v11910_v0 }
0x5859   :  { %11220 = vmatpush3.bf16.msra.mxu1 %v12749_v4 }
0x585a   :  { %10399 = vmatprep.subr.mxu1 %v11911_v1 }
0x5927   :  { %v5693_v21 = vpop.f32.mrb[54].mxu1 }
0x5928   :  { %v5694_v39 = vadd.f32 %v11681_v17, %v5693_v21  ;;  %v10365_v33 = vpop.f32.mrb[55].mxu1 }
0x592a   :  { %5704 = vrot.lane.b32.xlu0 %v5694_v39, %s11915_s19  ;;  %v8996_v12 = vmul.f32 -1.442695, %v5694_v39 }
0x592c   :  { %11600 = vpow2.f32 %v8996_v12 }
0x5936   :  { %v11601_v45 = vpop.eup %11600 }
0x5937   :  { %v5700_v26 = vadd.f32 1.0, %v11601_v45 }
0x5939   :  { %11602 = vrcp.f32 %v5700_v26 }
0x5943   :  { %v11603_v30 = vpop.eup %11602 }
0x5944   :  { %v5714_v27 = vsub.f32 1.0, %v11603_v30  ;;  %v5720_v59 = vmul.f32 %v11603_v30, %v13063_v32  ;;  %v11682_v32 = vld [vmem:[%s13756_s10] ss:$0 sm:$0xff] }
0x599c   :  { %v5705_v2 = vpop.permute.xlu0 %5704 }
0x599d   :  { %v5707_v3 = vmul.f32 %v11603_v30, %v5705_v2  ;;  %v6157_v2 = vld [vmem:[%s13753_s7] sm:$0xff] }
0x599f   :  { %5709 = vrot.lane.b32.xlu1 %v5707_v3, %s11913_s5  ;;  %v6158_v3 = vld [vmem:[%s13753_s7 + $0x8] sm:$0xff] }
0x5a11   :  { %v5710_v7 = vpop.permute.xlu1 %5709 }
0x5a12   :  { %v5712_v4 = vadd.f32 %v5710_v7, %v5694_v39  ;;  %v6159_v7 = vld [vmem:[%s13753_s7 + $0x10] sm:$0xff] }
0x5a14   :  { %11604 = vtanh.f32 %v5712_v4  ;;  %v13192_v4 = vpack.c.bf16 %v6158_v3, %v6157_v2  ;;  %v6357_v2 = vld [vmem:[#allocation14] sm:$0xff]  ;;  %v6358_v3 = vld [vmem:[#allocation14 + $0x8] sm:$0xff] }
0x5a1e   :  { %v11605_v61 = vpop.eup %11604 }
0x5a1f   :  { %5716 = vrot.lane.b32.xlu0 %v11605_v61, %s11914_s8  ;;  %v6160_v61 = vld [vmem:[%s13753_s7 + $0x18] sm:$0xff] }
0x5a23   :  { %6129 = vrot.lane.b32.xlu0 %v13151_v34, %s11913_s5 }
0x5a91   :  { %v5717_v9 = vpop.permute.xlu0 %5716 }
0x5a92   :  { %v5719_v24 = vmul.f32 %v5717_v9, %v5714_v27  ;;  %v13198_v27 = vpack.c.bf16 %v6160_v61, %v6159_v7  ;;  %v6161_v9 = vld [vmem:[%s13753_s7 + $0x20] sm:$0xff]  ;;  %v13258_v7 = vpack.c.bf16 %v6358_v3, %v6357_v2 }
0x5a93   :  { %v13344_v3 = vld [vmem:[#allocation10] ss:$0 sm:$0xff] }
0x5a94   :  { %v5721_v41 = vadd.f32 %v5720_v59, %v5719_v24  ;;  %v6162_v59 = vld [vmem:[%s13753_s7 + $0x28] sm:$0xff] }
0x5a95   :  { %v6130_v28 = vpop.permute.xlu0 %6129  ;;  %v13208_v24 = vpack.c.bf16 %v6162_v59, %v6161_v9  ;;  %v6360_v9 = vld [vmem:[#allocation14 + $0x18] sm:$0xff] }
0x5a96   :  { %5723 = vrot.lane.b32.xlu1 %v5721_v41, %s11914_s8 }
0x5b08   :  { %v5724_v10 = vpop.permute.xlu1 %5723 }
0x5b09   :  { %10375 = vmatmul.mubr.msk.f32.vlgmr.msra.gmra.mrb[66].mxu0 %vm243_vm2, %v5724_v10  ;;  %v6163_v10 = vld [vmem:[%s13753_s7 + $0x30] sm:$0xff] }
0x5b0a   :  { %11223 = vmatpush3.bf16.msra.mxu0 %v12759_v38  ;;  %10396 = vmatprep.mubr.msk.f32.mxu0 %vm11912_vm0, %v11911_v1  ;;  %v13141_v38 = vld [vmem:[#allocation5] sm:$0xff] }
0x5b0b   :  { %11224 = vmatprep.subr.bf16.mxu0 %v11910_v0 }
0x5b0e   :  { %11226 = vmatpush3.bf16.msra.mxu0 %v12778_v55  ;;  %v5958_v55 = vld [vmem:[#allocation2 + $0x20] sm:$0xff] }
0x5b0f   :  { %11227 = vmatprep.subr.bf16.mxu0 %v11910_v0 }
0x5bdc   :  { %v5793_v29 = vpop.f32.mrb[66].mxu0 }
0x5bdd   :  { %v5794_v35 = vadd.f32 %v11682_v32, %v5793_v29  ;;  %v10376_v43 = vpop.f32.mrb[67].mxu0  ;;  %v6164_v29 = vld [vmem:[%s13753_s7 + $0x38] sm:$0xff] }
0x5bde   :  { %v13219_v32 = vpack.c.bf16 %v6164_v29, %v6163_v10  ;;  %v6443_v10 = vld [vmem:[%s13759_s13 + $0x8] sm:$0xff] }
0x5bdf   :  { %v5797_v14 = vmax.f32 %v5794_v35, 0.0 }
0x5be1   :  { %10386 = vmatmul.mubr.msk.f32.vlgmr.msra.gmra.mrb[56].mxu1 %vm243_vm2, %v5797_v14 }
0x5be2   :  { %10401 = vmatprep.mubr.msk.f32.mxu1 %vm11912_vm0, %v11911_v1  ;;  %10400 = vmatpush3.msra.mxu1 %v13141_v38 }
0x5be3   :  { %11233 = vmatprep.subr.bf16.mxu1 %v11910_v0 }
0x5be5   :  { %10402 = vmatmul.mubr.msk.f32.vlgmr.msra.gmra.mrb[58].mxu1 %vm165_vm1, %v5958_v55 }
0x5be6   :  { %10431 = vmatprep.mubr.msk.f32.mxu1 %vm11912_vm0, %v11911_v1  ;;  %11235 = vmatpush3.bf16.msra.mxu1 %v13192_v4 }
0x5be7   :  { %11236 = vmatprep.subr.bf16.mxu1 %v11910_v0 }
0x5bea   :  { %11238 = vmatpush3.bf16.msra.mxu1 %v13198_v27 }
0x5beb   :  { %11239 = vmatprep.subr.bf16.mxu1 %v11910_v0 }
0x5bee   :  { %11241 = vmatpush3.bf16.msra.mxu1 %v13208_v24 }
0x5bef   :  { %11242 = vmatprep.subr.bf16.mxu1 %v11910_v0 }
0x5bf2   :  { %11244 = vmatpush3.bf16.msra.mxu1 %v13219_v32 }
0x5bf3   :  { %11257 = vmatprep.subr.bf16.mxu1 %v11910_v0 }
0x5cb4   :  { %v5867_v16 = vpop.f32.mrb[56].mxu1 }
0x5cb5   :  { %v5868_v53 = vadd.f32 %v11683_v49, %v5867_v16  ;;  %v10387_v51 = vpop.f32.mrb[57].mxu1  ;;  %v13237_v49 = vld [vmem:[#allocation11] ss:$0 sm:$0xff] }
0x5cb7   :  { %v5871_v40 = vmax.f32 %v5868_v53, 0.0 }
0x5cb8   :  { %v6036_v60 = vpop.f32.mrb[58].mxu1 }
0x5cb9   :  { %10397 = vmatmul.mubr.msk.f32.vlgmr.msra.gmra.mrb[68].mxu0 %vm243_vm2, %v5871_v40  ;;  %v10403_v20 = vpop.f32.mrb[59].mxu1 }
0x5cba   :  { %11229 = vmatpush3.bf16.msra.mxu0 %v13158_v37  ;;  %10412 = vmatprep.mubr.msk.f32.mxu0 %vm11912_vm0, %v11911_v1 }
0x5cbb   :  { %11230 = vmatprep.subr.bf16.mxu0 %v11910_v0 }
0x5cbe   :  { %11232 = vmatpush3.bf16.msra.mxu0 %v13162_v48 }
0x5cbf   :  { %11245 = vmatprep.subr.bf16.mxu0 %v11910_v0 }
0x5cc1   :  { %10413 = vmatmul.mubr.msk.f32.vlgmr.msra.gmra.mrb[70].mxu0 %vm243_vm2, %v12974_v58  ;;  %v6037_v58 = vadd.f32 %v13179_v8, %v6036_v60 }
0x5cc2   :  { %10442 = vmatprep.mubr.msk.f32.mxu0 %vm11912_vm0, %v11911_v1 }
0x5d8c   :  { %v13173_v46 = vpop.f32.mrb[68].mxu0 }
0x5d8d   :  { %v10398_v22 = vpop.f32.mrb[69].mxu0 }
0x5d94   :  { %v6112_v56 = vpop.f32.mrb[70].mxu0 }
0x5d95   :  { %v6132_v62 = vadd.f32 %v6130_v28, %v6112_v56  ;;  %v10414_v6 = vpop.f32.mrb[71].mxu0  ;;  %v6116_v11 = vadd.f32 %v6112_v56, %v6037_v58 }
0x5d96   :  { %v6271_v6 = vld [vmem:[#allocation13 + $0x8] sm:$0xff] }
0x5d97   :  { %6134 = vrot.lane.b32.xlu1 %v6132_v62, %s11913_s5  ;;  %v9004_v21 = vmul.f32 -1.442695, %v6116_v11  ;;  %v6270_v62 = vld [vmem:[#allocation13] sm:$0xff] }
0x5d98   :  { %v13242_v11 = vpack.c.bf16 %v6271_v6, %v6270_v62 }
0x5d99   :  { %11606 = vpow2.f32 %v9004_v21  ;;  %v6273_v21 = vld [vmem:[#allocation13 + $0x18] sm:$0xff] }
0x5d9a   :  { %11247 = vmatpush3.bf16.msra.mxu0 %v13242_v11 }
0x5d9b   :  { %11248 = vmatprep.subr.bf16.mxu0 %v11910_v0 }
0x5da3   :  { %v11607_v17 = vpop.eup %11606 }
0x5da4   :  { %v6120_v39 = vadd.f32 1.0, %v11607_v17 }
0x5da6   :  { %11608 = vrcp.f32 %v6120_v39 }
0x5db0   :  { %v11609_v33 = vpop.eup %11608 }
0x5db1   :  { %v6144_v35 = vsub.f32 1.0, %v11609_v33  ;;  %v6150_v14 = vmul.f32 %v11609_v33, %v12970_v18 }
0x5e09   :  { %v6135_v12 = vpop.permute.xlu1 %6134 }
0x5e0a   :  { %v6137_v45 = vmul.f32 %v11609_v33, %v6135_v12 }
0x5e0c   :  { %6139 = vrot.lane.b32.xlu0 %v6137_v45, %s11913_s5 }
0x5e7e   :  { %v6140_v26 = vpop.permute.xlu0 %6139 }
0x5e7f   :  { %v6142_v30 = vadd.f32 %v6140_v26, %v6037_v58  ;;  %v6272_v58 = vld [vmem:[#allocation13 + $0x10] sm:$0xff] }
0x5e80   :  { %v13245_v17 = vpack.c.bf16 %v6273_v21, %v6272_v58  ;;  %v13323_v21 = vld [vmem:[#allocation8 + $0x20] sm:$0xff] }
0x5e81   :  { %11610 = vtanh.f32 %v6142_v30 }
0x5e82   :  { %11250 = vmatpush3.bf16.msra.mxu0 %v13245_v17 }
0x5e83   :  { %11251 = vmatprep.subr.bf16.mxu0 %v11910_v0 }
0x5e8b   :  { %v11611_v41 = vpop.eup %11610 }
0x5e8c   :  { %6146 = vrot.lane.b32.xlu1 %v11611_v41, %s11914_s8  ;;  %v6442_v41 = vld [vmem:[%s13759_s13] sm:$0xff] }
0x5e8d   :  { %v13275_v29 = vpack.c.bf16 %v6443_v10, %v6442_v41 }
0x5efe   :  { %v6147_v43 = vpop.permute.xlu1 %6146 }
0x5eff   :  { %v6149_v55 = vmul.f32 %v6147_v43, %v6144_v35  ;;  %v13282_v35 = vld [vmem:[%s13756_s10] ss:$0 sm:$0xff] }
0x5f01   :  { %v13225_v25 = vadd.f32 %v6150_v14, %v6149_v55 }
0x5f03   :  { %6153 = vrot.lane.b32.xlu0 %v13225_v25, %s11914_s8 }
0x5f75   :  { %v13229_v42 = vpop.permute.xlu0 %6153 }
0x5f76   :  { %v6156_v16 = vsel %vm243_vm2, %v13229_v42, %v12993_v50 }
0x5f77   :  { %10432 = vmatmul.mubr.msk.f32.vlgmr.msra.gmra.mrb[60].mxu1 %vm373_vm3, %v6156_v16 }
0x5f78   :  { %10464 = vmatprep.mubr.msk.f32.mxu1 %vm11912_vm0, %v11911_v1  ;;  %11259 = vmatpush3.bf16.msra.mxu1 %v13275_v29 }
0x5f79   :  { %11260 = vmatprep.subr.bf16.mxu1 %v11910_v0 }
0x604a   :  { %v6241_v18 = vpop.f32.mrb[60].mxu1 }
0x604b   :  { %v6242_v53 = vadd.f32 %v13237_v49, %v6241_v18  ;;  %v10433_v51 = vpop.f32.mrb[61].mxu1  ;;  %v6444_v18 = vld [vmem:[%s13759_s13 + $0x10] sm:$0xff] }
0x604d   :  { %6252 = vrot.lane.b32.xlu1 %v6242_v53, %s11915_s19  ;;  %v9008_v40 = vmul.f32 -1.442695, %v6242_v53 }
0x604f   :  { %11612 = vpow2.f32 %v9008_v40  ;;  %v6530_v40 = vld [vmem:[#allocation8] sm:$0xff] }
0x6059   :  { %v11613_v63 = vpop.eup %11612 }
0x605a   :  { %v6248_v47 = vadd.f32 1.0, %v11613_v63  ;;  %v6531_v63 = vld [vmem:[#allocation8 + $0x8] sm:$0xff] }
0x605c   :  { %11614 = vrcp.f32 %v6248_v47  ;;  %v6532_v47 = vld [vmem:[#allocation8 + $0x10] sm:$0xff] }
0x6066   :  { %v11615_v60 = vpop.eup %11614 }
0x6067   :  { %v6262_v33 = vsub.f32 1.0, %v11615_v60  ;;  %v6268_v45 = vmul.f32 %v11615_v60, %v12993_v50  ;;  %v6359_v50 = vld [vmem:[#allocation14 + $0x10] sm:$0xff] }
0x6068   :  { %v13265_v59 = vpack.c.bf16 %v6360_v9, %v6359_v50 }
0x60bf   :  { %v6253_v20 = vpop.permute.xlu1 %6252 }
0x60c0   :  { %v6255_v22 = vmul.f32 %v11615_v60, %v6253_v20  ;;  %v13298_v60 = vpack.c.bf16 %v6531_v63, %v6530_v40  ;;  %v6533_v20 = vld [vmem:[#allocation8 + $0x18] sm:$0xff] }
0x60c2   :  { %6257 = vrot.lane.b32.xlu0 %v6255_v22, %s11913_s5  ;;  %v13301_v22 = vpack.c.bf16 %v6533_v20, %v6532_v47 }
0x6134   :  { %v6258_v28 = vpop.permute.xlu0 %6257 }
0x6135   :  { %v6260_v56 = vadd.f32 %v6258_v28, %v6242_v53  ;;  %v6445_v53 = vld [vmem:[%s13759_s13 + $0x18] sm:$0xff]  ;;  %v13309_v28 = vld [vmem:[%s13758_s12] ss:$0 sm:$0xff]  ;;  %s8865_s13 = sshll.u32 %s11918_s17, 4  ;;  %s8866_s13 = int_to_ptr.vmem [resolvable:$true] %s8865_s13 }
0x6136   :  { %v13294_v51 = vpack.c.bf16 %v6445_v53, %v6444_v18  ;;  %s11866_s6 = scalar_lea.vmem %s8866_s13, 256  ;;  %p11871_p9 = scmp.lt.s32.totalorder %s8866_s13, %s8866_s13 }
0x6137   :  { %11616 = vtanh.f32 %v6260_v56  ;;  %p11867_p8 = scmp.ne.s32.totalorder %s8866_s13, %s11866_s6  ;;  %p11872_p10 = scmp.lt.s32.totalorder %s11866_s6, %s11866_s6 }
0x6138   :  { %11262 = vmatpush3.bf16.msra.mxu1 %v13294_v51 }
0x6139   :  { %11269 = vmatprep.subr.bf16.mxu1 %v11910_v0  ;;  %p11873_p11 = por %p11872_p10, %p11871_p9 }
0x613b   :  { %p11874_p12 = pnand %p11873_p11, %p11867_p8 }
0x6141   :  { %v11617_v39 = vpop.eup %11616 }
0x6142   :  { %6264 = vrot.lane.b32.xlu1 %v11617_v39, %s11914_s8  ;;  %v13330_v39 = vld [vmem:[%s13760_s14] ss:$0 sm:$0xff] }
0x6146   :  { %6526 = vrot.lane.b32.xlu1 %v13225_v25, %s11916_s1 }
0x61b4   :  { %v6265_v12 = vpop.permute.xlu1 %6264 }
0x61b5   :  { %v6267_v26 = vmul.f32 %v6265_v12, %v6262_v33 }
0x61b7   :  { %v13254_v30 = vadd.f32 %v6268_v45, %v6267_v26 }
0x61b8   :  { %v6527_v26 = vpop.permute.xlu1 %6526 }
0x61b9   :  { %6282 = vrot.lane.b32.xlu0 %v13254_v30, %s11914_s8 }
0x622b   :  { %v6283_v61 = vpop.permute.xlu0 %6282 }
0x622c   :  { %10443 = vmatmul.mubr.msk.f32.vlgmr.msra.gmra.mrb[72].mxu0 %vm243_vm2, %v6283_v61 }
0x622d   :  { %11253 = vmatpush3.bf16.msra.mxu0 %v13258_v7  ;;  %10453 = vmatprep.mubr.msk.f32.mxu0 %vm11912_vm0, %v11911_v1 }
0x622e   :  { %11254 = vmatprep.subr.bf16.mxu0 %v11910_v0 }
0x6231   :  { %11256 = vmatpush3.bf16.msra.mxu0 %v13265_v59 }
0x6232   :  { %11263 = vmatprep.subr.bf16.mxu0 %v11910_v0 }
0x62ff   :  { %v6352_v43 = vpop.f32.mrb[72].mxu0 }
0x6300   :  { %v6353_v14 = vadd.f32 %v13282_v35, %v6352_v43  ;;  %v10444_v55 = vpop.f32.mrb[73].mxu0 }
0x6302   :  { %v6356_v16 = vmax.f32 %v6353_v14, 0.0 }
0x6304   :  { %10454 = vmatmul.mubr.msk.f32.vlgmr.msra.gmra.mrb[74].mxu0 %vm243_vm2, %v6356_v16 }
0x6305   :  { %10477 = vmatprep.mubr.msk.f32.mxu0 %vm11912_vm0, %v11911_v1  ;;  %11265 = vmatpush3.bf16.msra.mxu0 %v13298_v60 }
0x6306   :  { %11266 = vmatprep.subr.bf16.mxu0 %v11910_v0 }
0x6309   :  { %11268 = vmatpush3.bf16.msra.mxu0 %v13301_v22 }
0x630a   :  { %10475 = vmatprep.subr.mxu0 %v11911_v1 }
0x630d   :  { %10476 = vmatpush3.msra.mxu0 %v13323_v21 }
0x630e   :  { %11281 = vmatprep.subr.bf16.mxu0 %v11910_v0 }
0x63d7   :  { %v6437_v56 = vpop.f32.mrb[74].mxu0 }
0x63d8   :  { %v6438_v62 = vadd.f32 %v13309_v28, %v6437_v56  ;;  %v10455_v6 = vpop.f32.mrb[75].mxu0 }
0x63da   :  { %v6441_v58 = vmax.f32 %v6438_v62, 0.0 }
0x63dc   :  { %10465 = vmatmul.mubr.msk.f32.vlgmr.msra.gmra.mrb[62].mxu1 %vm243_vm2, %v6441_v58 }
0x63dd   :  { %11271 = vmatpush3.bf16.msra.mxu1 %v13192_v4  ;;  %10496 = vmatprep.mubr.msk.f32.mxu1 %vm11912_vm0, %v11911_v1 }
0x63de   :  { %11272 = vmatprep.subr.bf16.mxu1 %v11910_v0 }
0x63e1   :  { %11274 = vmatpush3.bf16.msra.mxu1 %v13198_v27 }
0x63e2   :  { %11275 = vmatprep.subr.bf16.mxu1 %v11910_v0 }
0x63e5   :  { %11277 = vmatpush3.bf16.msra.mxu1 %v13208_v24 }
0x63e6   :  { %11278 = vmatprep.subr.bf16.mxu1 %v11910_v0 }
0x63e9   :  { %11280 = vmatpush3.bf16.msra.mxu1 %v13219_v32 }
0x63ea   :  { %11293 = vmatprep.subr.bf16.mxu1 %v11910_v0 }
0x64af   :  { %v6522_v33 = vpop.f32.mrb[62].mxu1 }
0x64b0   :  { %v13333_v12 = vadd.f32 %v13330_v39, %v6522_v33  ;;  %v10466_v45 = vpop.f32.mrb[63].mxu1 }
0x64b2   :  { %v6529_v2 = vsel %vm165_vm1, %v13333_v12, %v6527_v26 }
0x64b3   :  { %10478 = vmatmul.mubr.msk.f32.vlgmr.msra.gmra.mrb[76].mxu0 %vm744_vm4, %v6529_v2 }
0x64b4   :  { %11283 = vmatpush3.bf16.msra.mxu0 %v13242_v11  ;;  %10507 = vmatprep.mubr.msk.f32.mxu0 %vm11912_vm0, %v11911_v1 }
0x64b5   :  { %11284 = vmatprep.subr.bf16.mxu0 %v11910_v0 }
0x64b8   :  { %11286 = vmatpush3.bf16.msra.mxu0 %v13245_v17 }
0x64b9   :  { %11287 = vmatprep.subr.bf16.mxu0 %v11910_v0 }
0x6586   :  { %v6611_v61 = vpop.f32.mrb[76].mxu0 }
0x6587   :  { %v6612_v50 = vadd.f32 %v13344_v3, %v6611_v61  ;;  %v10479_v9 = vpop.f32.mrb[77].mxu0 }
0x6589   :  { %6622 = vrot.lane.b32.xlu0 %v6612_v50, %s11915_s19  ;;  %v9017_v41 = vmul.f32 -1.442695, %v6612_v50 }
0x658b   :  { %11618 = vpow2.f32 %v9017_v41 }
0x6595   :  { %v11619_v10 = vpop.eup %11618 }
0x6596   :  { %v6618_v43 = vadd.f32 1.0, %v11619_v10 }
0x6598   :  { %11620 = vrcp.f32 %v6618_v43 }
0x65a2   :  { %v11621_v14 = vpop.eup %11620 }
0x65a3   :  { %v6632_v63 = vsub.f32 1.0, %v11621_v14  ;;  %v6638_v20 = vmul.f32 %v11621_v14, %v13225_v25 }
0x65fb   :  { %v6623_v55 = vpop.permute.xlu0 %6622 }
0x65fc   :  { %v6625_v16 = vmul.f32 %v11621_v14, %v6623_v55 }
0x65fe   :  { %6627 = vrot.lane.b32.xlu1 %v6625_v16, %s11913_s5 }
0x6670   :  { %v6628_v18 = vpop.permute.xlu1 %6627 }
0x6671   :  { %v6630_v53 = vadd.f32 %v6628_v18, %v6612_v50 }
0x6673   :  { %11622 = vtanh.f32 %v6630_v53 }
0x667d   :  { %v11623_v40 = vpop.eup %11622 }
0x667e   :  { %6634 = vrot.lane.b32.xlu0 %v11623_v40, %s11914_s8 }
0x66f0   :  { %v6635_v47 = vpop.permute.xlu0 %6634 }
0x66f1   :  { %v6637_v56 = vmul.f32 %v6635_v47, %v6632_v63 }
0x66f3   :  { %v13351_v62 = vadd.f32 %v6638_v20, %v6637_v56 }
0x66f5   :  { %6641 = vrot.lane.b32.xlu1 %v13351_v62, %s11914_s8 }
0x6767   :  { %v6642_v6 = vpop.permute.xlu1 %6641 }
0x6768   :  { %v6644_v58 = vsel %vm243_vm2, %v6642_v6, %v13254_v30 }
0x6769   :  { %10497 = vmatmul.mubr.msk.f32.vlgmr.msra.gmra.mrb[64].mxu1 %vm373_vm3, %v6644_v58 }
0x676a   :  { %11295 = vmatpush3.bf16.msra.mxu1 %v13275_v29  ;;  %10529 = vmatprep.mubr.msk.f32.mxu1 %vm11912_vm0, %v11911_v1 }
0x676b   :  { %11296 = vmatprep.subr.bf16.mxu1 %v11910_v0 }
0x676e   :  { %11298 = vmatpush3.bf16.msra.mxu1 %v13294_v51 }
0x676f   :  { %11305 = vmatprep.subr.bf16.mxu1 %v11910_v0 }
0x683c   :  { %v6714_v33 = vpop.f32.mrb[64].mxu1 }
0x683d   :  { %v6715_v45 = vadd.f32 %v13237_v49, %v6714_v33  ;;  %v10498_v26 = vpop.f32.mrb[65].mxu1 }
0x683f   :  { %6725 = vrot.lane.b32.xlu0 %v6715_v45, %s11915_s19  ;;  %v9019_v2 = vmul.f32 -1.442695, %v6715_v45 }
0x6841   :  { %11624 = vpow2.f32 %v9019_v2 }
0x684b   :  { %v11625_v61 = vpop.eup %11624 }
0x684c   :  { %v6721_v50 = vadd.f32 1.0, %v11625_v61 }
0x684e   :  { %11626 = vrcp.f32 %v6721_v50 }
0x6858   :  { %v11627_v9 = vpop.eup %11626 }
0x6859   :  { %v6735_v16 = vsub.f32 1.0, %v11627_v9  ;;  %v6741_v53 = vmul.f32 %v11627_v9, %v13254_v30 }
0x68b1   :  { %v6726_v41 = vpop.permute.xlu0 %6725 }
0x68b2   :  { %v6728_v10 = vmul.f32 %v11627_v9, %v6726_v41 }
0x68b4   :  { %6730 = vrot.lane.b32.xlu1 %v6728_v10, %s11913_s5 }
0x6926   :  { %v6731_v43 = vpop.permute.xlu1 %6730 }
0x6927   :  { %v6733_v14 = vadd.f32 %v6731_v43, %v6715_v45 }
0x6929   :  { %11628 = vtanh.f32 %v6733_v14 }
0x6933   :  { %v11629_v55 = vpop.eup %11628 }
0x6934   :  { %6737 = vrot.lane.b32.xlu0 %v11629_v55, %s11914_s8 }
0x6938   :  { %6966 = vrot.lane.b32.xlu0 %v13351_v62, %s11916_s1 }
0x69a6   :  { %v6738_v18 = vpop.permute.xlu0 %6737 }
0x69a7   :  { %v6740_v40 = vmul.f32 %v6738_v18, %v6735_v16 }
0x69a9   :  { %v13371_v63 = vadd.f32 %v6741_v53, %v6740_v40 }
0x69aa   :  { %v6967_v41 = vpop.permute.xlu0 %6966 }
0x69ab   :  { %6744 = vrot.lane.b32.xlu1 %v13371_v63, %s11914_s8 }
0x6a1d   :  { %v6745_v47 = vpop.permute.xlu1 %6744 }
0x6a1e   :  { %10508 = vmatmul.mubr.msk.f32.vlgmr.msra.gmra.mrb[78].mxu0 %vm243_vm2, %v6745_v47 }
0x6a1f   :  { %11289 = vmatpush3.bf16.msra.mxu0 %v13258_v7  ;;  %10518 = vmatprep.mubr.msk.f32.mxu0 %vm11912_vm0, %v11911_v1 }
0x6a20   :  { %11290 = vmatprep.subr.bf16.mxu0 %v11910_v0 }
0x6a23   :  { %11292 = vmatpush3.bf16.msra.mxu0 %v13265_v59 }
0x6a24   :  { %11299 = vmatprep.subr.bf16.mxu0 %v11910_v0 }
0x6af1   :  { %v6814_v20 = vpop.f32.mrb[78].mxu0 }
0x6af2   :  { %v6815_v56 = vadd.f32 %v13282_v35, %v6814_v20  ;;  %v10509_v6 = vpop.f32.mrb[79].mxu0 }
0x6af4   :  { %v6818_v58 = vmax.f32 %v6815_v56, 0.0 }
0x6af6   :  { %10519 = vmatmul.mubr.msk.f32.vlgmr.msra.gmra.mrb[80].mxu0 %vm243_vm2, %v6818_v58 }
0x6af7   :  { %11301 = vmatpush3.bf16.msra.mxu0 %v13298_v60  ;;  %10542 = vmatprep.mubr.msk.f32.mxu0 %vm11912_vm0, %v11911_v1 }
0x6af8   :  { %11302 = vmatprep.subr.bf16.mxu0 %v11910_v0 }
0x6afb   :  { %11304 = vmatpush3.bf16.msra.mxu0 %v13301_v22 }
0x6afc   :  { %10540 = vmatprep.subr.mxu0 %v11911_v1 }
0x6aff   :  { %10541 = vmatpush3.msra.mxu0 %v13323_v21 }
0x6b00   :  { %11317 = vmatprep.subr.bf16.mxu0 %v11910_v0 }
0x6bc9   :  { %v6888_v33 = vpop.f32.mrb[80].mxu0 }
0x6bca   :  { %v6889_v45 = vadd.f32 %v13309_v28, %v6888_v33  ;;  %v10520_v26 = vpop.f32.mrb[81].mxu0 }
0x6bcc   :  { %v6892_v2 = vmax.f32 %v6889_v45, 0.0 }
0x6bce   :  { %10530 = vmatmul.mubr.msk.f32.vlgmr.msra.gmra.mrb[66].mxu1 %vm243_vm2, %v6892_v2 }
0x6bcf   :  { %11307 = vmatpush3.bf16.msra.mxu1 %v13192_v4  ;;  %10561 = vmatprep.mubr.msk.f32.mxu1 %vm11912_vm0, %v11911_v1 }
0x6bd0   :  { %11308 = vmatprep.subr.bf16.mxu1 %v11910_v0 }
0x6bd3   :  { %11310 = vmatpush3.bf16.msra.mxu1 %v13198_v27 }
0x6bd4   :  { %11311 = vmatprep.subr.bf16.mxu1 %v11910_v0 }
0x6bd7   :  { %11313 = vmatpush3.bf16.msra.mxu1 %v13208_v24 }
0x6bd8   :  { %11314 = vmatprep.subr.bf16.mxu1 %v11910_v0 }
0x6bdb   :  { %11316 = vmatpush3.bf16.msra.mxu1 %v13219_v32 }
0x6bdc   :  { %11323 = vmatprep.subr.bf16.mxu1 %v11910_v0 }
0x6ca1   :  { %v6962_v61 = vpop.f32.mrb[66].mxu1 }
0x6ca2   :  { %v13405_v50 = vadd.f32 %v13330_v39, %v6962_v61  ;;  %v10531_v9 = vpop.f32.mrb[67].mxu1 }
0x6ca4   :  { %v6969_v10 = vsel %vm165_vm1, %v13405_v50, %v6967_v41 }
0x6ca5   :  { %10543 = vmatmul.mubr.msk.f32.vlgmr.msra.gmra.mrb[82].mxu0 %vm744_vm4, %v6969_v10 }
0x6ca6   :  { %11319 = vmatpush3.bf16.msra.mxu0 %v13242_v11  ;;  %10572 = vmatprep.mubr.msk.f32.mxu0 %vm11912_vm0, %v11911_v1 }
0x6ca7   :  { %11320 = vmatprep.subr.bf16.mxu0 %v11910_v0 }
0x6caa   :  { %11322 = vmatpush3.bf16.msra.mxu0 %v13245_v17 }
0x6cab   :  { %11329 = vmatprep.subr.bf16.mxu0 %v11910_v0 }
0x6d78   :  { %v7039_v43 = vpop.f32.mrb[82].mxu0 }
0x6d79   :  { %v7040_v14 = vadd.f32 %v13344_v3, %v7039_v43  ;;  %v10544_v55 = vpop.f32.mrb[83].mxu0 }
0x6d7b   :  { %7050 = vrot.lane.b32.xlu1 %v7040_v14, %s11915_s19  ;;  %v9024_v16 = vmul.f32 -1.442695, %v7040_v14 }
0x6d7d   :  { %11630 = vpow2.f32 %v9024_v16 }
0x6d87   :  { %v11631_v18 = vpop.eup %11630 }
0x6d88   :  { %v7046_v53 = vadd.f32 1.0, %v11631_v18 }
0x6d8a   :  { %11632 = vrcp.f32 %v7046_v53 }
0x6d94   :  { %v11633_v40 = vpop.eup %11632 }
0x6d95   :  { %v7060_v33 = vsub.f32 1.0, %v11633_v40  ;;  %v7066_v26 = vmul.f32 %v11633_v40, %v13351_v62 }
0x6ded   :  { %v7051_v47 = vpop.permute.xlu1 %7050 }
0x6dee   :  { %v7053_v20 = vmul.f32 %v11633_v40, %v7051_v47 }
0x6df0   :  { %7055 = vrot.lane.b32.xlu0 %v7053_v20, %s11913_s5 }
0x6e62   :  { %v7056_v56 = vpop.permute.xlu0 %7055 }
0x6e63   :  { %v7058_v6 = vadd.f32 %v7056_v56, %v7040_v14 }
0x6e65   :  { %11634 = vtanh.f32 %v7058_v6 }
0x6e6f   :  { %v11635_v58 = vpop.eup %11634 }
0x6e70   :  { %7062 = vrot.lane.b32.xlu1 %v11635_v58, %s11914_s8 }
0x6ee2   :  { %v7063_v45 = vpop.permute.xlu1 %7062 }
0x6ee3   :  { %v7065_v2 = vmul.f32 %v7063_v45, %v7060_v33 }
0x6ee5   :  { %v7067_v61 = vadd.f32 %v7066_v26, %v7065_v2 }
0x6ee7   :  { %7069 = vrot.lane.b32.xlu0 %v7067_v61, %s11914_s8 }
0x6f59   :  { %v7070_v9 = vpop.permute.xlu0 %7069 }
0x6f5a   :  { %v7072_v41 = vsel %vm243_vm2, %v7070_v9, %v13371_v63 }
0x6f5b   :  { %10562 = vmatmul.mubr.msk.f32.vlgmr.msra.gmra.mrb[68].mxu1 %vm373_vm3, %v7072_v41  ;;  %v7407_v41 = vld [vmem:[#allocation2 + $0x28] sm:$0xff] }
0x6f5c   :  { %11325 = vmatpush3.bf16.msra.mxu1 %v13258_v7  ;;  %10583 = vmatprep.mubr.msk.f32.mxu1 %vm11912_vm0, %v11911_v1 }
0x6f5d   :  { %11326 = vmatprep.subr.bf16.mxu1 %v11910_v0 }
0x6f60   :  { %11328 = vmatpush3.bf16.msra.mxu1 %v13265_v59 }
0x6f61   :  { %10597 = vmatprep.subr.mxu1 %v11911_v1 }
0x702e   :  { %v7142_v62 = vpop.f32.mrb[68].mxu1 }
0x702f   :  { %v7143_v10 = vadd.f32 %v13237_v49, %v7142_v62  ;;  %v10563_v43 = vpop.f32.mrb[69].mxu1 }
0x7031   :  { %7153 = vrot.lane.b32.xlu1 %v7143_v10, %s11915_s19  ;;  %v9026_v14 = vmul.f32 -1.442695, %v7143_v10 }
0x7033   :  { %11636 = vpow2.f32 %v9026_v14 }
0x703d   :  { %v11637_v55 = vpop.eup %11636 }
0x703e   :  { %v7149_v16 = vadd.f32 1.0, %v11637_v55 }
0x7040   :  { %11638 = vrcp.f32 %v7149_v16 }
0x704a   :  { %v11639_v18 = vpop.eup %11638 }
0x704b   :  { %v7163_v6 = vsub.f32 1.0, %v11639_v18  ;;  %v7169_v33 = vmul.f32 %v11639_v18, %v13371_v63 }
0x70a3   :  { %v7154_v53 = vpop.permute.xlu1 %7153 }
0x70a4   :  { %v7156_v40 = vmul.f32 %v11639_v18, %v7154_v53 }
0x70a6   :  { %7158 = vrot.lane.b32.xlu0 %v7156_v40, %s11913_s5 }
0x7118   :  { %v7159_v47 = vpop.permute.xlu0 %7158 }
0x7119   :  { %v7161_v20 = vadd.f32 %v7159_v47, %v7143_v10 }
0x711b   :  { %11640 = vtanh.f32 %v7161_v20 }
0x7125   :  { %v11641_v56 = vpop.eup %11640 }
0x7126   :  { %7165 = vrot.lane.b32.xlu1 %v11641_v56, %s11914_s8 }
0x712a   :  { %7578 = vrot.lane.b32.xlu1 %v13151_v34, %s11913_s5 }
0x7198   :  { %v7166_v58 = vpop.permute.xlu1 %7165 }
0x7199   :  { %v7168_v45 = vmul.f32 %v7166_v58, %v7163_v6 }
0x719b   :  { %v7170_v26 = vadd.f32 %v7169_v33, %v7168_v45 }
0x719c   :  { %v7579_v16 = vpop.permute.xlu1 %7578 }
0x719d   :  { %7172 = vrot.lane.b32.xlu0 %v7170_v26, %s11914_s8 }
0x720f   :  { %v7173_v2 = vpop.permute.xlu0 %7172 }
0x7210   :  { %10573 = vmatmul.mubr.msk.f32.vlgmr.msra.gmra.mrb[84].mxu0 %vm243_vm2, %v7173_v2 }
0x7211   :  { %11331 = vmatpush3.bf16.msra.mxu0 %v13275_v29  ;;  %10594 = vmatprep.mubr.msk.f32.mxu0 %vm11912_vm0, %v11911_v1 }
0x7212   :  { %11332 = vmatprep.subr.bf16.mxu0 %v11910_v0 }
0x7215   :  { %11334 = vmatpush3.bf16.msra.mxu0 %v13294_v51 }
0x7216   :  { %11335 = vmatprep.subr.bf16.mxu0 %v11910_v0 }
0x72e3   :  { %v7242_v34 = vpop.f32.mrb[84].mxu0 }
0x72e4   :  { %v7243_v63 = vadd.f32 %v13282_v35, %v7242_v34  ;;  %v10574_v61 = vpop.f32.mrb[85].mxu0 }
0x72e6   :  { %v7246_v9 = vmax.f32 %v7243_v63, 0.0 }
0x72e8   :  { %10584 = vmatmul.mubr.msk.f32.vlgmr.msra.gmra.mrb[70].mxu1 %vm243_vm2, %v7246_v9 }
0x72e9   :  { %10598 = vmatpush3.msra.mxu1 %v13141_v38  ;;  %10599 = vmatprep.mubr.msk.f32.mxu1 %vm11912_vm0, %v11911_v1 }
0x72ea   :  { %11341 = vmatprep.subr.bf16.mxu1 %v11910_v0 }
0x72ec   :  { %10600 = vmatmul.mubr.msk.f32.vlgmr.msra.gmra.mrb[72].mxu1 %vm165_vm1, %v7407_v41 }
0x72ed   :  { %11343 = vmatpush3.bf16.msra.mxu1 %v13192_v4  ;;  %10629 = vmatprep.mubr.msk.f32.mxu1 %vm11912_vm0, %v11911_v1 }
0x72ee   :  { %11344 = vmatprep.subr.bf16.mxu1 %v11910_v0 }
0x72f1   :  { %11346 = vmatpush3.bf16.msra.mxu1 %v13198_v27 }
0x72f2   :  { %11347 = vmatprep.subr.bf16.mxu1 %v11910_v0 }
0x72f5   :  { %11349 = vmatpush3.bf16.msra.mxu1 %v13208_v24 }
0x72f6   :  { %11350 = vmatprep.subr.bf16.mxu1 %v11910_v0 }
0x72f9   :  { %11352 = vmatpush3.bf16.msra.mxu1 %v13219_v32 }
0x72fa   :  { %11365 = vmatprep.subr.bf16.mxu1 %v11910_v0 }
0x73bb   :  { %v7316_v38 = vpop.f32.mrb[70].mxu1 }
0x73bc   :  { %v7317_v62 = vadd.f32 %v13309_v28, %v7316_v38  ;;  %v10585_v10 = vpop.f32.mrb[71].mxu1 }
0x73be   :  { %v7320_v43 = vmax.f32 %v7317_v62, 0.0 }
0x73c0   :  { %10595 = vmatmul.mubr.msk.f32.vlgmr.msra.gmra.mrb[86].mxu0 %vm243_vm2, %v7320_v43 }
0x73c1   :  { %11337 = vmatpush3.bf16.msra.mxu0 %v13158_v37  ;;  %10610 = vmatprep.mubr.msk.f32.mxu0 %vm11912_vm0, %v11911_v1  ;;  %v7485_v37 = vpop.f32.mrb[72].mxu1 }
0x73c2   :  { %11338 = vmatprep.subr.bf16.mxu0 %v11910_v0  ;;  %v10601_v14 = vpop.f32.mrb[73].mxu1  ;;  %v7486_v40 = vadd.f32 %v13179_v8, %v7485_v37 }
0x73c5   :  { %11340 = vmatpush3.bf16.msra.mxu0 %v13162_v48 }
0x73c6   :  { %11353 = vmatprep.subr.bf16.mxu0 %v11910_v0 }
0x73c8   :  { %10611 = vmatmul.mubr.msk.f32.vlgmr.msra.gmra.mrb[88].mxu0 %vm243_vm2, %v13229_v42 }
0x73c9   :  { %11355 = vmatpush3.bf16.msra.mxu0 %v13242_v11  ;;  %10640 = vmatprep.mubr.msk.f32.mxu0 %vm11912_vm0, %v11911_v1 }
0x73ca   :  { %11356 = vmatprep.subr.bf16.mxu0 %v11910_v0 }
0x73cd   :  { %11358 = vmatpush3.bf16.msra.mxu0 %v13245_v17 }
0x73ce   :  { %11359 = vmatprep.subr.bf16.mxu0 %v11910_v0 }
0x7493   :  { %v13479_v55 = vpop.f32.mrb[86].mxu0 }
0x7494   :  { %v10596_v48 = vpop.f32.mrb[87].mxu0 }
0x749b   :  { %v7561_v18 = vpop.f32.mrb[88].mxu0 }
0x749c   :  { %v7581_v53 = vadd.f32 %v7579_v16, %v7561_v18  ;;  %v10612_v42 = vpop.f32.mrb[89].mxu0  ;;  %v7565_v47 = vadd.f32 %v7561_v18, %v7486_v40 }
0x749e   :  { %7583 = vrot.lane.b32.xlu0 %v7581_v53, %s11913_s5  ;;  %v9034_v20 = vmul.f32 -1.442695, %v7565_v47 }
0x74a0   :  { %11642 = vpow2.f32 %v9034_v20 }
0x74aa   :  { %v11643_v56 = vpop.eup %11642 }
0x74ab   :  { %v7569_v6 = vadd.f32 1.0, %v11643_v56 }
0x74ad   :  { %11644 = vrcp.f32 %v7569_v6 }
0x74b7   :  { %v11645_v58 = vpop.eup %11644 }
0x74b8   :  { %v7593_v63 = vsub.f32 1.0, %v11645_v58  ;;  %v7599_v8 = vmul.f32 %v11645_v58, %v13225_v25 }
0x7510   :  { %v7584_v33 = vpop.permute.xlu0 %7583 }
0x7511   :  { %v7586_v45 = vmul.f32 %v11645_v58, %v7584_v33 }
0x7513   :  { %7588 = vrot.lane.b32.xlu1 %v7586_v45, %s11913_s5 }
0x7585   :  { %v7589_v26 = vpop.permute.xlu1 %7588 }
0x7586   :  { %v7591_v2 = vadd.f32 %v7589_v26, %v7486_v40 }
0x7588   :  { %11646 = vtanh.f32 %v7591_v2 }
0x7592   :  { %v11647_v34 = vpop.eup %11646 }
0x7593   :  { %7595 = vrot.lane.b32.xlu0 %v11647_v34, %s11914_s8 }
0x7605   :  { %v7596_v61 = vpop.permute.xlu0 %7595 }
0x7606   :  { %v7598_v9 = vmul.f32 %v7596_v61, %v7593_v63 }
0x7608   :  { %v13486_v41 = vadd.f32 %v7599_v8, %v7598_v9 }
0x760a   :  { %7602 = vrot.lane.b32.xlu1 %v13486_v41, %s11914_s8 }
0x767c   :  { %v7603_v38 = vpop.permute.xlu1 %7602 }
0x767d   :  { %v7605_v62 = vsel %vm243_vm2, %v7603_v38, %v13254_v30  ;;  %8856 = vst.msk [vmem:[#allocation16] sm:$0xff] %vm243_vm2, %v7603_v38 }
0x767e   :  { %10630 = vmatmul.mubr.msk.f32.vlgmr.msra.gmra.mrb[74].mxu1 %vm373_vm3, %v7605_v62 }
0x767f   :  { %11367 = vmatpush3.bf16.msra.mxu1 %v13275_v29  ;;  %10662 = vmatprep.mubr.msk.f32.mxu1 %vm11912_vm0, %v11911_v1 }
0x7680   :  { %11368 = vmatprep.subr.bf16.mxu1 %v11910_v0 }
0x7683   :  { %11370 = vmatpush3.bf16.msra.mxu1 %v13294_v51 }
0x7684   :  { %11377 = vmatprep.subr.bf16.mxu1 %v11910_v0 }
0x7751   :  { %v7690_v25 = vpop.f32.mrb[74].mxu1 }
0x7752   :  { %v7691_v10 = vadd.f32 %v13237_v49, %v7690_v25  ;;  %v10631_v43 = vpop.f32.mrb[75].mxu1 }
0x7754   :  { %7701 = vrot.lane.b32.xlu0 %v7691_v10, %s11915_s19  ;;  %v9038_v37 = vmul.f32 -1.442695, %v7691_v10 }
0x7756   :  { %11648 = vpow2.f32 %v9038_v37 }
0x7760   :  { %v11649_v14 = vpop.eup %11648 }
0x7761   :  { %v7697_v48 = vadd.f32 1.0, %v11649_v14 }
0x7763   :  { %11650 = vrcp.f32 %v7697_v48 }
0x776d   :  { %v11651_v16 = vpop.eup %11650 }
0x776e   :  { %v7711_v20 = vsub.f32 1.0, %v11651_v16  ;;  %v7717_v6 = vmul.f32 %v11651_v16, %v13254_v30 }
0x77c6   :  { %v7702_v18 = vpop.permute.xlu0 %7701 }
0x77c7   :  { %v7704_v53 = vmul.f32 %v11651_v16, %v7702_v18 }
0x77c9   :  { %7706 = vrot.lane.b32.xlu1 %v7704_v53, %s11913_s5 }
0x783b   :  { %v7707_v42 = vpop.permute.xlu1 %7706 }
0x783c   :  { %v7709_v40 = vadd.f32 %v7707_v42, %v7691_v10 }
0x783e   :  { %11652 = vtanh.f32 %v7709_v40 }
0x7848   :  { %v11653_v47 = vpop.eup %11652 }
0x7849   :  { %7713 = vrot.lane.b32.xlu0 %v11653_v47, %s11914_s8 }
0x784d   :  { %7975 = vrot.lane.b32.xlu0 %v13486_v41, %s11916_s1 }
0x78bb   :  { %v7714_v56 = vpop.permute.xlu0 %7713 }
0x78bc   :  { %v7716_v58 = vmul.f32 %v7714_v56, %v7711_v20 }
0x78be   :  { %v13507_v33 = vadd.f32 %v7717_v6, %v7716_v58 }
0x78bf   :  { %v7976_v10 = vpop.permute.xlu0 %7975 }
0x78c0   :  { %7731 = vrot.lane.b32.xlu1 %v13507_v33, %s11914_s8 }
0x7932   :  { %v7732_v45 = vpop.permute.xlu1 %7731 }
0x7933   :  { %8857 = vst.msk [vmem:[#allocation16 + $0x8] sm:$0xff] %vm243_vm2, %v7732_v45  ;;  %10641 = vmatmul.mubr.msk.f32.vlgmr.msra.gmra.mrb[90].mxu0 %vm243_vm2, %v7732_v45 }
0x7934   :  { %11361 = vmatpush3.bf16.msra.mxu0 %v13258_v7  ;;  %10651 = vmatprep.mubr.msk.f32.mxu0 %vm11912_vm0, %v11911_v1 }
0x7935   :  { %11362 = vmatprep.subr.bf16.mxu0 %v11910_v0 }
0x7938   :  { %11364 = vmatpush3.bf16.msra.mxu0 %v13265_v59 }
0x7939   :  { %11371 = vmatprep.subr.bf16.mxu0 %v11910_v0 }
0x7a06   :  { %v7801_v30 = vpop.f32.mrb[90].mxu0 }
0x7a07   :  { %v7802_v26 = vadd.f32 %v13282_v35, %v7801_v30  ;;  %v10642_v2 = vpop.f32.mrb[91].mxu0 }
0x7a09   :  { %v7805_v34 = vmax.f32 %v7802_v26, 0.0 }
0x7a0b   :  { %10652 = vmatmul.mubr.msk.f32.vlgmr.msra.gmra.mrb[92].mxu0 %vm243_vm2, %v7805_v34 }
0x7a0c   :  { %11373 = vmatpush3.bf16.msra.mxu0 %v13298_v60  ;;  %10675 = vmatprep.mubr.msk.f32.mxu0 %vm11912_vm0, %v11911_v1 }
0x7a0d   :  { %11374 = vmatprep.subr.bf16.mxu0 %v11910_v0 }
0x7a10   :  { %11376 = vmatpush3.bf16.msra.mxu0 %v13301_v22 }
0x7a11   :  { %10673 = vmatprep.subr.mxu0 %v11911_v1 }
0x7a14   :  { %10674 = vmatpush3.msra.mxu0 %v13323_v21 }
0x7a15   :  { %11389 = vmatprep.subr.bf16.mxu0 %v11910_v0 }
0x7ade   :  { %v7886_v63 = vpop.f32.mrb[92].mxu0 }
0x7adf   :  { %v7887_v61 = vadd.f32 %v13309_v28, %v7886_v63  ;;  %v10653_v8 = vpop.f32.mrb[93].mxu0 }
0x7ae1   :  { %v7890_v9 = vmax.f32 %v7887_v61, 0.0 }
0x7ae3   :  { %10663 = vmatmul.mubr.msk.f32.vlgmr.msra.gmra.mrb[76].mxu1 %vm243_vm2, %v7890_v9 }
0x7ae4   :  { %11379 = vmatpush3.bf16.msra.mxu1 %v13192_v4  ;;  %10694 = vmatprep.mubr.msk.f32.mxu1 %vm11912_vm0, %v11911_v1 }
0x7ae5   :  { %11380 = vmatprep.subr.bf16.mxu1 %v11910_v0 }
0x7ae8   :  { %11382 = vmatpush3.bf16.msra.mxu1 %v13198_v27 }
0x7ae9   :  { %11383 = vmatprep.subr.bf16.mxu1 %v11910_v0 }
0x7aec   :  { %11385 = vmatpush3.bf16.msra.mxu1 %v13208_v24 }
0x7aed   :  { %11386 = vmatprep.subr.bf16.mxu1 %v11910_v0 }
0x7af0   :  { %11388 = vmatpush3.bf16.msra.mxu1 %v13219_v32 }
0x7af1   :  { %11401 = vmatprep.subr.bf16.mxu1 %v11910_v0 }
0x7bb6   :  { %v7971_v38 = vpop.f32.mrb[76].mxu1 }
0x7bb7   :  { %v13542_v62 = vadd.f32 %v13330_v39, %v7971_v38  ;;  %v10664_v25 = vpop.f32.mrb[77].mxu1 }
0x7bb9   :  { %v7978_v43 = vsel %vm165_vm1, %v13542_v62, %v7976_v10 }
0x7bba   :  { %10676 = vmatmul.mubr.msk.f32.vlgmr.msra.gmra.mrb[94].mxu0 %vm744_vm4, %v7978_v43 }
0x7bbb   :  { %11391 = vmatpush3.bf16.msra.mxu0 %v13242_v11  ;;  %10705 = vmatprep.mubr.msk.f32.mxu0 %vm11912_vm0, %v11911_v1 }
0x7bbc   :  { %11392 = vmatprep.subr.bf16.mxu0 %v11910_v0 }
0x7bbf   :  { %11394 = vmatpush3.bf16.msra.mxu0 %v13245_v17 }
0x7bc0   :  { %11395 = vmatprep.subr.bf16.mxu0 %v11910_v0 }
0x7c8d   :  { %v8060_v37 = vpop.f32.mrb[94].mxu0 }
0x7c8e   :  { %v8061_v14 = vadd.f32 %v13344_v3, %v8060_v37  ;;  %v10677_v48 = vpop.f32.mrb[95].mxu0 }
0x7c90   :  { %8071 = vrot.lane.b32.xlu1 %v8061_v14, %s11915_s19  ;;  %v9047_v16 = vmul.f32 -1.442695, %v8061_v14 }
0x7c92   :  { %11654 = vpow2.f32 %v9047_v16 }
0x7c9c   :  { %v11655_v18 = vpop.eup %11654 }
0x7c9d   :  { %v8067_v53 = vadd.f32 1.0, %v11655_v18 }
0x7c9f   :  { %11656 = vrcp.f32 %v8067_v53 }
0x7ca9   :  { %v11657_v42 = vpop.eup %11656 }
0x7caa   :  { %v8081_v58 = vsub.f32 1.0, %v11657_v42  ;;  %v8087_v30 = vmul.f32 %v11657_v42, %v13486_v41 }
0x7d02   :  { %v8072_v40 = vpop.permute.xlu1 %8071 }
0x7d03   :  { %v8074_v47 = vmul.f32 %v11657_v42, %v8072_v40 }
0x7d05   :  { %8076 = vrot.lane.b32.xlu0 %v8074_v47, %s11913_s5 }
0x7d77   :  { %v8077_v20 = vpop.permute.xlu0 %8076 }
0x7d78   :  { %v8079_v56 = vadd.f32 %v8077_v20, %v8061_v14 }
0x7d7a   :  { %11658 = vtanh.f32 %v8079_v56 }
0x7d84   :  { %v11659_v6 = vpop.eup %11658 }
0x7d85   :  { %8083 = vrot.lane.b32.xlu1 %v11659_v6, %s11914_s8 }
0x7df7   :  { %v8084_v45 = vpop.permute.xlu1 %8083 }
0x7df8   :  { %v8086_v26 = vmul.f32 %v8084_v45, %v8081_v58 }
0x7dfa   :  { %v13558_v2 = vadd.f32 %v8087_v30, %v8086_v26 }
0x7dfc   :  { %8090 = vrot.lane.b32.xlu0 %v13558_v2, %s11914_s8 }
0x7e6e   :  { %v8091_v34 = vpop.permute.xlu0 %8090 }
0x7e6f   :  { %v8093_v63 = vsel %vm243_vm2, %v8091_v34, %v13507_v33 }
0x7e70   :  { %10695 = vmatmul.mubr.msk.f32.vlgmr.msra.gmra.mrb[78].mxu1 %vm373_vm3, %v8093_v63 }
0x7e71   :  { %11403 = vmatpush3.bf16.msra.mxu1 %v13275_v29  ;;  %10727 = vmatprep.mubr.msk.f32.mxu1 %vm11912_vm0, %v11911_v1 }
0x7e72   :  { %11404 = vmatprep.subr.bf16.mxu1 %v11910_v0 }
0x7e75   :  { %11406 = vmatpush3.bf16.msra.mxu1 %v13294_v51 }
0x7e76   :  { %11413 = vmatprep.subr.bf16.mxu1 %v11910_v0 }
0x7f43   :  { %v8163_v41 = vpop.f32.mrb[78].mxu1 }
0x7f44   :  { %v8164_v61 = vadd.f32 %v13237_v49, %v8163_v41  ;;  %v10696_v8 = vpop.f32.mrb[79].mxu1 }
0x7f46   :  { %8174 = vrot.lane.b32.xlu1 %v8164_v61, %s11915_s19  ;;  %v9049_v9 = vmul.f32 -1.442695, %v8164_v61 }
0x7f48   :  { %11660 = vpow2.f32 %v9049_v9 }
0x7f52   :  { %v11661_v38 = vpop.eup %11660 }
0x7f53   :  { %v8170_v25 = vadd.f32 1.0, %v11661_v38 }
0x7f55   :  { %11662 = vrcp.f32 %v8170_v25 }
0x7f5f   :  { %v11663_v10 = vpop.eup %11662 }
0x7f60   :  { %v8184_v49 = vsub.f32 1.0, %v11663_v10  ;;  %v8190_v53 = vmul.f32 %v11663_v10, %v13507_v33 }
0x7fb8   :  { %v8175_v43 = vpop.permute.xlu1 %8174 }
0x7fb9   :  { %v8177_v37 = vmul.f32 %v11663_v10, %v8175_v43 }
0x7fbb   :  { %8179 = vrot.lane.b32.xlu0 %v8177_v37, %s11913_s5 }
0x802d   :  { %v8180_v14 = vpop.permute.xlu0 %8179 }
0x802e   :  { %v8182_v48 = vadd.f32 %v8180_v14, %v8164_v61 }
0x8030   :  { %11664 = vtanh.f32 %v8182_v48  ;;  %v11684_v48 = vld [vmem:[#allocation11] ss:$0 sm:$0xff] }
0x803a   :  { %v11665_v16 = vpop.eup %11664 }
0x803b   :  { %8186 = vrot.lane.b32.xlu1 %v11665_v16, %s11914_s8 }
0x803f   :  { %8415 = vrot.lane.b32.xlu1 %v13558_v2, %s11916_s1 }
0x80ad   :  { %v8187_v18 = vpop.permute.xlu1 %8186 }
0x80ae   :  { %v8189_v42 = vmul.f32 %v8187_v18, %v8184_v49 }
0x80b0   :  { %v13578_v40 = vadd.f32 %v8190_v53, %v8189_v42 }
0x80b2   :  { %8193 = vrot.lane.b32.xlu0 %v13578_v40, %s11914_s8 }
0x8124   :  { %v8194_v47 = vpop.permute.xlu0 %8193 }
0x8125   :  { %10706 = vmatmul.mubr.msk.f32.vlgmr.msra.gmra.mrb[96].mxu0 %vm243_vm2, %v8194_v47 }
0x8126   :  { %11397 = vmatpush3.bf16.msra.mxu0 %v13258_v7  ;;  %10716 = vmatprep.mubr.msk.f32.mxu0 %vm11912_vm0, %v11911_v1 }
0x8127   :  { %11398 = vmatprep.subr.bf16.mxu0 %v11910_v0 }
0x812a   :  { %11400 = vmatpush3.bf16.msra.mxu0 %v13265_v59 }
0x812b   :  { %11407 = vmatprep.subr.bf16.mxu0 %v11910_v0 }
0x81f8   :  { %v8263_v33 = vpop.f32.mrb[96].mxu0 }
0x81f9   :  { %v8264_v20 = vadd.f32 %v13282_v35, %v8263_v33  ;;  %v10707_v56 = vpop.f32.mrb[97].mxu0 }
0x81fb   :  { %v8267_v6 = vmax.f32 %v8264_v20, 0.0 }
0x81fd   :  { %10717 = vmatmul.mubr.msk.f32.vlgmr.msra.gmra.mrb[98].mxu0 %vm243_vm2, %v8267_v6  ;;  %v11685_v6 = vld [vmem:[%s13760_s14] ss:$0 sm:$0xff] }
0x81fe   :  { %11409 = vmatpush3.bf16.msra.mxu0 %v13298_v60  ;;  %10740 = vmatprep.mubr.msk.f32.mxu0 %vm11912_vm0, %v11911_v1 }
0x81ff   :  { %11410 = vmatprep.subr.bf16.mxu0 %v11910_v0 }
0x8202   :  { %11412 = vmatpush3.bf16.msra.mxu0 %v13301_v22 }
0x8203   :  { %10738 = vmatprep.subr.mxu0 %v11911_v1 }
0x8206   :  { %10739 = vmatpush3.msra.mxu0 %v13323_v21 }
0x8207   :  { %11425 = vmatprep.subr.bf16.mxu0 %v11910_v0 }
0x82d0   :  { %v8337_v35 = vpop.f32.mrb[98].mxu0 }
0x82d1   :  { %v8338_v58 = vadd.f32 %v13309_v28, %v8337_v35  ;;  %v10718_v45 = vpop.f32.mrb[99].mxu0  ;;  %v8416_v28 = vpop.permute.xlu1 %8415  ;;  %v1594_v35 = vadd.f32 %v11685_v6, %v12447_v44 }
0x82d3   :  { %v8341_v30 = vmax.f32 %v8338_v58, 0.0  ;;  %v11686_v58 = vld [vmem:[%s13760_s14] ss:$0 sm:$0xff] }
0x82d5   :  { %10728 = vmatmul.mubr.msk.f32.vlgmr.msra.gmra.mrb[80].mxu1 %vm243_vm2, %v8341_v30 }
0x82d6   :  { %11415 = vmatpush3.bf16.msra.mxu1 %v13192_v4  ;;  %10759 = vmatprep.mubr.msk.f32.mxu1 %vm11912_vm0, %v11911_v1 }
0x82d7   :  { %11416 = vmatprep.subr.bf16.mxu1 %v11910_v0 }
0x82da   :  { %11418 = vmatpush3.bf16.msra.mxu1 %v13198_v27 }
0x82db   :  { %11419 = vmatprep.subr.bf16.mxu1 %v11910_v0 }
0x82de   :  { %11421 = vmatpush3.bf16.msra.mxu1 %v13208_v24 }
0x82df   :  { %11422 = vmatprep.subr.bf16.mxu1 %v11910_v0 }
0x82e2   :  { %11424 = vmatpush3.bf16.msra.mxu1 %v13219_v32 }
0x82e3   :  { %11431 = vmatprep.subr.bf16.mxu1 %v11910_v0 }
0x83a8   :  { %v8411_v60 = vpop.f32.mrb[80].mxu1 }
0x83a9   :  { %v13612_v4 = vadd.f32 %v13330_v39, %v8411_v60  ;;  %v10729_v22 = vpop.f32.mrb[81].mxu1 }
0x83ab   :  { %v8418_v21 = vsel %vm165_vm1, %v13612_v4, %v8416_v28 }
0x83ac   :  { %10741 = vmatmul.mubr.msk.f32.vlgmr.msra.gmra.mrb[100].mxu0 %vm744_vm4, %v8418_v21 }
0x83ad   :  { %11427 = vmatpush3.bf16.msra.mxu0 %v13242_v11  ;;  %10770 = vmatprep.mubr.msk.f32.mxu0 %vm11912_vm0, %v11911_v1 }
0x83ae   :  { %11428 = vmatprep.subr.bf16.mxu0 %v11910_v0 }
0x83b1   :  { %11430 = vmatpush3.bf16.msra.mxu0 %v13245_v17 }
0x83b2   :  { %11437 = vmatprep.subr.bf16.mxu0 %v11910_v0 }
0x847f   :  { %v8488_v27 = vpop.f32.mrb[100].mxu0 }
0x8480   :  { %v8489_v24 = vadd.f32 %v13344_v3, %v8488_v27  ;;  %v10742_v32 = vpop.f32.mrb[101].mxu0 }
0x8482   :  { %8499 = vrot.lane.b32.xlu0 %v8489_v24, %s11915_s19  ;;  %v9054_v26 = vmul.f32 -1.442695, %v8489_v24 }
0x8484   :  { %11666 = vpow2.f32 %v9054_v26 }
0x848e   :  { %v11667_v34 = vpop.eup %11666 }
0x848f   :  { %v8495_v63 = vadd.f32 1.0, %v11667_v34 }
0x8491   :  { %11668 = vrcp.f32 %v8495_v63 }
0x849b   :  { %v11669_v11 = vpop.eup %11668 }
0x849c   :  { %v8509_v3 = vsub.f32 1.0, %v11669_v11  ;;  %v8515_v25 = vmul.f32 %v11669_v11, %v13558_v2 }
0x84f4   :  { %v8500_v41 = vpop.permute.xlu0 %8499 }
0x84f5   :  { %v8502_v61 = vmul.f32 %v11669_v11, %v8500_v41 }
0x84f7   :  { %8504 = vrot.lane.b32.xlu1 %v8502_v61, %s11913_s5 }
0x8569   :  { %v8505_v8 = vpop.permute.xlu1 %8504 }
0x856a   :  { %v8507_v17 = vadd.f32 %v8505_v8, %v8489_v24 }
0x856c   :  { %11670 = vtanh.f32 %v8507_v17 }
0x8576   :  { %v11671_v9 = vpop.eup %11670 }
0x8577   :  { %8511 = vrot.lane.b32.xlu0 %v11671_v9, %s11914_s8 }
0x85e9   :  { %v8512_v38 = vpop.permute.xlu0 %8511 }
0x85ea   :  { %v8514_v10 = vmul.f32 %v8512_v38, %v8509_v3 }
0x85ec   :  { %v8516_v43 = vadd.f32 %v8515_v25, %v8514_v10 }
0x85ee   :  { %8518 = vrot.lane.b32.xlu1 %v8516_v43, %s11914_s8 }
0x8660   :  { %v8519_v37 = vpop.permute.xlu1 %8518 }
0x8661   :  { %v8521_v14 = vsel %vm243_vm2, %v8519_v37, %v13578_v40 }
0x8662   :  { %10760 = vmatmul.mubr.msk.f32.vlgmr.msra.gmra.mrb[82].mxu1 %vm373_vm3, %v8521_v14 }
0x8663   :  { %11433 = vmatpush3.bf16.msra.mxu1 %v13258_v7  ;;  %10781 = vmatprep.mubr.msk.f32.mxu1 %vm11912_vm0, %v11911_v1 }
0x8664   :  { %11434 = vmatprep.subr.bf16.mxu1 %v11910_v0 }
0x8667   :  { %11436 = vmatpush3.bf16.msra.mxu1 %v13265_v59 }
0x8735   :  { %v8591_v2 = vpop.f32.mrb[82].mxu1 }
0x8736   :  { %v8592_v16 = vadd.f32 %v11684_v48, %v8591_v2  ;;  %v10761_v49 = vpop.f32.mrb[83].mxu1 }
0x8738   :  { %8602 = vrot.lane.b32.xlu0 %v8592_v16, %s11915_s19  ;;  %v9056_v18 = vmul.f32 -1.442695, %v8592_v16 }
0x873a   :  { %11672 = vpow2.f32 %v9056_v18 }
0x8744   :  { %v11673_v53 = vpop.eup %11672 }
0x8745   :  { %v8598_v42 = vadd.f32 1.0, %v11673_v53 }
0x8747   :  { %11674 = vrcp.f32 %v8598_v42 }
0x8751   :  { %v11675_v47 = vpop.eup %11674 }
0x8752   :  { %v8618_v44 = vmul.f32 %v11675_v47, %v13578_v40 }
0x87aa   :  { %v8603_v7 = vpop.permute.xlu0 %8602 }
0x87ab   :  { %v8605_v33 = vmul.f32 %v11675_v47, %v8603_v7 }
0x87ad   :  { %8607 = vrot.lane.b32.xlu1 %v8605_v33, %s11913_s5  ;;  %s11917_s5 = smov 16  }
0x881f   :  { %v8608_v20 = vpop.permute.xlu1 %8607 }
0x8820   :  { %v8610_v56 = vadd.f32 %v8608_v20, %v8592_v16 }
0x8822   :  { %11676 = vtanh.f32 %v8610_v56 }
0x882c   :  { %v11677_v59 = vpop.eup %11676 }
0x882d   :  { %8614 = vrot.lane.b32.xlu0 %v11677_v59, %s11914_s8 }
0x8831   :  { %1598 = vrot.lane.b32.xlu0 %v12373_v15, %s11904_s30  ;;  %v4493_v15 = vadd.f32 %v11686_v58, %v12963_v13 }
0x8835   :  { %4497 = vrot.lane.b32.xlu0 %v12889_v57, %s11904_s30  ;;  %v7391_v57 = vadd.f32 %v13330_v39, %v13479_v55 }
0x8839   :  { %7395 = vrot.lane.b32.xlu0 %v13405_v50, %s11904_s30  ;;  %v8612_v50 = vsub.f32 1.0, %v11675_v47 }
0x883d   :  { %1602 = vrot.lane.b32.xlu0 %v1594_v35, %s11917_s5 }
0x8841   :  { %4501 = vrot.lane.b32.xlu0 %v4493_v15, %s11917_s5 }
0x8845   :  { %7399 = vrot.lane.b32.xlu0 %v7391_v57, %s11917_s5 }
0x889f   :  { %v8615_v45 = vpop.permute.xlu0 %8614 }
0x88a0   :  { %v8617_v30 = vmul.f32 %v8615_v45, %v8612_v50 }
0x88a2   :  { %v8619_v60 = vadd.f32 %v8618_v44, %v8617_v30 }
0x88a3   :  { %v1599_v22 = vpop.permute.xlu0 %1598 }
0x88a4   :  { %8621 = vrot.lane.b32.xlu1 %v8619_v60, %s11914_s8  ;;  %v1605_v39 = vsel %vm165_vm1, %v12301_v54, %v1599_v22  ;;  %v5942_v54 = vadd.f32 %v11686_v58, %v13173_v46 }
0x88a7   :  { %v4498_v28 = vpop.permute.xlu0 %4497 }
0x88a8   :  { %3048 = vrot.lane.b32.xlu1 %v12581_v31, %s11904_s30  ;;  %v3044_v31 = vadd.f32 %v11685_v6, %v12657_v19 }
0x88ab   :  { %v7396_v13 = vpop.permute.xlu0 %7395 }
0x88ac   :  { %5946 = vrot.lane.b32.xlu1 %v13097_v5, %s11904_s30  ;;  %v4504_v5 = vsel %vm165_vm1, %v12817_v36, %v4498_v28 }
0x88af   :  { %v1603_v55 = vpop.permute.xlu0 %1602 }
0x88b0   :  { %v1607_v40 = vsel %vm1606_vm5, %v1605_v39, %v1603_v55  ;;  %8844 = vrot.lane.b32.xlu1 %v13612_v4, %s11904_s30  ;;  %v7402_v4 = vsel %vm165_vm1, %v13333_v12, %v7396_v13 }
0x88b1   :  { %1609 = vst.msk [vmem:[%s13761_s15] sm:$0xff] %vm1608_vm6, %v1607_v40 }
0x88b3   :  { %v4502_v21 = vpop.permute.xlu0 %4501 }
0x88b4   :  { %v4505_v27 = vsel %vm1606_vm5, %v4504_v5, %v4502_v21  ;;  %3052 = vrot.lane.b32.xlu1 %v3044_v31, %s11917_s5 }
0x88b5   :  { %8970 = vst.msk [vmem:[%s13761_s15 + $0x10] sm:$0xff] %vm1608_vm6, %v4505_v27 }
0x88b7   :  { %v7400_v24 = vpop.permute.xlu0 %7399 }
0x88b8   :  { %v7403_v19 = vsel %vm1606_vm5, %v7402_v4, %v7400_v24  ;;  %5950 = vrot.lane.b32.xlu1 %v5942_v54, %s11917_s5 }
0x88b9   :  { %9030 = vst.msk [vmem:[%s13761_s15 + $0x20] sm:$0xff] %vm1608_vm6, %v7403_v19 }
0x8916   :  { %v8622_v36 = vpop.permute.xlu1 %8621 }
0x8917   :  { %10771 = vmatmul.mubr.msk.f32.vlgmr.msra.gmra.mrb[102].mxu0 %vm243_vm2, %v8622_v36 }
0x8918   :  { %11439 = vmatpush3.bf16.msra.mxu0 %v13275_v29  ;;  %10792 = vmatprep.mubr.msk.f32.mxu0 %vm11912_vm0, %v11911_v1 }
0x8919   :  { %11440 = vmatprep.subr.bf16.mxu0 %v11910_v0 }
0x891a   :  { %v3049_v46 = vpop.permute.xlu1 %3048 }
0x891b   :  { %v3055_v26 = vsel %vm165_vm1, %v12511_v23, %v3049_v46 }
0x891c   :  { %11442 = vmatpush3.bf16.msra.mxu0 %v13294_v51  ;;  %v11687_v51 = vld [vmem:[%s13756_s10] ss:$0 sm:$0xff] }
0x891e   :  { %v5947_v12 = vpop.permute.xlu1 %5946 }
0x891f   :  { %v5953_v1 = vsel %vm165_vm1, %v13027_v52, %v5947_v12  ;;  %v11688_v52 = vld [vmem:[%s13758_s12] ss:$0 sm:$0xff] }
0x8922   :  { %v8845_v32 = vpop.permute.xlu1 %8844 }
0x8926   :  { %v3053_v34 = vpop.permute.xlu1 %3052 }
0x8927   :  { %v3056_v63 = vsel %vm1606_vm5, %v3055_v26, %v3053_v34 }
0x8928   :  { %8940 = vst.msk [vmem:[%s13761_s15 + $0x8] sm:$0xff] %vm1608_vm6, %v3056_v63 }
0x892a   :  { %v5951_v0 = vpop.permute.xlu1 %5950 }
0x892b   :  { %v5954_v29 = vsel %vm1606_vm5, %v5953_v1, %v5951_v0 }
0x892c   :  { %9000 = vst.msk [vmem:[%s13761_s15 + $0x18] sm:$0xff] %vm1608_vm6, %v5954_v29 }
0x89ea   :  { %v8691_v23 = vpop.f32.mrb[102].mxu0 }
0x89eb   :  { %v8692_v11 = vadd.f32 %v11687_v51, %v8691_v23  ;;  %v10772_v41 = vpop.f32.mrb[103].mxu0 }
0x89ed   :  { %v8695_v61 = vmax.f32 %v8692_v11, 0.0 }
0x89ef   :  { %10782 = vmatmul.mubr.msk.f32.vlgmr.msra.gmra.mrb[84].mxu1 %vm243_vm2, %v8695_v61 }
0x8ac2   :  { %v8765_v8 = vpop.f32.mrb[84].mxu1 }
0x8ac3   :  { %v8766_v17 = vadd.f32 %v11688_v52, %v8765_v8  ;;  %v10783_v9 = vpop.f32.mrb[85].mxu1 }
0x8ac5   :  { %v8769_v3 = vmax.f32 %v8766_v17, 0.0 }
0x8ac7   :  { %10793 = vmatmul.mubr.msk.f32.vlgmr.msra.gmra.mrb[104].mxu0 %vm243_vm2, %v8769_v3 }
0x8ac8   :  { %11877 = shalt.err (!%p11874_p12)
}
0x8ac9   :  { %s11878_s20 = scalar_lea.hbm %s13762_s16, 256 }
0x8aca   :  { %p11879_p13 = scmp.ne.s32.totalorder %s13762_s16, %s11878_s20  ;;  %p11882_p0 = scmp.lt.u32.totalorder %s11878_s20, %s13762_s16 }
0x8acc   :  { %p11884_p1 = pnand %p11882_p0, %p11879_p13 }
0x8ace   :  { %11887 = shalt.err (!%p11884_p1)
}
0x8acf   :  { %8871 = dma.vmem_to_hbm [thread:$0]  %s8866_s13, 256, %s13762_s16, [#allocation4], %s11903_s22, %s11903_s22, %s11904_s30   ;;  %v8851_v37 = vsel %vm165_vm1, %v13542_v62, %v8845_v32 }
0x8ad0   :  { %v11689_v25 = vld [vmem:[%s13760_s14] ss:$0 sm:$0xff] }
0x8b9a   :  { %v8839_v38 = vpop.f32.mrb[104].mxu0 }
0x8b9b   :  { %v8840_v10 = vadd.f32 %v11689_v25, %v8839_v38  ;;  %v10794_v43 = vpop.f32.mrb[105].mxu0 }
0x8b9d   :  { %8848 = vrot.lane.b32.xlu1 %v8840_v10, %s11917_s5 }
0x8c0f   :  { %v8849_v14 = vpop.permute.xlu1 %8848 }
0x8c10   :  { %v8852_v2 = vsel %vm1606_vm5, %v8851_v37, %v8849_v14 }
0x8c11   :  { %9060 = vst.msk [vmem:[%s13761_s15 + $0x28] sm:$0xff] %vm1608_vm6, %v8852_v2 }
0x8c12   :  { %11898 = dma.done.wait [#allocation4], 256  }
0x8c13   :  { %11899 = vsyncadd [#allocation4], 4294967040 }
0x8c14   :  { %8877 = vsyncpa [#allocation3], 1 }
0x8c15   :  { %8878 = vsyncpa [#allocation6], 1 }
0x8c16   :  { %8879 = vsyncpa [#allocation9], 1 }
0x8c17   :  { %8880 = vsyncpa [#allocation12], 1 }
0x8c18   :  { %8881 = vsyncpa [#allocation15], 1 }
0x8c19   :  { %8882 = vsyncpa [#allocation4], 1 }

</bundles_post_ra>
